<compile_context>
chip_gen: v5e
topology: v5e:2x2
jax: 0.10.0
libtpu: 0.0.40
codegen_flags: <defaults>
</compile_context>

<pallas_src>
import functools

import jax
import jax.numpy as jnp
import numpy as np
from jax import lax
from jax.experimental import pallas as pl
from jax.experimental.pallas import tpu as pltpu

COMPUTE_DTYPE = jnp.bfloat16   # MXU input dtype (accumulation stays f32)
_IN_EPS = 1e-5                 # nn.InstanceNorm2d default eps


# -----------------------------------------------------------------------------
# Architecture metadata (mirrors ContentEncoder.__init__) + static geometry
# -----------------------------------------------------------------------------
def build_layers(n_downsample, n_res, input_dim, dim, norm, activ):
    layers = [dict(k=7, s=1, p=3, cin=input_dim, cout=dim, norm=norm, act=activ,
                   res_start=False, res=False)]
    d = dim
    for _ in range(n_downsample):
        layers.append(dict(k=4, s=2, p=1, cin=d, cout=2 * d, norm=norm, act=activ,
                           res_start=False, res=False))
        d *= 2
    for _ in range(n_res):        # ResBlock = conv(act) -> conv(none) + skip
        layers.append(dict(k=3, s=1, p=1, cin=d, cout=d, norm=norm, act=activ,
                           res_start=True, res=False))
        layers.append(dict(k=3, s=1, p=1, cin=d, cout=d, norm=norm, act="none",
                           res_start=False, res=True))
    return layers, d


def plan_encoder(layers, H, W):
    """Attach static per-layer geometry used by the fused kernel."""
    metas = []
    h, w = H, W
    for m in layers:
        k, s, p = m["k"], m["s"], m["p"]
        Hp, Wp = h + 2 * p, w + 2 * p
        Hf, Wf = Hp - k + 1, Wp - k + 1                 # stride-1 ("full") extent
        Ho, Wo = (Hp - k) // s + 1, (Wp - k) // s + 1   # strided output extent
        meta = dict(m, H=h, W=w, Hp=Hp, Wp=Wp, Hf=Hf, Wf=Wf, Ho=Ho, Wo=Wo,
                    M=Ho * Wo, L=(Hf - 1) * Wp + Wf, K=m["cin"] * k * k)
        metas.append(meta)
        h, w = Ho, Wo
    return metas


def init_params(key, layers):
    params = []
    for meta in layers:
        key, k_w, k_b = jax.random.split(key, 3)
        fan_in = meta["cin"] * meta["k"] * meta["k"]
        bound = 1.0 / np.sqrt(fan_in)
        w = jax.random.uniform(k_w, (meta["cout"], meta["cin"], meta["k"], meta["k"]),
                               jnp.float32, -bound, bound)
        b = jax.random.uniform(k_b, (meta["cout"],), jnp.float32, -bound, bound)
        params.append((w, b))
    return params


# -----------------------------------------------------------------------------
# One-time model preparation (outside the per-forward trace)
# -----------------------------------------------------------------------------
def _pad_mode(pad_type):
    return {"reflect": "reflect", "replicate": "edge", "zero": "constant"}[pad_type]


def _pad_src_index(i, p, n, pad_type):
    """Source index in [0, n) for padded index i (None => zero padding)."""
    j = i - p
    if 0 <= j < n:
        return j
    if pad_type == "zero":
        return None
    if pad_type == "replicate":
        return min(max(j, 0), n - 1)
    if pad_type == "reflect":
        return -j if j < 0 else 2 * (n - 1) - j
    raise ValueError(f"unsupported pad_type {pad_type}")


def _sel_matrix(m):
    """(L, M) 0/1 matrix: compacts the valid columns of the extended im2col and
    applies the conv stride; exactly one 1 per output column (so the matmul is
    an exact gather)."""
    sel = np.zeros((m["L"], m["M"]), np.float32)
    s, Wp, Ho, Wo = m["s"], m["Wp"], m["Ho"], m["Wo"]
    for y in range(Ho):
        for x in range(Wo):
            sel[s * y * Wp + s * x, y * Wo + x] = 1.0
    return sel


def _pad_matrix(m, pad_type):
    """(H*W, Hp*Wp) 0/1 matrix: flattened reflect padding expressed as a
    duplication matmul; at most one 1 per padded column."""
    H, W, Hp, Wp, p = m["H"], m["W"], m["Hp"], m["Wp"], m["p"]
    pm = np.zeros((H * W, Hp * Wp), np.float32)
    for i in range(Hp):
        oi = _pad_src_index(i, p, H, pad_type)
        if oi is None:
            continue
        for j in range(Wp):
            oj = _pad_src_index(j, p, W, pad_type)
            if oj is None:
                continue
            pm[oi * W + oj, i * Wp + j] = 1.0
    return pm


def prepare_model(params, metas, pad_type):
    """One-time re-layout of weights + constant Sel/Pad matrices."""
    wmats, sels, pmats = [], [], []
    for li, ((w, _b), m) in enumerate(zip(params, metas)):
        # Bias intentionally dropped: affine-free InstanceNorm cancels it exactly.
        assert m["norm"] == "in", "fused Pallas path implements norm='in' only"
        # TODO(synk): 'bn'/'ln'/'adain' norms and the SpectralNorm ('sn') wrapper
        # are unused by ContentEncoder defaults and not implemented here.
        wmat = jnp.transpose(w, (2, 3, 1, 0)).reshape(m["K"], m["cout"]).T
        wmats.append(wmat.astype(COMPUTE_DTYPE))            # (Cout, K), K=(di,dj,c)
        sels.append(jnp.asarray(_sel_matrix(m), COMPUTE_DTYPE))
        if li > 0:
            pmats.append(jnp.asarray(_pad_matrix(m, pad_type), COMPUTE_DTYPE))
    return dict(wmats=wmats, sels=sels, pmats=pmats)


# -----------------------------------------------------------------------------
# The fused encoder kernel (one pallas_call, grid=(N,))
# -----------------------------------------------------------------------------
def _encoder_kernel(*refs, metas):
    n = len(metas)
    x0_ref = refs[0]                         # (1, Cin0, Hp0*Wp0) bf16, pre-padded
    w_refs = refs[1:1 + n]                   # (Cout, K) bf16 per layer
    sel_refs = refs[1 + n:1 + 2 * n]         # (L, M)   bf16 per layer
    pmat_refs = refs[1 + 2 * n:3 * n]        # (H*W, Hp*Wp) bf16 for layers 1..n-1
    o_ref = refs[3 * n]                      # (1, Cd, Mf) f32
    patch_ref = refs[3 * n + 1]              # VMEM (K_max, L_max) bf16 scratch
    pad_ref = refs[3 * n + 2]                # VMEM (C_max, P_max) bf16 scratch

    act = None                               # f32 (C, M) activation of prev layer
    res = None                               # ResBlock residual (f32, in VMEM/vregs)
    for li, m in enumerate(metas):
        cin, cout, k = m["cin"], m["cout"], m["k"]
        Wp, L, M, K = m["Wp"], m["L"], m["M"], m["K"]
        P = m["Hp"] * m["Wp"]

        if m["res_start"]:
            res = act

        # ---- reflect-padded, flattened bf16 input for this layer (in VMEM) ----
        if li == 0:
            pad_ref[0:cin, 0:P] = x0_ref[0]
        else:
            # Padding = one exact 0/1 duplication matmul (MXU), no relayouts.
            pad16 = jnp.dot(act.astype(COMPUTE_DTYPE), pmat_refs[li - 1][...],
                            preferred_element_type=jnp.float32)
            pad_ref[0:cin, 0:P] = pad16.astype(COMPUTE_DTYPE)

        # ---- extended im2col: contiguous lane slices only (no reshapes) -------
        for di in range(k):
            for dj in range(k):
                r0 = (di * k + dj) * cin
                off = di * Wp + dj
                patch_ref[r0:r0 + cin, 0:L] = pad_ref[0:cin, off:off + L]

        # ---- conv = two MXU matmuls; Sel compacts/strides the spatial columns --
        psel = jnp.dot(patch_ref[0:K, 0:L], sel_refs[li][...],
                       preferred_element_type=jnp.float32).astype(COMPUTE_DTYPE)
        acc = jnp.dot(w_refs[li][...], psel,
                      preferred_element_type=jnp.float32)          # (Cout, M) f32

        # Conv bias omitted: InstanceNorm2d(affine=False) cancels it exactly.
        # ---- one-pass InstanceNorm (per-channel over the spatial lane axis) ----
        if m["norm"] == "in":
            mu = jnp.mean(acc, axis=1, keepdims=True)
            ex2 = jnp.mean(acc * acc, axis=1, keepdims=True)
            var = jnp.maximum(ex2 - mu * mu, 0.0)
            acc = (acc - mu) * lax.rsqrt(var + _IN_EPS)

        a = m["act"]
        if a == "relu":
            acc = jnp.maximum(acc, 0.0)
        elif a == "lrelu":
            acc = jnp.where(acc >= 0.0, acc, 0.2 * acc)
        elif a == "tanh":
            acc = jnp.tanh(acc)

        if m["res"]:                        # ResBlock: out = block(x) + x
            acc = acc + res

        act = acc

    o_ref[0] = act.astype(o_ref.dtype)


# -----------------------------------------------------------------------------
# Forward wrapper (single pallas_call)
# -----------------------------------------------------------------------------
def _vmem_limit_bytes():
    cap = 64 * 1024 * 1024
    try:
        cap = int(getattr(pltpu.get_tpu_info(), "vmem_capacity_bytes", cap))
    except Exception:
        pass
    return int(min(cap * 3 // 4, 100 * 1024 * 1024))   # ~48 MiB v7x, ~96 MiB v5e/v6e


def content_encoder_forward(x, model, *, metas, pad_type):
    """Pallas-backed ContentEncoder forward: (N,C,H,W) f32 -> (N,Cd,H',W') f32."""
    N = x.shape[0]
    m0, mf = metas[0], metas[-1]
    n_layers = len(metas)

    p0 = m0["p"]
    x0 = x
    if p0 > 0:
        x0 = jnp.pad(x, ((0, 0), (0, 0), (p0, p0), (p0, p0)), mode=_pad_mode(pad_type))
    P0 = m0["Hp"] * m0["Wp"]
    x0 = x0.reshape(N, m0["cin"], P0).astype(COMPUTE_DTYPE)   # flattened, lane-dense

    inputs = [x0] + list(model["wmats"]) + list(model["sels"]) + list(model["pmats"])
    in_specs = [pl.BlockSpec((1, m0["cin"], P0), lambda n: (n, 0, 0))]
    in_specs += [pl.BlockSpec((m["cout"], m["K"]), lambda n: (0, 0)) for m in metas]
    in_specs += [pl.BlockSpec((m["L"], m["M"]), lambda n: (0, 0)) for m in metas]
    in_specs += [pl.BlockSpec((m["H"] * m["W"], m["Hp"] * m["Wp"]), lambda n: (0, 0))
                 for m in metas[1:]]

    Cd, Mf = mf["cout"], mf["M"]
    K_max = max(m["K"] for m in metas)
    L_max = max(m["L"] for m in metas)
    C_max = max(m["cin"] for m in metas)
    P_max = max(m["Hp"] * m["Wp"] for m in metas)

    flops = 0
    for li, m in enumerate(metas):
        flops += 2 * m["M"] * m["K"] * (m["L"] + m["cout"])
        if li > 0:
            flops += 2 * m["cin"] * m["H"] * m["W"] * m["Hp"] * m["Wp"]
    flops *= N
    bytes_accessed = sum(int(np.prod(a.shape)) * a.dtype.itemsize for a in inputs)
    bytes_accessed += N * Cd * Mf * 4
    cost = pl.CostEstimate(flops=int(flops),
                           transcendentals=int(N * sum(m["cout"] for m in metas)),
                           bytes_accessed=int(bytes_accessed))

    out = pl.pallas_call(
        functools.partial(_encoder_kernel, metas=metas),
        out_shape=jax.ShapeDtypeStruct((N, Cd, Mf), jnp.float32),
        grid=(N,),
        in_specs=in_specs,
        out_specs=pl.BlockSpec((1, Cd, Mf), lambda n: (n, 0, 0)),
        scratch_shapes=[pltpu.VMEM((K_max, L_max), COMPUTE_DTYPE),
                        pltpu.VMEM((C_max, P_max), COMPUTE_DTYPE)],
        compiler_params=pltpu.CompilerParams(
            dimension_semantics=("parallel",),          # batch -> both TCs on v7x
            vmem_limit_bytes=_vmem_limit_bytes()),
        cost_estimate=cost,
    )(*inputs)
    return out.reshape(N, Cd, mf["Ho"], mf["Wo"])       # free reshape, no transpose


# -----------------------------------------------------------------------------
# Pure-JAX f32 reference (for correctness check)
# -----------------------------------------------------------------------------
def reference_forward(x, params, metas, pad_type):
    mode = _pad_mode(pad_type)
    dn = ("NCHW", "OIHW", "NCHW")
    resid = None
    y = x
    for m, (w, b) in zip(metas, params):
        if m["res_start"]:
            resid = y
        p, s = m["p"], m["s"]
        yp = jnp.pad(y, ((0, 0), (0, 0), (p, p), (p, p)), mode=mode) if p else y
        z = lax.conv_general_dilated(yp, w, (s, s), "VALID", dimension_numbers=dn)
        z = z + b.reshape(1, -1, 1, 1)                  # cancelled by IN below
        if m["norm"] == "in":
            mu = z.mean(axis=(2, 3), keepdims=True)
            var = jnp.mean(jnp.square(z - mu), axis=(2, 3), keepdims=True)
            z = (z - mu) * lax.rsqrt(var + _IN_EPS)
        if m["act"] == "relu":
            z = jnp.maximum(z, 0.0)
        elif m["act"] == "lrelu":
            z = jnp.where(z >= 0.0, z, 0.2 * z)
        elif m["act"] == "tanh":
            z = jnp.tanh(z)
        if m["res"]:
            z = z + resid
        y = z
    return y


# -----------------------------------------------------------------------------
if __name__ == "__main__":
    # ContentEncoder(n_downsample=2, n_res=2, input_dim=3, dim=8,
    #                norm='in', activ='relu', pad_type='reflect')
    n_downsample, n_res, input_dim, dim = 2, 2, 3, 8
    norm, activ, pad_type = "in", "relu", "reflect"
    N, H, W = 2, 16, 16

    layers, out_dim = build_layers(n_downsample, n_res, input_dim, dim, norm, activ)
    metas = plan_encoder(layers, H, W)

    key = jax.random.PRNGKey(0)
    kx, kp = jax.random.split(key)
    x = jax.random.normal(kx, (N, input_dim, H, W), jnp.float32)
    params = init_params(kp, layers)

    # Weight / Sel / Pad re-layouts happen once per model, outside the forward.
    model = prepare_model(params, metas, pad_type)

    fwd = jax.jit(functools.partial(content_encoder_forward,
                                    metas=metas, pad_type=pad_type))
    out = jax.block_until_ready(fwd(x, model))

    ref = jax.block_until_ready(reference_forward(x, params, metas, pad_type))
    assert out.shape == (N, out_dim, H // (2 ** n_downsample), W // (2 ** n_downsample))
    # bf16 MXU inputs (f32 accumulation) across 7 stacked conv+InstanceNorm
    # layers vs. an all-f32 reference -> few-percent tolerance.
    np.testing.assert_allclose(np.asarray(out), np.asarray(ref),
                               rtol=5e-2, atol=5e-2)
    print("KERNEL_OK")
</pallas_src>

<mosaic_0001>
module attributes {stable_mosaic.version = 11 : i64} {
  func.func @_encoder_kernel(%arg0: i32, %arg1: memref<1x3x484xbf16, #tpu.memory_space<vmem>>, %arg2: memref<8x147xbf16, #tpu.memory_space<vmem>>, %arg3: memref<16x128xbf16, #tpu.memory_space<vmem>>, %arg4: memref<32x256xbf16, #tpu.memory_space<vmem>>, %arg5: memref<32x288xbf16, #tpu.memory_space<vmem>>, %arg6: memref<32x288xbf16, #tpu.memory_space<vmem>>, %arg7: memref<32x288xbf16, #tpu.memory_space<vmem>>, %arg8: memref<32x288xbf16, #tpu.memory_space<vmem>>, %arg9: memref<346x256xbf16, #tpu.memory_space<vmem>>, %arg10: memref<267x64xbf16, #tpu.memory_space<vmem>>, %arg11: memref<67x16xbf16, #tpu.memory_space<vmem>>, %arg12: memref<22x16xbf16, #tpu.memory_space<vmem>>, %arg13: memref<22x16xbf16, #tpu.memory_space<vmem>>, %arg14: memref<22x16xbf16, #tpu.memory_space<vmem>>, %arg15: memref<22x16xbf16, #tpu.memory_space<vmem>>, %arg16: memref<256x324xbf16, #tpu.memory_space<vmem>>, %arg17: memref<64x100xbf16, #tpu.memory_space<vmem>>, %arg18: memref<16x36xbf16, #tpu.memory_space<vmem>>, %arg19: memref<16x36xbf16, #tpu.memory_space<vmem>>, %arg20: memref<16x36xbf16, #tpu.memory_space<vmem>>, %arg21: memref<16x36xbf16, #tpu.memory_space<vmem>>, %arg22: memref<1x32x16xf32, #tpu.memory_space<vmem>>, %arg23: memref<288x346xbf16, #tpu.memory_space<vmem>>, %arg24: memref<32x484xbf16, #tpu.memory_space<vmem>>) attributes {dimension_semantics = [#tpu.dimension_semantics<parallel>], iteration_bounds = array<i64: 2>, scalar_prefetch = 0 : i64, scratch_operands = 2 : i64, tpu.core_type = #tpu.core_type<tc>, window_params = [{transform_indices = @transform_0, window_bounds = array<i64: 1, 3, 484>}, {pipeline_mode = #tpu.pipeline_mode<synchronous>, transform_indices = @transform_1, window_bounds = array<i64: 8, 147>}, {pipeline_mode = #tpu.pipeline_mode<synchronous>, transform_indices = @transform_2, window_bounds = array<i64: 16, 128>}, {pipeline_mode = #tpu.pipeline_mode<synchronous>, transform_indices = @transform_3, window_bounds = array<i64: 32, 256>}, {pipeline_mode = #tpu.pipeline_mode<synchronous>, transform_indices = @transform_4, window_bounds = array<i64: 32, 288>}, {pipeline_mode = #tpu.pipeline_mode<synchronous>, transform_indices = @transform_5, window_bounds = array<i64: 32, 288>}, {pipeline_mode = #tpu.pipeline_mode<synchronous>, transform_indices = @transform_6, window_bounds = array<i64: 32, 288>}, {pipeline_mode = #tpu.pipeline_mode<synchronous>, transform_indices = @transform_7, window_bounds = array<i64: 32, 288>}, {pipeline_mode = #tpu.pipeline_mode<synchronous>, transform_indices = @transform_8, window_bounds = array<i64: 346, 256>}, {pipeline_mode = #tpu.pipeline_mode<synchronous>, transform_indices = @transform_9, window_bounds = array<i64: 267, 64>}, {pipeline_mode = #tpu.pipeline_mode<synchronous>, transform_indices = @transform_10, window_bounds = array<i64: 67, 16>}, {pipeline_mode = #tpu.pipeline_mode<synchronous>, transform_indices = @transform_11, window_bounds = array<i64: 22, 16>}, {pipeline_mode = #tpu.pipeline_mode<synchronous>, transform_indices = @transform_12, window_bounds = array<i64: 22, 16>}, {pipeline_mode = #tpu.pipeline_mode<synchronous>, transform_indices = @transform_13, window_bounds = array<i64: 22, 16>}, {pipeline_mode = #tpu.pipeline_mode<synchronous>, transform_indices = @transform_14, window_bounds = array<i64: 22, 16>}, {pipeline_mode = #tpu.pipeline_mode<synchronous>, transform_indices = @transform_15, window_bounds = array<i64: 256, 324>}, {pipeline_mode = #tpu.pipeline_mode<synchronous>, transform_indices = @transform_16, window_bounds = array<i64: 64, 100>}, {pipeline_mode = #tpu.pipeline_mode<synchronous>, transform_indices = @transform_17, window_bounds = array<i64: 16, 36>}, {pipeline_mode = #tpu.pipeline_mode<synchronous>, transform_indices = @transform_18, window_bounds = array<i64: 16, 36>}, {pipeline_mode = #tpu.pipeline_mode<synchronous>, transform_indices = @transform_19, window_bounds = array<i64: 16, 36>}, {pipeline_mode = #tpu.pipeline_mode<synchronous>, transform_indices = @transform_20, window_bounds = array<i64: 16, 36>}, {transform_indices = @transform_21, window_bounds = array<i64: 1, 32, 16>}]} {
    %c0 = arith.constant 0 : index
    %c0_0 = arith.constant 0 : index
    %c0_1 = arith.constant 0 : index
    %0 = vector.load %arg1[%c0, %c0_0, %c0_1] : memref<1x3x484xbf16, #tpu.memory_space<vmem>>, vector<1x3x484xbf16>
    %1 = vector.shape_cast %0 : vector<1x3x484xbf16> to vector<3x484xbf16>
    %c0_2 = arith.constant 0 : index
    %c0_3 = arith.constant 0 : index
    %2 = vector.load %arg24[%c0_2, %c0_3] : memref<32x484xbf16, #tpu.memory_space<vmem>>, vector<3x484xbf16>
    tpu.vector_store %arg24[%c0_2, %c0_3], %1 {strides = array<i32>} : memref<32x484xbf16, #tpu.memory_space<vmem>>, vector<3x484xbf16>,
    %c0_4 = arith.constant 0 : index
    %c0_5 = arith.constant 0 : index
    %3 = vector.load %arg24[%c0_4, %c0_5] : memref<32x484xbf16, #tpu.memory_space<vmem>>, vector<3x346xbf16>
    %c0_6 = arith.constant 0 : index
    %c0_7 = arith.constant 0 : index
    %4 = vector.load %arg23[%c0_6, %c0_7] : memref<288x346xbf16, #tpu.memory_space<vmem>>, vector<3x346xbf16>
    tpu.vector_store %arg23[%c0_6, %c0_7], %3 {strides = array<i32>} : memref<288x346xbf16, #tpu.memory_space<vmem>>, vector<3x346xbf16>,
    %c0_8 = arith.constant 0 : index
    %c1 = arith.constant 1 : index
    %5 = vector.load %arg24[%c0_8, %c1] : memref<32x484xbf16, #tpu.memory_space<vmem>>, vector<3x346xbf16>
    %c3 = arith.constant 3 : index
    %c0_9 = arith.constant 0 : index
    %6 = vector.load %arg23[%c3, %c0_9] : memref<288x346xbf16, #tpu.memory_space<vmem>>, vector<3x346xbf16>
    tpu.vector_store %arg23[%c3, %c0_9], %5 {strides = array<i32>} : memref<288x346xbf16, #tpu.memory_space<vmem>>, vector<3x346xbf16>,
    %c0_10 = arith.constant 0 : index
    %c2 = arith.constant 2 : index
    %7 = vector.load %arg24[%c0_10, %c2] : memref<32x484xbf16, #tpu.memory_space<vmem>>, vector<3x346xbf16>
    %c6 = arith.constant 6 : index
    %c0_11 = arith.constant 0 : index
    %8 = vector.load %arg23[%c6, %c0_11] : memref<288x346xbf16, #tpu.memory_space<vmem>>, vector<3x346xbf16>
    tpu.vector_store %arg23[%c6, %c0_11], %7 {strides = array<i32>} : memref<288x346xbf16, #tpu.memory_space<vmem>>, vector<3x346xbf16>,
    %c0_12 = arith.constant 0 : index
    %c3_13 = arith.constant 3 : index
    %9 = vector.load %arg24[%c0_12, %c3_13] : memref<32x484xbf16, #tpu.memory_space<vmem>>, vector<3x346xbf16>
    %c9 = arith.constant 9 : index
    %c0_14 = arith.constant 0 : index
    %10 = vector.load %arg23[%c9, %c0_14] : memref<288x346xbf16, #tpu.memory_space<vmem>>, vector<3x346xbf16>
    tpu.vector_store %arg23[%c9, %c0_14], %9 {strides = array<i32>} : memref<288x346xbf16, #tpu.memory_space<vmem>>, vector<3x346xbf16>,
    %c0_15 = arith.constant 0 : index
    %c4 = arith.constant 4 : index
    %11 = vector.load %arg24[%c0_15, %c4] : memref<32x484xbf16, #tpu.memory_space<vmem>>, vector<3x346xbf16>
    %c12 = arith.constant 12 : index
    %c0_16 = arith.constant 0 : index
    %12 = vector.load %arg23[%c12, %c0_16] : memref<288x346xbf16, #tpu.memory_space<vmem>>, vector<3x346xbf16>
    tpu.vector_store %arg23[%c12, %c0_16], %11 {strides = array<i32>} : memref<288x346xbf16, #tpu.memory_space<vmem>>, vector<3x346xbf16>,
    %c0_17 = arith.constant 0 : index
    %c5 = arith.constant 5 : index
    %13 = vector.load %arg24[%c0_17, %c5] : memref<32x484xbf16, #tpu.memory_space<vmem>>, vector<3x346xbf16>
    %c15 = arith.constant 15 : index
    %c0_18 = arith.constant 0 : index
    %14 = vector.load %arg23[%c15, %c0_18] : memref<288x346xbf16, #tpu.memory_space<vmem>>, vector<3x346xbf16>
    tpu.vector_store %arg23[%c15, %c0_18], %13 {strides = array<i32>} : memref<288x346xbf16, #tpu.memory_space<vmem>>, vector<3x346xbf16>,
    %c0_19 = arith.constant 0 : index
    %c6_20 = arith.constant 6 : index
    %15 = vector.load %arg24[%c0_19, %c6_20] : memref<32x484xbf16, #tpu.memory_space<vmem>>, vector<3x346xbf16>
    %c18 = arith.constant 18 : index
    %c0_21 = arith.constant 0 : index
    %16 = vector.load %arg23[%c18, %c0_21] : memref<288x346xbf16, #tpu.memory_space<vmem>>, vector<3x346xbf16>
    tpu.vector_store %arg23[%c18, %c0_21], %15 {strides = array<i32>} : memref<288x346xbf16, #tpu.memory_space<vmem>>, vector<3x346xbf16>,
    %c0_22 = arith.constant 0 : index
    %c22 = arith.constant 22 : index
    %17 = vector.load %arg24[%c0_22, %c22] : memref<32x484xbf16, #tpu.memory_space<vmem>>, vector<3x346xbf16>
    %c21 = arith.constant 21 : index
    %c0_23 = arith.constant 0 : index
    %18 = vector.load %arg23[%c21, %c0_23] : memref<288x346xbf16, #tpu.memory_space<vmem>>, vector<3x346xbf16>
    tpu.vector_store %arg23[%c21, %c0_23], %17 {strides = array<i32>} : memref<288x346xbf16, #tpu.memory_space<vmem>>, vector<3x346xbf16>,
    %c0_24 = arith.constant 0 : index
    %c23 = arith.constant 23 : index
    %19 = vector.load %arg24[%c0_24, %c23] : memref<32x484xbf16, #tpu.memory_space<vmem>>, vector<3x346xbf16>
    %c24 = arith.constant 24 : index
    %c0_25 = arith.constant 0 : index
    %20 = vector.load %arg23[%c24, %c0_25] : memref<288x346xbf16, #tpu.memory_space<vmem>>, vector<3x346xbf16>
    tpu.vector_store %arg23[%c24, %c0_25], %19 {strides = array<i32>} : memref<288x346xbf16, #tpu.memory_space<vmem>>, vector<3x346xbf16>,
    %c0_26 = arith.constant 0 : index
    %c24_27 = arith.constant 24 : index
    %21 = vector.load %arg24[%c0_26, %c24_27] : memref<32x484xbf16, #tpu.memory_space<vmem>>, vector<3x346xbf16>
    %c27 = arith.constant 27 : index
    %c0_28 = arith.constant 0 : index
    %22 = vector.load %arg23[%c27, %c0_28] : memref<288x346xbf16, #tpu.memory_space<vmem>>, vector<3x346xbf16>
    tpu.vector_store %arg23[%c27, %c0_28], %21 {strides = array<i32>} : memref<288x346xbf16, #tpu.memory_space<vmem>>, vector<3x346xbf16>,
    %c0_29 = arith.constant 0 : index
    %c25 = arith.constant 25 : index
    %23 = vector.load %arg24[%c0_29, %c25] : memref<32x484xbf16, #tpu.memory_space<vmem>>, vector<3x346xbf16>
    %c30 = arith.constant 30 : index
    %c0_30 = arith.constant 0 : index
    %24 = vector.load %arg23[%c30, %c0_30] : memref<288x346xbf16, #tpu.memory_space<vmem>>, vector<3x346xbf16>
    tpu.vector_store %arg23[%c30, %c0_30], %23 {strides = array<i32>} : memref<288x346xbf16, #tpu.memory_space<vmem>>, vector<3x346xbf16>,
    %c0_31 = arith.constant 0 : index
    %c26 = arith.constant 26 : index
    %25 = vector.load %arg24[%c0_31, %c26] : memref<32x484xbf16, #tpu.memory_space<vmem>>, vector<3x346xbf16>
    %c33 = arith.constant 33 : index
    %c0_32 = arith.constant 0 : index
    %26 = vector.load %arg23[%c33, %c0_32] : memref<288x346xbf16, #tpu.memory_space<vmem>>, vector<3x346xbf16>
    tpu.vector_store %arg23[%c33, %c0_32], %25 {strides = array<i32>} : memref<288x346xbf16, #tpu.memory_space<vmem>>, vector<3x346xbf16>,
    %c0_33 = arith.constant 0 : index
    %c27_34 = arith.constant 27 : index
    %27 = vector.load %arg24[%c0_33, %c27_34] : memref<32x484xbf16, #tpu.memory_space<vmem>>, vector<3x346xbf16>
    %c36 = arith.constant 36 : index
    %c0_35 = arith.constant 0 : index
    %28 = vector.load %arg23[%c36, %c0_35] : memref<288x346xbf16, #tpu.memory_space<vmem>>, vector<3x346xbf16>
    tpu.vector_store %arg23[%c36, %c0_35], %27 {strides = array<i32>} : memref<288x346xbf16, #tpu.memory_space<vmem>>, vector<3x346xbf16>,
    %c0_36 = arith.constant 0 : index
    %c28 = arith.constant 28 : index
    %29 = vector.load %arg24[%c0_36, %c28] : memref<32x484xbf16, #tpu.memory_space<vmem>>, vector<3x346xbf16>
    %c39 = arith.constant 39 : index
    %c0_37 = arith.constant 0 : index
    %30 = vector.load %arg23[%c39, %c0_37] : memref<288x346xbf16, #tpu.memory_space<vmem>>, vector<3x346xbf16>
    tpu.vector_store %arg23[%c39, %c0_37], %29 {strides = array<i32>} : memref<288x346xbf16, #tpu.memory_space<vmem>>, vector<3x346xbf16>,
    %c0_38 = arith.constant 0 : index
    %c44 = arith.constant 44 : index
    %31 = vector.load %arg24[%c0_38, %c44] : memref<32x484xbf16, #tpu.memory_space<vmem>>, vector<3x346xbf16>
    %c42 = arith.constant 42 : index
    %c0_39 = arith.constant 0 : index
    %32 = vector.load %arg23[%c42, %c0_39] : memref<288x346xbf16, #tpu.memory_space<vmem>>, vector<3x346xbf16>
    tpu.vector_store %arg23[%c42, %c0_39], %31 {strides = array<i32>} : memref<288x346xbf16, #tpu.memory_space<vmem>>, vector<3x346xbf16>,
    %c0_40 = arith.constant 0 : index
    %c45 = arith.constant 45 : index
    %33 = vector.load %arg24[%c0_40, %c45] : memref<32x484xbf16, #tpu.memory_space<vmem>>, vector<3x346xbf16>
    %c45_41 = arith.constant 45 : index
    %c0_42 = arith.constant 0 : index
    %34 = vector.load %arg23[%c45_41, %c0_42] : memref<288x346xbf16, #tpu.memory_space<vmem>>, vector<3x346xbf16>
    tpu.vector_store %arg23[%c45_41, %c0_42], %33 {strides = array<i32>} : memref<288x346xbf16, #tpu.memory_space<vmem>>, vector<3x346xbf16>,
    %c0_43 = arith.constant 0 : index
    %c46 = arith.constant 46 : index
    %35 = vector.load %arg24[%c0_43, %c46] : memref<32x484xbf16, #tpu.memory_space<vmem>>, vector<3x346xbf16>
    %c48 = arith.constant 48 : index
    %c0_44 = arith.constant 0 : index
    %36 = vector.load %arg23[%c48, %c0_44] : memref<288x346xbf16, #tpu.memory_space<vmem>>, vector<3x346xbf16>
    tpu.vector_store %arg23[%c48, %c0_44], %35 {strides = array<i32>} : memref<288x346xbf16, #tpu.memory_space<vmem>>, vector<3x346xbf16>,
    %c0_45 = arith.constant 0 : index
    %c47 = arith.constant 47 : index
    %37 = vector.load %arg24[%c0_45, %c47] : memref<32x484xbf16, #tpu.memory_space<vmem>>, vector<3x346xbf16>
    %c51 = arith.constant 51 : index
    %c0_46 = arith.constant 0 : index
    %38 = vector.load %arg23[%c51, %c0_46] : memref<288x346xbf16, #tpu.memory_space<vmem>>, vector<3x346xbf16>
    tpu.vector_store %arg23[%c51, %c0_46], %37 {strides = array<i32>} : memref<288x346xbf16, #tpu.memory_space<vmem>>, vector<3x346xbf16>,
    %c0_47 = arith.constant 0 : index
    %c48_48 = arith.constant 48 : index
    %39 = vector.load %arg24[%c0_47, %c48_48] : memref<32x484xbf16, #tpu.memory_space<vmem>>, vector<3x346xbf16>
    %c54 = arith.constant 54 : index
    %c0_49 = arith.constant 0 : index
    %40 = vector.load %arg23[%c54, %c0_49] : memref<288x346xbf16, #tpu.memory_space<vmem>>, vector<3x346xbf16>
    tpu.vector_store %arg23[%c54, %c0_49], %39 {strides = array<i32>} : memref<288x346xbf16, #tpu.memory_space<vmem>>, vector<3x346xbf16>,
    %c0_50 = arith.constant 0 : index
    %c49 = arith.constant 49 : index
    %41 = vector.load %arg24[%c0_50, %c49] : memref<32x484xbf16, #tpu.memory_space<vmem>>, vector<3x346xbf16>
    %c57 = arith.constant 57 : index
    %c0_51 = arith.constant 0 : index
    %42 = vector.load %arg23[%c57, %c0_51] : memref<288x346xbf16, #tpu.memory_space<vmem>>, vector<3x346xbf16>
    tpu.vector_store %arg23[%c57, %c0_51], %41 {strides = array<i32>} : memref<288x346xbf16, #tpu.memory_space<vmem>>, vector<3x346xbf16>,
    %c0_52 = arith.constant 0 : index
    %c50 = arith.constant 50 : index
    %43 = vector.load %arg24[%c0_52, %c50] : memref<32x484xbf16, #tpu.memory_space<vmem>>, vector<3x346xbf16>
    %c60 = arith.constant 60 : index
    %c0_53 = arith.constant 0 : index
    %44 = vector.load %arg23[%c60, %c0_53] : memref<288x346xbf16, #tpu.memory_space<vmem>>, vector<3x346xbf16>
    tpu.vector_store %arg23[%c60, %c0_53], %43 {strides = array<i32>} : memref<288x346xbf16, #tpu.memory_space<vmem>>, vector<3x346xbf16>,
    %c0_54 = arith.constant 0 : index
    %c66 = arith.constant 66 : index
    %45 = vector.load %arg24[%c0_54, %c66] : memref<32x484xbf16, #tpu.memory_space<vmem>>, vector<3x346xbf16>
    %c63 = arith.constant 63 : index
    %c0_55 = arith.constant 0 : index
    %46 = vector.load %arg23[%c63, %c0_55] : memref<288x346xbf16, #tpu.memory_space<vmem>>, vector<3x346xbf16>
    tpu.vector_store %arg23[%c63, %c0_55], %45 {strides = array<i32>} : memref<288x346xbf16, #tpu.memory_space<vmem>>, vector<3x346xbf16>,
    %c0_56 = arith.constant 0 : index
    %c67 = arith.constant 67 : index
    %47 = vector.load %arg24[%c0_56, %c67] : memref<32x484xbf16, #tpu.memory_space<vmem>>, vector<3x346xbf16>
    %c66_57 = arith.constant 66 : index
    %c0_58 = arith.constant 0 : index
    %48 = vector.load %arg23[%c66_57, %c0_58] : memref<288x346xbf16, #tpu.memory_space<vmem>>, vector<3x346xbf16>
    tpu.vector_store %arg23[%c66_57, %c0_58], %47 {strides = array<i32>} : memref<288x346xbf16, #tpu.memory_space<vmem>>, vector<3x346xbf16>,
    %c0_59 = arith.constant 0 : index
    %c68 = arith.constant 68 : index
    %49 = vector.load %arg24[%c0_59, %c68] : memref<32x484xbf16, #tpu.memory_space<vmem>>, vector<3x346xbf16>
    %c69 = arith.constant 69 : index
    %c0_60 = arith.constant 0 : index
    %50 = vector.load %arg23[%c69, %c0_60] : memref<288x346xbf16, #tpu.memory_space<vmem>>, vector<3x346xbf16>
    tpu.vector_store %arg23[%c69, %c0_60], %49 {strides = array<i32>} : memref<288x346xbf16, #tpu.memory_space<vmem>>, vector<3x346xbf16>,
    %c0_61 = arith.constant 0 : index
    %c69_62 = arith.constant 69 : index
    %51 = vector.load %arg24[%c0_61, %c69_62] : memref<32x484xbf16, #tpu.memory_space<vmem>>, vector<3x346xbf16>
    %c72 = arith.constant 72 : index
    %c0_63 = arith.constant 0 : index
    %52 = vector.load %arg23[%c72, %c0_63] : memref<288x346xbf16, #tpu.memory_space<vmem>>, vector<3x346xbf16>
    tpu.vector_store %arg23[%c72, %c0_63], %51 {strides = array<i32>} : memref<288x346xbf16, #tpu.memory_space<vmem>>, vector<3x346xbf16>,
    %c0_64 = arith.constant 0 : index
    %c70 = arith.constant 70 : index
    %53 = vector.load %arg24[%c0_64, %c70] : memref<32x484xbf16, #tpu.memory_space<vmem>>, vector<3x346xbf16>
    %c75 = arith.constant 75 : index
    %c0_65 = arith.constant 0 : index
    %54 = vector.load %arg23[%c75, %c0_65] : memref<288x346xbf16, #tpu.memory_space<vmem>>, vector<3x346xbf16>
    tpu.vector_store %arg23[%c75, %c0_65], %53 {strides = array<i32>} : memref<288x346xbf16, #tpu.memory_space<vmem>>, vector<3x346xbf16>,
    %c0_66 = arith.constant 0 : index
    %c71 = arith.constant 71 : index
    %55 = vector.load %arg24[%c0_66, %c71] : memref<32x484xbf16, #tpu.memory_space<vmem>>, vector<3x346xbf16>
    %c78 = arith.constant 78 : index
    %c0_67 = arith.constant 0 : index
    %56 = vector.load %arg23[%c78, %c0_67] : memref<288x346xbf16, #tpu.memory_space<vmem>>, vector<3x346xbf16>
    tpu.vector_store %arg23[%c78, %c0_67], %55 {strides = array<i32>} : memref<288x346xbf16, #tpu.memory_space<vmem>>, vector<3x346xbf16>,
    %c0_68 = arith.constant 0 : index
    %c72_69 = arith.constant 72 : index
    %57 = vector.load %arg24[%c0_68, %c72_69] : memref<32x484xbf16, #tpu.memory_space<vmem>>, vector<3x346xbf16>
    %c81 = arith.constant 81 : index
    %c0_70 = arith.constant 0 : index
    %58 = vector.load %arg23[%c81, %c0_70] : memref<288x346xbf16, #tpu.memory_space<vmem>>, vector<3x346xbf16>
    tpu.vector_store %arg23[%c81, %c0_70], %57 {strides = array<i32>} : memref<288x346xbf16, #tpu.memory_space<vmem>>, vector<3x346xbf16>,
    %c0_71 = arith.constant 0 : index
    %c88 = arith.constant 88 : index
    %59 = vector.load %arg24[%c0_71, %c88] : memref<32x484xbf16, #tpu.memory_space<vmem>>, vector<3x346xbf16>
    %c84 = arith.constant 84 : index
    %c0_72 = arith.constant 0 : index
    %60 = vector.load %arg23[%c84, %c0_72] : memref<288x346xbf16, #tpu.memory_space<vmem>>, vector<3x346xbf16>
    tpu.vector_store %arg23[%c84, %c0_72], %59 {strides = array<i32>} : memref<288x346xbf16, #tpu.memory_space<vmem>>, vector<3x346xbf16>,
    %c0_73 = arith.constant 0 : index
    %c89 = arith.constant 89 : index
    %61 = vector.load %arg24[%c0_73, %c89] : memref<32x484xbf16, #tpu.memory_space<vmem>>, vector<3x346xbf16>
    %c87 = arith.constant 87 : index
    %c0_74 = arith.constant 0 : index
    %62 = vector.load %arg23[%c87, %c0_74] : memref<288x346xbf16, #tpu.memory_space<vmem>>, vector<3x346xbf16>
    tpu.vector_store %arg23[%c87, %c0_74], %61 {strides = array<i32>} : memref<288x346xbf16, #tpu.memory_space<vmem>>, vector<3x346xbf16>,
    %c0_75 = arith.constant 0 : index
    %c90 = arith.constant 90 : index
    %63 = vector.load %arg24[%c0_75, %c90] : memref<32x484xbf16, #tpu.memory_space<vmem>>, vector<3x346xbf16>
    %c90_76 = arith.constant 90 : index
    %c0_77 = arith.constant 0 : index
    %64 = vector.load %arg23[%c90_76, %c0_77] : memref<288x346xbf16, #tpu.memory_space<vmem>>, vector<3x346xbf16>
    tpu.vector_store %arg23[%c90_76, %c0_77], %63 {strides = array<i32>} : memref<288x346xbf16, #tpu.memory_space<vmem>>, vector<3x346xbf16>,
    %c0_78 = arith.constant 0 : index
    %c91 = arith.constant 91 : index
    %65 = vector.load %arg24[%c0_78, %c91] : memref<32x484xbf16, #tpu.memory_space<vmem>>, vector<3x346xbf16>
    %c93 = arith.constant 93 : index
    %c0_79 = arith.constant 0 : index
    %66 = vector.load %arg23[%c93, %c0_79] : memref<288x346xbf16, #tpu.memory_space<vmem>>, vector<3x346xbf16>
    tpu.vector_store %arg23[%c93, %c0_79], %65 {strides = array<i32>} : memref<288x346xbf16, #tpu.memory_space<vmem>>, vector<3x346xbf16>,
    %c0_80 = arith.constant 0 : index
    %c92 = arith.constant 92 : index
    %67 = vector.load %arg24[%c0_80, %c92] : memref<32x484xbf16, #tpu.memory_space<vmem>>, vector<3x346xbf16>
    %c96 = arith.constant 96 : index
    %c0_81 = arith.constant 0 : index
    %68 = vector.load %arg23[%c96, %c0_81] : memref<288x346xbf16, #tpu.memory_space<vmem>>, vector<3x346xbf16>
    tpu.vector_store %arg23[%c96, %c0_81], %67 {strides = array<i32>} : memref<288x346xbf16, #tpu.memory_space<vmem>>, vector<3x346xbf16>,
    %c0_82 = arith.constant 0 : index
    %c93_83 = arith.constant 93 : index
    %69 = vector.load %arg24[%c0_82, %c93_83] : memref<32x484xbf16, #tpu.memory_space<vmem>>, vector<3x346xbf16>
    %c99 = arith.constant 99 : index
    %c0_84 = arith.constant 0 : index
    %70 = vector.load %arg23[%c99, %c0_84] : memref<288x346xbf16, #tpu.memory_space<vmem>>, vector<3x346xbf16>
    tpu.vector_store %arg23[%c99, %c0_84], %69 {strides = array<i32>} : memref<288x346xbf16, #tpu.memory_space<vmem>>, vector<3x346xbf16>,
    %c0_85 = arith.constant 0 : index
    %c94 = arith.constant 94 : index
    %71 = vector.load %arg24[%c0_85, %c94] : memref<32x484xbf16, #tpu.memory_space<vmem>>, vector<3x346xbf16>
    %c102 = arith.constant 102 : index
    %c0_86 = arith.constant 0 : index
    %72 = vector.load %arg23[%c102, %c0_86] : memref<288x346xbf16, #tpu.memory_space<vmem>>, vector<3x346xbf16>
    tpu.vector_store %arg23[%c102, %c0_86], %71 {strides = array<i32>} : memref<288x346xbf16, #tpu.memory_space<vmem>>, vector<3x346xbf16>,
    %c0_87 = arith.constant 0 : index
    %c110 = arith.constant 110 : index
    %73 = vector.load %arg24[%c0_87, %c110] : memref<32x484xbf16, #tpu.memory_space<vmem>>, vector<3x346xbf16>
    %c105 = arith.constant 105 : index
    %c0_88 = arith.constant 0 : index
    %74 = vector.load %arg23[%c105, %c0_88] : memref<288x346xbf16, #tpu.memory_space<vmem>>, vector<3x346xbf16>
    tpu.vector_store %arg23[%c105, %c0_88], %73 {strides = array<i32>} : memref<288x346xbf16, #tpu.memory_space<vmem>>, vector<3x346xbf16>,
    %c0_89 = arith.constant 0 : index
    %c111 = arith.constant 111 : index
    %75 = vector.load %arg24[%c0_89, %c111] : memref<32x484xbf16, #tpu.memory_space<vmem>>, vector<3x346xbf16>
    %c108 = arith.constant 108 : index
    %c0_90 = arith.constant 0 : index
    %76 = vector.load %arg23[%c108, %c0_90] : memref<288x346xbf16, #tpu.memory_space<vmem>>, vector<3x346xbf16>
    tpu.vector_store %arg23[%c108, %c0_90], %75 {strides = array<i32>} : memref<288x346xbf16, #tpu.memory_space<vmem>>, vector<3x346xbf16>,
    %c0_91 = arith.constant 0 : index
    %c112 = arith.constant 112 : index
    %77 = vector.load %arg24[%c0_91, %c112] : memref<32x484xbf16, #tpu.memory_space<vmem>>, vector<3x346xbf16>
    %c111_92 = arith.constant 111 : index
    %c0_93 = arith.constant 0 : index
    %78 = vector.load %arg23[%c111_92, %c0_93] : memref<288x346xbf16, #tpu.memory_space<vmem>>, vector<3x346xbf16>
    tpu.vector_store %arg23[%c111_92, %c0_93], %77 {strides = array<i32>} : memref<288x346xbf16, #tpu.memory_space<vmem>>, vector<3x346xbf16>,
    %c0_94 = arith.constant 0 : index
    %c113 = arith.constant 113 : index
    %79 = vector.load %arg24[%c0_94, %c113] : memref<32x484xbf16, #tpu.memory_space<vmem>>, vector<3x346xbf16>
    %c114 = arith.constant 114 : index
    %c0_95 = arith.constant 0 : index
    %80 = vector.load %arg23[%c114, %c0_95] : memref<288x346xbf16, #tpu.memory_space<vmem>>, vector<3x346xbf16>
    tpu.vector_store %arg23[%c114, %c0_95], %79 {strides = array<i32>} : memref<288x346xbf16, #tpu.memory_space<vmem>>, vector<3x346xbf16>,
    %c0_96 = arith.constant 0 : index
    %c114_97 = arith.constant 114 : index
    %81 = vector.load %arg24[%c0_96, %c114_97] : memref<32x484xbf16, #tpu.memory_space<vmem>>, vector<3x346xbf16>
    %c117 = arith.constant 117 : index
    %c0_98 = arith.constant 0 : index
    %82 = vector.load %arg23[%c117, %c0_98] : memref<288x346xbf16, #tpu.memory_space<vmem>>, vector<3x346xbf16>
    tpu.vector_store %arg23[%c117, %c0_98], %81 {strides = array<i32>} : memref<288x346xbf16, #tpu.memory_space<vmem>>, vector<3x346xbf16>,
    %c0_99 = arith.constant 0 : index
    %c115 = arith.constant 115 : index
    %83 = vector.load %arg24[%c0_99, %c115] : memref<32x484xbf16, #tpu.memory_space<vmem>>, vector<3x346xbf16>
    %c120 = arith.constant 120 : index
    %c0_100 = arith.constant 0 : index
    %84 = vector.load %arg23[%c120, %c0_100] : memref<288x346xbf16, #tpu.memory_space<vmem>>, vector<3x346xbf16>
    tpu.vector_store %arg23[%c120, %c0_100], %83 {strides = array<i32>} : memref<288x346xbf16, #tpu.memory_space<vmem>>, vector<3x346xbf16>,
    %c0_101 = arith.constant 0 : index
    %c116 = arith.constant 116 : index
    %85 = vector.load %arg24[%c0_101, %c116] : memref<32x484xbf16, #tpu.memory_space<vmem>>, vector<3x346xbf16>
    %c123 = arith.constant 123 : index
    %c0_102 = arith.constant 0 : index
    %86 = vector.load %arg23[%c123, %c0_102] : memref<288x346xbf16, #tpu.memory_space<vmem>>, vector<3x346xbf16>
    tpu.vector_store %arg23[%c123, %c0_102], %85 {strides = array<i32>} : memref<288x346xbf16, #tpu.memory_space<vmem>>, vector<3x346xbf16>,
    %c0_103 = arith.constant 0 : index
    %c132 = arith.constant 132 : index
    %87 = vector.load %arg24[%c0_103, %c132] : memref<32x484xbf16, #tpu.memory_space<vmem>>, vector<3x346xbf16>
    %c126 = arith.constant 126 : index
    %c0_104 = arith.constant 0 : index
    %88 = vector.load %arg23[%c126, %c0_104] : memref<288x346xbf16, #tpu.memory_space<vmem>>, vector<3x346xbf16>
    tpu.vector_store %arg23[%c126, %c0_104], %87 {strides = array<i32>} : memref<288x346xbf16, #tpu.memory_space<vmem>>, vector<3x346xbf16>,
    %c0_105 = arith.constant 0 : index
    %c133 = arith.constant 133 : index
    %89 = vector.load %arg24[%c0_105, %c133] : memref<32x484xbf16, #tpu.memory_space<vmem>>, vector<3x346xbf16>
    %c129 = arith.constant 129 : index
    %c0_106 = arith.constant 0 : index
    %90 = vector.load %arg23[%c129, %c0_106] : memref<288x346xbf16, #tpu.memory_space<vmem>>, vector<3x346xbf16>
    tpu.vector_store %arg23[%c129, %c0_106], %89 {strides = array<i32>} : memref<288x346xbf16, #tpu.memory_space<vmem>>, vector<3x346xbf16>,
    %c0_107 = arith.constant 0 : index
    %c134 = arith.constant 134 : index
    %91 = vector.load %arg24[%c0_107, %c134] : memref<32x484xbf16, #tpu.memory_space<vmem>>, vector<3x346xbf16>
    %c132_108 = arith.constant 132 : index
    %c0_109 = arith.constant 0 : index
    %92 = vector.load %arg23[%c132_108, %c0_109] : memref<288x346xbf16, #tpu.memory_space<vmem>>, vector<3x346xbf16>
    tpu.vector_store %arg23[%c132_108, %c0_109], %91 {strides = array<i32>} : memref<288x346xbf16, #tpu.memory_space<vmem>>, vector<3x346xbf16>,
    %c0_110 = arith.constant 0 : index
    %c135 = arith.constant 135 : index
    %93 = vector.load %arg24[%c0_110, %c135] : memref<32x484xbf16, #tpu.memory_space<vmem>>, vector<3x346xbf16>
    %c135_111 = arith.constant 135 : index
    %c0_112 = arith.constant 0 : index
    %94 = vector.load %arg23[%c135_111, %c0_112] : memref<288x346xbf16, #tpu.memory_space<vmem>>, vector<3x346xbf16>
    tpu.vector_store %arg23[%c135_111, %c0_112], %93 {strides = array<i32>} : memref<288x346xbf16, #tpu.memory_space<vmem>>, vector<3x346xbf16>,
    %c0_113 = arith.constant 0 : index
    %c136 = arith.constant 136 : index
    %95 = vector.load %arg24[%c0_113, %c136] : memref<32x484xbf16, #tpu.memory_space<vmem>>, vector<3x346xbf16>
    %c138 = arith.constant 138 : index
    %c0_114 = arith.constant 0 : index
    %96 = vector.load %arg23[%c138, %c0_114] : memref<288x346xbf16, #tpu.memory_space<vmem>>, vector<3x346xbf16>
    tpu.vector_store %arg23[%c138, %c0_114], %95 {strides = array<i32>} : memref<288x346xbf16, #tpu.memory_space<vmem>>, vector<3x346xbf16>,
    %c0_115 = arith.constant 0 : index
    %c137 = arith.constant 137 : index
    %97 = vector.load %arg24[%c0_115, %c137] : memref<32x484xbf16, #tpu.memory_space<vmem>>, vector<3x346xbf16>
    %c141 = arith.constant 141 : index
    %c0_116 = arith.constant 0 : index
    %98 = vector.load %arg23[%c141, %c0_116] : memref<288x346xbf16, #tpu.memory_space<vmem>>, vector<3x346xbf16>
    tpu.vector_store %arg23[%c141, %c0_116], %97 {strides = array<i32>} : memref<288x346xbf16, #tpu.memory_space<vmem>>, vector<3x346xbf16>,
    %c0_117 = arith.constant 0 : index
    %c138_118 = arith.constant 138 : index
    %99 = vector.load %arg24[%c0_117, %c138_118] : memref<32x484xbf16, #tpu.memory_space<vmem>>, vector<3x346xbf16>
    %c144 = arith.constant 144 : index
    %c0_119 = arith.constant 0 : index
    %100 = vector.load %arg23[%c144, %c0_119] : memref<288x346xbf16, #tpu.memory_space<vmem>>, vector<3x346xbf16>
    tpu.vector_store %arg23[%c144, %c0_119], %99 {strides = array<i32>} : memref<288x346xbf16, #tpu.memory_space<vmem>>, vector<3x346xbf16>,
    %c0_120 = arith.constant 0 : index
    %c0_121 = arith.constant 0 : index
    %101 = vector.load %arg23[%c0_120, %c0_121] : memref<288x346xbf16, #tpu.memory_space<vmem>>, vector<147x346xbf16>
    %c0_122 = arith.constant 0 : index
    %c0_123 = arith.constant 0 : index
    %102 = vector.load %arg9[%c0_122, %c0_123] : memref<346x256xbf16, #tpu.memory_space<vmem>>, vector<346x256xbf16>
    %cst = arith.constant dense<0.000000e+00> : vector<147x256xf32>
    %103 = tpu.matmul %101, %102, %cst {dimension_numbers = #tpu.dot_dimension_numbers<[1], [0], [0], [1], [0, 0, 1, 1], [], []>} : vector<147x346xbf16>, vector<346x256xbf16>, vector<147x256xf32> -> vector<147x256xf32>
    %104 = arith.truncf %103 : vector<147x256xf32> to vector<147x256xbf16>
    %c0_124 = arith.constant 0 : index
    %c0_125 = arith.constant 0 : index
    %105 = vector.load %arg2[%c0_124, %c0_125] : memref<8x147xbf16, #tpu.memory_space<vmem>>, vector<8x147xbf16>
    %cst_126 = arith.constant dense<0.000000e+00> : vector<8x256xf32>
    %106 = tpu.matmul %105, %104, %cst_126 {dimension_numbers = #tpu.dot_dimension_numbers<[1], [0], [0], [1], [0, 0, 1, 1], [], []>} : vector<8x147xbf16>, vector<147x256xbf16>, vector<8x256xf32> -> vector<8x256xf32>
    %cst_127 = arith.constant dense<0.000000e+00> : vector<8xf32>
    %107 = vector.multi_reduction <add>, %106, %cst_127 [1] : vector<8x256xf32> to vector<8xf32>
    %108 = vector.shape_cast %107 : vector<8xf32> to vector<8x1xf32>
    %cst_128 = arith.constant 2.560000e+02 : f32
    %109 = vector.broadcast %cst_128 : f32 to vector<8x1xf32>
    %110 = arith.divf %108, %109 : vector<8x1xf32>
    %111 = arith.mulf %106, %106 : vector<8x256xf32>
    %cst_129 = arith.constant dense<0.000000e+00> : vector<8xf32>
    %112 = vector.multi_reduction <add>, %111, %cst_129 [1] : vector<8x256xf32> to vector<8xf32>
    %113 = vector.shape_cast %112 : vector<8xf32> to vector<8x1xf32>
    %cst_130 = arith.constant 2.560000e+02 : f32
    %114 = vector.broadcast %cst_130 : f32 to vector<8x1xf32>
    %115 = arith.divf %113, %114 : vector<8x1xf32>
    %116 = arith.mulf %110, %110 : vector<8x1xf32>
    %117 = arith.subf %115, %116 : vector<8x1xf32>
    %cst_131 = arith.constant 0.000000e+00 : f32
    %118 = vector.broadcast %cst_131 : f32 to vector<8x1xf32>
    %119 = arith.maximumf %117, %118 : vector<8x1xf32>
    %120 = vector.broadcast %110 : vector<8x1xf32> to vector<8x256xf32>
    %121 = arith.subf %106, %120 : vector<8x256xf32>
    %cst_132 = arith.constant 9.99999974E-6 : f32
    %122 = vector.broadcast %cst_132 : f32 to vector<8x1xf32>
    %123 = arith.addf %119, %122 : vector<8x1xf32>
    %124 = math.rsqrt %123 : vector<8x1xf32>
    %125 = vector.broadcast %124 : vector<8x1xf32> to vector<8x256xf32>
    %126 = arith.mulf %121, %125 : vector<8x256xf32>
    %cst_133 = arith.constant 0.000000e+00 : f32
    %127 = vector.broadcast %cst_133 : f32 to vector<8x256xf32>
    %128 = arith.maximumf %126, %127 : vector<8x256xf32>
    %129 = arith.truncf %128 : vector<8x256xf32> to vector<8x256xbf16>
    %c0_134 = arith.constant 0 : index
    %c0_135 = arith.constant 0 : index
    %130 = vector.load %arg16[%c0_134, %c0_135] : memref<256x324xbf16, #tpu.memory_space<vmem>>, vector<256x324xbf16>
    %cst_136 = arith.constant dense<0.000000e+00> : vector<8x324xf32>
    %131 = tpu.matmul %129, %130, %cst_136 {dimension_numbers = #tpu.dot_dimension_numbers<[1], [0], [0], [1], [0, 0, 1, 1], [], []>} : vector<8x256xbf16>, vector<256x324xbf16>, vector<8x324xf32> -> vector<8x324xf32>
    %132 = arith.truncf %131 : vector<8x324xf32> to vector<8x324xbf16>
    %c0_137 = arith.constant 0 : index
    %c0_138 = arith.constant 0 : index
    %133 = vector.load %arg24[%c0_137, %c0_138] : memref<32x484xbf16, #tpu.memory_space<vmem>>, vector<8x324xbf16>
    tpu.vector_store %arg24[%c0_137, %c0_138], %132 {strides = array<i32>} : memref<32x484xbf16, #tpu.memory_space<vmem>>, vector<8x324xbf16>,
    %c0_139 = arith.constant 0 : index
    %c0_140 = arith.constant 0 : index
    %134 = vector.load %arg24[%c0_139, %c0_140] : memref<32x484xbf16, #tpu.memory_space<vmem>>, vector<8x267xbf16>
    %c0_141 = arith.constant 0 : index
    %c0_142 = arith.constant 0 : index
    %135 = vector.load %arg23[%c0_141, %c0_142] : memref<288x346xbf16, #tpu.memory_space<vmem>>, vector<8x267xbf16>
    tpu.vector_store %arg23[%c0_141, %c0_142], %134 {strides = array<i32>} : memref<288x346xbf16, #tpu.memory_space<vmem>>, vector<8x267xbf16>,
    %c0_143 = arith.constant 0 : index
    %c1_144 = arith.constant 1 : index
    %136 = vector.load %arg24[%c0_143, %c1_144] : memref<32x484xbf16, #tpu.memory_space<vmem>>, vector<8x267xbf16>
    %c8 = arith.constant 8 : index
    %c0_145 = arith.constant 0 : index
    %137 = vector.load %arg23[%c8, %c0_145] : memref<288x346xbf16, #tpu.memory_space<vmem>>, vector<8x267xbf16>
    tpu.vector_store %arg23[%c8, %c0_145], %136 {strides = array<i32>} : memref<288x346xbf16, #tpu.memory_space<vmem>>, vector<8x267xbf16>,
    %c0_146 = arith.constant 0 : index
    %c2_147 = arith.constant 2 : index
    %138 = vector.load %arg24[%c0_146, %c2_147] : memref<32x484xbf16, #tpu.memory_space<vmem>>, vector<8x267xbf16>
    %c16 = arith.constant 16 : index
    %c0_148 = arith.constant 0 : index
    %139 = vector.load %arg23[%c16, %c0_148] : memref<288x346xbf16, #tpu.memory_space<vmem>>, vector<8x267xbf16>
    tpu.vector_store %arg23[%c16, %c0_148], %138 {strides = array<i32>} : memref<288x346xbf16, #tpu.memory_space<vmem>>, vector<8x267xbf16>,
    %c0_149 = arith.constant 0 : index
    %c3_150 = arith.constant 3 : index
    %140 = vector.load %arg24[%c0_149, %c3_150] : memref<32x484xbf16, #tpu.memory_space<vmem>>, vector<8x267xbf16>
    %c24_151 = arith.constant 24 : index
    %c0_152 = arith.constant 0 : index
    %141 = vector.load %arg23[%c24_151, %c0_152] : memref<288x346xbf16, #tpu.memory_space<vmem>>, vector<8x267xbf16>
    tpu.vector_store %arg23[%c24_151, %c0_152], %140 {strides = array<i32>} : memref<288x346xbf16, #tpu.memory_space<vmem>>, vector<8x267xbf16>,
    %c0_153 = arith.constant 0 : index
    %c18_154 = arith.constant 18 : index
    %142 = vector.load %arg24[%c0_153, %c18_154] : memref<32x484xbf16, #tpu.memory_space<vmem>>, vector<8x267xbf16>
    %c32 = arith.constant 32 : index
    %c0_155 = arith.constant 0 : index
    %143 = vector.load %arg23[%c32, %c0_155] : memref<288x346xbf16, #tpu.memory_space<vmem>>, vector<8x267xbf16>
    tpu.vector_store %arg23[%c32, %c0_155], %142 {strides = array<i32>} : memref<288x346xbf16, #tpu.memory_space<vmem>>, vector<8x267xbf16>,
    %c0_156 = arith.constant 0 : index
    %c19 = arith.constant 19 : index
    %144 = vector.load %arg24[%c0_156, %c19] : memref<32x484xbf16, #tpu.memory_space<vmem>>, vector<8x267xbf16>
    %c40 = arith.constant 40 : index
    %c0_157 = arith.constant 0 : index
    %145 = vector.load %arg23[%c40, %c0_157] : memref<288x346xbf16, #tpu.memory_space<vmem>>, vector<8x267xbf16>
    tpu.vector_store %arg23[%c40, %c0_157], %144 {strides = array<i32>} : memref<288x346xbf16, #tpu.memory_space<vmem>>, vector<8x267xbf16>,
    %c0_158 = arith.constant 0 : index
    %c20 = arith.constant 20 : index
    %146 = vector.load %arg24[%c0_158, %c20] : memref<32x484xbf16, #tpu.memory_space<vmem>>, vector<8x267xbf16>
    %c48_159 = arith.constant 48 : index
    %c0_160 = arith.constant 0 : index
    %147 = vector.load %arg23[%c48_159, %c0_160] : memref<288x346xbf16, #tpu.memory_space<vmem>>, vector<8x267xbf16>
    tpu.vector_store %arg23[%c48_159, %c0_160], %146 {strides = array<i32>} : memref<288x346xbf16, #tpu.memory_space<vmem>>, vector<8x267xbf16>,
    %c0_161 = arith.constant 0 : index
    %c21_162 = arith.constant 21 : index
    %148 = vector.load %arg24[%c0_161, %c21_162] : memref<32x484xbf16, #tpu.memory_space<vmem>>, vector<8x267xbf16>
    %c56 = arith.constant 56 : index
    %c0_163 = arith.constant 0 : index
    %149 = vector.load %arg23[%c56, %c0_163] : memref<288x346xbf16, #tpu.memory_space<vmem>>, vector<8x267xbf16>
    tpu.vector_store %arg23[%c56, %c0_163], %148 {strides = array<i32>} : memref<288x346xbf16, #tpu.memory_space<vmem>>, vector<8x267xbf16>,
    %c0_164 = arith.constant 0 : index
    %c36_165 = arith.constant 36 : index
    %150 = vector.load %arg24[%c0_164, %c36_165] : memref<32x484xbf16, #tpu.memory_space<vmem>>, vector<8x267xbf16>
    %c64 = arith.constant 64 : index
    %c0_166 = arith.constant 0 : index
    %151 = vector.load %arg23[%c64, %c0_166] : memref<288x346xbf16, #tpu.memory_space<vmem>>, vector<8x267xbf16>
    tpu.vector_store %arg23[%c64, %c0_166], %150 {strides = array<i32>} : memref<288x346xbf16, #tpu.memory_space<vmem>>, vector<8x267xbf16>,
    %c0_167 = arith.constant 0 : index
    %c37 = arith.constant 37 : index
    %152 = vector.load %arg24[%c0_167, %c37] : memref<32x484xbf16, #tpu.memory_space<vmem>>, vector<8x267xbf16>
    %c72_168 = arith.constant 72 : index
    %c0_169 = arith.constant 0 : index
    %153 = vector.load %arg23[%c72_168, %c0_169] : memref<288x346xbf16, #tpu.memory_space<vmem>>, vector<8x267xbf16>
    tpu.vector_store %arg23[%c72_168, %c0_169], %152 {strides = array<i32>} : memref<288x346xbf16, #tpu.memory_space<vmem>>, vector<8x267xbf16>,
    %c0_170 = arith.constant 0 : index
    %c38 = arith.constant 38 : index
    %154 = vector.load %arg24[%c0_170, %c38] : memref<32x484xbf16, #tpu.memory_space<vmem>>, vector<8x267xbf16>
    %c80 = arith.constant 80 : index
    %c0_171 = arith.constant 0 : index
    %155 = vector.load %arg23[%c80, %c0_171] : memref<288x346xbf16, #tpu.memory_space<vmem>>, vector<8x267xbf16>
    tpu.vector_store %arg23[%c80, %c0_171], %154 {strides = array<i32>} : memref<288x346xbf16, #tpu.memory_space<vmem>>, vector<8x267xbf16>,
    %c0_172 = arith.constant 0 : index
    %c39_173 = arith.constant 39 : index
    %156 = vector.load %arg24[%c0_172, %c39_173] : memref<32x484xbf16, #tpu.memory_space<vmem>>, vector<8x267xbf16>
    %c88_174 = arith.constant 88 : index
    %c0_175 = arith.constant 0 : index
    %157 = vector.load %arg23[%c88_174, %c0_175] : memref<288x346xbf16, #tpu.memory_space<vmem>>, vector<8x267xbf16>
    tpu.vector_store %arg23[%c88_174, %c0_175], %156 {strides = array<i32>} : memref<288x346xbf16, #tpu.memory_space<vmem>>, vector<8x267xbf16>,
    %c0_176 = arith.constant 0 : index
    %c54_177 = arith.constant 54 : index
    %158 = vector.load %arg24[%c0_176, %c54_177] : memref<32x484xbf16, #tpu.memory_space<vmem>>, vector<8x267xbf16>
    %c96_178 = arith.constant 96 : index
    %c0_179 = arith.constant 0 : index
    %159 = vector.load %arg23[%c96_178, %c0_179] : memref<288x346xbf16, #tpu.memory_space<vmem>>, vector<8x267xbf16>
    tpu.vector_store %arg23[%c96_178, %c0_179], %158 {strides = array<i32>} : memref<288x346xbf16, #tpu.memory_space<vmem>>, vector<8x267xbf16>,
    %c0_180 = arith.constant 0 : index
    %c55 = arith.constant 55 : index
    %160 = vector.load %arg24[%c0_180, %c55] : memref<32x484xbf16, #tpu.memory_space<vmem>>, vector<8x267xbf16>
    %c104 = arith.constant 104 : index
    %c0_181 = arith.constant 0 : index
    %161 = vector.load %arg23[%c104, %c0_181] : memref<288x346xbf16, #tpu.memory_space<vmem>>, vector<8x267xbf16>
    tpu.vector_store %arg23[%c104, %c0_181], %160 {strides = array<i32>} : memref<288x346xbf16, #tpu.memory_space<vmem>>, vector<8x267xbf16>,
    %c0_182 = arith.constant 0 : index
    %c56_183 = arith.constant 56 : index
    %162 = vector.load %arg24[%c0_182, %c56_183] : memref<32x484xbf16, #tpu.memory_space<vmem>>, vector<8x267xbf16>
    %c112_184 = arith.constant 112 : index
    %c0_185 = arith.constant 0 : index
    %163 = vector.load %arg23[%c112_184, %c0_185] : memref<288x346xbf16, #tpu.memory_space<vmem>>, vector<8x267xbf16>
    tpu.vector_store %arg23[%c112_184, %c0_185], %162 {strides = array<i32>} : memref<288x346xbf16, #tpu.memory_space<vmem>>, vector<8x267xbf16>,
    %c0_186 = arith.constant 0 : index
    %c57_187 = arith.constant 57 : index
    %164 = vector.load %arg24[%c0_186, %c57_187] : memref<32x484xbf16, #tpu.memory_space<vmem>>, vector<8x267xbf16>
    %c120_188 = arith.constant 120 : index
    %c0_189 = arith.constant 0 : index
    %165 = vector.load %arg23[%c120_188, %c0_189] : memref<288x346xbf16, #tpu.memory_space<vmem>>, vector<8x267xbf16>
    tpu.vector_store %arg23[%c120_188, %c0_189], %164 {strides = array<i32>} : memref<288x346xbf16, #tpu.memory_space<vmem>>, vector<8x267xbf16>,
    %c0_190 = arith.constant 0 : index
    %c0_191 = arith.constant 0 : index
    %166 = vector.load %arg23[%c0_190, %c0_191] : memref<288x346xbf16, #tpu.memory_space<vmem>>, vector<128x267xbf16>
    %c0_192 = arith.constant 0 : index
    %c0_193 = arith.constant 0 : index
    %167 = vector.load %arg10[%c0_192, %c0_193] : memref<267x64xbf16, #tpu.memory_space<vmem>>, vector<267x64xbf16>
    %cst_194 = arith.constant dense<0.000000e+00> : vector<128x64xf32>
    %168 = tpu.matmul %166, %167, %cst_194 {dimension_numbers = #tpu.dot_dimension_numbers<[1], [0], [0], [1], [0, 0, 1, 1], [], []>} : vector<128x267xbf16>, vector<267x64xbf16>, vector<128x64xf32> -> vector<128x64xf32>
    %169 = arith.truncf %168 : vector<128x64xf32> to vector<128x64xbf16>
    %c0_195 = arith.constant 0 : index
    %c0_196 = arith.constant 0 : index
    %170 = vector.load %arg3[%c0_195, %c0_196] : memref<16x128xbf16, #tpu.memory_space<vmem>>, vector<16x128xbf16>
    %cst_197 = arith.constant dense<0.000000e+00> : vector<16x64xf32>
    %171 = tpu.matmul %170, %169, %cst_197 {dimension_numbers = #tpu.dot_dimension_numbers<[1], [0], [0], [1], [0, 0, 1, 1], [], []>} : vector<16x128xbf16>, vector<128x64xbf16>, vector<16x64xf32> -> vector<16x64xf32>
    %cst_198 = arith.constant dense<0.000000e+00> : vector<16xf32>
    %172 = vector.multi_reduction <add>, %171, %cst_198 [1] : vector<16x64xf32> to vector<16xf32>
    %173 = vector.shape_cast %172 : vector<16xf32> to vector<16x1xf32>
    %cst_199 = arith.constant 6.400000e+01 : f32
    %174 = vector.broadcast %cst_199 : f32 to vector<16x1xf32>
    %175 = arith.divf %173, %174 : vector<16x1xf32>
    %176 = arith.mulf %171, %171 : vector<16x64xf32>
    %cst_200 = arith.constant dense<0.000000e+00> : vector<16xf32>
    %177 = vector.multi_reduction <add>, %176, %cst_200 [1] : vector<16x64xf32> to vector<16xf32>
    %178 = vector.shape_cast %177 : vector<16xf32> to vector<16x1xf32>
    %cst_201 = arith.constant 6.400000e+01 : f32
    %179 = vector.broadcast %cst_201 : f32 to vector<16x1xf32>
    %180 = arith.divf %178, %179 : vector<16x1xf32>
    %181 = arith.mulf %175, %175 : vector<16x1xf32>
    %182 = arith.subf %180, %181 : vector<16x1xf32>
    %cst_202 = arith.constant 0.000000e+00 : f32
    %183 = vector.broadcast %cst_202 : f32 to vector<16x1xf32>
    %184 = arith.maximumf %182, %183 : vector<16x1xf32>
    %185 = vector.broadcast %175 : vector<16x1xf32> to vector<16x64xf32>
    %186 = arith.subf %171, %185 : vector<16x64xf32>
    %cst_203 = arith.constant 9.99999974E-6 : f32
    %187 = vector.broadcast %cst_203 : f32 to vector<16x1xf32>
    %188 = arith.addf %184, %187 : vector<16x1xf32>
    %189 = math.rsqrt %188 : vector<16x1xf32>
    %190 = vector.broadcast %189 : vector<16x1xf32> to vector<16x64xf32>
    %191 = arith.mulf %186, %190 : vector<16x64xf32>
    %cst_204 = arith.constant 0.000000e+00 : f32
    %192 = vector.broadcast %cst_204 : f32 to vector<16x64xf32>
    %193 = arith.maximumf %191, %192 : vector<16x64xf32>
    %194 = arith.truncf %193 : vector<16x64xf32> to vector<16x64xbf16>
    %c0_205 = arith.constant 0 : index
    %c0_206 = arith.constant 0 : index
    %195 = vector.load %arg17[%c0_205, %c0_206] : memref<64x100xbf16, #tpu.memory_space<vmem>>, vector<64x100xbf16>
    %cst_207 = arith.constant dense<0.000000e+00> : vector<16x100xf32>
    %196 = tpu.matmul %194, %195, %cst_207 {dimension_numbers = #tpu.dot_dimension_numbers<[1], [0], [0], [1], [0, 0, 1, 1], [], []>} : vector<16x64xbf16>, vector<64x100xbf16>, vector<16x100xf32> -> vector<16x100xf32>
    %197 = arith.truncf %196 : vector<16x100xf32> to vector<16x100xbf16>
    %c0_208 = arith.constant 0 : index
    %c0_209 = arith.constant 0 : index
    %198 = vector.load %arg24[%c0_208, %c0_209] : memref<32x484xbf16, #tpu.memory_space<vmem>>, vector<16x100xbf16>
    tpu.vector_store %arg24[%c0_208, %c0_209], %197 {strides = array<i32>} : memref<32x484xbf16, #tpu.memory_space<vmem>>, vector<16x100xbf16>,
    %c0_210 = arith.constant 0 : index
    %c0_211 = arith.constant 0 : index
    %199 = vector.load %arg24[%c0_210, %c0_211] : memref<32x484xbf16, #tpu.memory_space<vmem>>, vector<16x67xbf16>
    %c0_212 = arith.constant 0 : index
    %c0_213 = arith.constant 0 : index
    %200 = vector.load %arg23[%c0_212, %c0_213] : memref<288x346xbf16, #tpu.memory_space<vmem>>, vector<16x67xbf16>
    tpu.vector_store %arg23[%c0_212, %c0_213], %199 {strides = array<i32>} : memref<288x346xbf16, #tpu.memory_space<vmem>>, vector<16x67xbf16>,
    %c0_214 = arith.constant 0 : index
    %c1_215 = arith.constant 1 : index
    %201 = vector.load %arg24[%c0_214, %c1_215] : memref<32x484xbf16, #tpu.memory_space<vmem>>, vector<16x67xbf16>
    %c16_216 = arith.constant 16 : index
    %c0_217 = arith.constant 0 : index
    %202 = vector.load %arg23[%c16_216, %c0_217] : memref<288x346xbf16, #tpu.memory_space<vmem>>, vector<16x67xbf16>
    tpu.vector_store %arg23[%c16_216, %c0_217], %201 {strides = array<i32>} : memref<288x346xbf16, #tpu.memory_space<vmem>>, vector<16x67xbf16>,
    %c0_218 = arith.constant 0 : index
    %c2_219 = arith.constant 2 : index
    %203 = vector.load %arg24[%c0_218, %c2_219] : memref<32x484xbf16, #tpu.memory_space<vmem>>, vector<16x67xbf16>
    %c32_220 = arith.constant 32 : index
    %c0_221 = arith.constant 0 : index
    %204 = vector.load %arg23[%c32_220, %c0_221] : memref<288x346xbf16, #tpu.memory_space<vmem>>, vector<16x67xbf16>
    tpu.vector_store %arg23[%c32_220, %c0_221], %203 {strides = array<i32>} : memref<288x346xbf16, #tpu.memory_space<vmem>>, vector<16x67xbf16>,
    %c0_222 = arith.constant 0 : index
    %c3_223 = arith.constant 3 : index
    %205 = vector.load %arg24[%c0_222, %c3_223] : memref<32x484xbf16, #tpu.memory_space<vmem>>, vector<16x67xbf16>
    %c48_224 = arith.constant 48 : index
    %c0_225 = arith.constant 0 : index
    %206 = vector.load %arg23[%c48_224, %c0_225] : memref<288x346xbf16, #tpu.memory_space<vmem>>, vector<16x67xbf16>
    tpu.vector_store %arg23[%c48_224, %c0_225], %205 {strides = array<i32>} : memref<288x346xbf16, #tpu.memory_space<vmem>>, vector<16x67xbf16>,
    %c0_226 = arith.constant 0 : index
    %c10 = arith.constant 10 : index
    %207 = vector.load %arg24[%c0_226, %c10] : memref<32x484xbf16, #tpu.memory_space<vmem>>, vector<16x67xbf16>
    %c64_227 = arith.constant 64 : index
    %c0_228 = arith.constant 0 : index
    %208 = vector.load %arg23[%c64_227, %c0_228] : memref<288x346xbf16, #tpu.memory_space<vmem>>, vector<16x67xbf16>
    tpu.vector_store %arg23[%c64_227, %c0_228], %207 {strides = array<i32>} : memref<288x346xbf16, #tpu.memory_space<vmem>>, vector<16x67xbf16>,
    %c0_229 = arith.constant 0 : index
    %c11 = arith.constant 11 : index
    %209 = vector.load %arg24[%c0_229, %c11] : memref<32x484xbf16, #tpu.memory_space<vmem>>, vector<16x67xbf16>
    %c80_230 = arith.constant 80 : index
    %c0_231 = arith.constant 0 : index
    %210 = vector.load %arg23[%c80_230, %c0_231] : memref<288x346xbf16, #tpu.memory_space<vmem>>, vector<16x67xbf16>
    tpu.vector_store %arg23[%c80_230, %c0_231], %209 {strides = array<i32>} : memref<288x346xbf16, #tpu.memory_space<vmem>>, vector<16x67xbf16>,
    %c0_232 = arith.constant 0 : index
    %c12_233 = arith.constant 12 : index
    %211 = vector.load %arg24[%c0_232, %c12_233] : memref<32x484xbf16, #tpu.memory_space<vmem>>, vector<16x67xbf16>
    %c96_234 = arith.constant 96 : index
    %c0_235 = arith.constant 0 : index
    %212 = vector.load %arg23[%c96_234, %c0_235] : memref<288x346xbf16, #tpu.memory_space<vmem>>, vector<16x67xbf16>
    tpu.vector_store %arg23[%c96_234, %c0_235], %211 {strides = array<i32>} : memref<288x346xbf16, #tpu.memory_space<vmem>>, vector<16x67xbf16>,
    %c0_236 = arith.constant 0 : index
    %c13 = arith.constant 13 : index
    %213 = vector.load %arg24[%c0_236, %c13] : memref<32x484xbf16, #tpu.memory_space<vmem>>, vector<16x67xbf16>
    %c112_237 = arith.constant 112 : index
    %c0_238 = arith.constant 0 : index
    %214 = vector.load %arg23[%c112_237, %c0_238] : memref<288x346xbf16, #tpu.memory_space<vmem>>, vector<16x67xbf16>
    tpu.vector_store %arg23[%c112_237, %c0_238], %213 {strides = array<i32>} : memref<288x346xbf16, #tpu.memory_space<vmem>>, vector<16x67xbf16>,
    %c0_239 = arith.constant 0 : index
    %c20_240 = arith.constant 20 : index
    %215 = vector.load %arg24[%c0_239, %c20_240] : memref<32x484xbf16, #tpu.memory_space<vmem>>, vector<16x67xbf16>
    %c128 = arith.constant 128 : index
    %c0_241 = arith.constant 0 : index
    %216 = vector.load %arg23[%c128, %c0_241] : memref<288x346xbf16, #tpu.memory_space<vmem>>, vector<16x67xbf16>
    tpu.vector_store %arg23[%c128, %c0_241], %215 {strides = array<i32>} : memref<288x346xbf16, #tpu.memory_space<vmem>>, vector<16x67xbf16>,
    %c0_242 = arith.constant 0 : index
    %c21_243 = arith.constant 21 : index
    %217 = vector.load %arg24[%c0_242, %c21_243] : memref<32x484xbf16, #tpu.memory_space<vmem>>, vector<16x67xbf16>
    %c144_244 = arith.constant 144 : index
    %c0_245 = arith.constant 0 : index
    %218 = vector.load %arg23[%c144_244, %c0_245] : memref<288x346xbf16, #tpu.memory_space<vmem>>, vector<16x67xbf16>
    tpu.vector_store %arg23[%c144_244, %c0_245], %217 {strides = array<i32>} : memref<288x346xbf16, #tpu.memory_space<vmem>>, vector<16x67xbf16>,
    %c0_246 = arith.constant 0 : index
    %c22_247 = arith.constant 22 : index
    %219 = vector.load %arg24[%c0_246, %c22_247] : memref<32x484xbf16, #tpu.memory_space<vmem>>, vector<16x67xbf16>
    %c160 = arith.constant 160 : index
    %c0_248 = arith.constant 0 : index
    %220 = vector.load %arg23[%c160, %c0_248] : memref<288x346xbf16, #tpu.memory_space<vmem>>, vector<16x67xbf16>
    tpu.vector_store %arg23[%c160, %c0_248], %219 {strides = array<i32>} : memref<288x346xbf16, #tpu.memory_space<vmem>>, vector<16x67xbf16>,
    %c0_249 = arith.constant 0 : index
    %c23_250 = arith.constant 23 : index
    %221 = vector.load %arg24[%c0_249, %c23_250] : memref<32x484xbf16, #tpu.memory_space<vmem>>, vector<16x67xbf16>
    %c176 = arith.constant 176 : index
    %c0_251 = arith.constant 0 : index
    %222 = vector.load %arg23[%c176, %c0_251] : memref<288x346xbf16, #tpu.memory_space<vmem>>, vector<16x67xbf16>
    tpu.vector_store %arg23[%c176, %c0_251], %221 {strides = array<i32>} : memref<288x346xbf16, #tpu.memory_space<vmem>>, vector<16x67xbf16>,
    %c0_252 = arith.constant 0 : index
    %c30_253 = arith.constant 30 : index
    %223 = vector.load %arg24[%c0_252, %c30_253] : memref<32x484xbf16, #tpu.memory_space<vmem>>, vector<16x67xbf16>
    %c192 = arith.constant 192 : index
    %c0_254 = arith.constant 0 : index
    %224 = vector.load %arg23[%c192, %c0_254] : memref<288x346xbf16, #tpu.memory_space<vmem>>, vector<16x67xbf16>
    tpu.vector_store %arg23[%c192, %c0_254], %223 {strides = array<i32>} : memref<288x346xbf16, #tpu.memory_space<vmem>>, vector<16x67xbf16>,
    %c0_255 = arith.constant 0 : index
    %c31 = arith.constant 31 : index
    %225 = vector.load %arg24[%c0_255, %c31] : memref<32x484xbf16, #tpu.memory_space<vmem>>, vector<16x67xbf16>
    %c208 = arith.constant 208 : index
    %c0_256 = arith.constant 0 : index
    %226 = vector.load %arg23[%c208, %c0_256] : memref<288x346xbf16, #tpu.memory_space<vmem>>, vector<16x67xbf16>
    tpu.vector_store %arg23[%c208, %c0_256], %225 {strides = array<i32>} : memref<288x346xbf16, #tpu.memory_space<vmem>>, vector<16x67xbf16>,
    %c0_257 = arith.constant 0 : index
    %c32_258 = arith.constant 32 : index
    %227 = vector.load %arg24[%c0_257, %c32_258] : memref<32x484xbf16, #tpu.memory_space<vmem>>, vector<16x67xbf16>
    %c224 = arith.constant 224 : index
    %c0_259 = arith.constant 0 : index
    %228 = vector.load %arg23[%c224, %c0_259] : memref<288x346xbf16, #tpu.memory_space<vmem>>, vector<16x67xbf16>
    tpu.vector_store %arg23[%c224, %c0_259], %227 {strides = array<i32>} : memref<288x346xbf16, #tpu.memory_space<vmem>>, vector<16x67xbf16>,
    %c0_260 = arith.constant 0 : index
    %c33_261 = arith.constant 33 : index
    %229 = vector.load %arg24[%c0_260, %c33_261] : memref<32x484xbf16, #tpu.memory_space<vmem>>, vector<16x67xbf16>
    %c240 = arith.constant 240 : index
    %c0_262 = arith.constant 0 : index
    %230 = vector.load %arg23[%c240, %c0_262] : memref<288x346xbf16, #tpu.memory_space<vmem>>, vector<16x67xbf16>
    tpu.vector_store %arg23[%c240, %c0_262], %229 {strides = array<i32>} : memref<288x346xbf16, #tpu.memory_space<vmem>>, vector<16x67xbf16>,
    %c0_263 = arith.constant 0 : index
    %c0_264 = arith.constant 0 : index
    %231 = vector.load %arg23[%c0_263, %c0_264] : memref<288x346xbf16, #tpu.memory_space<vmem>>, vector<256x67xbf16>
    %c0_265 = arith.constant 0 : index
    %c0_266 = arith.constant 0 : index
    %232 = vector.load %arg11[%c0_265, %c0_266] : memref<67x16xbf16, #tpu.memory_space<vmem>>, vector<67x16xbf16>
    %cst_267 = arith.constant dense<0.000000e+00> : vector<256x16xf32>
    %233 = tpu.matmul %231, %232, %cst_267 {dimension_numbers = #tpu.dot_dimension_numbers<[1], [0], [0], [1], [0, 0, 1, 1], [], []>} : vector<256x67xbf16>, vector<67x16xbf16>, vector<256x16xf32> -> vector<256x16xf32>
    %234 = arith.truncf %233 : vector<256x16xf32> to vector<256x16xbf16>
    %c0_268 = arith.constant 0 : index
    %c0_269 = arith.constant 0 : index
    %235 = vector.load %arg4[%c0_268, %c0_269] : memref<32x256xbf16, #tpu.memory_space<vmem>>, vector<32x256xbf16>
    %cst_270 = arith.constant dense<0.000000e+00> : vector<32x16xf32>
    %236 = tpu.matmul %235, %234, %cst_270 {dimension_numbers = #tpu.dot_dimension_numbers<[1], [0], [0], [1], [0, 0, 1, 1], [], []>} : vector<32x256xbf16>, vector<256x16xbf16>, vector<32x16xf32> -> vector<32x16xf32>
    %cst_271 = arith.constant dense<0.000000e+00> : vector<32xf32>
    %237 = vector.multi_reduction <add>, %236, %cst_271 [1] : vector<32x16xf32> to vector<32xf32>
    %238 = vector.shape_cast %237 : vector<32xf32> to vector<32x1xf32>
    %cst_272 = arith.constant 1.600000e+01 : f32
    %239 = vector.broadcast %cst_272 : f32 to vector<32x1xf32>
    %240 = arith.divf %238, %239 : vector<32x1xf32>
    %241 = arith.mulf %236, %236 : vector<32x16xf32>
    %cst_273 = arith.constant dense<0.000000e+00> : vector<32xf32>
    %242 = vector.multi_reduction <add>, %241, %cst_273 [1] : vector<32x16xf32> to vector<32xf32>
    %243 = vector.shape_cast %242 : vector<32xf32> to vector<32x1xf32>
    %cst_274 = arith.constant 1.600000e+01 : f32
    %244 = vector.broadcast %cst_274 : f32 to vector<32x1xf32>
    %245 = arith.divf %243, %244 : vector<32x1xf32>
    %246 = arith.mulf %240, %240 : vector<32x1xf32>
    %247 = arith.subf %245, %246 : vector<32x1xf32>
    %cst_275 = arith.constant 0.000000e+00 : f32
    %248 = vector.broadcast %cst_275 : f32 to vector<32x1xf32>
    %249 = arith.maximumf %247, %248 : vector<32x1xf32>
    %250 = vector.broadcast %240 : vector<32x1xf32> to vector<32x16xf32>
    %251 = arith.subf %236, %250 : vector<32x16xf32>
    %cst_276 = arith.constant 9.99999974E-6 : f32
    %252 = vector.broadcast %cst_276 : f32 to vector<32x1xf32>
    %253 = arith.addf %249, %252 : vector<32x1xf32>
    %254 = math.rsqrt %253 : vector<32x1xf32>
    %255 = vector.broadcast %254 : vector<32x1xf32> to vector<32x16xf32>
    %256 = arith.mulf %251, %255 : vector<32x16xf32>
    %cst_277 = arith.constant 0.000000e+00 : f32
    %257 = vector.broadcast %cst_277 : f32 to vector<32x16xf32>
    %258 = arith.maximumf %256, %257 : vector<32x16xf32>
    %259 = arith.truncf %258 : vector<32x16xf32> to vector<32x16xbf16>
    %c0_278 = arith.constant 0 : index
    %c0_279 = arith.constant 0 : index
    %260 = vector.load %arg18[%c0_278, %c0_279] : memref<16x36xbf16, #tpu.memory_space<vmem>>, vector<16x36xbf16>
    %cst_280 = arith.constant dense<0.000000e+00> : vector<32x36xf32>
    %261 = tpu.matmul %259, %260, %cst_280 {dimension_numbers = #tpu.dot_dimension_numbers<[1], [0], [0], [1], [0, 0, 1, 1], [], []>} : vector<32x16xbf16>, vector<16x36xbf16>, vector<32x36xf32> -> vector<32x36xf32>
    %262 = arith.truncf %261 : vector<32x36xf32> to vector<32x36xbf16>
    %c0_281 = arith.constant 0 : index
    %c0_282 = arith.constant 0 : index
    %263 = vector.load %arg24[%c0_281, %c0_282] : memref<32x484xbf16, #tpu.memory_space<vmem>>, vector<32x36xbf16>
    tpu.vector_store %arg24[%c0_281, %c0_282], %262 {strides = array<i32>} : memref<32x484xbf16, #tpu.memory_space<vmem>>, vector<32x36xbf16>,
    %c0_283 = arith.constant 0 : index
    %c0_284 = arith.constant 0 : index
    %264 = vector.load %arg24[%c0_283, %c0_284] : memref<32x484xbf16, #tpu.memory_space<vmem>>, vector<32x22xbf16>
    %c0_285 = arith.constant 0 : index
    %c0_286 = arith.constant 0 : index
    %265 = vector.load %arg23[%c0_285, %c0_286] : memref<288x346xbf16, #tpu.memory_space<vmem>>, vector<32x22xbf16>
    tpu.vector_store %arg23[%c0_285, %c0_286], %264 {strides = array<i32>} : memref<288x346xbf16, #tpu.memory_space<vmem>>, vector<32x22xbf16>,
    %c0_287 = arith.constant 0 : index
    %c1_288 = arith.constant 1 : index
    %266 = vector.load %arg24[%c0_287, %c1_288] : memref<32x484xbf16, #tpu.memory_space<vmem>>, vector<32x22xbf16>
    %c32_289 = arith.constant 32 : index
    %c0_290 = arith.constant 0 : index
    %267 = vector.load %arg23[%c32_289, %c0_290] : memref<288x346xbf16, #tpu.memory_space<vmem>>, vector<32x22xbf16>
    tpu.vector_store %arg23[%c32_289, %c0_290], %266 {strides = array<i32>} : memref<288x346xbf16, #tpu.memory_space<vmem>>, vector<32x22xbf16>,
    %c0_291 = arith.constant 0 : index
    %c2_292 = arith.constant 2 : index
    %268 = vector.load %arg24[%c0_291, %c2_292] : memref<32x484xbf16, #tpu.memory_space<vmem>>, vector<32x22xbf16>
    %c64_293 = arith.constant 64 : index
    %c0_294 = arith.constant 0 : index
    %269 = vector.load %arg23[%c64_293, %c0_294] : memref<288x346xbf16, #tpu.memory_space<vmem>>, vector<32x22xbf16>
    tpu.vector_store %arg23[%c64_293, %c0_294], %268 {strides = array<i32>} : memref<288x346xbf16, #tpu.memory_space<vmem>>, vector<32x22xbf16>,
    %c0_295 = arith.constant 0 : index
    %c6_296 = arith.constant 6 : index
    %270 = vector.load %arg24[%c0_295, %c6_296] : memref<32x484xbf16, #tpu.memory_space<vmem>>, vector<32x22xbf16>
    %c96_297 = arith.constant 96 : index
    %c0_298 = arith.constant 0 : index
    %271 = vector.load %arg23[%c96_297, %c0_298] : memref<288x346xbf16, #tpu.memory_space<vmem>>, vector<32x22xbf16>
    tpu.vector_store %arg23[%c96_297, %c0_298], %270 {strides = array<i32>} : memref<288x346xbf16, #tpu.memory_space<vmem>>, vector<32x22xbf16>,
    %c0_299 = arith.constant 0 : index
    %c7 = arith.constant 7 : index
    %272 = vector.load %arg24[%c0_299, %c7] : memref<32x484xbf16, #tpu.memory_space<vmem>>, vector<32x22xbf16>
    %c128_300 = arith.constant 128 : index
    %c0_301 = arith.constant 0 : index
    %273 = vector.load %arg23[%c128_300, %c0_301] : memref<288x346xbf16, #tpu.memory_space<vmem>>, vector<32x22xbf16>
    tpu.vector_store %arg23[%c128_300, %c0_301], %272 {strides = array<i32>} : memref<288x346xbf16, #tpu.memory_space<vmem>>, vector<32x22xbf16>,
    %c0_302 = arith.constant 0 : index
    %c8_303 = arith.constant 8 : index
    %274 = vector.load %arg24[%c0_302, %c8_303] : memref<32x484xbf16, #tpu.memory_space<vmem>>, vector<32x22xbf16>
    %c160_304 = arith.constant 160 : index
    %c0_305 = arith.constant 0 : index
    %275 = vector.load %arg23[%c160_304, %c0_305] : memref<288x346xbf16, #tpu.memory_space<vmem>>, vector<32x22xbf16>
    tpu.vector_store %arg23[%c160_304, %c0_305], %274 {strides = array<i32>} : memref<288x346xbf16, #tpu.memory_space<vmem>>, vector<32x22xbf16>,
    %c0_306 = arith.constant 0 : index
    %c12_307 = arith.constant 12 : index
    %276 = vector.load %arg24[%c0_306, %c12_307] : memref<32x484xbf16, #tpu.memory_space<vmem>>, vector<32x22xbf16>
    %c192_308 = arith.constant 192 : index
    %c0_309 = arith.constant 0 : index
    %277 = vector.load %arg23[%c192_308, %c0_309] : memref<288x346xbf16, #tpu.memory_space<vmem>>, vector<32x22xbf16>
    tpu.vector_store %arg23[%c192_308, %c0_309], %276 {strides = array<i32>} : memref<288x346xbf16, #tpu.memory_space<vmem>>, vector<32x22xbf16>,
    %c0_310 = arith.constant 0 : index
    %c13_311 = arith.constant 13 : index
    %278 = vector.load %arg24[%c0_310, %c13_311] : memref<32x484xbf16, #tpu.memory_space<vmem>>, vector<32x22xbf16>
    %c224_312 = arith.constant 224 : index
    %c0_313 = arith.constant 0 : index
    %279 = vector.load %arg23[%c224_312, %c0_313] : memref<288x346xbf16, #tpu.memory_space<vmem>>, vector<32x22xbf16>
    tpu.vector_store %arg23[%c224_312, %c0_313], %278 {strides = array<i32>} : memref<288x346xbf16, #tpu.memory_space<vmem>>, vector<32x22xbf16>,
    %c0_314 = arith.constant 0 : index
    %c14 = arith.constant 14 : index
    %280 = vector.load %arg24[%c0_314, %c14] : memref<32x484xbf16, #tpu.memory_space<vmem>>, vector<32x22xbf16>
    %c256 = arith.constant 256 : index
    %c0_315 = arith.constant 0 : index
    %281 = vector.load %arg23[%c256, %c0_315] : memref<288x346xbf16, #tpu.memory_space<vmem>>, vector<32x22xbf16>
    tpu.vector_store %arg23[%c256, %c0_315], %280 {strides = array<i32>} : memref<288x346xbf16, #tpu.memory_space<vmem>>, vector<32x22xbf16>,
    %c0_316 = arith.constant 0 : index
    %c0_317 = arith.constant 0 : index
    %282 = vector.load %arg23[%c0_316, %c0_317] : memref<288x346xbf16, #tpu.memory_space<vmem>>, vector<288x22xbf16>
    %c0_318 = arith.constant 0 : index
    %c0_319 = arith.constant 0 : index
    %283 = vector.load %arg12[%c0_318, %c0_319] : memref<22x16xbf16, #tpu.memory_space<vmem>>, vector<22x16xbf16>
    %cst_320 = arith.constant dense<0.000000e+00> : vector<288x16xf32>
    %284 = tpu.matmul %282, %283, %cst_320 {dimension_numbers = #tpu.dot_dimension_numbers<[1], [0], [0], [1], [0, 0, 1, 1], [], []>} : vector<288x22xbf16>, vector<22x16xbf16>, vector<288x16xf32> -> vector<288x16xf32>
    %285 = arith.truncf %284 : vector<288x16xf32> to vector<288x16xbf16>
    %c0_321 = arith.constant 0 : index
    %c0_322 = arith.constant 0 : index
    %286 = vector.load %arg5[%c0_321, %c0_322] : memref<32x288xbf16, #tpu.memory_space<vmem>>, vector<32x288xbf16>
    %cst_323 = arith.constant dense<0.000000e+00> : vector<32x16xf32>
    %287 = tpu.matmul %286, %285, %cst_323 {dimension_numbers = #tpu.dot_dimension_numbers<[1], [0], [0], [1], [0, 0, 1, 1], [], []>} : vector<32x288xbf16>, vector<288x16xbf16>, vector<32x16xf32> -> vector<32x16xf32>
    %cst_324 = arith.constant dense<0.000000e+00> : vector<32xf32>
    %288 = vector.multi_reduction <add>, %287, %cst_324 [1] : vector<32x16xf32> to vector<32xf32>
    %289 = vector.shape_cast %288 : vector<32xf32> to vector<32x1xf32>
    %cst_325 = arith.constant 1.600000e+01 : f32
    %290 = vector.broadcast %cst_325 : f32 to vector<32x1xf32>
    %291 = arith.divf %289, %290 : vector<32x1xf32>
    %292 = arith.mulf %287, %287 : vector<32x16xf32>
    %cst_326 = arith.constant dense<0.000000e+00> : vector<32xf32>
    %293 = vector.multi_reduction <add>, %292, %cst_326 [1] : vector<32x16xf32> to vector<32xf32>
    %294 = vector.shape_cast %293 : vector<32xf32> to vector<32x1xf32>
    %cst_327 = arith.constant 1.600000e+01 : f32
    %295 = vector.broadcast %cst_327 : f32 to vector<32x1xf32>
    %296 = arith.divf %294, %295 : vector<32x1xf32>
    %297 = arith.mulf %291, %291 : vector<32x1xf32>
    %298 = arith.subf %296, %297 : vector<32x1xf32>
    %cst_328 = arith.constant 0.000000e+00 : f32
    %299 = vector.broadcast %cst_328 : f32 to vector<32x1xf32>
    %300 = arith.maximumf %298, %299 : vector<32x1xf32>
    %301 = vector.broadcast %291 : vector<32x1xf32> to vector<32x16xf32>
    %302 = arith.subf %287, %301 : vector<32x16xf32>
    %cst_329 = arith.constant 9.99999974E-6 : f32
    %303 = vector.broadcast %cst_329 : f32 to vector<32x1xf32>
    %304 = arith.addf %300, %303 : vector<32x1xf32>
    %305 = math.rsqrt %304 : vector<32x1xf32>
    %306 = vector.broadcast %305 : vector<32x1xf32> to vector<32x16xf32>
    %307 = arith.mulf %302, %306 : vector<32x16xf32>
    %cst_330 = arith.constant 0.000000e+00 : f32
    %308 = vector.broadcast %cst_330 : f32 to vector<32x16xf32>
    %309 = arith.maximumf %307, %308 : vector<32x16xf32>
    %310 = arith.truncf %309 : vector<32x16xf32> to vector<32x16xbf16>
    %c0_331 = arith.constant 0 : index
    %c0_332 = arith.constant 0 : index
    %311 = vector.load %arg19[%c0_331, %c0_332] : memref<16x36xbf16, #tpu.memory_space<vmem>>, vector<16x36xbf16>
    %cst_333 = arith.constant dense<0.000000e+00> : vector<32x36xf32>
    %312 = tpu.matmul %310, %311, %cst_333 {dimension_numbers = #tpu.dot_dimension_numbers<[1], [0], [0], [1], [0, 0, 1, 1], [], []>} : vector<32x16xbf16>, vector<16x36xbf16>, vector<32x36xf32> -> vector<32x36xf32>
    %313 = arith.truncf %312 : vector<32x36xf32> to vector<32x36xbf16>
    %c0_334 = arith.constant 0 : index
    %c0_335 = arith.constant 0 : index
    %314 = vector.load %arg24[%c0_334, %c0_335] : memref<32x484xbf16, #tpu.memory_space<vmem>>, vector<32x36xbf16>
    tpu.vector_store %arg24[%c0_334, %c0_335], %313 {strides = array<i32>} : memref<32x484xbf16, #tpu.memory_space<vmem>>, vector<32x36xbf16>,
    %c0_336 = arith.constant 0 : index
    %c0_337 = arith.constant 0 : index
    %315 = vector.load %arg24[%c0_336, %c0_337] : memref<32x484xbf16, #tpu.memory_space<vmem>>, vector<32x22xbf16>
    %c0_338 = arith.constant 0 : index
    %c0_339 = arith.constant 0 : index
    %316 = vector.load %arg23[%c0_338, %c0_339] : memref<288x346xbf16, #tpu.memory_space<vmem>>, vector<32x22xbf16>
    tpu.vector_store %arg23[%c0_338, %c0_339], %315 {strides = array<i32>} : memref<288x346xbf16, #tpu.memory_space<vmem>>, vector<32x22xbf16>,
    %c0_340 = arith.constant 0 : index
    %c1_341 = arith.constant 1 : index
    %317 = vector.load %arg24[%c0_340, %c1_341] : memref<32x484xbf16, #tpu.memory_space<vmem>>, vector<32x22xbf16>
    %c32_342 = arith.constant 32 : index
    %c0_343 = arith.constant 0 : index
    %318 = vector.load %arg23[%c32_342, %c0_343] : memref<288x346xbf16, #tpu.memory_space<vmem>>, vector<32x22xbf16>
    tpu.vector_store %arg23[%c32_342, %c0_343], %317 {strides = array<i32>} : memref<288x346xbf16, #tpu.memory_space<vmem>>, vector<32x22xbf16>,
    %c0_344 = arith.constant 0 : index
    %c2_345 = arith.constant 2 : index
    %319 = vector.load %arg24[%c0_344, %c2_345] : memref<32x484xbf16, #tpu.memory_space<vmem>>, vector<32x22xbf16>
    %c64_346 = arith.constant 64 : index
    %c0_347 = arith.constant 0 : index
    %320 = vector.load %arg23[%c64_346, %c0_347] : memref<288x346xbf16, #tpu.memory_space<vmem>>, vector<32x22xbf16>
    tpu.vector_store %arg23[%c64_346, %c0_347], %319 {strides = array<i32>} : memref<288x346xbf16, #tpu.memory_space<vmem>>, vector<32x22xbf16>,
    %c0_348 = arith.constant 0 : index
    %c6_349 = arith.constant 6 : index
    %321 = vector.load %arg24[%c0_348, %c6_349] : memref<32x484xbf16, #tpu.memory_space<vmem>>, vector<32x22xbf16>
    %c96_350 = arith.constant 96 : index
    %c0_351 = arith.constant 0 : index
    %322 = vector.load %arg23[%c96_350, %c0_351] : memref<288x346xbf16, #tpu.memory_space<vmem>>, vector<32x22xbf16>
    tpu.vector_store %arg23[%c96_350, %c0_351], %321 {strides = array<i32>} : memref<288x346xbf16, #tpu.memory_space<vmem>>, vector<32x22xbf16>,
    %c0_352 = arith.constant 0 : index
    %c7_353 = arith.constant 7 : index
    %323 = vector.load %arg24[%c0_352, %c7_353] : memref<32x484xbf16, #tpu.memory_space<vmem>>, vector<32x22xbf16>
    %c128_354 = arith.constant 128 : index
    %c0_355 = arith.constant 0 : index
    %324 = vector.load %arg23[%c128_354, %c0_355] : memref<288x346xbf16, #tpu.memory_space<vmem>>, vector<32x22xbf16>
    tpu.vector_store %arg23[%c128_354, %c0_355], %323 {strides = array<i32>} : memref<288x346xbf16, #tpu.memory_space<vmem>>, vector<32x22xbf16>,
    %c0_356 = arith.constant 0 : index
    %c8_357 = arith.constant 8 : index
    %325 = vector.load %arg24[%c0_356, %c8_357] : memref<32x484xbf16, #tpu.memory_space<vmem>>, vector<32x22xbf16>
    %c160_358 = arith.constant 160 : index
    %c0_359 = arith.constant 0 : index
    %326 = vector.load %arg23[%c160_358, %c0_359] : memref<288x346xbf16, #tpu.memory_space<vmem>>, vector<32x22xbf16>
    tpu.vector_store %arg23[%c160_358, %c0_359], %325 {strides = array<i32>} : memref<288x346xbf16, #tpu.memory_space<vmem>>, vector<32x22xbf16>,
    %c0_360 = arith.constant 0 : index
    %c12_361 = arith.constant 12 : index
    %327 = vector.load %arg24[%c0_360, %c12_361] : memref<32x484xbf16, #tpu.memory_space<vmem>>, vector<32x22xbf16>
    %c192_362 = arith.constant 192 : index
    %c0_363 = arith.constant 0 : index
    %328 = vector.load %arg23[%c192_362, %c0_363] : memref<288x346xbf16, #tpu.memory_space<vmem>>, vector<32x22xbf16>
    tpu.vector_store %arg23[%c192_362, %c0_363], %327 {strides = array<i32>} : memref<288x346xbf16, #tpu.memory_space<vmem>>, vector<32x22xbf16>,
    %c0_364 = arith.constant 0 : index
    %c13_365 = arith.constant 13 : index
    %329 = vector.load %arg24[%c0_364, %c13_365] : memref<32x484xbf16, #tpu.memory_space<vmem>>, vector<32x22xbf16>
    %c224_366 = arith.constant 224 : index
    %c0_367 = arith.constant 0 : index
    %330 = vector.load %arg23[%c224_366, %c0_367] : memref<288x346xbf16, #tpu.memory_space<vmem>>, vector<32x22xbf16>
    tpu.vector_store %arg23[%c224_366, %c0_367], %329 {strides = array<i32>} : memref<288x346xbf16, #tpu.memory_space<vmem>>, vector<32x22xbf16>,
    %c0_368 = arith.constant 0 : index
    %c14_369 = arith.constant 14 : index
    %331 = vector.load %arg24[%c0_368, %c14_369] : memref<32x484xbf16, #tpu.memory_space<vmem>>, vector<32x22xbf16>
    %c256_370 = arith.constant 256 : index
    %c0_371 = arith.constant 0 : index
    %332 = vector.load %arg23[%c256_370, %c0_371] : memref<288x346xbf16, #tpu.memory_space<vmem>>, vector<32x22xbf16>
    tpu.vector_store %arg23[%c256_370, %c0_371], %331 {strides = array<i32>} : memref<288x346xbf16, #tpu.memory_space<vmem>>, vector<32x22xbf16>,
    %c0_372 = arith.constant 0 : index
    %c0_373 = arith.constant 0 : index
    %333 = vector.load %arg23[%c0_372, %c0_373] : memref<288x346xbf16, #tpu.memory_space<vmem>>, vector<288x22xbf16>
    %c0_374 = arith.constant 0 : index
    %c0_375 = arith.constant 0 : index
    %334 = vector.load %arg13[%c0_374, %c0_375] : memref<22x16xbf16, #tpu.memory_space<vmem>>, vector<22x16xbf16>
    %cst_376 = arith.constant dense<0.000000e+00> : vector<288x16xf32>
    %335 = tpu.matmul %333, %334, %cst_376 {dimension_numbers = #tpu.dot_dimension_numbers<[1], [0], [0], [1], [0, 0, 1, 1], [], []>} : vector<288x22xbf16>, vector<22x16xbf16>, vector<288x16xf32> -> vector<288x16xf32>
    %336 = arith.truncf %335 : vector<288x16xf32> to vector<288x16xbf16>
    %c0_377 = arith.constant 0 : index
    %c0_378 = arith.constant 0 : index
    %337 = vector.load %arg6[%c0_377, %c0_378] : memref<32x288xbf16, #tpu.memory_space<vmem>>, vector<32x288xbf16>
    %cst_379 = arith.constant dense<0.000000e+00> : vector<32x16xf32>
    %338 = tpu.matmul %337, %336, %cst_379 {dimension_numbers = #tpu.dot_dimension_numbers<[1], [0], [0], [1], [0, 0, 1, 1], [], []>} : vector<32x288xbf16>, vector<288x16xbf16>, vector<32x16xf32> -> vector<32x16xf32>
    %cst_380 = arith.constant dense<0.000000e+00> : vector<32xf32>
    %339 = vector.multi_reduction <add>, %338, %cst_380 [1] : vector<32x16xf32> to vector<32xf32>
    %340 = vector.shape_cast %339 : vector<32xf32> to vector<32x1xf32>
    %cst_381 = arith.constant 1.600000e+01 : f32
    %341 = vector.broadcast %cst_381 : f32 to vector<32x1xf32>
    %342 = arith.divf %340, %341 : vector<32x1xf32>
    %343 = arith.mulf %338, %338 : vector<32x16xf32>
    %cst_382 = arith.constant dense<0.000000e+00> : vector<32xf32>
    %344 = vector.multi_reduction <add>, %343, %cst_382 [1] : vector<32x16xf32> to vector<32xf32>
    %345 = vector.shape_cast %344 : vector<32xf32> to vector<32x1xf32>
    %cst_383 = arith.constant 1.600000e+01 : f32
    %346 = vector.broadcast %cst_383 : f32 to vector<32x1xf32>
    %347 = arith.divf %345, %346 : vector<32x1xf32>
    %348 = arith.mulf %342, %342 : vector<32x1xf32>
    %349 = arith.subf %347, %348 : vector<32x1xf32>
    %cst_384 = arith.constant 0.000000e+00 : f32
    %350 = vector.broadcast %cst_384 : f32 to vector<32x1xf32>
    %351 = arith.maximumf %349, %350 : vector<32x1xf32>
    %352 = vector.broadcast %342 : vector<32x1xf32> to vector<32x16xf32>
    %353 = arith.subf %338, %352 : vector<32x16xf32>
    %cst_385 = arith.constant 9.99999974E-6 : f32
    %354 = vector.broadcast %cst_385 : f32 to vector<32x1xf32>
    %355 = arith.addf %351, %354 : vector<32x1xf32>
    %356 = math.rsqrt %355 : vector<32x1xf32>
    %357 = vector.broadcast %356 : vector<32x1xf32> to vector<32x16xf32>
    %358 = arith.mulf %353, %357 : vector<32x16xf32>
    %359 = arith.addf %358, %258 : vector<32x16xf32>
    %360 = arith.truncf %359 : vector<32x16xf32> to vector<32x16xbf16>
    %c0_386 = arith.constant 0 : index
    %c0_387 = arith.constant 0 : index
    %361 = vector.load %arg20[%c0_386, %c0_387] : memref<16x36xbf16, #tpu.memory_space<vmem>>, vector<16x36xbf16>
    %cst_388 = arith.constant dense<0.000000e+00> : vector<32x36xf32>
    %362 = tpu.matmul %360, %361, %cst_388 {dimension_numbers = #tpu.dot_dimension_numbers<[1], [0], [0], [1], [0, 0, 1, 1], [], []>} : vector<32x16xbf16>, vector<16x36xbf16>, vector<32x36xf32> -> vector<32x36xf32>
    %363 = arith.truncf %362 : vector<32x36xf32> to vector<32x36xbf16>
    %c0_389 = arith.constant 0 : index
    %c0_390 = arith.constant 0 : index
    %364 = vector.load %arg24[%c0_389, %c0_390] : memref<32x484xbf16, #tpu.memory_space<vmem>>, vector<32x36xbf16>
    tpu.vector_store %arg24[%c0_389, %c0_390], %363 {strides = array<i32>} : memref<32x484xbf16, #tpu.memory_space<vmem>>, vector<32x36xbf16>,
    %c0_391 = arith.constant 0 : index
    %c0_392 = arith.constant 0 : index
    %365 = vector.load %arg24[%c0_391, %c0_392] : memref<32x484xbf16, #tpu.memory_space<vmem>>, vector<32x22xbf16>
    %c0_393 = arith.constant 0 : index
    %c0_394 = arith.constant 0 : index
    %366 = vector.load %arg23[%c0_393, %c0_394] : memref<288x346xbf16, #tpu.memory_space<vmem>>, vector<32x22xbf16>
    tpu.vector_store %arg23[%c0_393, %c0_394], %365 {strides = array<i32>} : memref<288x346xbf16, #tpu.memory_space<vmem>>, vector<32x22xbf16>,
    %c0_395 = arith.constant 0 : index
    %c1_396 = arith.constant 1 : index
    %367 = vector.load %arg24[%c0_395, %c1_396] : memref<32x484xbf16, #tpu.memory_space<vmem>>, vector<32x22xbf16>
    %c32_397 = arith.constant 32 : index
    %c0_398 = arith.constant 0 : index
    %368 = vector.load %arg23[%c32_397, %c0_398] : memref<288x346xbf16, #tpu.memory_space<vmem>>, vector<32x22xbf16>
    tpu.vector_store %arg23[%c32_397, %c0_398], %367 {strides = array<i32>} : memref<288x346xbf16, #tpu.memory_space<vmem>>, vector<32x22xbf16>,
    %c0_399 = arith.constant 0 : index
    %c2_400 = arith.constant 2 : index
    %369 = vector.load %arg24[%c0_399, %c2_400] : memref<32x484xbf16, #tpu.memory_space<vmem>>, vector<32x22xbf16>
    %c64_401 = arith.constant 64 : index
    %c0_402 = arith.constant 0 : index
    %370 = vector.load %arg23[%c64_401, %c0_402] : memref<288x346xbf16, #tpu.memory_space<vmem>>, vector<32x22xbf16>
    tpu.vector_store %arg23[%c64_401, %c0_402], %369 {strides = array<i32>} : memref<288x346xbf16, #tpu.memory_space<vmem>>, vector<32x22xbf16>,
    %c0_403 = arith.constant 0 : index
    %c6_404 = arith.constant 6 : index
    %371 = vector.load %arg24[%c0_403, %c6_404] : memref<32x484xbf16, #tpu.memory_space<vmem>>, vector<32x22xbf16>
    %c96_405 = arith.constant 96 : index
    %c0_406 = arith.constant 0 : index
    %372 = vector.load %arg23[%c96_405, %c0_406] : memref<288x346xbf16, #tpu.memory_space<vmem>>, vector<32x22xbf16>
    tpu.vector_store %arg23[%c96_405, %c0_406], %371 {strides = array<i32>} : memref<288x346xbf16, #tpu.memory_space<vmem>>, vector<32x22xbf16>,
    %c0_407 = arith.constant 0 : index
    %c7_408 = arith.constant 7 : index
    %373 = vector.load %arg24[%c0_407, %c7_408] : memref<32x484xbf16, #tpu.memory_space<vmem>>, vector<32x22xbf16>
    %c128_409 = arith.constant 128 : index
    %c0_410 = arith.constant 0 : index
    %374 = vector.load %arg23[%c128_409, %c0_410] : memref<288x346xbf16, #tpu.memory_space<vmem>>, vector<32x22xbf16>
    tpu.vector_store %arg23[%c128_409, %c0_410], %373 {strides = array<i32>} : memref<288x346xbf16, #tpu.memory_space<vmem>>, vector<32x22xbf16>,
    %c0_411 = arith.constant 0 : index
    %c8_412 = arith.constant 8 : index
    %375 = vector.load %arg24[%c0_411, %c8_412] : memref<32x484xbf16, #tpu.memory_space<vmem>>, vector<32x22xbf16>
    %c160_413 = arith.constant 160 : index
    %c0_414 = arith.constant 0 : index
    %376 = vector.load %arg23[%c160_413, %c0_414] : memref<288x346xbf16, #tpu.memory_space<vmem>>, vector<32x22xbf16>
    tpu.vector_store %arg23[%c160_413, %c0_414], %375 {strides = array<i32>} : memref<288x346xbf16, #tpu.memory_space<vmem>>, vector<32x22xbf16>,
    %c0_415 = arith.constant 0 : index
    %c12_416 = arith.constant 12 : index
    %377 = vector.load %arg24[%c0_415, %c12_416] : memref<32x484xbf16, #tpu.memory_space<vmem>>, vector<32x22xbf16>
    %c192_417 = arith.constant 192 : index
    %c0_418 = arith.constant 0 : index
    %378 = vector.load %arg23[%c192_417, %c0_418] : memref<288x346xbf16, #tpu.memory_space<vmem>>, vector<32x22xbf16>
    tpu.vector_store %arg23[%c192_417, %c0_418], %377 {strides = array<i32>} : memref<288x346xbf16, #tpu.memory_space<vmem>>, vector<32x22xbf16>,
    %c0_419 = arith.constant 0 : index
    %c13_420 = arith.constant 13 : index
    %379 = vector.load %arg24[%c0_419, %c13_420] : memref<32x484xbf16, #tpu.memory_space<vmem>>, vector<32x22xbf16>
    %c224_421 = arith.constant 224 : index
    %c0_422 = arith.constant 0 : index
    %380 = vector.load %arg23[%c224_421, %c0_422] : memref<288x346xbf16, #tpu.memory_space<vmem>>, vector<32x22xbf16>
    tpu.vector_store %arg23[%c224_421, %c0_422], %379 {strides = array<i32>} : memref<288x346xbf16, #tpu.memory_space<vmem>>, vector<32x22xbf16>,
    %c0_423 = arith.constant 0 : index
    %c14_424 = arith.constant 14 : index
    %381 = vector.load %arg24[%c0_423, %c14_424] : memref<32x484xbf16, #tpu.memory_space<vmem>>, vector<32x22xbf16>
    %c256_425 = arith.constant 256 : index
    %c0_426 = arith.constant 0 : index
    %382 = vector.load %arg23[%c256_425, %c0_426] : memref<288x346xbf16, #tpu.memory_space<vmem>>, vector<32x22xbf16>
    tpu.vector_store %arg23[%c256_425, %c0_426], %381 {strides = array<i32>} : memref<288x346xbf16, #tpu.memory_space<vmem>>, vector<32x22xbf16>,
    %c0_427 = arith.constant 0 : index
    %c0_428 = arith.constant 0 : index
    %383 = vector.load %arg23[%c0_427, %c0_428] : memref<288x346xbf16, #tpu.memory_space<vmem>>, vector<288x22xbf16>
    %c0_429 = arith.constant 0 : index
    %c0_430 = arith.constant 0 : index
    %384 = vector.load %arg14[%c0_429, %c0_430] : memref<22x16xbf16, #tpu.memory_space<vmem>>, vector<22x16xbf16>
    %cst_431 = arith.constant dense<0.000000e+00> : vector<288x16xf32>
    %385 = tpu.matmul %383, %384, %cst_431 {dimension_numbers = #tpu.dot_dimension_numbers<[1], [0], [0], [1], [0, 0, 1, 1], [], []>} : vector<288x22xbf16>, vector<22x16xbf16>, vector<288x16xf32> -> vector<288x16xf32>
    %386 = arith.truncf %385 : vector<288x16xf32> to vector<288x16xbf16>
    %c0_432 = arith.constant 0 : index
    %c0_433 = arith.constant 0 : index
    %387 = vector.load %arg7[%c0_432, %c0_433] : memref<32x288xbf16, #tpu.memory_space<vmem>>, vector<32x288xbf16>
    %cst_434 = arith.constant dense<0.000000e+00> : vector<32x16xf32>
    %388 = tpu.matmul %387, %386, %cst_434 {dimension_numbers = #tpu.dot_dimension_numbers<[1], [0], [0], [1], [0, 0, 1, 1], [], []>} : vector<32x288xbf16>, vector<288x16xbf16>, vector<32x16xf32> -> vector<32x16xf32>
    %cst_435 = arith.constant dense<0.000000e+00> : vector<32xf32>
    %389 = vector.multi_reduction <add>, %388, %cst_435 [1] : vector<32x16xf32> to vector<32xf32>
    %390 = vector.shape_cast %389 : vector<32xf32> to vector<32x1xf32>
    %cst_436 = arith.constant 1.600000e+01 : f32
    %391 = vector.broadcast %cst_436 : f32 to vector<32x1xf32>
    %392 = arith.divf %390, %391 : vector<32x1xf32>
    %393 = arith.mulf %388, %388 : vector<32x16xf32>
    %cst_437 = arith.constant dense<0.000000e+00> : vector<32xf32>
    %394 = vector.multi_reduction <add>, %393, %cst_437 [1] : vector<32x16xf32> to vector<32xf32>
    %395 = vector.shape_cast %394 : vector<32xf32> to vector<32x1xf32>
    %cst_438 = arith.constant 1.600000e+01 : f32
    %396 = vector.broadcast %cst_438 : f32 to vector<32x1xf32>
    %397 = arith.divf %395, %396 : vector<32x1xf32>
    %398 = arith.mulf %392, %392 : vector<32x1xf32>
    %399 = arith.subf %397, %398 : vector<32x1xf32>
    %cst_439 = arith.constant 0.000000e+00 : f32
    %400 = vector.broadcast %cst_439 : f32 to vector<32x1xf32>
    %401 = arith.maximumf %399, %400 : vector<32x1xf32>
    %402 = vector.broadcast %392 : vector<32x1xf32> to vector<32x16xf32>
    %403 = arith.subf %388, %402 : vector<32x16xf32>
    %cst_440 = arith.constant 9.99999974E-6 : f32
    %404 = vector.broadcast %cst_440 : f32 to vector<32x1xf32>
    %405 = arith.addf %401, %404 : vector<32x1xf32>
    %406 = math.rsqrt %405 : vector<32x1xf32>
    %407 = vector.broadcast %406 : vector<32x1xf32> to vector<32x16xf32>
    %408 = arith.mulf %403, %407 : vector<32x16xf32>
    %cst_441 = arith.constant 0.000000e+00 : f32
    %409 = vector.broadcast %cst_441 : f32 to vector<32x16xf32>
    %410 = arith.maximumf %408, %409 : vector<32x16xf32>
    %411 = arith.truncf %410 : vector<32x16xf32> to vector<32x16xbf16>
    %c0_442 = arith.constant 0 : index
    %c0_443 = arith.constant 0 : index
    %412 = vector.load %arg21[%c0_442, %c0_443] : memref<16x36xbf16, #tpu.memory_space<vmem>>, vector<16x36xbf16>
    %cst_444 = arith.constant dense<0.000000e+00> : vector<32x36xf32>
    %413 = tpu.matmul %411, %412, %cst_444 {dimension_numbers = #tpu.dot_dimension_numbers<[1], [0], [0], [1], [0, 0, 1, 1], [], []>} : vector<32x16xbf16>, vector<16x36xbf16>, vector<32x36xf32> -> vector<32x36xf32>
    %414 = arith.truncf %413 : vector<32x36xf32> to vector<32x36xbf16>
    %c0_445 = arith.constant 0 : index
    %c0_446 = arith.constant 0 : index
    %415 = vector.load %arg24[%c0_445, %c0_446] : memref<32x484xbf16, #tpu.memory_space<vmem>>, vector<32x36xbf16>
    tpu.vector_store %arg24[%c0_445, %c0_446], %414 {strides = array<i32>} : memref<32x484xbf16, #tpu.memory_space<vmem>>, vector<32x36xbf16>,
    %c0_447 = arith.constant 0 : index
    %c0_448 = arith.constant 0 : index
    %416 = vector.load %arg24[%c0_447, %c0_448] : memref<32x484xbf16, #tpu.memory_space<vmem>>, vector<32x22xbf16>
    %c0_449 = arith.constant 0 : index
    %c0_450 = arith.constant 0 : index
    %417 = vector.load %arg23[%c0_449, %c0_450] : memref<288x346xbf16, #tpu.memory_space<vmem>>, vector<32x22xbf16>
    tpu.vector_store %arg23[%c0_449, %c0_450], %416 {strides = array<i32>} : memref<288x346xbf16, #tpu.memory_space<vmem>>, vector<32x22xbf16>,
    %c0_451 = arith.constant 0 : index
    %c1_452 = arith.constant 1 : index
    %418 = vector.load %arg24[%c0_451, %c1_452] : memref<32x484xbf16, #tpu.memory_space<vmem>>, vector<32x22xbf16>
    %c32_453 = arith.constant 32 : index
    %c0_454 = arith.constant 0 : index
    %419 = vector.load %arg23[%c32_453, %c0_454] : memref<288x346xbf16, #tpu.memory_space<vmem>>, vector<32x22xbf16>
    tpu.vector_store %arg23[%c32_453, %c0_454], %418 {strides = array<i32>} : memref<288x346xbf16, #tpu.memory_space<vmem>>, vector<32x22xbf16>,
    %c0_455 = arith.constant 0 : index
    %c2_456 = arith.constant 2 : index
    %420 = vector.load %arg24[%c0_455, %c2_456] : memref<32x484xbf16, #tpu.memory_space<vmem>>, vector<32x22xbf16>
    %c64_457 = arith.constant 64 : index
    %c0_458 = arith.constant 0 : index
    %421 = vector.load %arg23[%c64_457, %c0_458] : memref<288x346xbf16, #tpu.memory_space<vmem>>, vector<32x22xbf16>
    tpu.vector_store %arg23[%c64_457, %c0_458], %420 {strides = array<i32>} : memref<288x346xbf16, #tpu.memory_space<vmem>>, vector<32x22xbf16>,
    %c0_459 = arith.constant 0 : index
    %c6_460 = arith.constant 6 : index
    %422 = vector.load %arg24[%c0_459, %c6_460] : memref<32x484xbf16, #tpu.memory_space<vmem>>, vector<32x22xbf16>
    %c96_461 = arith.constant 96 : index
    %c0_462 = arith.constant 0 : index
    %423 = vector.load %arg23[%c96_461, %c0_462] : memref<288x346xbf16, #tpu.memory_space<vmem>>, vector<32x22xbf16>
    tpu.vector_store %arg23[%c96_461, %c0_462], %422 {strides = array<i32>} : memref<288x346xbf16, #tpu.memory_space<vmem>>, vector<32x22xbf16>,
    %c0_463 = arith.constant 0 : index
    %c7_464 = arith.constant 7 : index
    %424 = vector.load %arg24[%c0_463, %c7_464] : memref<32x484xbf16, #tpu.memory_space<vmem>>, vector<32x22xbf16>
    %c128_465 = arith.constant 128 : index
    %c0_466 = arith.constant 0 : index
    %425 = vector.load %arg23[%c128_465, %c0_466] : memref<288x346xbf16, #tpu.memory_space<vmem>>, vector<32x22xbf16>
    tpu.vector_store %arg23[%c128_465, %c0_466], %424 {strides = array<i32>} : memref<288x346xbf16, #tpu.memory_space<vmem>>, vector<32x22xbf16>,
    %c0_467 = arith.constant 0 : index
    %c8_468 = arith.constant 8 : index
    %426 = vector.load %arg24[%c0_467, %c8_468] : memref<32x484xbf16, #tpu.memory_space<vmem>>, vector<32x22xbf16>
    %c160_469 = arith.constant 160 : index
    %c0_470 = arith.constant 0 : index
    %427 = vector.load %arg23[%c160_469, %c0_470] : memref<288x346xbf16, #tpu.memory_space<vmem>>, vector<32x22xbf16>
    tpu.vector_store %arg23[%c160_469, %c0_470], %426 {strides = array<i32>} : memref<288x346xbf16, #tpu.memory_space<vmem>>, vector<32x22xbf16>,
    %c0_471 = arith.constant 0 : index
    %c12_472 = arith.constant 12 : index
    %428 = vector.load %arg24[%c0_471, %c12_472] : memref<32x484xbf16, #tpu.memory_space<vmem>>, vector<32x22xbf16>
    %c192_473 = arith.constant 192 : index
    %c0_474 = arith.constant 0 : index
    %429 = vector.load %arg23[%c192_473, %c0_474] : memref<288x346xbf16, #tpu.memory_space<vmem>>, vector<32x22xbf16>
    tpu.vector_store %arg23[%c192_473, %c0_474], %428 {strides = array<i32>} : memref<288x346xbf16, #tpu.memory_space<vmem>>, vector<32x22xbf16>,
    %c0_475 = arith.constant 0 : index
    %c13_476 = arith.constant 13 : index
    %430 = vector.load %arg24[%c0_475, %c13_476] : memref<32x484xbf16, #tpu.memory_space<vmem>>, vector<32x22xbf16>
    %c224_477 = arith.constant 224 : index
    %c0_478 = arith.constant 0 : index
    %431 = vector.load %arg23[%c224_477, %c0_478] : memref<288x346xbf16, #tpu.memory_space<vmem>>, vector<32x22xbf16>
    tpu.vector_store %arg23[%c224_477, %c0_478], %430 {strides = array<i32>} : memref<288x346xbf16, #tpu.memory_space<vmem>>, vector<32x22xbf16>,
    %c0_479 = arith.constant 0 : index
    %c14_480 = arith.constant 14 : index
    %432 = vector.load %arg24[%c0_479, %c14_480] : memref<32x484xbf16, #tpu.memory_space<vmem>>, vector<32x22xbf16>
    %c256_481 = arith.constant 256 : index
    %c0_482 = arith.constant 0 : index
    %433 = vector.load %arg23[%c256_481, %c0_482] : memref<288x346xbf16, #tpu.memory_space<vmem>>, vector<32x22xbf16>
    tpu.vector_store %arg23[%c256_481, %c0_482], %432 {strides = array<i32>} : memref<288x346xbf16, #tpu.memory_space<vmem>>, vector<32x22xbf16>,
    %c0_483 = arith.constant 0 : index
    %c0_484 = arith.constant 0 : index
    %434 = vector.load %arg23[%c0_483, %c0_484] : memref<288x346xbf16, #tpu.memory_space<vmem>>, vector<288x22xbf16>
    %c0_485 = arith.constant 0 : index
    %c0_486 = arith.constant 0 : index
    %435 = vector.load %arg15[%c0_485, %c0_486] : memref<22x16xbf16, #tpu.memory_space<vmem>>, vector<22x16xbf16>
    %cst_487 = arith.constant dense<0.000000e+00> : vector<288x16xf32>
    %436 = tpu.matmul %434, %435, %cst_487 {dimension_numbers = #tpu.dot_dimension_numbers<[1], [0], [0], [1], [0, 0, 1, 1], [], []>} : vector<288x22xbf16>, vector<22x16xbf16>, vector<288x16xf32> -> vector<288x16xf32>
    %437 = arith.truncf %436 : vector<288x16xf32> to vector<288x16xbf16>
    %c0_488 = arith.constant 0 : index
    %c0_489 = arith.constant 0 : index
    %438 = vector.load %arg8[%c0_488, %c0_489] : memref<32x288xbf16, #tpu.memory_space<vmem>>, vector<32x288xbf16>
    %cst_490 = arith.constant dense<0.000000e+00> : vector<32x16xf32>
    %439 = tpu.matmul %438, %437, %cst_490 {dimension_numbers = #tpu.dot_dimension_numbers<[1], [0], [0], [1], [0, 0, 1, 1], [], []>} : vector<32x288xbf16>, vector<288x16xbf16>, vector<32x16xf32> -> vector<32x16xf32>
    %cst_491 = arith.constant dense<0.000000e+00> : vector<32xf32>
    %440 = vector.multi_reduction <add>, %439, %cst_491 [1] : vector<32x16xf32> to vector<32xf32>
    %441 = vector.shape_cast %440 : vector<32xf32> to vector<32x1xf32>
    %cst_492 = arith.constant 1.600000e+01 : f32
    %442 = vector.broadcast %cst_492 : f32 to vector<32x1xf32>
    %443 = arith.divf %441, %442 : vector<32x1xf32>
    %444 = arith.mulf %439, %439 : vector<32x16xf32>
    %cst_493 = arith.constant dense<0.000000e+00> : vector<32xf32>
    %445 = vector.multi_reduction <add>, %444, %cst_493 [1] : vector<32x16xf32> to vector<32xf32>
    %446 = vector.shape_cast %445 : vector<32xf32> to vector<32x1xf32>
    %cst_494 = arith.constant 1.600000e+01 : f32
    %447 = vector.broadcast %cst_494 : f32 to vector<32x1xf32>
    %448 = arith.divf %446, %447 : vector<32x1xf32>
    %449 = arith.mulf %443, %443 : vector<32x1xf32>
    %450 = arith.subf %448, %449 : vector<32x1xf32>
    %cst_495 = arith.constant 0.000000e+00 : f32
    %451 = vector.broadcast %cst_495 : f32 to vector<32x1xf32>
    %452 = arith.maximumf %450, %451 : vector<32x1xf32>
    %453 = vector.broadcast %443 : vector<32x1xf32> to vector<32x16xf32>
    %454 = arith.subf %439, %453 : vector<32x16xf32>
    %cst_496 = arith.constant 9.99999974E-6 : f32
    %455 = vector.broadcast %cst_496 : f32 to vector<32x1xf32>
    %456 = arith.addf %452, %455 : vector<32x1xf32>
    %457 = math.rsqrt %456 : vector<32x1xf32>
    %458 = vector.broadcast %457 : vector<32x1xf32> to vector<32x16xf32>
    %459 = arith.mulf %454, %458 : vector<32x16xf32>
    %460 = arith.addf %459, %359 : vector<32x16xf32>
    %c0_497 = arith.constant 0 : index
    %c0_498 = arith.constant 0 : index
    %c0_499 = arith.constant 0 : index
    %461 = vector.load %arg22[%c0_497, %c0_498, %c0_499] : memref<1x32x16xf32, #tpu.memory_space<vmem>>, vector<1x32x16xf32>
    %462 = vector.shape_cast %461 : vector<1x32x16xf32> to vector<32x16xf32>
    %463 = vector.shape_cast %460 : vector<32x16xf32> to vector<1x32x16xf32>
    tpu.vector_store %arg22[%c0_497, %c0_498, %c0_499], %463 {strides = array<i32>} : memref<1x32x16xf32, #tpu.memory_space<vmem>>, vector<1x32x16xf32>,
    return
  }
  func.func @transform_0(%arg0: i32) -> (i32, i32, i32) {
    %c0_i32 = arith.constant 0 : i32
    %c0_i32_0 = arith.constant 0 : i32
    %c0_i32_1 = arith.constant 0 : i32
    return %arg0, %c0_i32, %c0_i32_0 : i32, i32, i32
  }
  func.func @transform_1(%arg0: i32) -> (i32, i32) {
    %c0_i32 = arith.constant 0 : i32
    %c0_i32_0 = arith.constant 0 : i32
    %c0_i32_1 = arith.constant 0 : i32
    return %c0_i32, %c0_i32_0 : i32, i32
  }
  func.func @transform_2(%arg0: i32) -> (i32, i32) {
    %c0_i32 = arith.constant 0 : i32
    %c0_i32_0 = arith.constant 0 : i32
    %c0_i32_1 = arith.constant 0 : i32
    return %c0_i32, %c0_i32_0 : i32, i32
  }
  func.func @transform_3(%arg0: i32) -> (i32, i32) {
    %c0_i32 = arith.constant 0 : i32
    %c0_i32_0 = arith.constant 0 : i32
    %c0_i32_1 = arith.constant 0 : i32
    return %c0_i32, %c0_i32_0 : i32, i32
  }
  func.func @transform_4(%arg0: i32) -> (i32, i32) {
    %c0_i32 = arith.constant 0 : i32
    %c0_i32_0 = arith.constant 0 : i32
    %c0_i32_1 = arith.constant 0 : i32
    return %c0_i32, %c0_i32_0 : i32, i32
  }
  func.func @transform_5(%arg0: i32) -> (i32, i32) {
    %c0_i32 = arith.constant 0 : i32
    %c0_i32_0 = arith.constant 0 : i32
    %c0_i32_1 = arith.constant 0 : i32
    return %c0_i32, %c0_i32_0 : i32, i32
  }
  func.func @transform_6(%arg0: i32) -> (i32, i32) {
    %c0_i32 = arith.constant 0 : i32
    %c0_i32_0 = arith.constant 0 : i32
    %c0_i32_1 = arith.constant 0 : i32
    return %c0_i32, %c0_i32_0 : i32, i32
  }
  func.func @transform_7(%arg0: i32) -> (i32, i32) {
    %c0_i32 = arith.constant 0 : i32
    %c0_i32_0 = arith.constant 0 : i32
    %c0_i32_1 = arith.constant 0 : i32
    return %c0_i32, %c0_i32_0 : i32, i32
  }
  func.func @transform_8(%arg0: i32) -> (i32, i32) {
    %c0_i32 = arith.constant 0 : i32
    %c0_i32_0 = arith.constant 0 : i32
    %c0_i32_1 = arith.constant 0 : i32
    return %c0_i32, %c0_i32_0 : i32, i32
  }
  func.func @transform_9(%arg0: i32) -> (i32, i32) {
    %c0_i32 = arith.constant 0 : i32
    %c0_i32_0 = arith.constant 0 : i32
    %c0_i32_1 = arith.constant 0 : i32
    return %c0_i32, %c0_i32_0 : i32, i32
  }
  func.func @transform_10(%arg0: i32) -> (i32, i32) {
    %c0_i32 = arith.constant 0 : i32
    %c0_i32_0 = arith.constant 0 : i32
    %c0_i32_1 = arith.constant 0 : i32
    return %c0_i32, %c0_i32_0 : i32, i32
  }
  func.func @transform_11(%arg0: i32) -> (i32, i32) {
    %c0_i32 = arith.constant 0 : i32
    %c0_i32_0 = arith.constant 0 : i32
    %c0_i32_1 = arith.constant 0 : i32
    return %c0_i32, %c0_i32_0 : i32, i32
  }
  func.func @transform_12(%arg0: i32) -> (i32, i32) {
    %c0_i32 = arith.constant 0 : i32
    %c0_i32_0 = arith.constant 0 : i32
    %c0_i32_1 = arith.constant 0 : i32
    return %c0_i32, %c0_i32_0 : i32, i32
  }
  func.func @transform_13(%arg0: i32) -> (i32, i32) {
    %c0_i32 = arith.constant 0 : i32
    %c0_i32_0 = arith.constant 0 : i32
    %c0_i32_1 = arith.constant 0 : i32
    return %c0_i32, %c0_i32_0 : i32, i32
  }
  func.func @transform_14(%arg0: i32) -> (i32, i32) {
    %c0_i32 = arith.constant 0 : i32
    %c0_i32_0 = arith.constant 0 : i32
    %c0_i32_1 = arith.constant 0 : i32
    return %c0_i32, %c0_i32_0 : i32, i32
  }
  func.func @transform_15(%arg0: i32) -> (i32, i32) {
    %c0_i32 = arith.constant 0 : i32
    %c0_i32_0 = arith.constant 0 : i32
    %c0_i32_1 = arith.constant 0 : i32
    return %c0_i32, %c0_i32_0 : i32, i32
  }
  func.func @transform_16(%arg0: i32) -> (i32, i32) {
    %c0_i32 = arith.constant 0 : i32
    %c0_i32_0 = arith.constant 0 : i32
    %c0_i32_1 = arith.constant 0 : i32
    return %c0_i32, %c0_i32_0 : i32, i32
  }
  func.func @transform_17(%arg0: i32) -> (i32, i32) {
    %c0_i32 = arith.constant 0 : i32
    %c0_i32_0 = arith.constant 0 : i32
    %c0_i32_1 = arith.constant 0 : i32
    return %c0_i32, %c0_i32_0 : i32, i32
  }
  func.func @transform_18(%arg0: i32) -> (i32, i32) {
    %c0_i32 = arith.constant 0 : i32
    %c0_i32_0 = arith.constant 0 : i32
    %c0_i32_1 = arith.constant 0 : i32
    return %c0_i32, %c0_i32_0 : i32, i32
  }
  func.func @transform_19(%arg0: i32) -> (i32, i32) {
    %c0_i32 = arith.constant 0 : i32
    %c0_i32_0 = arith.constant 0 : i32
    %c0_i32_1 = arith.constant 0 : i32
    return %c0_i32, %c0_i32_0 : i32, i32
  }
  func.func @transform_20(%arg0: i32) -> (i32, i32) {
    %c0_i32 = arith.constant 0 : i32
    %c0_i32_0 = arith.constant 0 : i32
    %c0_i32_1 = arith.constant 0 : i32
    return %c0_i32, %c0_i32_0 : i32, i32
  }
  func.func @transform_21(%arg0: i32) -> (i32, i32, i32) {
    %c0_i32 = arith.constant 0 : i32
    %c0_i32_0 = arith.constant 0 : i32
    %c0_i32_1 = arith.constant 0 : i32
    return %arg0, %c0_i32, %c0_i32_0 : i32, i32, i32
  }
}

</mosaic_0001>

<bundles_post_ra>
// kernel: content_encoder_forward.1
= control target key start
LH: loop header
LB: loop body
LE: loop exit
PB: predicated region body
PF: predicated region fallthrough
CT: control target
= control target key end

     0   :  { %s13328_s0 = inlined_call_operand.vmem [shape: bf16[2,3,484], index: 0, kind: input, shape index: {}]   ;;  %s13329_s1 = inlined_call_operand.vmem [shape: bf16[8,147], index: 1, kind: input, shape index: {}]   ;;  %s13330_s2 = inlined_call_operand.vmem [shape: bf16[16,128], index: 2, kind: input, shape index: {}]   ;;  %s13331_s3 = inlined_call_operand.vmem [shape: bf16[32,256], index: 3, kind: input, shape index: {}]   ;;  %s13332_s4 = inlined_call_operand.vmem [shape: bf16[32,288], index: 4, kind: input, shape index: {}]   ;;  %s13333_s5 = inlined_call_operand.vmem [shape: bf16[32,288], index: 5, kind: input, shape index: {}]   ;;  %s13334_s6 = inlined_call_operand.vmem [shape: bf16[32,288], index: 6, kind: input, shape index: {}]   ;;  %s13335_s7 = inlined_call_operand.vmem [shape: bf16[32,288], index: 7, kind: input, shape index: {}]   ;;  %s13336_s8 = inlined_call_operand.vmem [shape: bf16[346,256], index: 8, kind: input, shape index: {}]   ;;  %s13337_s9 = inlined_call_operand.vmem [shape: bf16[267,64], index: 9, kind: input, shape index: {}]   ;;  %s13338_s10 = inlined_call_operand.vmem [shape: bf16[67,16], index: 10, kind: input, shape index: {}]   ;;  %s13339_s11 = inlined_call_operand.vmem [shape: bf16[22,16], index: 11, kind: input, shape index: {}]   ;;  %s13340_s12 = inlined_call_operand.vmem [shape: bf16[22,16], index: 12, kind: input, shape index: {}]   ;;  %s13341_s13 = inlined_call_operand.vmem [shape: bf16[22,16], index: 13, kind: input, shape index: {}]   ;;  %s13342_s14 = inlined_call_operand.vmem [shape: bf16[22,16], index: 14, kind: input, shape index: {}]   ;;  %s13343_s15 = inlined_call_operand.vmem [shape: bf16[256,324], index: 15, kind: input, shape index: {}]   ;;  %s13344_s16 = inlined_call_operand.vmem [shape: bf16[64,100], index: 16, kind: input, shape index: {}]   ;;  %s13345_s17 = inlined_call_operand.vmem [shape: bf16[16,36], index: 17, kind: input, shape index: {}]   ;;  %s13346_s18 = inlined_call_operand.vmem [shape: bf16[16,36], index: 18, kind: input, shape index: {}]   ;;  %s13347_s19 = inlined_call_operand.vmem [shape: bf16[16,36], index: 19, kind: input, shape index: {}]   ;;  %s13348_s20 = inlined_call_operand.vmem [shape: bf16[16,36], index: 20, kind: input, shape index: {}]   ;;  %s13349_s21 = inlined_call_operand.vmem [shape: f32[2,32,16], index: 21, kind: output, shape index: {}]  }
   0x1   :  { %13467 = sst [smem:[#allocation11_spill]] %s13328_s0 }
   0x2   :  { %13468 = sst [smem:[#allocation12_spill]] %s13329_s1 }
   0x3   :  { %13469 = sst [smem:[#allocation13_spill]] %s13330_s2  ;;  %s10284_s2 = smov 0  }
   0x4   :  { %13470 = sst [smem:[#allocation14_spill]] %s13331_s3 }
   0x5   :  { %13471 = sst [smem:[#allocation15_spill]] %s13332_s4 }
   0x6   :  { %13472 = sst [smem:[#allocation16_spill]] %s13333_s5 }
   0x7   :  { %13473 = sst [smem:[#allocation17_spill]] %s13336_s8 }
   0x8   :  { %13474 = sst [smem:[#allocation18_spill]] %s13337_s9 }
   0x9   :  { %13475 = sst [smem:[#allocation19_spill]] %s13338_s10 }
   0xa   :  { %13476 = sst [smem:[#allocation20_spill]] %s13339_s11 }
   0xb   :  { %13477 = sst [smem:[#allocation21_spill]] %s13340_s12 }
   0xc   :  { %13478 = sst [smem:[#allocation22_spill]] %s13343_s15 }
   0xd LB: > { %s8316_s25 = sadd.s32 4294967295, %s10103_s2   ;;  %p8320_p0 = scmp.ge.s32.totalorder %s10103_s2, 1  ;;  %s10103_s2 = sphi %s10284_s2, %s31_s2  }
   0xe   : > { %p587_p1 = scmp.lt.s32.totalorder %s10103_s2, 3 }
  0x10   : > { %p588_p2 = pnand %p8320_p0, %p587_p1 }
  0x12   : > { %591 = sbr.rel (%p588_p2) target bundleno = 6772 (0x1a74), region = 104 }
  0x17   : > { %p647_p3 = scmp.lt.s32.totalorder %s8316_s25, 1  ;;  %vm13367_vm0 = vcmask 1041408   ;;  %vm666_vm1 = vsmask.f32 1280  ;;  %s13479_s28 = sld [smem:[#allocation11_spill]]  ;;  %vm13366_vm2 = vcmask 1045508  }
  0x18   : > { %vm669_vm3 = vsmask.f32 5376  ;;  %vm675_vm4 = vcmask 816132   ;;  %vm667_vm5 = vmand %vm13367_vm0, %vm666_vm1  ;;  %v13480_v1 = vmov 0  ;;  %v678_v2 = vld [vmem:[#allocation3 + $0x8] sm:$0x33] }
  0x19   : > { %s13825_s25 = smov (!%p647_p3, %s8316_s25), 1  ;;  %vm670_vm6 = vmand %vm13366_vm2, %vm669_vm3  ;;  %v672_v3 = vld [vmem:[#allocation3] sm:$0x33]  ;;  %s10105_s0 = smov 124   ;;  %vm13375_vm10 = vcmask 730112   ;;  %vm731_vm12 = vcmask 731137  }
  0x1a   : > { %s9634_s26 = sshll.u32 %s13825_s25, 3  ;;  %vm676_vm7 = vmand %vm675_vm4, %vm669_vm3  ;;  %s13376_s4 = smov 122   ;;  %vm13368_vm13 = vsmask.f32 2304  ;;  %vm13365_vm15 = vcmask 1044480   ;;  %vm13369_vm3 = vcmask 1040384  }
  0x1b   : > { %vm10301_vm8 = vmor %vm670_vm6, %vm667_vm5  ;;  %s13359_s30 = smov 126   ;;  %s13361_s5 = smov 127   ;;  %vm13370_vm6 = vcmask 1043458   ;;  %vm13374_vm2 = vcmask 1046533   ;;  %vm725_vm0 = vsmask.f32 7958 }
  0x1c   : > { %v13481_v1 = vsel %vm10301_vm8, 4294967295, %v13480_v1  ;;  %vm677_vm9 = vmor %vm676_vm7, %vm667_vm5  ;;  %s13363_s22 = smov 123   ;;  %s13357_s23 = smov 125   ;;  %vm13372_vm5 = vcmask 1042433   ;;  %vm840_vm7 = vsmask.f32 3328 }
  0x1d   : > { %s651_s29 = scalar_lea.vmem %s13479_s28, %s9634_s26  ;;  %s13353_s1 = smov 105   ;;  %vm10337_vm11 = vmand %vm13375_vm10, %vm666_vm1  ;;  %vm722_vm1 = vsmask.f32 7942  ;;  %vm13382_vm10 = vcmask 729088  }
  0x1e   : > { %v658_v0 = vld [vmem:[%s651_s29] sm:$0xff]  ;;  %s13355_s24 = smov 106   ;;  %s10113_s26 = smov 104   ;;  %vm10359_vm14 = vmand %vm731_vm12, %vm13368_vm13 }
  0x1f   : > { %660 = vst [vmem:[#allocation1] ss:$2 sm:$0xff] %v658_v0  ;;  %s10114_s27 = smov 103   ;;  %s10115_s3 = smov 84   ;;  %vm10382_vm4 = vmand %vm731_vm12, %vm722_vm1 }
  0x20   : > { %s10116_s28 = smov 101   ;;  %s10117_s29 = smov 83   ;;  %vm10495_vm12 = vmand %vm13372_vm5, %vm722_vm1  ;;  %vm13378_vm5 = vcmask 1039360  }
  0x21   : > { %s13484_s8 = sld [smem:[#allocation17_spill]]  ;;  %vm10504_vm13 = vmand %vm13370_vm6, %vm840_vm7  ;;  %vm13381_vm6 = vcmask 1043456  }
  0x22   : > { %s13701_s9 = sld [smem:[#allocation18_spill]] }
  0x23   : > { %s13727_s15 = sld [smem:[#allocation22_spill]] }
  0x24   : > { %s13757_s10 = sld [smem:[#allocation19_spill]] }
  0x25   : > { %s13774_s11 = sld [smem:[#allocation20_spill]] }
  0x26   : > { %v662_v4 = vld.sshfl [vmem:[#allocation1 + $0x8] sm:$0xff pattern:$0x75643120]  ;;  %v661_v5 = vld.sshfl [vmem:[#allocation1] sm:$0xff pattern:$0x75643120] }
  0x27   : > { %v679_v6 = vsel %vm677_vm9, %v662_v4, %v678_v2  ;;  %v673_v7 = vsel %vm10301_vm8, %v661_v5, %v672_v3  ;;  %vm13371_vm9 = vcmask 732162   ;;  %s13787_s12 = sld [smem:[#allocation21_spill]] }
  0x28   : > { %680 = vst [vmem:[#allocation3 + $0x8] sm:$0x33] %v679_v6  ;;  %vm10518_vm1 = vmand %vm13371_vm9, %vm840_vm7 }
  0x29   : > { %674 = vst [vmem:[#allocation3] sm:$0x33] %v673_v7  ;;  %vm10530_vm7 = vmand %vm13374_vm2, %vm725_vm0  ;;  %vm13380_vm0 = vsmask.f32 256 }
  0x2f   : > { %v823_v8 = vld [vmem:[#allocation3 + $0x8] sm:$0x3] }
  0x30   : > { %v914_v9 = vld [vmem:[#allocation3 + $0x8] sm:$0x3]  ;;  %v827_v11 = vrot.slane %v823_v8, 6  ;;  %v822_v12 = vld [vmem:[#allocation3] sm:$0x33] }
  0x31   : > { %v737_v10 = vld [vmem:[#allocation3 + $0x8] sm:$0x3]  ;;  %v918_v13 = vrot.slane %v914_v9, 7  ;;  %v826_v14 = vrot.slane %v822_v12, 6  ;;  %v10310_v19 = vld [vmem:[#allocation3] sm:$0x33] }
  0x32   : > { %v741_v15 = vrot.slane %v737_v10, 5  ;;  %v692_v16 = vld [vmem:[#allocation3 + $0x8] sm:$0x3]  ;;  %830 = vrot.lane.b32.xlu0 %v827_v11, %s10105_s0  ;;  %v857_v26 = vshll.u32 %v10310_v19, 16  ;;  %v783_v33 = vld [vmem:[#allocation3] sm:$0x33] }
  0x33   : > { %921 = vrot.lane.b32.xlu2 %v918_v13, %s13376_s4  ;;  %v702_v17 = vshrl.u32 %v692_v16, 16  ;;  %v705_v18 = vshll.u32 %v692_v16, 16  ;;  %828 = vrot.lane.b32.xlu1 %v826_v14, %s10105_s0  ;;  %v855_v20 = vld [vmem:[#allocation3 + $0x8] sm:$0x3]  ;;  %v691_v34 = vld [vmem:[#allocation3] sm:$0x33] }
  0x34   : > { %v784_v21 = vld [vmem:[#allocation3 + $0x8] sm:$0x3]  ;;  %v743_v24 = vrot.slane %v741_v15, 4  ;;  %v861_v27 = vshll.u32 %v855_v20, 16  ;;  %v10315_v29 = vrot.slane %v857_v26, 5  ;;  %v786_v36 = vshrl.u32 %v783_v33, 16 }
  0x35   : > { %v704_v22 = vrot.slane %v702_v17, 6  ;;  %v707_v23 = vrot.slane %v705_v18, 7  ;;  %v793_v28 = vshrl.u32 %v784_v21, 16  ;;  %v796_v32 = vshll.u32 %v784_v21, 16  ;;  %v736_v35 = vld [vmem:[#allocation3] sm:$0x33] }
  0x36   : > { %v863_v30 = vrot.slane %v861_v27, 5  ;;  %v694_v39 = vshrl.u32 %v691_v34, 16  ;;  %v697_v40 = vshll.u32 %v691_v34, 16  ;;  %v740_v41 = vrot.slane %v736_v35, 5  ;;  %v943_v50 = vld [vmem:[#allocation3 + $0x8] sm:$0x3] }
  0x37   : > { %v708_v25 = vor.u32 %v707_v23, %v704_v22  ;;  %v795_v31 = vrot.slane %v793_v28, 7  ;;  %v788_v42 = vrot.slane %v786_v36, 7  ;;  %v789_v43 = vshll.u32 %v783_v33, 16  ;;  %v913_v51 = vld [vmem:[#allocation3] sm:$0x33] }
  0x38   : > { %v10015_v37 = vpack.i.bf16 %v10315_v29, %v863_v30  ;;  %v696_v44 = vrot.slane %v694_v39, 6  ;;  %v699_v45 = vrot.slane %v697_v40, 7  ;;  %v742_v48 = vrot.slane %v740_v41, 4  ;;  %v1005_v52 = vld [vmem:[#allocation3 + $0x8] sm:$0x3] }
  0x39   : > { %v798_v38 = vor.u32 %v796_v32, %v795_v31  ;;  %v791_v46 = vor.u32 %v789_v43, %v788_v42  ;;  %v869_v49 = vshrl.u32 %v855_v20, 16  ;;  %v984_v53 = vld [vmem:[#allocation3 + $0x8] sm:$0x3]  ;;  %v953_v54 = vshrl.u32 %v943_v50, 16  ;;  %v983_v58 = vld [vmem:[#allocation3] sm:$0x33] }
  0x3a   : > { %750 = vrot.lane.b32.xlu0 %v743_v24, %s13359_s30  ;;  %v700_v47 = vor.u32 %v699_v45, %v696_v44  ;;  %v956_v55 = vshll.u32 %v943_v50, 16  ;;  %v917_v57 = vrot.slane %v913_v51, 7  ;;  %v1015_v59 = vshrl.u32 %v1005_v52, 16  ;;  %v1004_v3 = vld [vmem:[#allocation3] sm:$0x33] }
  0x3b   : > { %711 = vrot.lane.b32.xlu2 %v708_v25, %s13361_s5  ;;  %746 = vrot.lane.b32.xlu1 %v741_v15, %s13359_s30  ;;  %v871_v56 = vrot.slane %v869_v49, 4  ;;  %v1018_v60 = vshll.u32 %v1005_v52, 16  ;;  %v955_v61 = vrot.slane %v953_v54, 5  ;;  %v942_v4 = vld [vmem:[#allocation3] sm:$0x33]  ;;  %v1007_v7 = vshrl.u32 %v1004_v3, 16 }
  0x3c   : > { %v958_v62 = vrot.slane %v956_v55, 6  ;;  %v1017_v0 = vrot.slane %v1015_v59, 6  ;;  %v1010_v8 = vshll.u32 %v1004_v3, 16  ;;  %v945_v10 = vshrl.u32 %v942_v4, 16  ;;  %v1040_v14 = vld [vmem:[#allocation3 + $0x8] sm:$0x3] }
  0x3d   : > { %v872_v63 = vor.u32 %v871_v56, %v863_v30  ;;  %v1020_v2 = vrot.slane %v1018_v60, 7  ;;  %v948_v11 = vshll.u32 %v942_v4, 16  ;;  %v1009_v12 = vrot.slane %v1007_v7, 6  ;;  %v1182_v23 = vld [vmem:[#allocation3 + $0x8] sm:$0x33] }
  0x3e   : > { %v959_v5 = vor.u32 %v958_v62, %v955_v61  ;;  %v1012_v13 = vrot.slane %v1010_v8, 7  ;;  %v947_v15 = vrot.slane %v945_v10, 5  ;;  %v864_v17 = vshrl.u32 %v10310_v19, 16  ;;  %v1039_v25 = vld [vmem:[#allocation3] sm:$0x33] }
  0x3f   : > { %v873_v6 = vrot.slane %v872_v63, 4  ;;  %v1021_v9 = vor.u32 %v1020_v2, %v1017_v0  ;;  %v950_v16 = vrot.slane %v948_v11, 6  ;;  %v1044_v18 = vrot.slane %v1040_v14, 5  ;;  %v1206_v19 = vld [vmem:[#allocation3 + $0x8] sm:$0x33] }
  0x40   : > { %v1013_v20 = vor.u32 %v1012_v13, %v1009_v12  ;;  %v866_v22 = vrot.slane %v864_v17, 4  ;;  %v1186_v26 = vrot.slane %v1182_v23, 7  ;;  %v1043_v27 = vrot.slane %v1039_v25, 5  ;;  %v1110_v30 = vld [vmem:[#allocation3 + $0x8] sm:$0x3] }
  0x41   : > { %v951_v21 = vor.u32 %v950_v16, %v947_v15  ;;  %v1046_v31 = vrot.slane %v1044_v18, 4  ;;  %v1216_v33 = vshrl.u32 %v1206_v19, 16  ;;  %v1219_v34 = vshll.u32 %v1206_v19, 16  ;;  %v1133_v36 = vld [vmem:[#allocation3 + $0x8] sm:$0x3] }
  0x42   : > { %10016 = vrot.lane.b32.xlu0 %v10015_v37, %s13363_s22  ;;  %v867_v24 = vor.u32 %v866_v22, %v10315_v29  ;;  %v1045_v32 = vrot.slane %v1043_v27, 4  ;;  %v1114_v35 = vrot.slane %v1110_v30, 6  ;;  %v1109_v37 = vld [vmem:[#allocation3] sm:$0x33]  ;;  %v1139_v40 = vshll.u32 %v1133_v36, 16 }
  0x43   : > { %801 = vrot.lane.b32.xlu2 %v798_v38, %s13357_s23  ;;  %744 = vrot.lane.b32.xlu1 %v740_v41, %s13359_s30  ;;  %v1181_v29 = vld [vmem:[#allocation3] sm:$0x33]  ;;  %v1218_v38 = vrot.slane %v1216_v33, 5  ;;  %v1221_v39 = vrot.slane %v1219_v34, 6  ;;  %v1147_v41 = vshrl.u32 %v1133_v36, 16  ;;  %v13482_v45 = vmov 0 }
  0x44   : > { %v868_v28 = vrot.slane %v867_v24, 4  ;;  %v1077_v42 = vld [vmem:[#allocation3 + $0x8] sm:$0x3]  ;;  %v688_v43 = vld [vmem:[#allocation2 + $0x8] sm:$0x3]  ;;  %v13483_v45 = vsel %vm10337_vm11, 4294967295, %v13482_v45 }
  0x45   : > { %v1132_v44 = vld [vmem:[#allocation3] sm:$0x33]  ;;  %v1222_v49 = vor.u32 %v1221_v39, %v1218_v38  ;;  %v1086_v50 = vshrl.u32 %v1077_v42, 16  ;;  %v1141_v51 = vrot.slane %v1139_v40, 5  ;;  %v1149_v52 = vrot.slane %v1147_v41, 4 }
  0x46   : > { %v1135_v54 = vshll.u32 %v1132_v44, 16  ;;  %v1089_v56 = vshll.u32 %v1077_v42, 16  ;;  %v1076_v59 = vld [vmem:[#allocation3] sm:$0x33]  ;;  %v10347_v10 = vld [vmem:[#allocation3 + $0x8] sm:$0x33] }
  0x47   : > { %v1088_v55 = vrot.slane %v1086_v50, 7  ;;  %v1205_v60 = vld [vmem:[#allocation3] sm:$0x33]  ;;  %v1079_v63 = vshrl.u32 %v1076_v59, 16  ;;  %v1242_v13 = vld [vmem:[#allocation3 + $0x8] sm:$0x33] }
  0x48   : > { %v1208_v2 = vshrl.u32 %v1205_v60, 16  ;;  %v1211_v3 = vshll.u32 %v1205_v60, 16  ;;  %v8603_v14 = vld [vmem:[%s13484_s8 + $0x150] sm:$0xf]  ;;  %v9706_v15 = vld [vmem:[%s13484_s8 + $0x154] sm:$0x10] }
  0x49   : > { %v1091_v61 = vor.u32 %v1089_v56, %v1088_v55  ;;  %v1081_v4 = vrot.slane %v1079_v63, 7  ;;  %v1304_v16 = vrot.slane %v10347_v10, 5  ;;  %v13485_v17 = vmov 0  ;;  %v683_v22 = vld [vmem:[#allocation2] sm:$0x33] }
  0x4a   : > { %799 = vrot.lane.b32.xlu0 %v791_v46, %s13357_s23  ;;  %v682_v46 = vld [vmem:[#allocation3 + $0x8] sm:$0x3]  ;;  %v1210_v7 = vrot.slane %v1208_v2, 5  ;;  %v1213_v8 = vrot.slane %v1211_v3, 6  ;;  %s10120_s23 = smov 82   ;;  %v13486_v17 = vsel %vm10359_vm14, 4294967295, %v13485_v17 }
  0x4b   : > { %709 = vrot.lane.b32.xlu2 %v700_v47, %s13361_s5  ;;  %748 = vrot.lane.b32.xlu1 %v742_v48, %s13359_s30  ;;  %v1113_v47 = vrot.slane %v1109_v37, 6  ;;  %v689_v48 = vsel %vm10337_vm11, %v682_v46, %v688_v43  ;;  %v1373_v24 = vld [vmem:[#allocation3 + $0x8] sm:$0x33]  ;;  %v681_v25 = vld [vmem:[#allocation3] sm:$0x33]  ;;  %v13420_v33 = vmov 65535  }
  0x4c   : > { %690 = vst [vmem:[#allocation2 + $0x8] sm:$0x3] %v689_v48  ;;  %v1214_v12 = vor.u32 %v1213_v8, %v1210_v7  ;;  %v684_v19 = vsel %vm10301_vm8, %v681_v25, %v683_v22  ;;  %v10378_v34 = vsel %vm13369_vm3, 4294967295, %v13420_v33  ;;  %v1264_v37 = vld [vmem:[#allocation3 + $0x8] sm:$0x33]  ;;  %s10126_s5 = smov 79  }
  0x4d   : > { %685 = vst [vmem:[#allocation2] sm:$0x33] %v684_v19  ;;  %v10387_v38 = vld [vmem:[#allocation3 + $0x8] sm:$0x33]  ;;  %v9704_v40 = vld [vmem:[%s13484_s8 + $0x144] sm:$0xf0] }
  0x4e   : > { %13487 = vst [vmem:[#allocation4_spill] sm:$0xff] %v10378_v34  ;;  %v8595_v39 = vld [vmem:[%s13484_s8 + $0x140] sm:$0xf]  ;;  %v10397_v42 = vld [vmem:[#allocation3] sm:$0x33]  ;;  %v1274_v46 = vshrl.u32 %v1264_v37, 16 }
  0x4f   : > { %v10399_v43 = vld [vmem:[#allocation3 + $0x8] sm:$0x33]  ;;  %v8587_v48 = vld [vmem:[%s13484_s8 + $0x130] sm:$0xf]  ;;  %v1399_v56 = vshll.u32 %v10397_v42, 16  ;;  %s10131_s30 = smov 57  }
  0x50   : > { %v9694_v60 = vld [vmem:[%s13484_s8 + $0xf4] sm:$0xf0]  ;;  %v10430_v2 = vrot.slane %v1274_v46, 6  ;;  %v9700_v7 = vld [vmem:[%s13484_s8 + $0x124] sm:$0xf0] }
  0x51   : > { %v1241_v63 = vld [vmem:[#allocation3] sm:$0x33]  ;;  %v10441_v8 = vrot.slane %v1399_v56, 5  ;;  %v8571_v22 = vld [vmem:[%s13484_s8 + $0x110] sm:$0xf]  ;;  %v13494_v56 = vmov 0 }
  0x52   : > { %989 = vrot.lane.b32.xlu0 %v984_v53, %s13353_s1  ;;  %v1185_v53 = vrot.slane %v1181_v29, 7  ;;  %v1372_v29 = vld [vmem:[#allocation3] sm:$0x33]  ;;  %vm843_vm3 = vsmask.f32 7424  ;;  %v13495_v56 = vsel %vm10518_vm1, 4294967295, %v13494_v56 }
  0x53   : > { %987 = vrot.lane.b32.xlu2 %v983_v58, %s13353_s1  ;;  %919 = vrot.lane.b32.xlu1 %v917_v57, %s13376_s4  ;;  %v1150_v57 = vor.u32 %v1149_v52, %v1141_v51  ;;  %v1137_v58 = vrot.slane %v1135_v54, 5  ;;  %v733_v41 = vld [vmem:[#allocation2 + $0x8] sm:$0x6]  ;;  %v9678_v54 = vld [vmem:[%s13484_s8 + $0x74] sm:$0xf0]  ;;  %s10138_s1 = smov 34  }
  0x54   : > { %v1263_v25 = vld [vmem:[#allocation3] sm:$0x33]  ;;  %v1472_v10 = vld [vmem:[#allocation3 + $0x8] sm:$0x33]  ;;  %s10139_s4 = smov 17  }
  0x55   : > { %v1151_v62 = vrot.slane %v1150_v57, 4  ;;  %v10020_v0 = vpack.i.bf16 %v1137_v58, %v1141_v51  ;;  %v1348_v51 = vshrl.u32 %v10387_v38, 16  ;;  %v1403_v57 = vshll.u32 %v10399_v43, 16 }
  0x5a   : > { %962 = vrot.lane.b32.xlu0 %v959_v5, %s13355_s24  ;;  %v1082_v5 = vshll.u32 %v1076_v59, 16  ;;  %v8555_v59 = vld [vmem:[%s13484_s8 + $0xf0] sm:$0xf] }
  0x5b   : > { %880 = vrot.lane.b32.xlu2 %v873_v6, %s13363_s22  ;;  %1024 = vrot.lane.b32.xlu1 %v1021_v9, %s10113_s26  ;;  %v1142_v6 = vshrl.u32 %v1132_v44, 16  ;;  %v8596_v44 = vor.u32 %v9704_v40, %v8595_v39  ;;  %v9690_v39 = vld [vmem:[%s13484_s8 + $0xd4] sm:$0xf0]  ;;  %v1266_v40 = vshrl.u32 %v1263_v25, 16 }
  0x5c   : > { %v1084_v9 = vor.u32 %v1082_v5, %v1081_v4  ;;  %v1350_v4 = vrot.slane %v1348_v51, 7  ;;  %v1351_v5 = vshll.u32 %v10387_v38, 16  ;;  %v8539_v38 = vld [vmem:[%s13484_s8 + $0xd0] sm:$0xf] }
  0x5d   : > { %v1144_v11 = vrot.slane %v1142_v6, 4  ;;  %v8579_v6 = vld [vmem:[%s13484_s8 + $0x120] sm:$0xf]  ;;  %v8540_v46 = vor.u32 %v9690_v39, %v8539_v38  ;;  %v9668_v38 = vld [vmem:[%s13484_s8 + $0x24] sm:$0xf0] }
  0x62   : > { %1049 = vrot.lane.b32.xlu0 %v1044_v18, %s10114_s27  ;;  %v939_v18 = vld [vmem:[#allocation2 + $0x20] sm:$0x6] }
  0x63   : > { %1022 = vrot.lane.b32.xlu2 %v1013_v20, %s10113_s26  ;;  %960 = vrot.lane.b32.xlu1 %v951_v21, %s13355_s24  ;;  %s10118_s26 = smov 102   ;;  %v1145_v20 = vor.u32 %v1144_v11, %v1137_v58  ;;  %v8604_v21 = vor.u32 %v9706_v15, %v8603_v14  ;;  %v8580_v11 = vor.u32 %v9700_v7, %v8579_v6  ;;  %v10453_v14 = vld [vmem:[#allocation3] sm:$0x33]  ;;  %v8459_v6 = vld [vmem:[%s13484_s8 + $0x30] sm:$0xf]  ;;  %s10128_s24 = smov 59  }
  0x64   : > { %v9670_v7 = vld [vmem:[%s13484_s8 + $0x34] sm:$0xf0] }
  0x65   : > { %v1146_v30 = vrot.slane %v1145_v20, 4  ;;  %v9692_v20 = vld [vmem:[%s13484_s8 + $0xe4] sm:$0xf0] }
  0x6a   : > { %1189 = vrot.lane.b32.xlu0 %v1186_v26, %s10115_s3 }
  0x6b   : > { %1047 = vrot.lane.b32.xlu2 %v1043_v27, %s10114_s27  ;;  %878 = vrot.lane.b32.xlu1 %v868_v28, %s13363_s22  ;;  %v1306_v27 = vrot.slane %v1304_v16, 4  ;;  %v10371_v28 = vld [vmem:[#allocation3] sm:$0x33]  ;;  %s10127_s22 = smov 61  }
  0x6c   : > { %v1303_v36 = vrot.slane %v10371_v28, 5  ;;  %v13509_v28 = vmov 0 }
  0x72   : > { %1053 = vrot.lane.b32.xlu0 %v1046_v31, %s10114_s27  ;;  %v2793_v31 = vsel %vm13365_vm15, %v8604_v21, 0  ;;  %vm13373_vm15 = vcmask 1047558  }
  0x73   : > { %1051 = vrot.lane.b32.xlu2 %v1045_v32, %s10114_s27  ;;  %1117 = vrot.lane.b32.xlu1 %v1114_v35, %s10116_s28  ;;  %s10119_s27 = smov 100   ;;  %v1377_v32 = vrot.slane %v1373_v24, 6  ;;  %vm10536_vm9 = vmand %vm13373_vm15, %vm843_vm3  ;;  %vm13379_vm3 = vcmask 1014784  }
  0x74   : > { %2916 = vmatpush.bf16.msra.mxu2 %v2793_v31  ;;  %vm10552_vm15 = vmor %vm10530_vm7, %vm10495_vm12  ;;  %vm13384_vm12 = vcmask 732163   ;;  %vm895_vm7 = vcmask 1043459  }
  0x75   : > { %vm10560_vm2 = vmor %vm10536_vm9, %vm10504_vm13  ;;  %vm13383_vm9 = vsmask.f32 7938 }
  0x76   : > { %vm10589_vm13 = vmand %vm13382_vm10, %vm13380_vm0 }
  0x78   : > { %2917 = vmatpush.bf16.msra.mxu2 %v8596_v44 }
  0x7a   : > { %1115 = vrot.lane.b32.xlu0 %v1113_v47, %s10116_s28  ;;  %s10123_s28 = smov 78   ;;  %v1277_v47 = vshll.u32 %v1264_v37, 16 }
  0x7b   : > { %1225 = vrot.lane.b32.xlu2 %v1222_v49, %s10117_s29  ;;  %1187 = vrot.lane.b32.xlu1 %v1185_v53, %s10115_s3  ;;  %s10122_s3 = smov 80   ;;  %v9702_v49 = vld [vmem:[%s13484_s8 + $0x134] sm:$0xf0]  ;;  %v8491_v53 = vld [vmem:[%s13484_s8 + $0x70] sm:$0xf] }
  0x7c   : > { %v8588_v52 = vor.u32 %v9702_v49, %v8587_v48  ;;  %v8492_v58 = vor.u32 %v9678_v54, %v8491_v53  ;;  %v10432_v3 = vrot.slane %v1277_v47, 7  ;;  %v8563_v47 = vld [vmem:[%s13484_s8 + $0x100] sm:$0xf]  ;;  %v9696_v48 = vld [vmem:[%s13484_s8 + $0x104] sm:$0xf0] }
  0x7d   : > { %v8564_v51 = vor.u32 %v9696_v48, %v8563_v47  ;;  %v9672_v54 = vld [vmem:[%s13484_s8 + $0x44] sm:$0xf0]  ;;  %v13504_v47 = vmov 0 }
  0x7e   : > { %2798 = vmatpush.bf16.msra.mxu0 %v8492_v58  ;;  %2918 = vmatpush.bf16.msra.mxu2 %v8588_v52  ;;  %v1280_v31 = vor.u32 %v10432_v3, %v10430_v2  ;;  %v8467_v52 = vld [vmem:[%s13484_s8 + $0x40] sm:$0xf]  ;;  %v13505_v47 = vsel %vm10589_vm13, 4294967295, %v13504_v47 }
  0x82   : > { %1094 = vrot.lane.b32.xlu0 %v1091_v61, %s10118_s26  ;;  %v1376_v61 = vrot.slane %v1372_v29, 6  ;;  %2919 = vmatpush.bf16.msra.mxu2 %v8580_v11  ;;  %v9674_v29 = vld [vmem:[%s13484_s8 + $0x54] sm:$0xf0] }
  0x83   : > { %1158 = vrot.lane.b32.xlu2 %v1151_v62, %s10119_s27  ;;  %10021 = vrot.lane.b32.xlu1 %v10020_v0, %s10119_s27  ;;  %v8556_v62 = vor.u32 %v9694_v60, %v8555_v59  ;;  %v1305_v0 = vrot.slane %v1303_v36, 4  ;;  %v1344_v59 = vshll.u32 %v10453_v14, 16  ;;  %v8468_v60 = vor.u32 %v9672_v54, %v8467_v52  ;;  %v9684_v52 = vld [vmem:[%s13484_s8 + $0xa4] sm:$0xf0] }
  0x85   : > { %2856 = vmatpush.bf16.msra.mxu1 %v8556_v62  ;;  %9929 = vmatpush.bf16.msra.mxu3 %v8556_v62 }
  0x8a   : > { %1092 = vrot.lane.b32.xlu0 %v1084_v9, %s10118_s26  ;;  %v10443_v9 = vrot.slane %v1403_v57, 5  ;;  %v851_v57 = vld [vmem:[#allocation2 + $0x14] sm:$0xc]  ;;  %s10136_s26 = smov 37  }
  0x8b   : > { %1247 = vrot.lane.b32.xlu2 %v1242_v13, %s10120_s23  ;;  %1223 = vrot.lane.b32.xlu1 %v1214_v12, %s10117_s29  ;;  %v8483_v12 = vld [vmem:[%s13484_s8 + $0x60] sm:$0xf]  ;;  %v9676_v13 = vld [vmem:[%s13484_s8 + $0x64] sm:$0xf0]  ;;  %s10130_s29 = smov 58  }
  0x8c   : > { %v8484_v15 = vor.u32 %v9676_v13, %v8483_v12  ;;  %v10025_v37 = vpack.i.bf16 %v10441_v8, %v10443_v9  ;;  %v846_v13 = vld [vmem:[#allocation2 + $0xc] sm:$0xcc] }
  0x8d   : > { %v10364_v23 = vpop.permute.xlu2 %921 }
  0x8e   : > { %v940_v26 = vsel %vm10359_vm14, %v10364_v23, %v939_v18  ;;  %v8547_v18 = vld [vmem:[%s13484_s8 + $0xe0] sm:$0xf]  ;;  %2799 = vmatpush.bf16.msra.mxu0 %v8484_v15 }
  0x8f   : > { %941 = vst [vmem:[#allocation2 + $0x20] sm:$0x6] %v940_v26  ;;  %v8548_v21 = vor.u32 %v9692_v20, %v8547_v18  ;;  %v9698_v26 = vld [vmem:[%s13484_s8 + $0x114] sm:$0xf0]  ;;  %v13500_v20 = vmov 0 }
  0x90   : > { %v8572_v19 = vor.u32 %v9698_v26, %v8571_v22  ;;  %v13501_v20 = vsel %vm10552_vm15, 4294967295, %v13500_v20  ;;  %v13502_v26 = vmov 0 }
  0x91   : > { %2857 = vmatpush.bf16.msra.mxu1 %v8548_v21  ;;  %9930 = vmatpush.bf16.msra.mxu3 %v8548_v21  ;;  %v728_v21 = vld [vmem:[#allocation2] sm:$0x66]  ;;  %v13503_v26 = vsel %vm10560_vm2, 4294967295, %v13502_v26 }
  0x92   : > { %1313 = vrot.lane.b32.xlu0 %v1306_v27, %s10122_s3  ;;  %v1341_v27 = vshrl.u32 %v10453_v14, 16  ;;  %2920 = vmatpush.bf16.msra.mxu2 %v8572_v19 }
  0x93   : > { %1156 = vrot.lane.b32.xlu2 %v1146_v30, %s10119_s27  ;;  %1380 = vrot.lane.b32.xlu1 %v1377_v32, %s10123_s28  ;;  %v8475_v30 = vld [vmem:[%s13484_s8 + $0x50] sm:$0xf]  ;;  %v1353_v32 = vor.u32 %v1351_v5, %v1350_v4  ;;  %v9682_v5 = vld [vmem:[%s13484_s8 + $0x94] sm:$0xf0]  ;;  %s10137_s27 = smov 36  }
  0x94   : > { %v8476_v44 = vor.u32 %v9674_v29, %v8475_v30  ;;  %v1343_v58 = vrot.slane %v1341_v27, 7  ;;  %v8523_v30 = vld [vmem:[%s13484_s8 + $0xb0] sm:$0xf]  ;;  %v8451_v29 = vld [vmem:[%s13484_s8 + $0x20] sm:$0xf] }
  0x95   : > { %v10408_v50 = vpop.permute.xlu2 %711  ;;  %2858 = vmatpush.bf16.msra.mxu1 %v8540_v46  ;;  %9931 = vmatpush.bf16.msra.mxu3 %v8540_v46  ;;  %v8452_v49 = vor.u32 %v9668_v38, %v8451_v29 }
  0x96   : > { %v734_v55 = vsel %vm10382_vm4, %v10408_v50, %v733_v41  ;;  %v1269_v41 = vshll.u32 %v1263_v25, 16  ;;  %2800 = vmatpush.bf16.msra.mxu0 %v8476_v44  ;;  %v714_v62 = vrot.slane %v10408_v50, 4  ;;  %2921 = vmatpush.bf16.msra.mxu2 %v8564_v51  ;;  %v1346_v22 = vor.u32 %v1344_v59, %v1343_v58  ;;  %v1448_v44 = vld [vmem:[#allocation3 + $0x8] sm:$0x33] }
  0x97   : > { %735 = vst [vmem:[#allocation2 + $0x8] sm:$0x6] %v734_v55  ;;  %v8531_v55 = vld [vmem:[%s13484_s8 + $0xc0] sm:$0xf]  ;;  %v8460_v25 = vor.u32 %v9670_v7, %v8459_v6  ;;  %v1452_v58 = vrot.slane %v1448_v44, 7  ;;  %v13507_v6 = vmov 0 }
  0x98   : > { %v1271_v2 = vrot.slane %v1269_v41, 7  ;;  %v780_v41 = vld [vmem:[#allocation2 + $0x14] sm:$0x1]  ;;  %v8515_v51 = vld [vmem:[%s13484_s8 + $0xa0] sm:$0xf] }
  0x99   : > { %v8516_v54 = vor.u32 %v9684_v52, %v8515_v51  ;;  %v1508_v59 = vld [vmem:[#allocation3 + $0x8] sm:$0x33] }
  0x9a   : > { %1245 = vrot.lane.b32.xlu0 %v1241_v63, %s10120_s23  ;;  %s10124_s23 = smov 81   ;;  %2801 = vmatpush.bf16.msra.mxu0 %v8468_v60  ;;  %v1482_v60 = vshrl.u32 %v1472_v10, 16  ;;  %v1411_v63 = vshrl.u32 %v10399_v43, 16  ;;  %v8435_v43 = vld [vmem:[%s13484_s8] sm:$0xf] }
  0x9b   : > { %1378 = vrot.lane.b32.xlu2 %v1376_v61, %s10123_s28  ;;  %1311 = vrot.lane.b32.xlu1 %v1305_v0, %s10122_s3  ;;  %s10125_s28 = smov 62   ;;  %v9688_v61 = vld [vmem:[%s13484_s8 + $0xc4] sm:$0xf0]  ;;  %v1268_v0 = vrot.slane %v1266_v40, 6 }
  0x9c   : > { %v8532_v3 = vor.u32 %v9688_v61, %v8531_v55  ;;  %v1485_v61 = vshll.u32 %v1472_v10, 16  ;;  %v1484_v7 = vrot.slane %v1482_v60, 5  ;;  %v13517_v10 = vmov 0 }
  0x9d   : > { %v10465_v24 = vpop.permute.xlu2 %801  ;;  %v1272_v19 = vor.u32 %v1271_v2, %v1268_v0  ;;  %v8443_v0 = vld [vmem:[%s13484_s8 + $0x10] sm:$0xf]  ;;  %v9666_v2 = vld [vmem:[%s13484_s8 + $0x14] sm:$0xf0] }
  0x9e   : > { %2859 = vmatpush.bf16.msra.mxu1 %v8532_v3  ;;  %9932 = vmatpush.bf16.msra.mxu3 %v8532_v3  ;;  %v8507_v3 = vld [vmem:[%s13484_s8 + $0x90] sm:$0xf] }
  0x9f   : > { %2802 = vmatpush.bf16.msra.mxu0 %v8460_v25 }
  0xa2   : > { %1283 = vrot.lane.b32.xlu0 %v1280_v31, %s10124_s23  ;;  %v9686_v31 = vld [vmem:[%s13484_s8 + $0xb4] sm:$0xf0] }
  0xa3   : > { %10026 = vrot.lane.b32.xlu2 %v10025_v37, %s10125_s28  ;;  %1356 = vrot.lane.b32.xlu1 %v1353_v32, %s10126_s5  ;;  %v8524_v48 = vor.u32 %v9686_v31, %v8523_v30 }
  0xa4   : > { %v831_v4 = vpop.permute.xlu0 %830  ;;  %2803 = vmatpush.bf16.msra.mxu0 %v8452_v49 }
  0xa5   : > { %v710_v50 = vpop.permute.xlu2 %709  ;;  %v833_v11 = vrot.slane %v831_v4, 4  ;;  %v852_v12 = vsel %vm10518_vm1, %v831_v4, %v851_v57  ;;  %v829_v14 = vpop.permute.xlu1 %828  ;;  %2860 = vmatpush.bf16.msra.mxu1 %v8524_v48  ;;  %9933 = vmatpush.bf16.msra.mxu3 %v8524_v48  ;;  %v8444_v4 = vor.u32 %v9666_v2, %v8443_v0  ;;  %v10695_v0 = vld [vmem:[#allocation3 + $0x8] sm:$0x33]  ;;  %vm994_vm1 = vcmask 859136  }
  0xa6   : > { %v713_v15 = vrot.slane %v710_v50, 4  ;;  %853 = vst [vmem:[#allocation2 + $0x14] sm:$0xc] %v852_v12  ;;  %v832_v18 = vrot.slane %v829_v14, 4  ;;  %v8508_v12 = vor.u32 %v9682_v5, %v8507_v3  ;;  %v1471_v3 = vld [vmem:[#allocation3] sm:$0x33] }
  0xa8   : > { %v716_v27 = vsel %vm13381_vm6, %v713_v15, %v714_v62  ;;  %v834_v32 = vsel %vm13381_vm6, %v832_v18, %v833_v11  ;;  %v10612_v62 = vld [vmem:[#allocation3 + $0x8] sm:$0x33]  ;;  %vm13506_vm6 = vcmask 730112   ;;  %v1487_v11 = vrot.slane %v1485_v61, 6  ;;  %2804 = vmatpush.bf16.msra.mxu0 %v8444_v4 }
  0xa9   : > { %v718_v37 = vsel %vm13378_vm5, %v710_v50, %v716_v27  ;;  %v836_v39 = vsel %vm13379_vm3, %v829_v14, %v834_v32  ;;  %vm896_vm5 = vsmask.f32 7950  ;;  %vm899_vm3 = vsmask.f32 7966  ;;  %2861 = vmatpush.bf16.msra.mxu1 %v8516_v54  ;;  %9934 = vmatpush.bf16.msra.mxu3 %v8516_v54  ;;  %v9664_v50 = vld [vmem:[%s13484_s8 + $0x4] sm:$0xf0]  ;;  %vm10635_vm10 = vmand %vm13506_vm6, %vm13383_vm9 }
  0xaa   : > { %v729_v40 = vsel %vm10552_vm15, %v718_v37, %v728_v21  ;;  %v847_v46 = vsel %vm10560_vm2, %v836_v39, %v846_v13  ;;  %1309 = vrot.lane.b32.xlu0 %v1304_v16, %s10122_s3  ;;  %v13508_v6 = vsel %vm10635_vm10, 4294967295, %v13507_v6  ;;  %v8499_v13 = vld [vmem:[%s13484_s8 + $0x80] sm:$0xf]  ;;  %v9680_v14 = vld [vmem:[%s13484_s8 + $0x84] sm:$0xf0]  ;;  %vm10652_vm9 = vmand %vm13384_vm12, %vm896_vm5  ;;  %v8436_v15 = vor.u32 %v9664_v50, %v8435_v43 }
  0xab   : > { %730 = vst [vmem:[#allocation2] sm:$0x66] %v729_v40  ;;  %1354 = vrot.lane.b32.xlu2 %v1346_v22, %s10126_s5  ;;  %1281 = vrot.lane.b32.xlu1 %v1272_v19, %s10124_s23  ;;  %v13510_v28 = vsel %vm10652_vm9, 4294967295, %v13509_v28  ;;  %vm10659_vm0 = vmand %vm895_vm7, %vm896_vm5  ;;  %vm13387_vm6 = vcmask 1031168   ;;  %v1540_v27 = vshrl.u32 %v10612_v62, 16  ;;  %v8500_v19 = vor.u32 %v9680_v14, %v8499_v13  ;;  %s10132_s23 = smov 40  }
  0xac   : > { %848 = vst [vmem:[#allocation2 + $0xc] sm:$0xcc] %v847_v46  ;;  %v10601_v16 = vpop.permute.xlu0 %750  ;;  %vm13516_vm5 = vcmask 729088   ;;  %v1543_v38 = vshll.u32 %v10612_v62, 16  ;;  %v1413_v39 = vrot.slane %v1411_v63, 4  ;;  %v1488_v48 = vor.u32 %v1487_v11, %v1484_v7  ;;  %2805 = vmatpush.bf16.msra.mxu0 %v8436_v15  ;;  %s10133_s5 = smov 38  }
  0xad   : > { %v10603_v53 = vpop.permute.xlu2 %987  ;;  %v781_v55 = vsel %vm10589_vm13, %v10601_v16, %v780_v41  ;;  %v10608_v57 = vpop.permute.xlu1 %746  ;;  %2862 = vmatpush.bf16.msra.mxu1 %v8508_v12  ;;  %9935 = vmatpush.bf16.msra.mxu3 %v8508_v12  ;;  %v907_v41 = vld [vmem:[#allocation2 + $0x14] sm:$0x8]  ;;  %v1529_v50 = vld [vmem:[#allocation3] sm:$0x33]  ;;  %v1570_v13 = vrot.slane %v10695_v0, 5  ;;  %v755_v14 = vrot.slane %v10601_v16, 4 }
  0xae   : > { %782 = vst [vmem:[#allocation2 + $0x14] sm:$0x1] %v781_v55  ;;  %v753_v18 = vrot.slane %v10608_v57, 4  ;;  %v1507_v55 = vld [vmem:[#allocation3] sm:$0x33]  ;;  %v1545_v60 = vrot.slane %v1543_v38, 7  ;;  %v1414_v61 = vor.u32 %v1413_v39, %v10443_v9 }
  0xaf   : > { %767 = vst.msk [vmem:[#allocation2 + $0x8] sm:$0x8] %vm13384_vm12, %v10608_v57  ;;  %vm13513_vm12 = vcmask 1047559   ;;  %v1542_v57 = vrot.slane %v1540_v27, 6  ;;  %v1477_v21 = vshll.u32 %v1471_v3, 16  ;;  %v1535_v31 = vshll.u32 %v1529_v50, 16 }
  0xb0   : > { %vm10668_vm2 = vmand %vm13513_vm12, %vm899_vm3  ;;  %vm13521_vm12 = vcmask 1006592   ;;  %v1415_v12 = vrot.slane %v1414_v61, 4  ;;  %v804_v16 = vrot.slane %v10465_v24, 4  ;;  %v991_v39 = vrot.slane %v10603_v53, 4  ;;  %v935_v4 = vld [vmem:[#allocation2 + $0x18] sm:$0x66] }
  0xb1   : > { %vm10684_vm7 = vmor %vm10668_vm2, %vm10659_vm0  ;;  %2863 = vmatpush.bf16.msra.mxu1 %v8500_v19  ;;  %9936 = vmatpush.bf16.msra.mxu3 %v8500_v19  ;;  %vm13522_vm2 = vsmask.f32 256  ;;  %vm13523_vm0 = vcmask 1040384   ;;  %v1546_v11 = vor.u32 %v1545_v60, %v1542_v57  ;;  %v1572_v0 = vrot.slane %v1570_v13, 4  ;;  %v1604_v57 = vld [vmem:[#allocation3] sm:$0x33] }
  0xb2   : > { %1455 = vrot.lane.b32.xlu0 %v1452_v58, %s10127_s22  ;;  %v13518_v10 = vsel %vm10684_vm7, 4294967295, %v13517_v10 }
  0xb3   : > { %1307 = vrot.lane.b32.xlu2 %v1303_v36, %s10122_s3  ;;  %1513 = vrot.lane.b32.xlu1 %v1508_v59, %s10128_s24  ;;  %v1447_v36 = vld [vmem:[#allocation3] sm:$0x33]  ;;  %v902_v63 = vld [vmem:[#allocation2 + $0xc] sm:$0x88]  ;;  %s10129_s3 = smov 60  }
  0xb4   : > { %v10017_v22 = vpop.permute.xlu0 %10016  ;;  %v1451_v46 = vrot.slane %v1447_v36, 7  ;;  %v775_v36 = vld [vmem:[#allocation2 + $0xc] sm:$0x11] }
  0xb5   : > { %v10663_v25 = vpop.permute.xlu2 %880  ;;  %v819_v30 = vld [vmem:[#allocation2 + $0x14] sm:$0x3]  ;;  %v10019_v32 = vunpack.i.h.bf16 %v10017_v22  ;;  %v10018_v37 = vunpack.i.l.bf16 %v10017_v22  ;;  %v745_v29 = vpop.permute.xlu1 %744  ;;  %v13530_v22 = vmov 0 }
  0xb6   : > { %912 = vst.msk [vmem:[#allocation2 + $0x20] sm:$0x1] %vm13516_vm5, %v10663_v25  ;;  %v820_v40 = vsel %vm10635_vm10, %v10465_v24, %v819_v30  ;;  %v752_v44 = vrot.slane %v745_v29, 4  ;;  %vm13519_vm5 = vcmask 1043456   ;;  %v8335_v27 = vld [vmem:[#allocation2 + $0x8] sm:$0xf] }
  0xb7   : > { %821 = vst [vmem:[#allocation2 + $0x14] sm:$0x3] %v820_v40  ;;  %v882_v49 = vrot.slane %v10019_v32, 4  ;;  %v883_v51 = vrot.slane %v10018_v37, 4  ;;  %v908_v52 = vsel %vm10652_vm9, %v10018_v37, %v907_v41  ;;  %vm13520_vm3 = vmmov %vm13519_vm5  ;;  %v1532_v30 = vshrl.u32 %v1529_v50, 16 }
  0xb8   : > { %909 = vst [vmem:[#allocation2 + $0x14] sm:$0x8] %v908_v52  ;;  %v756_v54 = vsel %vm13519_vm5, %v752_v44, %v753_v18  ;;  %vm10699_vm5 = vmand %vm13523_vm0, %vm13522_vm2  ;;  %v1474_v18 = vshrl.u32 %v1471_v3, 16  ;;  %vm13533_vm2 = vcmask 1031168   ;;  %vm13534_vm9 = vsmask.f32 2304 }
  0xb9   : > { %v886_v58 = vsel %vm13520_vm3, %v882_v49, %v883_v51  ;;  %v758_v59 = vsel %vm13387_vm6, %v745_v29, %v756_v54  ;;  %vm13526_vm3 = vsmask.f32 4352  ;;  %vm13535_vm10 = vcmask 1042433   ;;  %v1001_v24 = vld [vmem:[#allocation2 + $0x2c] sm:$0x3] }
  0xba   : > { %v888_v62 = vsel %vm13521_vm12, %v10019_v32, %v886_v58  ;;  %765 = vst [vmem:[#allocation2] sm:$0x88] %v758_v59  ;;  %1453 = vrot.lane.b32.xlu0 %v1451_v46, %s10127_s22  ;;  %vm13527_vm12 = vcmask 1044484   ;;  %v1476_v41 = vrot.slane %v1474_v18, 5  ;;  %v1479_v44 = vrot.slane %v1477_v21, 6  ;;  %s10135_s22 = smov 39  }
  0xbb   : > { %1491 = vrot.lane.b32.xlu2 %v1488_v48, %s10129_s3  ;;  %v903_v9 = vsel %vm10684_vm7, %v888_v62, %v902_v63  ;;  %1511 = vrot.lane.b32.xlu1 %v1507_v55, %s10128_s24  ;;  %vm10708_vm6 = vmand %vm13527_vm12, %vm13526_vm3  ;;  %vm13532_vm3 = vcmask 1043456   ;;  %vm812_vm12 = vsmask.f32 7954  ;;  %vm932_vm7 = vsmask.f32 6400  ;;  %s10140_s24 = smov 35  }
  0xbc   : > { %904 = vst [vmem:[#allocation2 + $0xc] sm:$0x88] %v903_v9  ;;  %v10712_v5 = vpop.permute.xlu0 %799  ;;  %vm10722_vm0 = vmor %vm10708_vm6, %vm10699_vm5  ;;  %vm13538_vm5 = vcmask 736256   ;;  %v1534_v49 = vrot.slane %v1532_v30, 6  ;;  %v1537_v51 = vrot.slane %v1535_v31, 7  ;;  %v1406_v52 = vshrl.u32 %v10397_v42, 16 }
  0xbd   : > { %v10714_v43 = vpop.permute.xlu2 %1022  ;;  %v749_v7 = vpop.permute.xlu1 %748  ;;  %v13531_v22 = vsel %vm10722_vm0, 4294967295, %v13530_v22  ;;  %vm10733_vm6 = vmand %vm13535_vm10, %vm13534_vm9  ;;  %v803_v48 = vrot.slane %v10712_v5, 4  ;;  %v924_v54 = vrot.slane %v10364_v23, 4  ;;  %v998_v42 = vld [vmem:[#allocation2 + $0x24] sm:$0x33]  ;;  %vm13400_vm9 = vcmask 998400  }
  0xbe   : > { %v754_v15 = vrot.slane %v749_v7, 4  ;;  %v1480_v63 = vor.u32 %v1479_v44, %v1476_v41  ;;  %v13551_v3 = vmov 0  ;;  %v1538_v50 = vor.u32 %v1537_v51, %v1534_v49 }
  0xbf   : > { %v9638_v19 = vld [vmem:[#allocation2 + $0x10] sm:$0xf0]  ;;  %v1026_v31 = vrot.slane %v10714_v43, 4 }
  0xc0   : > { %v759_v32 = vsel %vm13532_vm3, %v754_v15, %v755_v14  ;;  %v10727_v37 = vor.u32 %v9638_v19, %v8335_v27  ;;  %vm13540_vm3 = vcmask 1041408   ;;  %v1639_v19 = vld [vmem:[#allocation3 + $0x8] sm:$0x33] }
  0xc1   : > { %v760_v29 = vsel %vm13533_vm2, %v749_v7, %v759_v32  ;;  %vm13539_vm2 = vsmask.f32 7938  ;;  %v1408_v7 = vrot.slane %v1406_v52, 4  ;;  %v1643_v44 = vrot.slane %v1639_v19, 6 }
  0xc2   : > { %v776_v40 = vsel %vm10722_vm0, %v760_v29, %v775_v36  ;;  %8609 = vmatmul.msk.bf16.vlgmr.msra.gmra.mxu2 %vm13538_vm5, %v10727_v37  ;;  %1549 = vrot.lane.b32.xlu0 %v1546_v11, %s10130_s29  ;;  %vm10745_vm10 = vmand %vm13540_vm3, %vm13539_vm2  ;;  %vm13543_vm5 = vcmask 1046533   ;;  %vm13546_vm3 = vcmask 1045508   ;;  %v13553_v11 = vmov 0  ;;  %v1714_v29 = vld [vmem:[#allocation3 + $0x8] sm:$0x33] }
  0xc3   : > { %777 = vst [vmem:[#allocation2 + $0xc] sm:$0x11] %v776_v40  ;;  %1422 = vrot.lane.b32.xlu1 %v1415_v12, %s10125_s28  ;;  %1575 = vrot.lane.b32.xlu2 %v1570_v13, %s10131_s30  ;;  %vm10756_vm2 = vmand %vm13543_vm5, %vm932_vm7  ;;  %vm971_vm7 = vsmask.f32 7946  ;;  %vm13549_vm5 = vcmask 1043456   ;;  %v1409_v30 = vor.u32 %v1408_v7, %v10441_v8  ;;  %v1718_v8 = vrot.slane %v1714_v29, 7 }
  0xc4   : > { %v990_v55 = vpop.permute.xlu0 %989  ;;  %vm10764_vm0 = vmand %vm13546_vm3, %vm812_vm12  ;;  %v805_v2 = vsel %vm13549_vm5, %v803_v48, %v804_v16  ;;  %v1565_v48 = vld [vmem:[#allocation3] sm:$0x33]  ;;  %v1663_v7 = vld [vmem:[#allocation3 + $0x8] sm:$0x33] }
  0xc5   : > { %v10760_v58 = vpop.permute.xlu2 %1047  ;;  %v992_v60 = vrot.slane %v990_v55, 4  ;;  %v1002_v23 = vsel %vm10337_vm11, %v990_v55, %v1001_v24  ;;  %v920_v61 = vpop.permute.xlu1 %919  ;;  %vm13550_vm13 = vmmov %vm13549_vm5  ;;  %v1410_v46 = vrot.slane %v1409_v30, 4  ;;  %v1669_v30 = vshll.u32 %v1663_v7, 16 }
  0xc6   : > { %1003 = vst [vmem:[#allocation2 + $0x2c] sm:$0x3] %v1002_v23  ;;  %v923_v62 = vrot.slane %v920_v61, 4  ;;  %vm10776_vm12 = vmor %vm10756_vm2, %vm10733_vm6  ;;  %vm13556_vm6 = vcmask 1022976   ;;  %v1055_v55 = vrot.slane %v10760_v58, 4  ;;  %v885_v23 = vrot.slane %v10663_v25, 4 }
  0xc7   : > { %v993_v9 = vsel %vm13550_vm13, %v991_v39, %v992_v60  ;;  %v13552_v3 = vsel %vm10776_vm12, 4294967295, %v13551_v3  ;;  %vm10784_vm3 = vmor %vm10764_vm0, %vm10745_vm10  ;;  %v807_v15 = vsel %vm13556_vm6, %v10712_v5, %v805_v2  ;;  %vm13557_vm0 = vcmask 732162   ;;  %v980_v5 = vld [vmem:[#allocation2 + $0x20] sm:$0xc]  ;;  %v9636_v60 = vld [vmem:[#allocation2 + $0x4] sm:$0xf] }
  0xc8   : > { %v13554_v11 = vsel %vm10784_vm3, 4294967295, %v13553_v11  ;;  %v995_v12 = vsel %vm994_vm1, %v10603_v53, %v993_v9  ;;  %vm13555_vm13 = vmmov %vm13549_vm5  ;;  %v13558_v53 = vmov 0  ;;  %vm1029_vm10 = vcmask 850944  }
  0xc9   : > { %v925_v13 = vsel %vm13555_vm13, %v923_v62, %v924_v54  ;;  %v999_v14 = vsel %vm10301_vm8, %v995_v12, %v998_v42  ;;  %vm10801_vm1 = vmand %vm13557_vm0, %vm971_vm7  ;;  %v10819_v54 = vld [vmem:[#allocation3 + $0x8] sm:$0x33]  ;;  %vm13561_vm13 = vcmask 1043458   ;;  %v8327_v42 = vld [vmem:[#allocation2] sm:$0xf] }
  0xca   : > { %v927_v36 = vsel %vm13400_vm9, %v920_v61, %v925_v13  ;;  %v815_v18 = vld [vmem:[#allocation2 + $0xc] sm:$0x33]  ;;  %1000 = vst [vmem:[#allocation2 + $0x24] sm:$0x33] %v999_v14  ;;  %1489 = vrot.lane.b32.xlu0 %v1480_v63, %s10129_s3  ;;  %v13559_v53 = vsel %vm10801_vm1, 4294967295, %v13558_v53  ;;  %vm13560_vm2 = vmmov %vm13549_vm5  ;;  %vm13578_vm9 = vcmask 1043456  }
  0xcb   : > { %v936_v21 = vsel %vm10776_vm12, %v927_v36, %v935_v4  ;;  %v816_v27 = vsel %vm10784_vm3, %v807_v15, %v815_v18  ;;  %1547 = vrot.lane.b32.xlu1 %v1538_v50, %s10130_s29  ;;  %1579 = vrot.lane.b32.xlu2 %v1572_v0, %s10131_s30  ;;  %vm973_vm5 = vsmask.f32 7962  ;;  %vm10824_vm6 = vmand %vm13561_vm13, %vm971_vm7  ;;  %vm13564_vm7 = vcmask 1047558   ;;  %v1638_v4 = vld [vmem:[#allocation3] sm:$0x33]  ;;  %s10141_s3 = smov 18  }
  0xcc   : > { %937 = vst [vmem:[#allocation2 + $0x18] sm:$0x66] %v936_v21  ;;  %v963_v32 = vpop.permute.xlu0 %962  ;;  %vm10835_vm0 = vmand %vm13564_vm7, %vm973_vm5  ;;  %v10845_v50 = vld [vmem:[#allocation3] sm:$0x33]  ;;  %vm967_vm5 = vcmask 867328   ;;  %v1614_v18 = vshrl.u32 %v10819_v54, 16 }
  0xcd   : > { %817 = vst [vmem:[#allocation2 + $0xc] sm:$0x33] %v816_v27  ;;  %v10811_v16 = vpop.permute.xlu2 %1051  ;;  %v981_v38 = vsel %vm10801_vm1, %v963_v32, %v980_v5  ;;  %v1036_v39 = vld [vmem:[#allocation2 + $0x2c] sm:$0x6]  ;;  %v1025_v40 = vpop.permute.xlu1 %1024  ;;  %v965_v14 = vrot.slane %v963_v32, 4  ;;  %vm13568_vm13 = vcmask 1043456   ;;  %vm10856_vm7 = vmor %vm10835_vm0, %vm10824_vm6 }
  0xce   : > { %982 = vst [vmem:[#allocation2 + $0x20] sm:$0xc] %v981_v38  ;;  %v1027_v24 = vrot.slane %v1025_v40, 4  ;;  %v1037_v41 = vsel %vm10382_vm4, %v1025_v40, %v1036_v39  ;;  %v13569_v27 = vmov 0  ;;  %v1642_v5 = vrot.slane %v1638_v4, 6  ;;  %s10142_s29 = smov 16  }
  0xcf   : > { %1038 = vst [vmem:[#allocation2 + $0x2c] sm:$0x6] %v1037_v41  ;;  %v13570_v27 = vsel %vm10856_vm7, 4294967295, %v13569_v27  ;;  %v1665_v19 = vshll.u32 %v10845_v50, 16  ;;  %v1616_v40 = vrot.slane %v1614_v18, 7  ;;  %vm13572_vm6 = vcmask 729088  }
  0xd0   : > { %v1028_v49 = vsel %vm13560_vm2, %v1026_v31, %v1027_v24  ;;  %vm13567_vm2 = vcmask 732163   ;;  %v1617_v24 = vshll.u32 %v10819_v54, 16  ;;  %v1738_v41 = vld [vmem:[#allocation3 + $0x8] sm:$0x33]  ;;  %vm13573_vm0 = vcmask 736256  }
  0xd1   : > { %v1030_v51 = vsel %vm1029_vm10, %v10714_v43, %v1028_v49  ;;  %v1033_v52 = vld [vmem:[#allocation2 + $0x24] sm:$0x66]  ;;  %v1569_v43 = vrot.slane %v1565_v48, 5  ;;  %vm1060_vm10 = vcmask 842752   ;;  %v1671_v48 = vrot.slane %v1669_v30, 5 }
  0xd2   : > { %v1034_v59 = vsel %vm10552_vm15, %v1030_v51, %v1033_v52  ;;  %1646 = vrot.lane.b32.xlu0 %v1643_v44, %s10132_s23  ;;  %v1677_v44 = vshrl.u32 %v1663_v7, 16  ;;  %v1619_v7 = vor.u32 %v1617_v24, %v1616_v40 }
  0xd3   : > { %1035 = vst [vmem:[#allocation2 + $0x24] sm:$0x66] %v1034_v59  ;;  %1721 = vrot.lane.b32.xlu1 %v1718_v8, %s10133_s5  ;;  %1420 = vrot.lane.b32.xlu2 %v1410_v46, %s10125_s28  ;;  %v1571_v15 = vrot.slane %v1569_v43, 4  ;;  %v976_v29 = vld [vmem:[#allocation2 + $0x18] sm:$0xcc]  ;;  %v10871_v46 = vrot.slane %v1665_v19, 5 }
  0xd4   : > { %v9637_v61 = vld [vmem:[#allocation2 + $0x8] sm:$0xf0]  ;;  %v8329_v62 = vld [vmem:[#allocation2 + $0xc] sm:$0xf0]  ;;  %v1050_v63 = vpop.permute.xlu0 %1049  ;;  %v1073_v19 = vld [vmem:[#allocation2 + $0x38] sm:$0x1] }
  0xd5   : > { %v10839_v0 = vpop.permute.xlu2 %1225  ;;  %v10841_v2 = vor.u32 %v9637_v61, %v8327_v42  ;;  %v10843_v9 = vor.u32 %v9636_v60, %v8329_v62  ;;  %v1056_v12 = vrot.slane %v1050_v63, 4  ;;  %1069 = vst.msk [vmem:[#allocation2 + $0x2c] sm:$0x8] %vm13567_vm2, %v1050_v63  ;;  %v961_v13 = vpop.permute.xlu1 %960  ;;  %vm13571_vm2 = vmmov %vm13568_vm13  ;;  %v1713_v8 = vld [vmem:[#allocation3] sm:$0x33]  ;;  %v1748_v60 = vshrl.u32 %v1738_v41, 16 }
  0xd6   : > { %v964_v36 = vrot.slane %v961_v13, 4  ;;  %v8347_v52 = vld [vmem:[#allocation2 + $0x20] sm:$0xf]  ;;  %v1717_v62 = vrot.slane %v1713_v8, 7  ;;  %v1679_v63 = vrot.slane %v1677_v44, 4  ;;  %s10134_s28 = smov 56  }
  0xd7   : > { %2806 = vmatmul.bf16.vlgmr.msra.gmra.mxu0 %v10841_v2  ;;  %2864 = vmatmul.bf16.vlgmr.msra.gmra.mxu1 %v10843_v9  ;;  %v1059_v21 = vsel %vm13568_vm13, %v1055_v55, %v1056_v12  ;;  %vm13403_vm13 = vcmask 687104   ;;  %v10030_v12 = vpack.i.bf16 %v10871_v46, %v1671_v48  ;;  %v1750_v18 = vrot.slane %v1748_v60, 5  ;;  %v1260_v8 = vld [vmem:[#allocation2 + $0x50] sm:$0x3] }
  0xd8   : > { %v1061_v31 = vsel %vm1060_vm10, %v10760_v58, %v1059_v21  ;;  %v966_v32 = vsel %vm13571_vm2, %v964_v36, %v965_v14  ;;  %v1202_v58 = vld [vmem:[#allocation2 + $0x44] sm:$0x6]  ;;  %v1737_v36 = vld [vmem:[#allocation3] sm:$0x33]  ;;  %v1680_v30 = vor.u32 %v1679_v63, %v1671_v48 }
  0xd9   : > { %1068 = vst [vmem:[#allocation2 + $0x24] sm:$0x88] %v1061_v31  ;;  %v968_v38 = vsel %vm967_vm5, %v961_v13, %v966_v32  ;;  %v1607_v13 = vshrl.u32 %v1604_v57, 16  ;;  %vm13574_vm5 = vmmov %vm13571_vm2  ;;  %vm13575_vm2 = vcmask 1006592   ;;  %v1057_v31 = vrot.slane %v10811_v16, 4 }
  0xda   : > { %v977_v39 = vsel %vm10856_vm7, %v968_v38, %v976_v29  ;;  %1573 = vrot.lane.b32.xlu0 %v1569_v43, %s10131_s30  ;;  %v1751_v43 = vshll.u32 %v1738_v41, 16  ;;  %v1129_v32 = vld [vmem:[#allocation2 + $0x38] sm:$0xc]  ;;  %v1610_v38 = vshll.u32 %v1604_v57, 16  ;;  %v1070_v57 = vld [vmem:[#allocation2 + $0x30] sm:$0x11] }
  0xdb   : > { %978 = vst [vmem:[#allocation2 + $0x18] sm:$0xcc] %v977_v39  ;;  %1577 = vrot.lane.b32.xlu1 %v1571_v15, %s10131_s30  ;;  %1644 = vrot.lane.b32.xlu2 %v1642_v5, %s10132_s23  ;;  %v1228_v5 = vrot.slane %v10839_v0, 4  ;;  %v1609_v29 = vrot.slane %v1607_v13, 7  ;;  %v1740_v39 = vshrl.u32 %v1737_v36, 16  ;;  %v1681_v60 = vrot.slane %v1680_v30, 4 }
  0xdc   : > { %v10873_v49 = vpop.permute.xlu0 %1189  ;;  %v9641_v55 = vld [vmem:[#allocation2 + $0x28] sm:$0xf0]  ;;  %v1753_v21 = vrot.slane %v1751_v43, 6  ;;  %v1743_v43 = vshll.u32 %v1737_v36, 16  ;;  %s10143_s30 = smov 15   ;;  %s10144_s23 = smov 13  }
  0xdd   : > { %v10875_v51 = vpop.permute.xlu2 %1158  ;;  %v1192_v54 = vrot.slane %v10873_v49, 4  ;;  %v879_v59 = vpop.permute.xlu1 %878  ;;  %v10880_v42 = vor.u32 %v9641_v55, %v8347_v52  ;;  %v1742_v63 = vrot.slane %v1740_v39, 5 }
  0xde   : > { %1180 = vst.msk [vmem:[#allocation2 + $0x44] sm:$0x1] %vm13572_vm6, %v10875_v51  ;;  %v884_v61 = vrot.slane %v879_v59, 4  ;;  %vm13402_vm6 = vcmask 678912   ;;  %v1754_v52 = vor.u32 %v1753_v21, %v1750_v18  ;;  %v1745_v30 = vrot.slane %v1743_v43, 6 }
  0xdf   : > { %v1196_v4 = vsel %vm13403_vm13, %v10873_v49, %v1192_v54  ;;  %8610 = vmatmul.msk.bf16.gmra.mxu2 %vm13573_vm0, %v10880_v42  ;;  %vm13401_vm0 = vcmask 670720   ;;  %v1232_v55 = vsel %vm13402_vm6, %v10839_v0, %v1228_v5  ;;  %vm1165_vm6 = vcmask 818176   ;;  %v1905_v49 = vld [vmem:[#allocation3 + $0x8] sm:$0x33] }
  0xe0   : > { %v1203_v14 = vsel %vm10359_vm14, %v1196_v4, %v1202_v58  ;;  %v889_v25 = vsel %vm13574_vm5, %v884_v61, %v885_v23  ;;  %vm13576_vm5 = vnez %v13505_v47  ;;  %v10915_v4 = vld [vmem:[#allocation3 + $0x8] sm:$0x33]  ;;  %vm13584_vm14 = vcmask 687104  }
  0xe1   : > { %1204 = vst [vmem:[#allocation2 + $0x44] sm:$0x6] %v1203_v14  ;;  %v890_v15 = vsel %vm13575_vm2, %v879_v59, %v889_v25  ;;  %vm13577_vm2 = vnez %v13495_v56  ;;  %v9640_v14 = vld [vmem:[#allocation2 + $0x20] sm:$0xf0]  ;;  %v8341_v25 = vld [vmem:[#allocation2 + $0x24] sm:$0xf0] }
  0xe2   : > { %910 = vst [vmem:[#allocation2 + $0x18] sm:$0x11] %v890_v15  ;;  %1719 = vrot.lane.b32.xlu0 %v1717_v62, %s10133_s5  ;;  %v1612_v62 = vor.u32 %v1610_v38, %v1609_v29  ;;  %v1836_v38 = vrot.slane %v10915_v4, 5  ;;  %v1257_v4 = vld [vmem:[#allocation2 + $0x48] sm:$0x33]  ;;  %s10145_s5 = smov 14  }
  0xe3   : > { %1622 = vrot.lane.b32.xlu1 %v1619_v7, %s10134_s28  ;;  %10031 = vrot.lane.b32.xlu2 %v10030_v12, %s10135_s22 }
  0xe4   : > { %v1054_v40 = vpop.permute.xlu0 %1053 }
  0xe5   : > { %v10899_v24 = vpop.permute.xlu2 %1247  ;;  %v1058_v41 = vrot.slane %v1054_v40, 4  ;;  %v1074_v44 = vsel %vm13576_vm5, %v1054_v40, %v1073_v19  ;;  %v1118_v58 = vpop.permute.xlu1 %1117 }
  0xe6   : > { %v1250_v48 = vrot.slane %v10899_v24, 4  ;;  %1075 = vst [vmem:[#allocation2 + $0x38] sm:$0x1] %v1074_v44  ;;  %v1130_v59 = vsel %vm13577_vm2, %v1118_v58, %v1129_v32  ;;  %v1163_v32 = vrot.slane %v10875_v51, 4  ;;  %v1120_v29 = vrot.slane %v1118_v58, 4 }
  0xe7   : > { %v1062_v23 = vsel %vm13578_vm9, %v1057_v31, %v1058_v41  ;;  %1131 = vst [vmem:[#allocation2 + $0x38] sm:$0xc] %v1130_v59  ;;  %vm13579_vm9 = vnez %v13531_v22  ;;  %v1672_v31 = vshrl.u32 %v10845_v50, 16  ;;  %v2256_v22 = vld [vmem:[#allocation2 + $0xd4] sm:$0x6] }
  0xe8   : > { %v1254_v61 = vsel %vm13401_vm0, %v10899_v24, %v1250_v48  ;;  %v1238_v7 = vld [vmem:[#allocation2 + $0x44] sm:$0xc]  ;;  %v1063_v12 = vsel %vm1060_vm10, %v10811_v16, %v1062_v23  ;;  %vm1122_vm10 = vcmask 826368   ;;  %vm13580_vm0 = vcmask 1043456  }
  0xe9   : > { %v1261_v13 = vsel %vm10337_vm11, %v1254_v61, %v1260_v8  ;;  %v1239_v36 = vsel %vm10801_vm1, %v1232_v55, %v1238_v7  ;;  %v1071_v15 = vsel %vm13579_vm9, %v1063_v12, %v1070_v57  ;;  %v8339_v18 = vld [vmem:[#allocation2 + $0x18] sm:$0xf]  ;;  %v9639_v21 = vld [vmem:[#allocation2 + $0x1c] sm:$0xf]  ;;  %v1126_v8 = vld [vmem:[#allocation2 + $0x30] sm:$0xcc]  ;;  %vm13583_vm11 = vnez %v13503_v26 }
  0xea   : > { %1262 = vst [vmem:[#allocation2 + $0x50] sm:$0x3] %v1261_v13  ;;  %1757 = vrot.lane.b32.xlu0 %v1754_v52, %s10136_s26  ;;  %v10926_v19 = vor.u32 %v9640_v14, %v8339_v18  ;;  %v10928_v16 = vor.u32 %v9639_v21, %v8341_v25  ;;  %v1746_v52 = vor.u32 %v1745_v30, %v1742_v63  ;;  %v1674_v58 = vrot.slane %v1672_v31, 4  ;;  %v1199_v57 = vld [vmem:[#allocation2 + $0x3c] sm:$0x66]  ;;  %vm13581_vm13 = vmmov %vm13580_vm0 }
  0xeb   : > { %1240 = vst [vmem:[#allocation2 + $0x44] sm:$0xc] %v1239_v36  ;;  %1688 = vrot.lane.b32.xlu1 %v1681_v60, %s10135_s22  ;;  %1620 = vrot.lane.b32.xlu2 %v1612_v62, %s10134_s28  ;;  %v1838_v60 = vrot.slane %v1836_v38, 4  ;;  %vm13582_vm1 = vmmov %vm13580_vm0  ;;  %v1774_v62 = vld [vmem:[#allocation3 + $0x8] sm:$0x33]  ;;  %v1909_v30 = vrot.slane %v1905_v49, 6 }
  0xec   : > { %1072 = vst [vmem:[#allocation2 + $0x30] sm:$0x11] %v1071_v15  ;;  %2811 = vmatmul.bf16.gmra.mxu0 %v10926_v19  ;;  %2869 = vmatmul.bf16.gmra.mxu1 %v10928_v16  ;;  %v1116_v39 = vpop.permute.xlu0 %1115  ;;  %v1675_v13 = vor.u32 %v1674_v58, %v10871_v46  ;;  %v1796_v36 = vld [vmem:[#allocation3 + $0x8] sm:$0x33]  ;;  %s10146_s28 = smov 12  }
  0xed   : > { %v1157_v40 = vpop.permute.xlu2 %1156  ;;  %v1119_v41 = vrot.slane %v1116_v39, 4  ;;  %v1188_v44 = vpop.permute.xlu1 %1187 }
  0xee   : > { %v1162_v50 = vrot.slane %v1157_v40, 4  ;;  %v1191_v51 = vrot.slane %v1188_v44, 4  ;;  %v1676_v31 = vrot.slane %v1675_v13, 4 }
  0xef   : > { %v1121_v55 = vsel %vm13580_vm0, %v1119_v41, %v1120_v29  ;;  %v10958_v29 = vld [vmem:[#allocation3] sm:$0x33] }
  0xf0   : > { %v1167_v59 = vsel %vm13581_vm13, %v1162_v50, %v1163_v32  ;;  %v1123_v43 = vsel %vm1122_vm10, %v1116_v39, %v1121_v55  ;;  %v1193_v23 = vsel %vm13582_vm1, %v1191_v51, %v1192_v54  ;;  %v1106_v54 = vld [vmem:[#allocation2 + $0x38] sm:$0x3]  ;;  %v1176_v32 = vld [vmem:[#allocation2 + $0x38] sm:$0x8]  ;;  %v1806_v39 = vshrl.u32 %v1796_v36, 16  ;;  %vm13587_vm13 = vmmov %vm13580_vm0 }
  0xf1   : > { %v1168_v61 = vsel %vm1165_vm6, %v1157_v40, %v1167_v59  ;;  %v1127_v63 = vsel %vm13583_vm11, %v1123_v43, %v1126_v8  ;;  %v1195_v7 = vsel %vm13584_vm14, %v1188_v44, %v1193_v23  ;;  %vm13585_vm14 = vnez %v13508_v6  ;;  %v1773_v8 = vld [vmem:[#allocation3] sm:$0x33]  ;;  %v10962_v51 = vld [vmem:[#allocation3 + $0x8] sm:$0x33]  ;;  %vm13589_vm10 = vmmov %vm13587_vm13 }
  0xf2   : > { %1179 = vst [vmem:[#allocation2 + $0x3c] sm:$0x11] %v1168_v61  ;;  %v1200_v12 = vsel %vm10776_vm12, %v1195_v7, %v1199_v57  ;;  %1755 = vrot.lane.b32.xlu0 %v1746_v52, %s10136_s26  ;;  %v1809_v40 = vshll.u32 %v1796_v36, 16  ;;  %vm13586_vm1 = vnez %v13510_v28  ;;  %v1835_v55 = vrot.slane %v10958_v29, 5  ;;  %v10967_v57 = vld [vmem:[#allocation3] sm:$0x33] }
  0xf3   : > { %1128 = vst [vmem:[#allocation2 + $0x30] sm:$0xcc] %v1127_v63  ;;  %1779 = vrot.lane.b32.xlu1 %v1774_v62, %s10137_s27  ;;  %1845 = vrot.lane.b32.xlu2 %v1838_v60, %s10138_s1  ;;  %v1808_v60 = vrot.slane %v1806_v39, 6  ;;  %v1880_v23 = vshrl.u32 %v10962_v51, 16  ;;  %v10973_v61 = vld [vmem:[#allocation3 + $0x8] sm:$0x33]  ;;  %vm13588_vm0 = vnez %v13518_v10 }
  0xf4   : > { %1201 = vst [vmem:[#allocation2 + $0x3c] sm:$0x66] %v1200_v12  ;;  %v1095_v14 = vpop.permute.xlu0 %1094  ;;  %v1811_v43 = vrot.slane %v1809_v40, 7  ;;  %v1904_v12 = vld [vmem:[#allocation3] sm:$0x33]  ;;  %v1931_v36 = vshll.u32 %v10967_v57, 16 }
  0xf5   : > { %v10954_v25 = vpop.permute.xlu2 %1378  ;;  %v1107_v15 = vsel %vm13585_vm14, %v1095_v14, %v1106_v54  ;;  %v10022_v18 = vpop.permute.xlu1 %10021  ;;  %v1097_v13 = vrot.slane %v1095_v14, 4  ;;  %v1795_v39 = vld [vmem:[#allocation3] sm:$0x33]  ;;  %vm13591_vm12 = vcmask 678912   ;;  %s13444_s26 = smov 120  }
  0xf6   : > { %1108 = vst [vmem:[#allocation2 + $0x38] sm:$0x3] %v1107_v15  ;;  %v10024_v21 = vunpack.i.h.bf16 %v10022_v18  ;;  %v10023_v46 = vunpack.i.l.bf16 %v10022_v18  ;;  %v1837_v18 = vrot.slane %v1835_v55, 4  ;;  %v1103_v14 = vld [vmem:[#allocation2 + $0x30] sm:$0x33] }
  0xf7   : > { %v9693_v10 = vld [vmem:[%s13484_s8 + $0xf4] sm:$0xf] }
  0xf8   : > { %v1160_v41 = vrot.slane %v10024_v21, 4  ;;  %v1161_v44 = vrot.slane %v10023_v46, 4  ;;  %v1177_v50 = vsel %vm13586_vm1, %v10023_v46, %v1176_v32  ;;  %v1882_v32 = vrot.slane %v1880_v23, 7 }
  0xf9   : > { %1178 = vst [vmem:[#allocation2 + $0x38] sm:$0x8] %v1177_v50  ;;  %v10987_v50 = vld [vmem:[#allocation3] sm:$0x33] }
  0xfa   : > { %v1173_v52 = vld [vmem:[#allocation2 + $0x30] sm:$0x88]  ;;  %v1164_v58 = vsel %vm13587_vm13, %v1160_v41, %v1161_v44  ;;  %1912 = vrot.lane.b32.xlu0 %v1909_v30, %s10139_s4  ;;  %v1908_v30 = vrot.slane %v1904_v12, 6  ;;  %vm13590_vm13 = vmmov %vm13589_vm10  ;;  %v1382_v12 = vrot.slane %v10954_v25, 4 }
  0xfb   : > { %v1166_v59 = vsel %vm1165_vm6, %v10024_v21, %v1164_v58  ;;  %1686 = vrot.lane.b32.xlu1 %v1676_v31, %s10135_s22  ;;  %1777 = vrot.lane.b32.xlu2 %v1773_v8, %s10137_s27  ;;  %vm1099_vm6 = vcmask 834560   ;;  %v1935_v21 = vshll.u32 %v10973_v61, 16  ;;  %v1812_v31 = vor.u32 %v1811_v43, %v1808_v60  ;;  %s13615_s22 = smov 122   ;;  %s13446_s27 = smov 121  }
  0xfc   : > { %v1174_v62 = vsel %vm13588_vm0, %v1166_v59, %v1173_v52  ;;  %v1093_v63 = vpop.permute.xlu0 %1092  ;;  %v1235_v52 = vld [vmem:[#allocation2 + $0x3c] sm:$0xcc]  ;;  %v9644_v59 = vld [vmem:[#allocation2 + $0x40] sm:$0xf0]  ;;  %v1883_v60 = vshll.u32 %v10962_v51, 16  ;;  %v10993_v43 = vrot.slane %v1931_v36, 5 }
  0xfd   : > { %v10977_v7 = vpop.permute.xlu2 %10026  ;;  %1175 = vst [vmem:[#allocation2 + $0x30] sm:$0x88] %v1174_v62  ;;  %v1096_v49 = vrot.slane %v1093_v63, 4  ;;  %v1224_v54 = vpop.permute.xlu1 %1223  ;;  %v11000_v23 = vrot.slane %v1935_v21, 5  ;;  %v1798_v62 = vshrl.u32 %v1795_v39, 16  ;;  %v1801_v51 = vshll.u32 %v1795_v39, 16 }
  0xfe   : > { %v1227_v15 = vrot.slane %v1224_v54, 4  ;;  %v1335_v36 = vld [vmem:[#allocation2 + $0x5c] sm:$0x1]  ;;  %v1393_v21 = vld [vmem:[#allocation2 + $0x5c] sm:$0xc] }
  0xff   : > { %v1098_v46 = vsel %vm13589_vm10, %v1096_v49, %v1097_v13  ;;  %v10029_v13 = vunpack.i.h.bf16 %v10977_v7  ;;  %vm1385_vm10 = vcmask 637952   ;;  %v1800_v39 = vrot.slane %v1798_v62, 6 }
 0x100   : > { %v1100_v40 = vsel %vm1099_vm6, %v1093_v63, %v1098_v46  ;;  %v1229_v41 = vsel %vm13590_vm13, %v1227_v15, %v1228_v5  ;;  %v8359_v44 = vld [vmem:[#allocation2 + $0x38] sm:$0xf]  ;;  %v1873_v63 = vshrl.u32 %v10987_v50, 16  ;;  %vm13412_vm6 = vcmask 654336  }
 0x101   : > { %v1104_v8 = vsel %vm10784_vm3, %v1100_v40, %v1103_v14  ;;  %v1231_v58 = vsel %vm13591_vm12, %v1224_v54, %v1229_v41  ;;  %v10998_v5 = vor.u32 %v9644_v59, %v8359_v44  ;;  %vm13592_vm12 = vcmask 736256   ;;  %v1390_v41 = vld [vmem:[#allocation2 + $0x54] sm:$0xcc] }
 0x102   : > { %1105 = vst [vmem:[#allocation2 + $0x30] sm:$0x33] %v1104_v8  ;;  %v1236_v0 = vsel %vm10856_vm7, %v1231_v58, %v1235_v52  ;;  %1843 = vrot.lane.b32.xlu0 %v1837_v18, %s10138_s1  ;;  %v10028_v40 = vunpack.i.l.bf16 %v10977_v7  ;;  %v1803_v44 = vrot.slane %v1801_v51, 7  ;;  %v1875_v8 = vrot.slane %v1873_v63, 7 }
 0x103   : > { %1237 = vst [vmem:[#allocation2 + $0x3c] sm:$0xcc] %v1236_v0  ;;  %1910 = vrot.lane.b32.xlu1 %v1908_v30, %s10139_s4  ;;  %1815 = vrot.lane.b32.xlu2 %v1812_v31, %s10140_s24  ;;  %v1885_v30 = vor.u32 %v1883_v60, %v1882_v32  ;;  %v10035_v31 = vpack.i.bf16 %v10993_v43, %v11000_v23  ;;  %v1424_v52 = vrot.slane %v10029_v13, 4  ;;  %s13450_s4 = smov 118  }
 0x104   : > { %8611 = vmatmul.msk.bf16.gmra.mxu2 %vm13592_vm12, %v10998_v5  ;;  %v1314_v49 = vpop.permute.xlu0 %1313  ;;  %vm13414_vm12 = vcmask 506880  }
 0x105   : > { %v11009_v54 = vpop.permute.xlu2 %1354  ;;  %v1318_v15 = vrot.slane %v1314_v49, 4  ;;  %v1381_v18 = vpop.permute.xlu1 %1380 }
 0x106   : > { %v1383_v46 = vrot.slane %v1381_v18, 4 }
 0x107   : > { %v1325_v14 = vsel %vm13412_vm6, %v1314_v49, %v1318_v15  ;;  %v1425_v49 = vrot.slane %v10028_v40, 4 }
 0x108   : > { %v1336_v58 = vsel %vm13576_vm5, %v1325_v14, %v1335_v36  ;;  %v1384_v59 = vsel %vm13590_vm13, %v1382_v12, %v1383_v46  ;;  %v1387_v0 = vsel %vm1385_vm10, %v1381_v18, %v1383_v46  ;;  %v1876_v18 = vshll.u32 %v10987_v50, 16 }
 0x109   : > { %1337 = vst [vmem:[#allocation2 + $0x5c] sm:$0x1] %v1336_v58  ;;  %v1386_v32 = vsel %vm1385_vm10, %v10954_v25, %v1384_v59  ;;  %v1394_v7 = vsel %vm13577_vm2, %v1387_v0, %v1393_v21  ;;  %v8351_v60 = vld [vmem:[#allocation2 + $0x30] sm:$0xf]  ;;  %v9642_v62 = vld [vmem:[#allocation2 + $0x34] sm:$0xf]  ;;  %vm13593_vm10 = vmmov %vm13590_vm13  ;;  %v1431_v59 = vsel %vm13414_vm12, %v10028_v40, %v1425_v49 }
 0x10a   : > { %v1391_v51 = vsel %vm13583_vm11, %v1386_v32, %v1390_v41  ;;  %1395 = vst [vmem:[#allocation2 + $0x5c] sm:$0xc] %v1394_v7  ;;  %1888 = vrot.lane.b32.xlu0 %v1885_v30, %s10141_s3  ;;  %v9643_v63 = vld [vmem:[#allocation2 + $0x38] sm:$0xf0]  ;;  %v8353_v12 = vld [vmem:[#allocation2 + $0x3c] sm:$0xf0]  ;;  %v1428_v14 = vsel %vm13593_vm10, %v1424_v52, %v1425_v49  ;;  %vm13594_vm13 = vmmov %vm13593_vm10  ;;  %v1878_v32 = vor.u32 %v1876_v18, %v1875_v8 }
 0x10b   : > { %1392 = vst [vmem:[#allocation2 + $0x54] sm:$0xcc] %v1391_v51  ;;  %10036 = vrot.lane.b32.xlu1 %v10035_v31, %s10142_s29  ;;  %1841 = vrot.lane.b32.xlu2 %v1836_v38, %s10138_s1  ;;  %v11030_v25 = vor.u32 %v9643_v63, %v8351_v60  ;;  %v11032_v36 = vor.u32 %v9642_v62, %v8353_v12  ;;  %v1980_v30 = vld [vmem:[#allocation3 + $0x8] sm:$0x33]  ;;  %vm13595_vm10 = vcmask 670720   ;;  %vm13596_vm6 = vmmov %vm13594_vm13  ;;  %vm13597_vm11 = vcmask 654336  }
 0x10c   : > { %v1246_v21 = vpop.permute.xlu0 %1245  ;;  %v1804_v31 = vor.u32 %v1803_v44, %v1800_v39  ;;  %v1332_v0 = vld [vmem:[#allocation2 + $0x54] sm:$0x11]  ;;  %v1984_v7 = vrot.slane %v1980_v30, 7  ;;  %v1430_v52 = vsel %vm13414_vm12, %v10029_v13, %v1428_v14  ;;  %v1358_v8 = vrot.slane %v11009_v54, 4  ;;  %v1296_v14 = vld [vmem:[#allocation2 + $0x50] sm:$0x6] }
 0x10d   : > { %v11035_v46 = vpop.permute.xlu2 %1307  ;;  %v1249_v41 = vrot.slane %v1246_v21, 4  ;;  %v1312_v58 = vpop.permute.xlu1 %1311  ;;  %2816 = vmatmul.bf16.gmra.mxu0 %v11030_v25  ;;  %2874 = vmatmul.bf16.gmra.mxu1 %v11032_v36  ;;  %v2004_v44 = vld [vmem:[#allocation3 + $0x8] sm:$0x33] }
 0x10e   : > { %v1317_v38 = vrot.slane %v1312_v58, 4  ;;  %v2062_v18 = vld [vmem:[#allocation3 + $0x8] sm:$0x33] }
 0x10f   : > { %v1251_v50 = vsel %vm13594_vm13, %v1249_v41, %v1250_v48 }
 0x110   : > { %v1253_v60 = vsel %vm13595_vm10, %v1246_v21, %v1251_v50  ;;  %v1323_v62 = vsel %vm13596_vm6, %v1317_v38, %v1318_v15  ;;  %v1979_v15 = vld [vmem:[#allocation3] sm:$0x33]  ;;  %vm1361_vm6 = vcmask 646144   ;;  %v2072_v50 = vshrl.u32 %v2062_v18, 16 }
 0x111   : > { %v1442_v51 = vld [vmem:[#allocation2 + $0x5c] sm:$0x8]  ;;  %v1258_v63 = vsel %vm10301_vm8, %v1253_v60, %v1257_v4  ;;  %v1324_v39 = vsel %vm13597_vm11, %v1312_v58, %v1323_v62  ;;  %vm13415_vm11 = vcmask 662528   ;;  %v1983_v58 = vrot.slane %v1979_v15, 7 }
 0x112   : > { %v1439_v40 = vld [vmem:[#allocation2 + $0x54] sm:$0x88]  ;;  %v1443_v24 = vsel %vm13586_vm1, %v1431_v59, %v1442_v51  ;;  %1259 = vst [vmem:[#allocation2 + $0x48] sm:$0x33] %v1258_v63  ;;  %v1333_v48 = vsel %vm13579_vm9, %v1324_v39, %v1332_v0  ;;  %1813 = vrot.lane.b32.xlu0 %v1804_v31, %s10140_s24  ;;  %v2014_v4 = vshrl.u32 %v2004_v44, 16  ;;  %v2017_v59 = vshll.u32 %v2004_v44, 16 }
 0x113   : > { %v1440_v13 = vsel %vm13588_vm0, %v1430_v52, %v1439_v40  ;;  %1444 = vst [vmem:[#allocation2 + $0x5c] sm:$0x8] %v1443_v24  ;;  %1886 = vrot.lane.b32.xlu1 %v1878_v32, %s10141_s3  ;;  %1987 = vrot.lane.b32.xlu2 %v1984_v7, %s10143_s30  ;;  %v2040_v31 = vld [vmem:[#allocation3 + $0x8] sm:$0x33]  ;;  %v2075_v0 = vshll.u32 %v2062_v18, 16  ;;  %v1943_v51 = vshrl.u32 %v10973_v61, 16 }
 0x114   : > { %1441 = vst [vmem:[#allocation2 + $0x54] sm:$0x88] %v1440_v13  ;;  %v1284_v12 = vpop.permute.xlu0 %1283  ;;  %v1369_v7 = vld [vmem:[#allocation2 + $0x5c] sm:$0x3]  ;;  %v2016_v39 = vrot.slane %v2014_v4, 5  ;;  %v1315_v40 = vrot.slane %v11035_v46, 4 }
 0x115   : > { %v11060_v49 = vpop.permute.xlu2 %1491  ;;  %1334 = vst [vmem:[#allocation2 + $0x54] sm:$0x11] %v1333_v48  ;;  %v1286_v21 = vrot.slane %v1284_v12, 4  ;;  %v1357_v30 = vpop.permute.xlu1 %1356  ;;  %v2019_v24 = vrot.slane %v2017_v59, 6  ;;  %v2074_v48 = vrot.slane %v2072_v50, 6  ;;  %v2077_v13 = vrot.slane %v2075_v0, 7 }
 0x116   : > { %v1359_v41 = vrot.slane %v1357_v30, 4  ;;  %v1945_v18 = vrot.slane %v1943_v51, 4  ;;  %v11093_v50 = vld [vmem:[#allocation3 + $0x4] sm:$0x33]  ;;  %s13452_s24 = smov 74   ;;  %s10159_s3 = smov 109  }
 0x117   : > { %v1290_v38 = vsel %vm13415_vm11, %v1284_v12, %v1286_v21  ;;  %v2078_v4 = vor.u32 %v2077_v13, %v2074_v48  ;;  %vm13601_vm11 = vcmask 732163   ;;  %v1601_v13 = vld [vmem:[#allocation2 + $0x80] sm:$0x1] }
 0x118   : > { %v1297_v32 = vsel %vm10382_vm4, %v1290_v38, %v1296_v14  ;;  %v1360_v52 = vsel %vm13594_vm13, %v1358_v8, %v1359_v41  ;;  %v1363_v60 = vsel %vm1361_vm6, %v1357_v30, %v1359_v41  ;;  %v2039_v41 = vld [vmem:[#allocation3] sm:$0x33] }
 0x119   : > { %1298 = vst [vmem:[#allocation2 + $0x50] sm:$0x6] %v1297_v32  ;;  %v1370_v62 = vsel %vm13585_vm14, %v1363_v60, %v1369_v7  ;;  %v1362_v63 = vsel %vm1361_vm6, %v11009_v54, %v1360_v52  ;;  %vm13598_vm6 = vmmov %vm13594_vm13  ;;  %vm13599_vm13 = vcmask 654336   ;;  %v1293_v32 = vld [vmem:[#allocation2 + $0x48] sm:$0x66]  ;;  %v1946_v7 = vor.u32 %v1945_v18, %v11000_v23 }
 0x11a   : > { %1371 = vst [vmem:[#allocation2 + $0x5c] sm:$0x3] %v1370_v62  ;;  %2045 = vrot.lane.b32.xlu0 %v2040_v31, %s10144_s23  ;;  %vm13600_vm12 = vmmov %vm13599_vm13  ;;  %v2101_v52 = vrot.slane %v11093_v50, 5  ;;  %v1468_v23 = vld [vmem:[#allocation2 + $0x68] sm:$0x6]  ;;  %vm13614_vm14 = vcmask 482304  }
 0x11b   : > { %1839 = vrot.lane.b32.xlu1 %v1835_v55, %s10138_s1  ;;  %1985 = vrot.lane.b32.xlu2 %v1983_v58, %s10143_s30  ;;  %v2020_v58 = vor.u32 %v2019_v24, %v2016_v39  ;;  %vm13602_vm10 = vmmov %vm13598_vm6  ;;  %v1947_v39 = vrot.slane %v1946_v7, 4  ;;  %v1526_v24 = vld [vmem:[#allocation2 + $0x74] sm:$0x3]  ;;  %s10149_s1 = smov 119   ;;  %s13728_s30 = smov 127  }
 0x11c   : > { %v1366_v61 = vld [vmem:[#allocation2 + $0x54] sm:$0x33]  ;;  %v1310_v15 = vpop.permute.xlu0 %1309  ;;  %v2103_v18 = vrot.slane %v2101_v52, 4 }
 0x11d   : > { %v1367_v54 = vsel %vm10784_vm3, %v1362_v63, %v1366_v61  ;;  %v1316_v44 = vrot.slane %v1310_v15, 4  ;;  %v1282_v8 = vpop.permute.xlu1 %1281  ;;  %v11080_v12 = vpop.permute.xlu2 %1575  ;;  %vm13603_vm3 = vcmask 465920  }
 0x11e   : > { %1368 = vst [vmem:[#allocation2 + $0x54] sm:$0x33] %v1367_v54  ;;  %v1285_v30 = vrot.slane %v1282_v8, 4  ;;  %v13424_v29 = vrot.slane %v11080_v12, 4 }
 0x11f   : > { %v1319_v55 = vsel %vm13598_vm6, %v1315_v40, %v1316_v44  ;;  %v1322_v14 = vsel %vm13599_vm13, %v1310_v15, %v1316_v44  ;;  %vm13604_vm6 = vcmask 662528   ;;  %v1494_v15 = vrot.slane %v11060_v49, 4 }
 0x120   : > { %v1321_v38 = vsel %vm13600_vm12, %v11035_v46, %v1319_v55  ;;  %1331 = vst.msk [vmem:[#allocation2 + $0x50] sm:$0x8] %vm13601_vm11, %v1322_v14  ;;  %v1287_v31 = vsel %vm13602_vm10, %v1285_v30, %v1286_v21  ;;  %v1588_v59 = vsel %vm13603_vm3, %v11080_v12, %v13424_v29  ;;  %vm13605_vm12 = vmmov %vm13601_vm11  ;;  %v2098_v21 = vld [vmem:[#allocation3 + $0xc] sm:$0x3]  ;;  %vm1460_vm3 = vcmask 498688  }
 0x121   : > { %1330 = vst [vmem:[#allocation2 + $0x48] sm:$0x88] %v1321_v38  ;;  %v1289_v0 = vsel %vm13604_vm6, %v1282_v8, %v1287_v31  ;;  %vm13418_vm11 = vcmask 482304   ;;  %v2102_v40 = vrot.slane %v2098_v21, 5  ;;  %v9647_v8 = vld [vmem:[#allocation2 + $0x58] sm:$0xf0]  ;;  %vm13606_vm10 = vnez %v13486_v17 }
 0x122   : > { %v1294_v46 = vsel %vm10552_vm15, %v1289_v0, %v1293_v32  ;;  %1597 = vst.msk [vmem:[#allocation2 + $0x74] sm:$0x8] %vm13605_vm12, %v1588_v59  ;;  %2043 = vrot.lane.b32.xlu0 %v2039_v41, %s10144_s23  ;;  %vm13607_vm13 = vcmask 465920   ;;  %vm13608_vm6 = vnez %v13483_v45  ;;  %vm13609_vm12 = vcmask 736256   ;;  %s13730_s23 = smov 125  }
 0x123   : > { %1295 = vst [vmem:[#allocation2 + $0x48] sm:$0x66] %v1294_v46  ;;  %2023 = vrot.lane.b32.xlu1 %v2020_v58, %s10145_s5  ;;  %2081 = vrot.lane.b32.xlu2 %v2078_v4, %s10146_s28  ;;  %v2003_v46 = vld [vmem:[#allocation3] sm:$0x33] }
 0x124   : > { %v1456_v60 = vpop.permute.xlu0 %1455 }
 0x125   : > { %v1458_v62 = vrot.slane %v1456_v60, 4  ;;  %v1514_v51 = vpop.permute.xlu1 %1513  ;;  %v11104_v63 = vpop.permute.xlu2 %1579  ;;  %v9646_v38 = vld [vmem:[#allocation2 + $0x50] sm:$0xf0]  ;;  %v8365_v31 = vld [vmem:[#allocation2 + $0x54] sm:$0xf0] }
 0x126   : > { %v1516_v48 = vrot.slane %v1514_v51, 4  ;;  %v13423_v61 = vrot.slane %v11104_v63, 4 }
 0x127   : > { %v1462_v54 = vsel %vm1460_vm3, %v1456_v60, %v1458_v62  ;;  %v8371_v44 = vld [vmem:[#allocation2 + $0x50] sm:$0xf]  ;;  %v2165_v60 = vld [vmem:[#allocation3 + $0x4] sm:$0x33] }
 0x128   : > { %v1469_v30 = vsel %vm13606_vm10, %v1462_v54, %v1468_v23  ;;  %v1520_v55 = vsel %vm13418_vm11, %v1514_v51, %v1516_v48  ;;  %v1591_v14 = vsel %vm13607_vm13, %v11104_v63, %v13423_v61  ;;  %v11118_v41 = vor.u32 %v9647_v8, %v8371_v44  ;;  %v2166_v23 = vld [vmem:[#allocation3 + $0xc] sm:$0x3]  ;;  %v1465_v54 = vld [vmem:[#allocation2 + $0x60] sm:$0x66] }
 0x129   : > { %1470 = vst [vmem:[#allocation2 + $0x68] sm:$0x6] %v1469_v30  ;;  %v1527_v58 = vsel %vm13608_vm6, %v1520_v55, %v1526_v24  ;;  %v1602_v4 = vsel %vm13576_vm5, %v1591_v14, %v1601_v13  ;;  %vm13419_vm13 = vcmask 490496   ;;  %v2104_v8 = vrot.slane %v2102_v40, 4  ;;  %v1523_v55 = vld [vmem:[#allocation2 + $0x6c] sm:$0x33] }
 0x12a   : > { %1528 = vst [vmem:[#allocation2 + $0x74] sm:$0x3] %v1527_v58  ;;  %1954 = vrot.lane.b32.xlu0 %v1947_v39, %s10142_s29  ;;  %8612 = vmatmul.msk.bf16.gmra.mxu2 %vm13609_vm12, %v11118_v41  ;;  %v8363_v59 = vld [vmem:[#allocation2 + $0x48] sm:$0xf]  ;;  %v9645_v0 = vld [vmem:[#allocation2 + $0x4c] sm:$0xf]  ;;  %v1498_v13 = vsel %vm13419_vm13, %v11060_v49, %v1494_v15  ;;  %vm13612_vm6 = vnez %v13559_v53  ;;  %vm13613_vm13 = vnez %v13552_v3 }
 0x12b   : > { %1603 = vst [vmem:[#allocation2 + $0x80] sm:$0x1] %v1602_v4  ;;  %2107 = vrot.lane.b32.xlu1 %v2102_v40, %s10105_s0  ;;  %2109 = vrot.lane.b32.xlu2 %v2103_v18, %s10105_s0  ;;  %v11129_v32 = vor.u32 %v9646_v38, %v8363_v59  ;;  %v11131_v7 = vor.u32 %v9645_v0, %v8365_v31  ;;  %v2006_v18 = vshrl.u32 %v2003_v46, 16  ;;  %vm13610_vm12 = vcmask 1043456  }
 0x12c   : > { %v1454_v21 = vpop.permute.xlu0 %1453  ;;  %v2169_v14 = vrot.slane %v2165_v60, 6  ;;  %v2170_v58 = vrot.slane %v2166_v23, 6  ;;  %v2009_v4 = vshll.u32 %v2003_v46, 16  ;;  %vm13611_vm11 = vmmov %vm13610_vm12  ;;  %v2236_v46 = vld [vmem:[#allocation3 + $0x4] sm:$0x33]  ;;  %v1938_v23 = vshrl.u32 %v10967_v57, 16 }
 0x12d   : > { %v1457_v51 = vrot.slane %v1454_v21, 4  ;;  %v1512_v39 = vpop.permute.xlu1 %1511  ;;  %2821 = vmatmul.bf16.gmra.mxu0 %v11129_v32  ;;  %2879 = vmatmul.bf16.gmra.mxu1 %v11131_v7  ;;  %v1421_v24 = vpop.permute.xlu2 %1420  ;;  %v2008_v60 = vrot.slane %v2006_v18, 5  ;;  %v2240_v18 = vrot.slane %v2236_v46, 7 }
 0x12e   : > { %v1515_v44 = vrot.slane %v1512_v39, 4 }
 0x12f   : > { %v1459_v30 = vsel %vm13610_vm12, %v1457_v51, %v1458_v62  ;;  %v1426_v51 = vrot.slane %v1421_v24, 4 }
 0x130   : > { %v1504_v38 = vld [vmem:[#allocation2 + $0x68] sm:$0xc]  ;;  %v1461_v31 = vsel %vm1460_vm3, %v1454_v21, %v1459_v30  ;;  %v1517_v59 = vsel %vm13611_vm11, %v1515_v44, %v1516_v48  ;;  %v2011_v48 = vrot.slane %v2009_v4, 6  ;;  %v2061_v21 = vld [vmem:[#allocation3] sm:$0x33]  ;;  %vm13616_vm3 = vmmov %vm13611_vm11  ;;  %vm13617_vm11 = vcmask 506880  }
 0x131   : > { %v1505_v0 = vsel %vm13612_vm6, %v1498_v13, %v1504_v38  ;;  %v1466_v33 = vsel %vm13613_vm13, %v1461_v31, %v1465_v54  ;;  %v1519_v40 = vsel %vm13614_vm14, %v1512_v39, %v1517_v59  ;;  %vm13422_vm14 = vcmask 474112   ;;  %v2237_v13 = vld [vmem:[#allocation3 + $0xc] sm:$0x3]  ;;  %vm13618_vm12 = vmmov %vm13617_vm11 }
 0x132   : > { %1506 = vst [vmem:[#allocation2 + $0x68] sm:$0xc] %v1505_v0  ;;  %v1524_v62 = vsel %vm10301_vm8, %v1519_v40, %v1523_v55  ;;  %2111 = vrot.lane.b32.xlu0 %v2104_v8, %s10105_s0  ;;  %v2067_v55 = vshll.u32 %v2061_v21, 16  ;;  %v2241_v4 = vrot.slane %v2237_v13, 7  ;;  %v2012_v38 = vor.u32 %v2011_v48, %v2008_v60  ;;  %v2134_v48 = vld [vmem:[#allocation3 + $0xc] sm:$0x3] }
 0x133   : > { %1467 = vst [vmem:[#allocation2 + $0x60] sm:$0x66] %v1466_v33  ;;  %2171 = vrot.lane.b32.xlu1 %v2169_v14, %s13615_s22  ;;  %2173 = vrot.lane.b32.xlu2 %v2170_v58, %s13615_s22  ;;  %v2064_v33 = vshrl.u32 %v2061_v21, 16  ;;  %v1562_v58 = vld [vmem:[#allocation2 + $0x74] sm:$0x6]  ;;  %v1940_v31 = vrot.slane %v1938_v23, 4 }
 0x134   : > { %1525 = vst [vmem:[#allocation2 + $0x6c] sm:$0x33] %v1524_v62  ;;  %v1550_v39 = vpop.permute.xlu0 %1549  ;;  %v2069_v46 = vrot.slane %v2067_v55, 7  ;;  %v2133_v21 = vld [vmem:[#allocation3 + $0x4] sm:$0x33]  ;;  %v2143_v55 = vshrl.u32 %v2134_v48, 16 }
 0x135   : > { %v1552_v54 = vrot.slane %v1550_v39, 4  ;;  %v1423_v44 = vpop.permute.xlu1 %1422  ;;  %v11153_v30 = vpop.permute.xlu2 %1644  ;;  %v2066_v62 = vrot.slane %v2064_v33, 6  ;;  %v1941_v60 = vor.u32 %v1940_v31, %v10993_v43 }
 0x136   : > { %v1427_v8 = vrot.slane %v1423_v44, 4 }
 0x137   : > { %v1556_v14 = vsel %vm13422_vm14, %v1550_v39, %v1552_v54  ;;  %vm13619_vm14 = vcmask 729088   ;;  %v2070_v33 = vor.u32 %v2069_v46, %v2066_v62 }
 0x138   : > { %v1563_v57 = vsel %vm10382_vm4, %v1556_v14, %v1562_v58  ;;  %v1432_v59 = vsel %vm13616_vm3, %v1426_v51, %v1427_v8  ;;  %v1434_v0 = vsel %vm13617_vm11, %v1423_v44, %v1427_v8  ;;  %v11166_v51 = vld [vmem:[#allocation3 + $0x4] sm:$0x33]  ;;  %v2136_v8 = vshrl.u32 %v2133_v21, 16 }
 0x139   : > { %1564 = vst [vmem:[#allocation2 + $0x74] sm:$0x6] %v1563_v57  ;;  %v1433_v40 = vsel %vm13618_vm12, %v1421_v24, %v1432_v59  ;;  %v11168_v24 = vld [vmem:[#allocation3 + $0xc] sm:$0x3]  ;;  %v1942_v58 = vrot.slane %v1941_v60, 4  ;;  %v2190_v43 = vshll.u32 %v11166_v51, 16 }
 0x13a   : > { %1445 = vst [vmem:[#allocation2 + $0x60] sm:$0x11] %v1433_v40  ;;  %2242 = vrot.lane.b32.xlu0 %v2240_v18, %s13444_s26  ;;  %vm13623_vm12 = vcmask 474112   ;;  %v2138_v46 = vrot.slane %v2136_v8, 7  ;;  %v2259_v60 = vld [vmem:[#allocation3 + $0x4] sm:$0x33] }
 0x13b   : > { %1446 = vst.msk [vmem:[#allocation2 + $0x68] sm:$0x1] %vm13619_vm14, %v1434_v0  ;;  %2244 = vrot.lane.b32.xlu1 %v2241_v4, %s13444_s26  ;;  %2021 = vrot.lane.b32.xlu2 %v2012_v38, %s10145_s5  ;;  %vm13620_vm14 = vmmov %vm13616_vm3  ;;  %v2194_v4 = vshll.u32 %v11168_v24, 16  ;;  %v1501_v38 = vld [vmem:[#allocation2 + $0x60] sm:$0xcc]  ;;  %vm13621_vm3 = vcmask 490496  }
 0x13c   : > { %v1490_v23 = vpop.permute.xlu0 %1489  ;;  %vm13622_vm11 = vmmov %vm13620_vm14  ;;  %v2139_v0 = vshll.u32 %v2133_v21, 16  ;;  %v1559_v62 = vld [vmem:[#allocation2 + $0x6c] sm:$0x66]  ;;  %s13726_s5 = sld [smem:[#allocation12_spill]]  ;;  %s13456_s26 = smov 108  }
 0x13d   : > { %v1493_v39 = vrot.slane %v1490_v23, 4  ;;  %v1548_v13 = vpop.permute.xlu1 %1547  ;;  %v11170_v44 = vpop.permute.xlu2 %10031  ;;  %v11195_v8 = vrot.slane %v2194_v4, 5 }
 0x13e   : > { %v1551_v18 = vrot.slane %v1548_v13, 4  ;;  %v10034_v21 = vunpack.i.h.bf16 %v11170_v44  ;;  %v2141_v50 = vor.u32 %v2139_v0, %v2138_v46 }
 0x13f   : > { %v1495_v14 = vsel %vm13620_vm14, %v1493_v39, %v1494_v15  ;;  %v2146_v15 = vshll.u32 %v2134_v48, 16  ;;  %v1648_v39 = vrot.slane %v11153_v30, 4  ;;  %v2260_v48 = vld [vmem:[#allocation3 + $0xc] sm:$0x3]  ;;  %vm1651_vm14 = vcmask 326656  }
 0x140   : > { %v1497_v31 = vsel %vm13621_vm3, %v1490_v23, %v1495_v14  ;;  %v1553_v57 = vsel %vm13622_vm11, %v1551_v18, %v1552_v54  ;;  %v9650_v59 = vld [vmem:[#allocation2 + $0x70] sm:$0xf0]  ;;  %v2145_v23 = vrot.slane %v2143_v55, 7  ;;  %v1656_v55 = vld [vmem:[#allocation2 + $0x78] sm:$0xcc]  ;;  %vm13425_vm3 = vcmask 310272  }
 0x141   : > { %v1502_v40 = vsel %vm10856_vm7, %v1497_v31, %v1501_v38  ;;  %v1555_v49 = vsel %vm13623_vm12, %v1548_v13, %v1553_v57  ;;  %v11193_v13 = vrot.slane %v2190_v43, 5  ;;  %vm13624_vm11 = vcmask 736256   ;;  %v1659_v14 = vld [vmem:[#allocation2 + $0x80] sm:$0xc]  ;;  %v1734_v43 = vld [vmem:[#allocation2 + $0x8c] sm:$0x6] }
 0x142   : > { %1503 = vst [vmem:[#allocation2 + $0x60] sm:$0xcc] %v1502_v40  ;;  %v1560_v61 = vsel %vm10552_vm15, %v1555_v49, %v1559_v62  ;;  %2079 = vrot.lane.b32.xlu0 %v2070_v33, %s10146_s28  ;;  %v8383_v54 = vld [vmem:[#allocation2 + $0x68] sm:$0xf]  ;;  %v10033_v33 = vunpack.i.l.bf16 %v11170_v44  ;;  %v2265_v31 = vshll.u32 %v2259_v60, 16  ;;  %v2270_v40 = vshrl.u32 %v2260_v48, 16 }
 0x143   : > { %1561 = vst [vmem:[#allocation2 + $0x6c] sm:$0x66] %v1560_v61  ;;  %1952 = vrot.lane.b32.xlu1 %v1942_v58, %s10142_s29  ;;  %v11188_v18 = vor.u32 %v9650_v59, %v8383_v54  ;;  %2105 = vrot.lane.b32.xlu2 %v2101_v52, %s10105_s0  ;;  %v2262_v52 = vshrl.u32 %v2259_v60, 16  ;;  %v2148_v59 = vor.u32 %v2146_v15, %v2145_v23  ;;  %v2273_v62 = vshll.u32 %v2260_v48, 16  ;;  %s13628_s0 = smov 123   ;;  %s10152_s29 = smov 110  }
 0x144   : > { %v1647_v61 = vpop.permute.xlu0 %1646  ;;  %v1690_v49 = vrot.slane %v10034_v21, 4  ;;  %vm13625_vm12 = vcmask 1043456   ;;  %v10040_v0 = vpack.i.bf16 %v11195_v8, %v11193_v13  ;;  %v1691_v46 = vrot.slane %v10033_v33, 4  ;;  %s13453_s28 = smov 91  }
 0x145   : > { %8613 = vmatmul.msk.bf16.gmra.mxu2 %vm13624_vm11, %v11188_v18  ;;  %v1649_v58 = vrot.slane %v1647_v61, 4  ;;  %v11200_v38 = vpop.permute.xlu1 %1721  ;;  %v11203_v57 = vpop.permute.xlu2 %1620  ;;  %vm13627_vm11 = vnez %v13503_v26  ;;  %vm13630_vm15 = vmmov %vm13625_vm12 }
 0x146   : > { %v13626_v15 = vrot.slane %v11200_v38, 4 }
 0x147   : > { %v1650_v54 = vsel %vm13625_vm12, %v1648_v39, %v1649_v58  ;;  %v1653_v29 = vsel %vm1651_vm14, %v1647_v61, %v1649_v58  ;;  %v2202_v61 = vshrl.u32 %v11168_v24, 16  ;;  %v2267_v58 = vrot.slane %v2265_v31, 6 }
 0x148   : > { %v1652_v60 = vsel %vm1651_vm14, %v11153_v30, %v1650_v54  ;;  %v1660_v4 = vsel %vm13577_vm2, %v1653_v29, %v1659_v14  ;;  %v1728_v23 = vsel %vm13425_vm3, %v11200_v38, %v13626_v15  ;;  %v2264_v30 = vrot.slane %v2262_v52, 5  ;;  %v1598_v15 = vld [vmem:[#allocation2 + $0x78] sm:$0x11]  ;;  %vm13633_vm3 = vmmov %vm13630_vm15 }
 0x149   : > { %v1657_v39 = vsel %vm13627_vm11, %v1652_v60, %v1656_v55  ;;  %1661 = vst [vmem:[#allocation2 + $0x80] sm:$0xc] %v1660_v4  ;;  %v1735_v48 = vsel %vm13606_vm10, %v1728_v23, %v1734_v43  ;;  %v2272_v29 = vrot.slane %v2270_v40, 5  ;;  %v2275_v14 = vrot.slane %v2273_v62, 6 }
 0x14a   : > { %1658 = vst [vmem:[#allocation2 + $0x78] sm:$0xcc] %v1657_v39  ;;  %2149 = vrot.lane.b32.xlu0 %v2141_v50, %s13628_s0  ;;  %vm13429_vm14 = vcmask 318464   ;;  %v1694_v55 = vsel %vm13625_vm12, %v1690_v49, %v1691_v46  ;;  %v2204_v24 = vrot.slane %v2202_v61, 4  ;;  %v2197_v50 = vshrl.u32 %v11166_v51, 16 }
 0x14b   : > { %1736 = vst [vmem:[#allocation2 + $0x8c] sm:$0x6] %v1735_v48  ;;  %2151 = vrot.lane.b32.xlu1 %v2148_v59, %s13628_s0  ;;  %10041 = vrot.lane.b32.xlu2 %v10040_v0, %s13446_s27  ;;  %v2268_v40 = vor.u32 %v2267_v58, %v2264_v30  ;;  %v2276_v62 = vor.u32 %v2275_v14, %v2272_v29  ;;  %v13629_v60 = vrot.slane %v11080_v12, 4  ;;  %v1867_v49 = vld [vmem:[#allocation2 + $0xa4] sm:$0x1]  ;;  %vm13631_vm12 = vcmask 465920  }
 0x14c   : > { %v1574_v4 = vpop.permute.xlu0 %1573  ;;  %v1697_v59 = vsel %vm13429_vm14, %v10033_v33, %v1691_v46  ;;  %v1696_v39 = vsel %vm13429_vm14, %v10034_v21, %v1694_v55  ;;  %v2199_v51 = vrot.slane %v2197_v50, 4  ;;  %v13632_v61 = vrot.slane %v11104_v63, 4  ;;  %vm13634_vm11 = vmmov %vm13631_vm12  ;;  %v2923_v50 = vpop.f32.mrf.mxu2  ;;  %s13454_s0 = smov 92  }
 0x14d   : > { %v1581_v43 = vrot.slane %v1574_v4, 4  ;;  %v1578_v54 = vpop.permute.xlu1 %1577  ;;  %v11229_v31 = vpop.permute.xlu2 %1845  ;;  %v2205_v44 = vor.u32 %v2204_v24, %v11195_v8 }
 0x14e   : > { %v1583_v52 = vrot.slane %v1578_v54, 4  ;;  %v1850_v23 = vrot.slane %v11229_v31, 4 }
 0x14f   : > { %v1585_v0 = vsel %vm13630_vm15, %v1581_v43, %v13629_v60  ;;  %vm13635_vm15 = vcmask 277504   ;;  %v1624_v43 = vrot.slane %v11203_v57, 4  ;;  %v1731_v60 = vld [vmem:[#allocation2 + $0x84] sm:$0x66] }
 0x150   : > { %v1587_v48 = vsel %vm13631_vm12, %v1574_v4, %v1585_v0  ;;  %v1589_v30 = vsel %vm13633_vm3, %v1583_v52, %v13632_v61  ;;  %v1708_v33 = vld [vmem:[#allocation2 + $0x80] sm:$0x8]  ;;  %v1857_v46 = vsel %vm13635_vm15, %v11229_v31, %v1850_v23  ;;  %v2200_v4 = vor.u32 %v2199_v51, %v11193_v13  ;;  %v1635_v51 = vld [vmem:[#allocation2 + $0x80] sm:$0x3] }
 0x151   : > { %1596 = vst [vmem:[#allocation2 + $0x6c] sm:$0x88] %v1587_v48  ;;  %v1590_v12 = vsel %vm13634_vm11, %v1578_v54, %v1589_v30  ;;  %v1705_v58 = vld [vmem:[#allocation2 + $0x78] sm:$0x88]  ;;  %v1709_v21 = vsel %vm13586_vm1, %v1697_v59, %v1708_v33  ;;  %v1868_v29 = vsel %vm13576_vm5, %v1857_v46, %v1867_v49  ;;  %vm1627_vm3 = vcmask 457728  }
 0x152   : > { %v1599_v63 = vsel %vm13579_vm9, %v1590_v12, %v1598_v15  ;;  %2277 = vrot.lane.b32.xlu0 %v2268_v40, %s10149_s1  ;;  %v1706_v14 = vsel %vm13588_vm0, %v1696_v39, %v1705_v58  ;;  %1710 = vst [vmem:[#allocation2 + $0x80] sm:$0x8] %v1709_v21  ;;  %v2201_v49 = vrot.slane %v2200_v4, 4  ;;  %v13637_v13 = vrot.slane %v11200_v38, 4  ;;  %v2294_v48 = vld [vmem:[#allocation3 + $0x4] sm:$0x33] }
 0x153   : > { %1600 = vst [vmem:[#allocation2 + $0x78] sm:$0x11] %v1599_v63  ;;  %2279 = vrot.lane.b32.xlu1 %v2276_v62, %s10149_s1  ;;  %v2206_v62 = vrot.slane %v2205_v44, 4  ;;  %vm13638_vm11 = vcmask 1043456   ;;  %vm13639_vm12 = vcmask 310272   ;;  %vm13647_vm5 = vcmask 302080  }
 0x154   : > { %v2807_v55 = vpop.f32.mrf.mxu0  ;;  %v2865_v8 = vpop.f32.mrf.mxu1  ;;  %1869 = vst [vmem:[#allocation2 + $0xa4] sm:$0x1] %v1868_v29  ;;  %vm13640_vm15 = vmmov %vm13638_vm11  ;;  %v8375_v12 = vld [vmem:[#allocation2 + $0x60] sm:$0xf]  ;;  %2211 = vrot.lane.b32.xlu2 %v2201_v49, %s13446_s27  ;;  %v9648_v29 = vld [vmem:[#allocation2 + $0x64] sm:$0xf] }
 0x155   : > { %v2866_v54 = vadd.f32 %v2865_v8, %v2807_v55  ;;  %v1720_v24 = vpop.permute.xlu0 %1719  ;;  %v1623_v59 = vpop.permute.xlu1 %1622  ;;  %1707 = vst [vmem:[#allocation2 + $0x78] sm:$0x88] %v1706_v14  ;;  %s10157_s1 = smov 90  }
 0x156   : > { %v1723_v52 = vrot.slane %v1720_v24, 4  ;;  %v1625_v0 = vrot.slane %v1623_v59, 4  ;;  %v11261_v15 = vpop.permute.xlu2 %1777 }
 0x157   : > { %v11259_v40 = vadd.f32 %v2923_v50, %v2866_v54  ;;  %v2295_v50 = vld [vmem:[#allocation3 + $0xc] sm:$0x3] }
 0x158   : > { %v1725_v39 = vsel %vm13638_vm11, %v1723_v52, %v13637_v13  ;;  %v1626_v30 = vsel %vm13640_vm15, %v1624_v43, %v1625_v0  ;;  %v1629_v33 = vsel %vm1627_vm3, %v1623_v59, %v1625_v0  ;;  %v9649_v46 = vld [vmem:[#allocation2 + $0x68] sm:$0xf0]  ;;  %v8377_v58 = vld [vmem:[#allocation2 + $0x6c] sm:$0xf0]  ;;  %vm13641_vm11 = vnez %v13508_v6  ;;  %v11302_v13 = vpop.f32.mrf.mxu2 }
 0x159   : > { %13636 = vst [vmem:[#allocation5_spill] sm:$0xff] %v11259_v40  ;;  %v1727_v61 = vsel %vm13639_vm12, %v1720_v24, %v1725_v39  ;;  %v1628_v38 = vsel %vm1627_vm3, %v11203_v57, %v1626_v30  ;;  %v1636_v21 = vsel %vm13641_vm11, %v1629_v33, %v1635_v51  ;;  %v11276_v63 = vor.u32 %v9649_v46, %v8375_v12  ;;  %v1770_v59 = vld [vmem:[#allocation2 + $0x8c] sm:$0xc]  ;;  %v1792_v30 = vld [vmem:[#allocation2 + $0x98] sm:$0x3] }
 0x15a   : > { %v1732_v44 = vsel %vm13613_vm13, %v1727_v61, %v1731_v60  ;;  %v1632_v14 = vld [vmem:[#allocation2 + $0x78] sm:$0x33]  ;;  %2213 = vrot.lane.b32.xlu0 %v2206_v62, %s13446_s27  ;;  %v11279_v55 = vor.u32 %v9648_v29, %v8377_v58  ;;  %vm13642_vm12 = vnez %v13554_v11  ;;  %1637 = vst [vmem:[#allocation2 + $0x80] sm:$0x3] %v1636_v21  ;;  %vm13428_vm3 = vcmask 302080   ;;  %s13729_s27 = smov 126  }
 0x15b   : > { %1733 = vst [vmem:[#allocation2 + $0x84] sm:$0x66] %v1732_v44  ;;  %v1633_v8 = vsel %vm13642_vm12, %v1628_v38, %v1632_v14  ;;  %2826 = vmatmul.bf16.gmra.mxu0 %v11276_v63  ;;  %2298 = vrot.lane.b32.xlu1 %v2294_v48, %s13450_s4  ;;  %vm13644_vm15 = vcmask 729088   ;;  %v1781_v39 = vrot.slane %v11261_v15, 4  ;;  %v1789_v58 = vld [vmem:[#allocation2 + $0x90] sm:$0x33] }
 0x15c   : > { %1634 = vst [vmem:[#allocation2 + $0x78] sm:$0x33] %v1633_v8  ;;  %2884 = vmatmul.bf16.gmra.mxu1 %v11279_v55  ;;  %2300 = vrot.lane.b32.xlu2 %v2295_v50, %s13450_s4  ;;  %v11297_v62 = vpop.f32.mrf.mxu0  ;;  %v11299_v49 = vpop.f32.mrf.mxu1  ;;  %v9689_v6 = vld [vmem:[%s13484_s8 + $0xd4] sm:$0xf]  ;;  %v9687_v11 = vld [vmem:[%s13484_s8 + $0xc4] sm:$0xf] }
 0x15d   : > { %v1758_v57 = vpop.permute.xlu0 %1757  ;;  %v11286_v43 = vpop.permute.xlu1 %1688  ;;  %13643 = vst [vmem:[#allocation6_spill] sm:$0xff] %v11299_v49  ;;  %s13458_s4 = smov 71  }
 0x15e   : > { %v1760_v4 = vrot.slane %v1758_v57, 4  ;;  %v1693_v54 = vrot.slane %v11286_v43, 4  ;;  %v11289_v24 = vpop.permute.xlu2 %1815  ;;  %13645 = vst [vmem:[#allocation7_spill] sm:$0xff] %v11302_v13 }
 0x160   : > { %v1764_v52 = vsel %vm13428_vm3, %v1758_v57, %v1760_v4  ;;  %v1700_v0 = vsel %vm13429_vm14, %v11286_v43, %v1693_v54  ;;  %vm1784_vm3 = vcmask 293888   ;;  %vm13646_vm14 = vcmask 1043456  }
 0x161   : > { %v1771_v60 = vsel %vm13612_vm6, %v1764_v52, %v1770_v59  ;;  %1712 = vst.msk [vmem:[#allocation2 + $0x8c] sm:$0x1] %vm13644_vm15, %v1700_v0  ;;  %vm13648_vm15 = vmmov %vm13646_vm14  ;;  %vm13649_vm6 = vnez %v13483_v45 }
 0x162   : > { %1772 = vst [vmem:[#allocation2 + $0x8c] sm:$0xc] %v1771_v60  ;;  %v1767_v21 = vld [vmem:[#allocation2 + $0x84] sm:$0xcc] }
 0x165   : > { %v1756_v51 = vpop.permute.xlu0 %1755  ;;  %v1780_v61 = vpop.permute.xlu1 %1779 }
 0x166   : > { %v1759_v48 = vrot.slane %v1756_v51, 4  ;;  %v1782_v33 = vrot.slane %v1780_v61, 4  ;;  %v11305_v12 = vpop.permute.xlu2 %1841 }
 0x167   : > { %v13437_v44 = vrot.slane %v11305_v12, 4 }
 0x168   : > { %v1761_v46 = vsel %vm13646_vm14, %v1759_v48, %v1760_v4  ;;  %v1783_v29 = vsel %vm13648_vm15, %v1781_v39, %v1782_v33  ;;  %v1786_v14 = vsel %vm1784_vm3, %v1780_v61, %v1782_v33  ;;  %v8395_v4 = vld [vmem:[#allocation2 + $0x80] sm:$0xf]  ;;  %vm13652_vm14 = vcmask 736256   ;;  %v1925_v33 = vld [vmem:[#allocation2 + $0xa4] sm:$0xc] }
 0x169   : > { %v1763_v38 = vsel %vm13647_vm5, %v1756_v51, %v1761_v46  ;;  %v1785_v57 = vsel %vm1784_vm3, %v11261_v15, %v1783_v29  ;;  %v1793_v43 = vsel %vm13649_vm6, %v1786_v14, %v1792_v30  ;;  %v2812_v50 = vpop.f32.mrf.mxu0  ;;  %v2870_v52 = vpop.f32.mrf.mxu1  ;;  %v9653_v59 = vld [vmem:[#allocation2 + $0x88] sm:$0xf0]  ;;  %vm13650_vm5 = vcmask 277504   ;;  %v2000_v14 = vld [vmem:[#allocation2 + $0xb0] sm:$0x6] }
 0x16a   : > { %v1768_v8 = vsel %vm10856_vm7, %v1763_v38, %v1767_v21  ;;  %v1790_v60 = vsel %vm10301_vm8, %v1785_v57, %v1789_v58  ;;  %v1854_v0 = vsel %vm13650_vm5, %v11305_v12, %v13437_v44  ;;  %v2871_v39 = vadd.f32 %v2870_v52, %v2812_v50  ;;  %v2928_v15 = vpop.f32.mrf.mxu2  ;;  %1794 = vst [vmem:[#allocation2 + $0x98] sm:$0x3] %v1793_v43 }
 0x16b   : > { %1769 = vst [vmem:[#allocation2 + $0x84] sm:$0xcc] %v1768_v8  ;;  %v11322_v51 = vor.u32 %v9653_v59, %v8395_v4  ;;  %vm1917_vm3 = vcmask 138240   ;;  %v1818_v30 = vrot.slane %v11289_v24, 4  ;;  %vm13653_vm15 = vcmask 732163  }
 0x16c   : > { %1791 = vst [vmem:[#allocation2 + $0x90] sm:$0x33] %v1790_v60  ;;  %v11324_v48 = vadd.f32 %v2928_v15, %v2871_v39  ;;  %vm13434_vm5 = vcmask 285696   ;;  %vm13435_vm7 = vcmask 121856  }
 0x16d   : > { %8614 = vmatmul.msk.bf16.gmra.mxu2 %vm13652_vm14, %v11322_v51  ;;  %v1913_v61 = vpop.permute.xlu0 %1912  ;;  %1863 = vst.msk [vmem:[#allocation2 + $0x98] sm:$0x8] %vm13653_vm15, %v1854_v0  ;;  %v1687_v58 = vpop.permute.xlu1 %1686  ;;  %vm13654_vm14 = vcmask 1043456   ;;  %v1822_v50 = vsel %vm13434_vm5, %v11289_v24, %v1818_v30  ;;  %vm13655_vm15 = vcmask 318464  }
 0x16e   : > { %13651 = vst [vmem:[#allocation8_spill] sm:$0xff] %v11324_v48  ;;  %v1915_v46 = vrot.slane %v1913_v61, 4  ;;  %v1692_v38 = vrot.slane %v1687_v58, 4  ;;  %v1988_v21 = vpop.permute.xlu2 %1987  ;;  %vm13657_vm5 = vmmov %vm13654_vm14 }
 0x16f   : > { %v1990_v8 = vrot.slane %v1988_v21, 4 }
 0x170   : > { %v1919_v29 = vsel %vm1917_vm3, %v1913_v61, %v1915_v46  ;;  %v1698_v43 = vsel %vm13654_vm14, %v1692_v38, %v1693_v54  ;;  %v1864_v61 = vld [vmem:[#allocation2 + $0x9c] sm:$0x11] }
 0x171   : > { %v1926_v57 = vsel %vm13577_vm2, %v1919_v29, %v1925_v33  ;;  %v1699_v52 = vsel %vm13655_vm15, %v1687_v58, %v1698_v43  ;;  %v1994_v4 = vsel %vm13435_vm7, %v1988_v21, %v1990_v8  ;;  %v1828_v60 = vld [vmem:[#allocation2 + $0x98] sm:$0x6]  ;;  %v1922_v21 = vld [vmem:[#allocation2 + $0x9c] sm:$0xcc]  ;;  %vm13656_vm15 = vcmask 277504   ;;  %vm13658_vm7 = vmmov %vm13657_vm5 }
 0x172   : > { %1927 = vst [vmem:[#allocation2 + $0xa4] sm:$0xc] %v1926_v57  ;;  %v2001_v59 = vsel %vm13606_vm10, %v1994_v4, %v2000_v14  ;;  %v1829_v0 = vsel %vm10382_vm4, %v1822_v50, %v1828_v60  ;;  %v1997_v43 = vld [vmem:[#allocation2 + $0xa8] sm:$0x66]  ;;  %vm13660_vm10 = vcmask 121856  }
 0x173   : > { %1711 = vst [vmem:[#allocation2 + $0x84] sm:$0x11] %v1699_v52  ;;  %v8387_v52 = vld [vmem:[#allocation2 + $0x78] sm:$0xf] }
 0x174   : > { %2002 = vst [vmem:[#allocation2 + $0xb0] sm:$0x6] %v2001_v59 }
 0x175   : > { %v1844_v54 = vpop.permute.xlu0 %1843  ;;  %1830 = vst [vmem:[#allocation2 + $0x98] sm:$0x6] %v1829_v0  ;;  %v1911_v15 = vpop.permute.xlu1 %1910  ;;  %v9651_v0 = vld [vmem:[#allocation2 + $0x7c] sm:$0xf] }
 0x176   : > { %v1849_v39 = vrot.slane %v1844_v54, 4  ;;  %v1914_v33 = vrot.slane %v1911_v15, 4  ;;  %v1986_v38 = vpop.permute.xlu2 %1985 }
 0x177   : > { %v1989_v29 = vrot.slane %v1986_v38, 4 }
 0x178   : > { %v1855_v58 = vsel %vm13654_vm14, %v1849_v39, %v1850_v23  ;;  %v1916_v57 = vsel %vm13657_vm5, %v1914_v33, %v1915_v46  ;;  %vm13659_vm14 = vnez %v13503_v26 }
 0x179   : > { %v1856_v14 = vsel %vm13656_vm15, %v1844_v54, %v1855_v58  ;;  %v1918_v4 = vsel %vm1917_vm3, %v1911_v15, %v1916_v57  ;;  %v1991_v59 = vsel %vm13658_vm7, %v1989_v29, %v1990_v8  ;;  %vm1893_vm7 = vcmask 146432   ;;  %vm13661_vm3 = vmmov %vm13657_vm5 }
 0x17a   : > { %v1865_v50 = vsel %vm13579_vm9, %v1856_v14, %v1864_v61  ;;  %v9652_v60 = vld [vmem:[#allocation2 + $0x80] sm:$0xf0]  ;;  %v8389_v31 = vld [vmem:[#allocation2 + $0x84] sm:$0xf0]  ;;  %v1923_v23 = vsel %vm13659_vm14, %v1918_v4, %v1922_v21  ;;  %v1993_v54 = vsel %vm13660_vm10, %v1986_v38, %v1991_v59  ;;  %vm13438_vm10 = vcmask 130048   ;;  %v11371_v4 = vpop.f32.mrf.mxu1  ;;  %vm13663_vm5 = vmmov %vm13661_vm3 }
 0x17b   : > { %1866 = vst [vmem:[#allocation2 + $0x9c] sm:$0x11] %v1865_v50  ;;  %v11356_v39 = vor.u32 %v9652_v60, %v8387_v52  ;;  %v11358_v46 = vor.u32 %v9651_v0, %v8389_v31  ;;  %v1998_v61 = vsel %vm13613_vm13, %v1993_v54, %v1997_v43  ;;  %v1901_v14 = vld [vmem:[#allocation2 + $0xa4] sm:$0x3]  ;;  %v11369_v50 = vpop.f32.mrf.mxu0  ;;  %v1974_v60 = vld [vmem:[#allocation2 + $0xa4] sm:$0x8] }
 0x17c   : > { %1924 = vst [vmem:[#allocation2 + $0x9c] sm:$0xcc] %v1923_v23  ;;  %vm13664_vm15 = vcmask 285696  }
 0x17d   : > { %1999 = vst [vmem:[#allocation2 + $0xa8] sm:$0x66] %v1998_v61  ;;  %2831 = vmatmul.bf16.gmra.mxu0 %v11356_v39  ;;  %2889 = vmatmul.bf16.gmra.mxu1 %v11358_v46  ;;  %v1889_v8 = vpop.permute.xlu0 %1888  ;;  %v10037_v33 = vpop.permute.xlu1 %10036 }
 0x17e   : > { %v1891_v15 = vrot.slane %v1889_v8, 4  ;;  %v10039_v58 = vunpack.i.h.bf16 %v10037_v33  ;;  %v10038_v21 = vunpack.i.l.bf16 %v10037_v33  ;;  %v11364_v38 = vpop.permute.xlu2 %2081  ;;  %v11378_v61 = vpop.f32.mrf.mxu2 }
 0x17f   : > { %13662 = vst [vmem:[#allocation9_spill] sm:$0xff] %v11378_v61 }
 0x180   : > { %v1895_v29 = vsel %vm1893_vm7, %v1889_v8, %v1891_v15  ;;  %v1956_v43 = vrot.slane %v10039_v58, 4  ;;  %v1957_v52 = vrot.slane %v10038_v21, 4 }
 0x181   : > { %v1902_v57 = vsel %vm13641_vm11, %v1895_v29, %v1901_v14 }
 0x182   : > { %1903 = vst [vmem:[#allocation2 + $0xa4] sm:$0x3] %v1902_v57  ;;  %v1960_v0 = vsel %vm13661_vm3, %v1956_v43, %v1957_v52  ;;  %v1963_v31 = vsel %vm13438_vm10, %v10038_v21, %v1957_v52  ;;  %v1825_v43 = vld [vmem:[#allocation2 + $0x90] sm:$0x66] }
 0x183   : > { %v1971_v59 = vld [vmem:[#allocation2 + $0x9c] sm:$0x88]  ;;  %v1962_v23 = vsel %vm13438_vm10, %v10039_v58, %v1960_v0  ;;  %v1975_v54 = vsel %vm13586_vm1, %v1963_v31, %v1974_v60  ;;  %vm13665_vm10 = vnez %v13501_v20  ;;  %v1898_v0 = vld [vmem:[#allocation2 + $0x9c] sm:$0x33]  ;;  %v9677_v20 = vld [vmem:[%s13484_s8 + $0x74] sm:$0xf] }
 0x184   : > { %v1972_v8 = vsel %vm13588_vm0, %v1962_v23, %v1971_v59  ;;  %1976 = vst [vmem:[#allocation2 + $0xa4] sm:$0x8] %v1975_v54 }
 0x185   : > { %v1814_v33 = vpop.permute.xlu0 %1813  ;;  %1973 = vst [vmem:[#allocation2 + $0x9c] sm:$0x88] %v1972_v8  ;;  %v1887_v14 = vpop.permute.xlu1 %1886 }
 0x186   : > { %v1817_v29 = vrot.slane %v1814_v33, 4  ;;  %v1890_v57 = vrot.slane %v1887_v14, 4  ;;  %v11382_v44 = vpop.permute.xlu2 %2109 }
 0x188   : > { %v1819_v58 = vsel %vm13663_vm5, %v1817_v29, %v1818_v30  ;;  %v1892_v52 = vsel %vm13661_vm3, %v1890_v57, %v1891_v15  ;;  %v8407_v30 = vld [vmem:[#allocation2 + $0x98] sm:$0xf]  ;;  %vm13439_vm5 = vcmask 105472   ;;  %v2184_v15 = vld [vmem:[#allocation2 + $0xc8] sm:$0xc] }
 0x189   : > { %v1821_v21 = vsel %vm13664_vm15, %v1814_v33, %v1819_v58  ;;  %v1894_v60 = vsel %vm1893_vm7, %v1887_v14, %v1892_v52  ;;  %v2933_v33 = vpop.f32.mrf.mxu2  ;;  %v2058_v14 = vld [vmem:[#allocation2 + $0xbc] sm:$0x3]  ;;  %vm13667_vm7 = vcmask 736256   ;;  %vm13669_vm15 = vmmov %vm13661_vm3  ;;  %vm13670_vm3 = vcmask 277504  }
 0x18a   : > { %v1826_v59 = vsel %vm13665_vm10, %v1821_v21, %v1825_v43  ;;  %v1899_v31 = vsel %vm13642_vm12, %v1894_v60, %v1898_v0  ;;  %v2817_v23 = vpop.f32.mrf.mxu0  ;;  %v2875_v54 = vpop.f32.mrf.mxu1 }
 0x18b   : > { %1827 = vst [vmem:[#allocation2 + $0x90] sm:$0x66] %v1826_v59  ;;  %v2876_v24 = vadd.f32 %v2875_v54, %v2817_v23  ;;  %v9656_v8 = vld [vmem:[#allocation2 + $0xa0] sm:$0xf0]  ;;  %v13668_v23 = vrot.slane %v11305_v12, 4 }
 0x18c   : > { %1900 = vst [vmem:[#allocation2 + $0x9c] sm:$0x33] %v1899_v31  ;;  %v11394_v57 = vor.u32 %v9656_v8, %v8407_v30  ;;  %v13440_v30 = vrot.slane %v11364_v38, 4  ;;  %v2055_v12 = vld [vmem:[#allocation2 + $0xb4] sm:$0x33] }
 0x18d   : > { %v2046_v29 = vpop.permute.xlu0 %2045  ;;  %v11396_v58 = vadd.f32 %v2933_v33, %v2876_v24  ;;  %v1840_v43 = vpop.permute.xlu1 %1839 }
 0x18e   : > { %v2048_v21 = vrot.slane %v2046_v29, 4  ;;  %v1847_v52 = vrot.slane %v1840_v43, 4  ;;  %v11398_v59 = vpop.permute.xlu2 %2173  ;;  %8615 = vmatmul.msk.bf16.gmra.mxu2 %vm13667_vm7, %v11394_v57  ;;  %vm13441_vm7 = vcmask 97280  }
 0x18f   : > { %13666 = vst [vmem:[#allocation10_spill] sm:$0xff] %v11396_v58  ;;  %v2185_v0 = vsel %vm13577_vm2, %v11398_v59, %v2184_v15  ;;  %vm13671_vm2 = vmmov %vm13669_vm15 }
 0x190   : > { %v2052_v60 = vsel %vm13439_vm5, %v2046_v29, %v2048_v21  ;;  %v1851_v54 = vsel %vm13669_vm15, %v1847_v52, %v13668_v23  ;;  %2186 = vst [vmem:[#allocation2 + $0xc8] sm:$0xc] %v2185_v0  ;;  %vm2028_vm5 = vcmask 113664   ;;  %v2088_v29 = vsel %vm13441_vm7, %v11364_v38, %v13440_v30  ;;  %vm13674_vm7 = vmmov %vm13671_vm2 }
 0x191   : > { %v2059_v31 = vsel %vm13649_vm6, %v2052_v60, %v2058_v14  ;;  %v1853_v24 = vsel %vm13670_vm3, %v1840_v43, %v1851_v54  ;;  %v2036_v14 = vld [vmem:[#allocation2 + $0xb0] sm:$0xc]  ;;  %vm13672_vm15 = vcmask 105472   ;;  %v2033_v54 = vld [vmem:[#allocation2 + $0xa8] sm:$0xcc]  ;;  %vm13673_vm3 = vnez %v13559_v53 }
 0x192   : > { %2060 = vst [vmem:[#allocation2 + $0xbc] sm:$0x3] %v2059_v31  ;;  %v8469_v53 = vld [vmem:[%s13484_s8 + $0x48] sm:$0xf0] }
 0x193   : > { %1862 = vst [vmem:[#allocation2 + $0x90] sm:$0x88] %v1853_v24  ;;  %v9655_v24 = vld [vmem:[#allocation2 + $0x98] sm:$0xf0]  ;;  %v8401_v48 = vld [vmem:[#allocation2 + $0x9c] sm:$0xf0] }
 0x195   : > { %v2044_v8 = vpop.permute.xlu0 %2043  ;;  %v2024_v56 = vpop.permute.xlu1 %2023 }
 0x196   : > { %v2047_v33 = vrot.slane %v2044_v8, 4  ;;  %v2026_v15 = vrot.slane %v2024_v56, 4  ;;  %v2022_v52 = vpop.permute.xlu2 %2021 }
 0x197   : > { %v2025_v43 = vrot.slane %v2022_v52, 4 }
 0x198   : > { %v2049_v60 = vsel %vm13671_vm2, %v2047_v33, %v2048_v21  ;;  %v2030_v23 = vsel %vm2028_vm5, %v2024_v56, %v2026_v15  ;;  %vm13678_vm2 = vcmask 729088  }
 0x199   : > { %v2094_v0 = vld [vmem:[#allocation2 + $0xbc] sm:$0x6]  ;;  %v2051_v31 = vsel %vm13672_vm15, %v2044_v8, %v2049_v60  ;;  %v2037_v40 = vsel %vm13673_vm3, %v2030_v23, %v2036_v14  ;;  %v2027_v13 = vsel %vm13674_vm7, %v2025_v43, %v2026_v15  ;;  %vm13677_vm7 = vcmask 130048   ;;  %v11446_v14 = vpop.f32.mrf.mxu0 }
 0x19a   : > { %v2095_v34 = vsel %vm10382_vm4, %v2088_v29, %v2094_v0  ;;  %v2056_v30 = vsel %vm10301_vm8, %v2051_v31, %v2055_v12  ;;  %v8399_v21 = vld [vmem:[#allocation2 + $0x90] sm:$0xf]  ;;  %v9654_v33 = vld [vmem:[#allocation2 + $0x94] sm:$0xf]  ;;  %v2029_v8 = vsel %vm2028_vm5, %v2022_v52, %v2027_v13  ;;  %vm13675_vm4 = vnez %v13570_v27  ;;  %2038 = vst [vmem:[#allocation2 + $0xb0] sm:$0xc] %v2037_v40  ;;  %v11448_v52 = vpop.f32.mrf.mxu1 }
 0x19b   : > { %2096 = vst [vmem:[#allocation2 + $0xbc] sm:$0x6] %v2095_v34  ;;  %v11428_v56 = vor.u32 %v9655_v24, %v8399_v21  ;;  %v11430_v60 = vor.u32 %v9654_v33, %v8401_v48  ;;  %v2034_v35 = vsel %vm13675_vm4, %v2029_v8, %v2033_v54  ;;  %vm13676_vm5 = vcmask 732163   ;;  %v2130_v0 = vld [vmem:[#allocation2 + $0xc8] sm:$0x1]  ;;  %v11453_v24 = vpop.f32.mrf.mxu2 }
 0x19c   : > { %2057 = vst [vmem:[#allocation2 + $0xb4] sm:$0x33] %v2056_v30  ;;  %vm13679_vm15 = vcmask 1043456   ;;  %vm13680_vm8 = vcmask 1014784   ;;  %v2115_v31 = vrot.slane %v11382_v44, 4  ;;  %v2176_v23 = vrot.slane %v11398_v59, 4 }
 0x19d   : > { %2836 = vmatmul.bf16.gmra.mxu0 %v11428_v56  ;;  %2894 = vmatmul.bf16.gmra.mxu1 %v11430_v60  ;;  %v11436_v29 = vpop.permute.xlu0 %1954  ;;  %2035 = vst [vmem:[#allocation2 + $0xa8] sm:$0xcc] %v2034_v35  ;;  %v2108_v12 = vpop.permute.xlu1 %2107  ;;  %v2127_v21 = vld [vmem:[#allocation2 + $0xc0] sm:$0x11]  ;;  %v9683_v27 = vld [vmem:[%s13484_s8 + $0xa4] sm:$0xf] }
 0x19e   : > { %v13443_v34 = vrot.slane %v11436_v29, 4  ;;  %v2114_v13 = vrot.slane %v2108_v12, 4  ;;  %2126 = vst.msk [vmem:[#allocation2 + $0xbc] sm:$0x8] %vm13676_vm5, %v2108_v12  ;;  %v2106_v48 = vpop.permute.xlu2 %2105  ;;  %vm13681_vm5 = vnez %v13505_v47 }
 0x19f   : > { %v2113_v40 = vrot.slane %v2106_v48, 4 }
 0x1a0   : > { %v1966_v30 = vsel %vm13677_vm7, %v11436_v29, %v13443_v34  ;;  %vm13683_vm7 = vcmask 1014784  }
 0x1a1   : > { %1978 = vst.msk [vmem:[#allocation2 + $0xb0] sm:$0x1] %vm13678_vm2, %v1966_v30  ;;  %v2117_v15 = vsel %vm13679_vm15, %v2113_v40, %v2114_v13  ;;  %v2231_v13 = vld [vmem:[#allocation2 + $0xc8] sm:$0x8]  ;;  %v2181_v40 = vld [vmem:[#allocation2 + $0xc0] sm:$0xcc] }
 0x1a2   : > { %v2118_v43 = vsel %vm13680_vm8, %v2106_v48, %v2117_v15  ;;  %vm13682_vm8 = vmmov %vm13679_vm15  ;;  %vm13685_vm15 = vcmask 998400  }
 0x1a3   : > { %2125 = vst [vmem:[#allocation2 + $0xb4] sm:$0x88] %v2118_v43  ;;  %vm13684_vm2 = vmmov %vm13682_vm8 }
 0x1a5   : > { %v2112_v54 = vpop.permute.xlu0 %2111  ;;  %v2172_v35 = vpop.permute.xlu1 %2171  ;;  %v9659_v43 = vld [vmem:[#allocation2 + $0xb8] sm:$0xf0] }
 0x1a6   : > { %v2116_v33 = vrot.slane %v2112_v54, 4  ;;  %v2131_v8 = vsel %vm13681_vm5, %v2112_v54, %v2130_v0  ;;  %v2175_v12 = vrot.slane %v2172_v35, 4  ;;  %v10042_v30 = vpop.permute.xlu2 %10041  ;;  %vm13686_vm5 = vcmask 736256  }
 0x1a7   : > { %2132 = vst [vmem:[#allocation2 + $0xc8] sm:$0x1] %v2131_v8  ;;  %v10044_v34 = vunpack.i.h.bf16 %v10042_v30  ;;  %v10043_v59 = vunpack.i.l.bf16 %v10042_v30 }
 0x1a8   : > { %v2119_v48 = vsel %vm13682_vm8, %v2115_v31, %v2116_v33  ;;  %v8419_v15 = vld [vmem:[#allocation2 + $0xb0] sm:$0xf]  ;;  %v2177_v58 = vsel %vm13684_vm2, %v2175_v12, %v2176_v23  ;;  %vm2249_vm8 = vcmask 982016  }
 0x1a9   : > { %v2120_v61 = vsel %vm13683_vm7, %v11382_v44, %v2119_v48  ;;  %v11461_v49 = vor.u32 %v9659_v43, %v8419_v15  ;;  %v2178_v0 = vsel %vm13685_vm15, %v2172_v35, %v2177_v58  ;;  %v2216_v54 = vrot.slane %v10044_v34, 4  ;;  %vm13689_vm7 = vmmov %vm13684_vm2 }
 0x1aa   : > { %v2128_v47 = vsel %vm13579_vm9, %v2120_v61, %v2127_v21  ;;  %v2232_v31 = vsel %vm13586_vm1, %v10044_v34, %v2231_v13  ;;  %v2182_v33 = vsel %vm13659_vm14, %v2178_v0, %v2181_v40  ;;  %v2822_v8 = vpop.f32.mrf.mxu0  ;;  %v2880_v30 = vpop.f32.mrf.mxu1  ;;  %v2215_v44 = vrot.slane %v10043_v59, 4  ;;  %vm13687_vm9 = vmmov %vm13684_vm2  ;;  %v2253_v13 = vld [vmem:[#allocation2 + $0xcc] sm:$0x66] }
 0x1ab   : > { %2129 = vst [vmem:[#allocation2 + $0xc0] sm:$0x11] %v2128_v47  ;;  %8616 = vmatmul.msk.bf16.gmra.mxu2 %vm13686_vm5, %v11461_v49  ;;  %v2881_v23 = vadd.f32 %v2880_v30, %v2822_v8  ;;  %vm2220_vm1 = vcmask 990208   ;;  %vm13688_vm14 = vnez %v13486_v17  ;;  %v13690_v30 = vrot.slane %v11364_v38, 4  ;;  %vm13698_vm5 = vmmov %vm13684_vm2 }
 0x1ac   : > { %2183 = vst [vmem:[#allocation2 + $0xc0] sm:$0xcc] %v2182_v33  ;;  %v2219_v28 = vsel %vm13687_vm9, %v2215_v44, %v2216_v54  ;;  %v2091_v44 = vld [vmem:[#allocation2 + $0xb4] sm:$0x66]  ;;  %vm13691_vm15 = vcmask 97280   ;;  %vm13700_vm9 = vmmov %vm13684_vm2 }
 0x1ad   : > { %v2243_v61 = vpop.permute.xlu0 %2242  ;;  %2233 = vst [vmem:[#allocation2 + $0xc8] sm:$0x8] %v2232_v31  ;;  %v2245_v21 = vpop.permute.xlu1 %2244  ;;  %v2221_v40 = vsel %vm2220_vm1, %v10043_v59, %v2219_v28 }
 0x1ae   : > { %v2246_v58 = vrot.slane %v2243_v61, 4  ;;  %v2938_v35 = vpop.f32.mrf.mxu2  ;;  %v2247_v26 = vrot.slane %v2245_v21, 4  ;;  %v2257_v34 = vsel %vm13688_vm14, %v2245_v21, %v2256_v22  ;;  %v11481_v0 = vpop.permute.xlu2 %2211  ;;  %v2312_v21 = vld [vmem:[#allocation2 + $0xe0] sm:$0x3] }
 0x1af   : > { %v11475_v12 = vadd.f32 %v2938_v35, %v2881_v23  ;;  %2258 = vst [vmem:[#allocation2 + $0xd4] sm:$0x6] %v2257_v34  ;;  %v13692_v23 = vrot.slane %v11436_v29, 4 }
 0x1b0   : > { %v2248_v48 = vsel %vm13689_vm7, %v2246_v58, %v2247_v26  ;;  %v2162_v26 = vld [vmem:[#allocation2 + $0xc8] sm:$0x3]  ;;  %vm13705_vm7 = vnez %v13481_v1  ;;  %v8501_v1 = vld [vmem:[%s13484_s8 + $0x88] sm:$0xf0] }
 0x1b1   : > { %v2250_v15 = vsel %vm2249_vm8, %v2243_v61, %v2248_v48  ;;  %v8557_v61 = vld [vmem:[%s13484_s8 + $0xf8] sm:$0xf0]  ;;  %vm13702_vm8 = vmmov %vm13684_vm2 }
 0x1b2   : > { %v2254_v43 = vsel %vm13613_vm13, %v2250_v15, %v2253_v13  ;;  %vm13693_vm13 = vmmov %vm13684_vm2  ;;  %v8560_v35 = vor.u32 %v9693_v10, %v8557_v61  ;;  %v8493_v13 = vld [vmem:[%s13484_s8 + $0x78] sm:$0xf0] }
 0x1b3   : > { %v2228_v47 = vld [vmem:[#allocation2 + $0xc0] sm:$0x88]  ;;  %2255 = vst [vmem:[#allocation2 + $0xcc] sm:$0x66] %v2254_v43  ;;  %v8496_v15 = vor.u32 %v9677_v20, %v8493_v13  ;;  %v9691_v43 = vld [vmem:[%s13484_s8 + $0xe4] sm:$0xf] }
 0x1b4   : > { %v2229_v17 = vsel %vm13588_vm0, %v2221_v40, %v2228_v47  ;;  %vm13694_vm0 = vcmask 130048   ;;  %3030 = vmatpush.bf16.msrb.mxu2 %v8560_v35  ;;  %v8533_v13 = vld [vmem:[%s13484_s8 + $0xc8] sm:$0xf0] }
 0x1b5   : > { %v2080_v54 = vpop.permute.xlu0 %2079  ;;  %2230 = vst [vmem:[#allocation2 + $0xc0] sm:$0x88] %v2229_v17  ;;  %v1953_v33 = vpop.permute.xlu1 %1952  ;;  %v8549_v17 = vld [vmem:[%s13484_s8 + $0xe8] sm:$0xf0]  ;;  %2972 = vmatpush.bf16.msrb.mxu3 %v8496_v15 }
 0x1b6   : > { %v2083_v31 = vrot.slane %v2080_v54, 4  ;;  %v1958_v8 = vrot.slane %v1953_v33, 4  ;;  %v11501_v29 = vpop.permute.xlu2 %2300 }
 0x1b7   : > { %v2313_v34 = vsel %vm13649_vm6, %v11501_v29, %v2312_v21  ;;  %vm13695_vm6 = vmmov %vm13684_vm2  ;;  %v9673_v21 = vld [vmem:[%s13484_s8 + $0x54] sm:$0xf] }
 0x1b8   : > { %v2085_v59 = vsel %vm13684_vm2, %v2083_v31, %v13690_v30  ;;  %v1964_v22 = vsel %vm13693_vm13, %v1958_v8, %v13692_v23  ;;  %2314 = vst [vmem:[#allocation2 + $0xe0] sm:$0x3] %v2313_v34  ;;  %v8552_v31 = vor.u32 %v9691_v43, %v8549_v17  ;;  %v9675_v8 = vld [vmem:[%s13484_s8 + $0x64] sm:$0xf]  ;;  %v8485_v30 = vld [vmem:[%s13484_s8 + $0x68] sm:$0xf0] }
 0x1b9   : > { %v2087_v3 = vsel %vm13691_vm15, %v2080_v54, %v2085_v59  ;;  %v1965_v58 = vsel %vm13694_vm0, %v1953_v33, %v1964_v22  ;;  %v2159_v54 = vld [vmem:[#allocation2 + $0xc0] sm:$0x33]  ;;  %v8488_v23 = vor.u32 %v9675_v8, %v8485_v30  ;;  %v8541_v22 = vld [vmem:[%s13484_s8 + $0xd8] sm:$0xf0]  ;;  %v9671_v30 = vld [vmem:[%s13484_s8 + $0x44] sm:$0xf] }
 0x1ba   : > { %v2092_v38 = vsel %vm13665_vm10, %v2087_v3, %v2091_v44  ;;  %1977 = vst [vmem:[#allocation2 + $0xa8] sm:$0x11] %v1965_v58  ;;  %3031 = vmatpush.bf16.msrb.mxu2 %v8552_v31  ;;  %v8544_v58 = vor.u32 %v9689_v6, %v8541_v22  ;;  %v2291_v43 = vld [vmem:[#allocation2 + $0xd4] sm:$0xc]  ;;  %v8536_v31 = vor.u32 %v9687_v11, %v8533_v13  ;;  %vm13697_vm10 = vcmask 1044480  }
 0x1bb   : > { %2093 = vst [vmem:[#allocation2 + $0xb4] sm:$0x66] %v2092_v38  ;;  %2973 = vmatpush.bf16.msrb.mxu3 %v8488_v23  ;;  %v8472_v22 = vor.u32 %v9671_v30, %v8469_v53  ;;  %v9669_v11 = vld [vmem:[%s13484_s8 + $0x34] sm:$0xf]  ;;  %v8453_v30 = vld [vmem:[%s13484_s8 + $0x28] sm:$0xf0]  ;;  %vm13704_vm14 = vmmov %vm13697_vm10 }
 0x1bc   : > { %v8985_v53 = vld [vmem:[%s13701_s9 + $0x80] sm:$0xf]  ;;  %vm13706_vm2 = vcmask 736256  }
 0x1bd   : > { %v2150_v28 = vpop.permute.xlu0 %2149  ;;  %v2152_v40 = vpop.permute.xlu1 %2151  ;;  %vm13707_vm15 = vmmov %vm13706_vm2 }
 0x1be   : > { %v2153_v48 = vrot.slane %v2150_v28, 4  ;;  %v2154_v47 = vrot.slane %v2152_v40, 4  ;;  %v2163_v45 = vsel %vm13641_vm11, %v2152_v40, %v2162_v26  ;;  %vm13696_vm11 = vcmask 1006592   ;;  %v8477_v26 = vld [vmem:[%s13484_s8 + $0x58] sm:$0xf0]  ;;  %3032 = vmatpush.bf16.msrb.mxu2 %v8544_v58  ;;  %vm13708_vm13 = vmmov %vm13706_vm2 }
 0x1bf   : > { %2164 = vst [vmem:[#allocation2 + $0xc8] sm:$0x3] %v2163_v45  ;;  %v8480_v20 = vor.u32 %v9673_v21, %v8477_v26  ;;  %v8605_v40 = vld [vmem:[%s13484_s8 + $0x158] sm:$0x10]  ;;  %v2303_v58 = vrot.slane %v11501_v29, 4  ;;  %vm13709_vm0 = vmmov %vm13706_vm2 }
 0x1c0   : > { %v2155_v33 = vsel %vm13695_vm6, %v2153_v48, %v2154_v47  ;;  %v9705_v48 = vld [vmem:[%s13484_s8 + $0x154] sm:$0xf]  ;;  %v8517_v29 = vld [vmem:[%s13484_s8 + $0xa8] sm:$0xf0]  ;;  %vm13710_vm6 = vmmov %vm13709_vm0 }
 0x1c1   : > { %v2156_v59 = vsel %vm13696_vm11, %v2150_v28, %v2155_v33  ;;  %v8411_v61 = vld [vmem:[#allocation2 + $0xa8] sm:$0xf]  ;;  %v9657_v38 = vld [vmem:[#allocation2 + $0xac] sm:$0xf]  ;;  %v8608_v45 = vor.u32 %v9705_v48, %v8605_v40  ;;  %v2217_v33 = vrot.slane %v11481_v0, 4  ;;  %2974 = vmatpush.bf16.msrb.mxu3 %v8480_v20  ;;  %vm13711_vm11 = vmmov %vm13709_vm0 }
 0x1c2   : > { %v9658_v44 = vld [vmem:[#allocation2 + $0xb0] sm:$0xf0]  ;;  %v8413_v3 = vld [vmem:[#allocation2 + $0xb4] sm:$0xf0]  ;;  %v2160_v10 = vsel %vm13642_vm12, %v2156_v59, %v2159_v54  ;;  %vm2284_vm12 = vcmask 973824   ;;  %3033 = vmatpush.bf16.msrb.mxu2 %v8536_v31 }
 0x1c3   : > { %2161 = vst [vmem:[#allocation2 + $0xc0] sm:$0x33] %v2160_v10  ;;  %v11539_v35 = vor.u32 %v9658_v44, %v8411_v61  ;;  %v11541_v28 = vor.u32 %v9657_v38, %v8413_v3  ;;  %v2796_v8 = vsel %vm13697_vm10, %v8608_v45, 0  ;;  %v9685_v59 = vld [vmem:[%s13484_s8 + $0xb4] sm:$0xf]  ;;  %vm13713_vm10 = vmmov %vm13709_vm0 }
 0x1c4   : > { %3090 = vmatpush.bf16.msrb.mxu0 %v2796_v8  ;;  %v8525_v44 = vld [vmem:[%s13484_s8 + $0xb8] sm:$0xf0]  ;;  %v2288_v3 = vld [vmem:[#allocation2 + $0xcc] sm:$0xcc]  ;;  %v9703_v10 = vld [vmem:[%s13484_s8 + $0x144] sm:$0xf] }
 0x1c5   : > { %v2278_v34 = vpop.permute.xlu0 %2277  ;;  %v2280_v47 = vpop.permute.xlu1 %2279  ;;  %2841 = vmatmul.bf16.gmra.mxu0 %v11539_v35  ;;  %2899 = vmatmul.bf16.gmra.mxu1 %v11541_v28  ;;  %v8597_v61 = vld [vmem:[%s13484_s8 + $0x148] sm:$0xf0]  ;;  %v8528_v21 = vor.u32 %v9685_v59, %v8525_v44  ;;  %v9701_v48 = vld [vmem:[%s13484_s8 + $0x134] sm:$0xf]  ;;  %v2309_v45 = vld [vmem:[#allocation2 + $0xd8] sm:$0x33] }
 0x1c6   : > { %v2281_v15 = vrot.slane %v2278_v34, 4  ;;  %v2282_v17 = vrot.slane %v2280_v47, 4  ;;  %v2292_v54 = vsel %vm13673_vm3, %v2280_v47, %v2291_v43  ;;  %v8600_v26 = vor.u32 %v9703_v10, %v8597_v61  ;;  %2975 = vmatpush.bf16.msrb.mxu3 %v8472_v22  ;;  %v8589_v43 = vld [vmem:[%s13484_s8 + $0x138] sm:$0xf0]  ;;  %v9667_v8 = vld [vmem:[%s13484_s8 + $0x24] sm:$0xf]  ;;  %v11622_v59 = vpop.f32.mrf.mxu0 }
 0x1c7   : > { %2293 = vst [vmem:[#allocation2 + $0xd4] sm:$0xc] %v2292_v54  ;;  %vm13699_vm3 = vcmask 729088   ;;  %3034 = vmatpush.bf16.msrb.mxu2 %v8528_v21  ;;  %v8592_v54 = vor.u32 %v9701_v48, %v8589_v43  ;;  %v8509_v22 = vld [vmem:[%s13484_s8 + $0x98] sm:$0xf0]  ;;  %v11655_v48 = vpop.f32.mrf.mxu2 }
 0x1c8   : > { %v2283_v6 = vsel %vm13698_vm5, %v2281_v15, %v2282_v17  ;;  %3091 = vmatpush.bf16.msrb.mxu0 %v8600_v26  ;;  %v8520_v17 = vor.u32 %v9683_v27, %v8517_v29  ;;  %v9699_v10 = vld [vmem:[%s13484_s8 + $0x124] sm:$0xf]  ;;  %v8581_v61 = vld [vmem:[%s13484_s8 + $0x128] sm:$0xf0]  ;;  %v9665_v21 = vld [vmem:[%s13484_s8 + $0x14] sm:$0xf] }
 0x1c9   : > { %v2285_v23 = vsel %vm2284_vm12, %v2278_v34, %v2283_v6  ;;  %v8461_v34 = vld [vmem:[%s13484_s8 + $0x38] sm:$0xf0]  ;;  %v9681_v6 = vld [vmem:[%s13484_s8 + $0x94] sm:$0xf]  ;;  %v9679_v27 = vld [vmem:[%s13484_s8 + $0x84] sm:$0xf] }
 0x1ca   : > { %v2289_v38 = vsel %vm13675_vm4, %v2285_v23, %v2288_v3  ;;  %v8464_v13 = vor.u32 %v9669_v11, %v8461_v34  ;;  %vm2305_vm4 = vcmask 965632   ;;  %v8456_v23 = vor.u32 %v9667_v8, %v8453_v30  ;;  %v8445_v26 = vld [vmem:[%s13484_s8 + $0x18] sm:$0xf0]  ;;  %v9697_v29 = vld [vmem:[%s13484_s8 + $0x114] sm:$0xf]  ;;  %vm13712_vm12 = vmmov %vm13709_vm0 }
 0x1cb   : > { %2290 = vst [vmem:[#allocation2 + $0xcc] sm:$0xcc] %v2289_v38  ;;  %v11636_v38 = vpop.f32.mrf.mxu1  ;;  %v13703_v11 = vmov 65535   ;;  %3035 = vmatpush.bf16.msrb.mxu2 %v8520_v17  ;;  %v8431_v43 = vld [vmem:[#allocation2 + $0xc8] sm:$0xf]  ;;  %v8504_v8 = vor.u32 %v9679_v27, %v8501_v1  ;;  %vm13714_vm5 = vmmov %vm13709_vm0 }
 0x1cc   : > { %2976 = vmatpush.bf16.msrb.mxu3 %v8464_v13  ;;  %3092 = vmatpush.bf16.msrb.mxu0 %v8592_v54  ;;  %v4251_v34 = vsel %vm13704_vm14, 4294967295, %v13703_v11  ;;  %v8512_v13 = vor.u32 %v9681_v6, %v8509_v22  ;;  %v8423_v30 = vld [vmem:[#allocation2 + $0xc0] sm:$0xf]  ;;  %v9660_v6 = vld [vmem:[#allocation2 + $0xc4] sm:$0xf] }
 0x1cd   : > { %v2214_v20 = vpop.permute.xlu0 %2213  ;;  %v2299_v15 = vpop.permute.xlu1 %2298  ;;  %v2352_v27 = vld [vmem:[#allocation2 + $0xe0] sm:$0x3] }
 0x1ce   : > { %v2218_v40 = vrot.slane %v2214_v20, 4  ;;  %2235 = vst.msk [vmem:[#allocation2 + $0xd4] sm:$0x1] %vm13699_vm3, %v2214_v20  ;;  %v2302_v47 = vrot.slane %v2299_v15, 4  ;;  %vm13720_vm3 = vmmov %vm13709_vm0 }
 0x1cf   : > { %3036 = vmatpush.bf16.msrb.mxu2 %v8512_v13 }
 0x1d0   : > { %v2222_v31 = vsel %vm13700_vm9, %v2217_v33, %v2218_v40  ;;  %v9795_v33 = vld [vmem:[%s13701_s9 + $0x80] sm:$0x30]  ;;  %v2304_v3 = vsel %vm13702_vm8, %v2302_v47, %v2303_v58  ;;  %v8584_v58 = vor.u32 %v9699_v10, %v8581_v61  ;;  %2977 = vmatpush.bf16.msrb.mxu3 %v8456_v23  ;;  %v8448_v40 = vor.u32 %v9665_v21, %v8445_v26  ;;  %v8565_v21 = vld [vmem:[%s13484_s8 + $0x108] sm:$0xf0]  ;;  %vm13724_vm9 = vmmov %vm13709_vm0 }
 0x1d1   : > { %v2223_v44 = vsel %vm2220_vm1, %v11481_v0, %v2222_v31  ;;  %v2306_v0 = vsel %vm2305_vm4, %v2299_v15, %v2304_v3  ;;  %vm4250_vm1 = vcmask 1045504   ;;  %v8573_v15 = vld [vmem:[%s13484_s8 + $0x118] sm:$0xf0]  ;;  %v8986_v17 = vor.u32 %v9795_v33, %v8985_v53  ;;  %v9663_v53 = vld [vmem:[%s13484_s8 + $0x4] sm:$0xf]  ;;  %vm13725_vm8 = vmmov %vm13709_vm0 }
 0x1d2   : > { %2234 = vst [vmem:[#allocation2 + $0xcc] sm:$0x11] %v2223_v44  ;;  %v2310_v20 = vsel %vm13705_vm7, %v2306_v0, %v2309_v45  ;;  %3093 = vmatpush.bf16.msrb.mxu0 %v8584_v58  ;;  %v8576_v45 = vor.u32 %v9697_v29, %v8573_v15  ;;  %v4252_v31 = vsel %vm4250_vm1, %v4251_v34, 0  ;;  %v8437_v0 = vld [vmem:[%s13484_s8 + $0x8] sm:$0xf0]  ;;  %v2491_v29 = vunpack.c.l.b16 %v2352_v27 }
 0x1d3   : > { %2311 = vst [vmem:[#allocation2 + $0xd8] sm:$0x33] %v2310_v20  ;;  %v11671_v33 = vand.u32 %v8986_v17, %v4252_v31  ;;  %v9695_v58 = vld [vmem:[%s13484_s8 + $0x104] sm:$0xf]  ;;  %3037 = vmatpush.bf16.msrb.mxu2 %v8504_v8  ;;  %v8440_v11 = vor.u32 %v9663_v53, %v8437_v0  ;;  %v2943_v20 = vpop.f32.mrf.mxu2  ;;  %vm13723_vm4 = vcmask 1041408   ;;  %vm3173_vm1 = vcmask 154624  }
 0x1d4   : > { %2978 = vmatpush.bf16.msrb.mxu3 %v8448_v40  ;;  %v8568_v34 = vor.u32 %v9695_v58, %v8565_v21  ;;  %v11691_v1 = vpack.c.b16 %v2491_v29, %v2491_v29  ;;  %s13759_s8 = smov 108  }
 0x1d5   : > { %v9662_v47 = vld [vmem:[#allocation2 + $0xd0] sm:$0xf0] }
 0x1d6   : > { %v11663_v54 = vor.u32 %v9662_v47, %v8431_v43  ;;  %3094 = vmatpush.bf16.msrb.mxu0 %v8576_v45 }
 0x1d8   : > { %8617 = vmatmul.msk.bf16.gmra.mxu2 %vm13706_vm2, %v11663_v54  ;;  %v2827_v44 = vpop.f32.mrf.mxu0  ;;  %2979 = vmatpush.bf16.msrb.mxu3 %v8440_v11 }
 0x1d9   : > { %v9661_v3 = vld [vmem:[#allocation2 + $0xc8] sm:$0xf0]  ;;  %v8425_v23 = vld [vmem:[#allocation2 + $0xcc] sm:$0xf0]  ;;  %v2885_v22 = vpop.f32.mrf.mxu1 }
 0x1da   : > { %v11673_v10 = vor.u32 %v9661_v3, %v8423_v30  ;;  %v11675_v61 = vor.u32 %v9660_v6, %v8425_v23  ;;  %v2886_v26 = vadd.f32 %v2885_v22, %v2827_v44  ;;  %3095 = vmatpush.bf16.msrb.mxu0 %v8568_v34  ;;  %v2351_v40 = vld [vmem:[#allocation2 + $0xd8] sm:$0x33] }
 0x1db   : > { %v2489_v15 = vunpack.c.l.b16 %v2351_v40  ;;  %v2490_v43 = vunpack.c.h.b16 %v2351_v40  ;;  %v2945_v17 = vpop.f32.mrf.mxu2 }
 0x1dc   : > { %2846 = vmatmul.bf16.gmra.mxu0 %v11673_v10  ;;  %2904 = vmatmul.bf16.vlgmr.msra.gmra.mxu3 %v11675_v61  ;;  %v11688_v13 = vadd.f32 %v2943_v20, %v2886_v26 }
 0x1dd   : > { %v11695_v47 = vpack.c.b16 %v2489_v15, %v2489_v15  ;;  %v11697_v45 = vpack.c.b16 %v2490_v43, %v2490_v43  ;;  %v2883_v43 = vadd.f32 %v11636_v38, %v11622_v59 }
 0x1de   : > { %4361 = vmatpush.bf16.msra.mxu0 %v11671_v33 }
 0x1e0   : > { %v2829_v31 = vpop.f32.mrf.mxu0 }
 0x1e1   : > { %v2887_v8 = vpop.f32.mrf.mxu1 }
 0x1e8   : > { %8618 = vmatmul.msk.bf16.gmra.mxu2 %vm13707_vm15, %v11691_v1 }
 0x1ec   : > { %2851 = vmatmul.bf16.gmra.mxu0 %v11695_v47  ;;  %2909 = vmatmul.bf16.gmra.mxu3 %v11697_v45 }
 0x1f8   : > { %3038 = vmatmul.bf16.vlgmr.msrb.gmra.mxu2 %v10843_v9 }
 0x1fa   : > { %v2832_v9 = vpop.f32.mrf.mxu0 }
 0x1fc   : > { %2980 = vmatmul.bf16.vlgmr.msrb.gmra.mxu3 %v10841_v2  ;;  %8619 = vmatmul.msk.bf16.vlgmr.msrb.gmra.mxu0 %vm13708_vm13, %v10727_v37  ;;  %v2948_v2 = vpop.f32.mrf.mxu2  ;;  %v2890_v37 = vpop.f32.mrf.mxu1  ;;  %vm3679_vm13 = vcmask 551936  }
 0x1fd   : > { %v2891_v34 = vadd.f32 %v2890_v37, %v2832_v9  ;;  %v2878_v9 = vadd.f32 %v11448_v52, %v11446_v14  ;;  %v2941_v37 = vadd.f32 %v11655_v48, %v2883_v43  ;;  %v13715_v52 = vld [vmem:[#allocation6_spill] sm:$0xff] }
 0x1fe   : > { %v13716_v48 = vld [vmem:[#allocation10_spill] sm:$0xff] }
 0x1ff   : > { %v2949_v40 = vadd.f32 %v2948_v2, %v2891_v34  ;;  %v3152_v59 = vpack.c.bf16 %v2941_v37, %v11475_v12  ;;  %v2936_v38 = vadd.f32 %v11453_v24, %v2878_v9 }
 0x201   : > { %v3150_v2 = vpack.c.bf16 %v2936_v38, %v13716_v48 }
 0x204   : > { %v2950_v30 = vpop.f32.mrf.mxu2 }
 0x208   : > { %3043 = vmatmul.bf16.gmra.mxu2 %v10928_v16  ;;  %v2892_v16 = vpop.f32.mrf.mxu1 }
 0x20c   : > { %2985 = vmatmul.bf16.gmra.mxu3 %v10926_v19  ;;  %8620 = vmatmul.msk.bf16.gmra.mxu0 %vm13709_vm0, %v10880_v42  ;;  %v2834_v19 = vpop.f32.mrf.mxu0  ;;  %vm3684_vm0 = vcmask 84992  }
 0x211   : > { %v2953_v42 = vpop.f32.mrf.mxu2 }
 0x218   : > { %3048 = vmatmul.bf16.gmra.mxu2 %v11032_v36 }
 0x21a   : > { %v2837_v36 = vpop.f32.mrf.mxu0  ;;  %v2895_v6 = vpop.f32.mrf.mxu1 }
 0x21c   : > { %2990 = vmatmul.bf16.gmra.mxu3 %v11030_v25  ;;  %8621 = vmatmul.msk.bf16.gmra.mxu0 %vm13710_vm6, %v10998_v5  ;;  %v2955_v25 = vpop.f32.mrf.mxu2  ;;  %vm13737_vm6 = vcmask 1043456  }
 0x222   : > { %v2839_v5 = vpop.f32.mrf.mxu0  ;;  %v2897_v44 = vpop.f32.mrf.mxu1 }
 0x223   : > { %v2898_v22 = vadd.f32 %v2897_v44, %v2839_v5 }
 0x225   : > { %v2956_v11 = vadd.f32 %v2955_v25, %v2898_v22 }
 0x228   : > { %3053 = vmatmul.bf16.gmra.mxu2 %v11131_v7 }
 0x22c   : > { %2995 = vmatmul.bf16.gmra.mxu3 %v11129_v32  ;;  %8622 = vmatmul.msk.bf16.gmra.mxu0 %vm13711_vm11, %v11118_v41  ;;  %vm13738_vm11 = vcmask 1039360  }
 0x22e   : > { %v2958_v7 = vpop.f32.mrf.mxu2 }
 0x238   : > { %3058 = vmatmul.bf16.gmra.mxu2 %v11279_v55  ;;  %v2960_v55 = vpop.f32.mrf.mxu2 }
 0x23c   : > { %3000 = vmatmul.bf16.gmra.mxu3 %v11276_v63  ;;  %8623 = vmatmul.msk.bf16.gmra.mxu0 %vm13712_vm12, %v11188_v18  ;;  %v2896_v63 = vadd.f32 %v2895_v6, %v2837_v36  ;;  %v2893_v18 = vadd.f32 %v2892_v16, %v2834_v19  ;;  %v13718_v16 = vld [vmem:[#allocation8_spill] sm:$0xff]  ;;  %vm4225_vm12 = vcmask 89088  }
 0x23e   : > { %v2954_v20 = vadd.f32 %v2953_v42, %v2896_v63  ;;  %v2951_v29 = vadd.f32 %v2950_v30, %v2893_v18 }
 0x240   : > { %v3158_v27 = vpack.c.bf16 %v2956_v11, %v2954_v20 }
 0x242   : > { %v2842_v3 = vpop.f32.mrf.mxu0  ;;  %v2900_v23 = vpop.f32.mrf.mxu1 }
 0x243   : > { %v2901_v32 = vadd.f32 %v2900_v23, %v2842_v3 }
 0x245   : > { %v2959_v58 = vadd.f32 %v2958_v7, %v2901_v32  ;;  %v13722_v7 = vld [vmem:[#allocation4_spill] sm:$0xff] }
 0x246   : > { %v11752_v3 = vsel %vm13723_vm4, %v13722_v7, 0  ;;  %vm13742_vm4 = vcmask 1022976  }
 0x248   : > { %3063 = vmatmul.bf16.gmra.mxu2 %v11358_v46  ;;  %v2888_v46 = vadd.f32 %v2887_v8, %v2829_v31  ;;  %v2873_v31 = vadd.f32 %v11371_v4, %v11369_v50  ;;  %v13719_v4 = vld [vmem:[#allocation7_spill] sm:$0xff] }
 0x24a   : > { %v2844_v41 = vpop.f32.mrf.mxu0  ;;  %v2902_v53 = vpop.f32.mrf.mxu1  ;;  %v2946_v15 = vadd.f32 %v2945_v17, %v2888_v46 }
 0x24b   : > { %v2903_v0 = vadd.f32 %v2902_v53, %v2844_v41 }
 0x24c   : > { %3005 = vmatmul.bf16.gmra.mxu3 %v11356_v39  ;;  %8624 = vmatmul.msk.bf16.gmra.mxu0 %vm13713_vm10, %v11322_v51  ;;  %v3156_v39 = vpack.c.bf16 %v2951_v29, %v2949_v40  ;;  %vm13739_vm10 = vmmov %vm13737_vm6 }
 0x24d   : > { %v2961_v21 = vadd.f32 %v2960_v55, %v2903_v0 }
 0x24f   : > { %v3160_v26 = vpack.c.bf16 %v2961_v21, %v2959_v58 }
 0x251   : > { %3187 = vmatpush.bf16.msrb.mxu1 %v3160_v26 }
 0x255   : > { %3188 = vmatpush.bf16.msrb.mxu1 %v3158_v27 }
 0x258   : > { %3068 = vmatmul.bf16.gmra.mxu2 %v11430_v60  ;;  %v3154_v60 = vpack.c.bf16 %v2946_v15, %v11688_v13 }
 0x259   : > { %v2847_v51 = vpop.f32.mrf.mxu0  ;;  %3189 = vmatpush.bf16.msrb.mxu1 %v3156_v39 }
 0x25b   : > { %v2963_v19 = vpop.f32.mrf.mxu2 }
 0x25c   : > { %3010 = vmatmul.bf16.gmra.mxu3 %v11428_v56  ;;  %8625 = vmatmul.msk.bf16.gmra.mxu0 %vm13714_vm5, %v11394_v57  ;;  %v2868_v56 = vadd.f32 %v13715_v52, %v11297_v62  ;;  %v13717_v57 = vld [vmem:[#allocation9_spill] sm:$0xff]  ;;  %vm13740_vm5 = vcmask 1031168  }
 0x25d   : > { %3190 = vmatpush.bf16.msrb.mxu1 %v3154_v60  ;;  %v2931_v30 = vadd.f32 %v13717_v57, %v2873_v31  ;;  %v13721_v62 = vld [vmem:[#allocation5_spill] sm:$0xff] }
 0x25e   : > { %v2926_v12 = vadd.f32 %v13719_v4, %v2868_v56 }
 0x25f   : > { %v2905_v17 = vpop.f32.mrf.mxu3  ;;  %v3148_v50 = vpack.c.bf16 %v2931_v30, %v13718_v16 }
 0x260   : > { %v3146_v36 = vpack.c.bf16 %v2926_v12, %v13721_v62  ;;  %v2906_v41 = vadd.f32 %v2905_v17, %v2847_v51 }
 0x261   : > { %v2849_v8 = vpop.f32.mrf.mxu0  ;;  %3191 = vmatpush.bf16.msrb.mxu1 %v3152_v59 }
 0x263   : > { %v2965_v14 = vpop.f32.mrf.mxu2 }
 0x265   : > { %3192 = vmatpush.bf16.msrb.mxu1 %v3150_v2 }
 0x267   : > { %v2907_v13 = vpop.f32.mrf.mxu3 }
 0x268   : > { %3073 = vmatmul.bf16.gmra.mxu2 %v11541_v28  ;;  %v2908_v28 = vadd.f32 %v2907_v13, %v2849_v8 }
 0x269   : > { %v2852_v42 = vpop.f32.mrf.mxu0  ;;  %3193 = vmatpush.bf16.msrb.mxu1 %v3148_v50 }
 0x26a   : > { %v2966_v53 = vadd.f32 %v2965_v14, %v2908_v28 }
 0x26b   : > { %v2968_v24 = vpop.f32.mrf.mxu2 }
 0x26c   : > { %3015 = vmatmul.bf16.gmra.mxu3 %v11539_v35  ;;  %8626 = vmatmul.msk.bf16.gmra.mxu0 %vm13720_vm3, %v11461_v49  ;;  %v2964_v49 = vadd.f32 %v2963_v19, %v2906_v41  ;;  %vm13741_vm3 = vmmov %vm13737_vm6 }
 0x26d   : > { %3194 = vmatpush.bf16.msrb.mxu1 %v3146_v36 }
 0x26e   : > { %v3162_v63 = vpack.c.bf16 %v2966_v53, %v2964_v49 }
 0x26f   : > { %v2910_v6 = vpop.f32.mrf.mxu3 }
 0x270   : > { %v2911_v25 = vadd.f32 %v2910_v6, %v2852_v42 }
 0x271   : > { %v2854_v5 = vpop.f32.mrf.mxu0 }
 0x272   : > { %v2969_v44 = vadd.f32 %v2968_v24, %v2911_v25 }
 0x273   : > { %v2970_v23 = vpop.f32.mrf.mxu2 }
 0x274   : > { %v3164_v32 = vpack.c.bf16 %v2969_v44, %v2969_v44  ;;  %v3166_v44 = vld [vmem:[%s13726_s5] sm:$0xff]  ;;  %s13448_s5 = smov 107  }
 0x275   : > { %v3169_v28 = vunpack.c.h.b16 %v3166_v44 }
 0x276   : > { %v3182_v35 = vand.u32 %v11752_v3, %v3164_v32 }
 0x277   : > { %v2912_v22 = vpop.f32.mrf.mxu3  ;;  %v11794_v23 = vpack.c.b16 %v3169_v28, %v3169_v28 }
 0x278   : > { %3078 = vmatmul.bf16.gmra.mxu2 %v11675_v61  ;;  %3206 = vmatpush.bf16.msra.mxu3 %v3182_v35  ;;  %v3168_v35 = vunpack.c.l.b16 %v3166_v44 }
 0x279   : > { %v3097_v0 = vpop.f32.mrf.mxu0 }
 0x27a   : > { %v11798_v53 = vpack.c.b16 %v3168_v35, %v3168_v35 }
 0x27b   : > { %v3039_v55 = vpop.f32.mrf.mxu2 }
 0x27c   : > { %3020 = vmatmul.bf16.gmra.mxu3 %v11673_v10  ;;  %8627 = vmatmul.msk.bf16.gmra.mxu0 %vm13724_vm9, %v11663_v54  ;;  %vm3745_vm9 = vcmask 900096  }
 0x27d   : > { %3207 = vmatpush.bf16.msra.mxu3 %v3162_v63  ;;  %3195 = vmatmul.bf16.vlgmr.msrb.gmra.mxu1 %v11798_v53 }
 0x27f   : > { %v2981_v58 = vpop.f32.mrf.mxu3 }
 0x280   : > { %v3040_v21 = vadd.f32 %v3039_v55, %v2981_v58 }
 0x281   : > { %v11759_v18 = vpop.f32.mrf.mxu0 }
 0x282   : > { %v11761_v26 = vadd.f32 %v3097_v0, %v3040_v21 }
 0x283   : > { %v11763_v11 = vpop.f32.mrf.mxu2 }
 0x287   : > { %v11765_v61 = vpop.f32.mrf.mxu3 }
 0x288   : > { %3083 = vmatmul.bf16.gmra.mxu2 %v11697_v45 }
 0x289   : > { %v3102_v34 = vpop.f32.mrf.mxu0 }
 0x28b   : > { %v3044_v20 = vpop.f32.mrf.mxu2 }
 0x28c   : > { %3025 = vmatmul.bf16.gmra.mxu3 %v11695_v47  ;;  %8628 = vmatmul.msk.bf16.gmra.mxu0 %vm13725_vm8, %v11691_v1  ;;  %vm13743_vm8 = vmmov %vm13741_vm3 }
 0x28f   : > { %v2986_v54 = vpop.f32.mrf.mxu3 }
 0x290   : > { %v3045_v10 = vadd.f32 %v3044_v20, %v2986_v54 }
 0x291   : > { %v11771_v46 = vpop.f32.mrf.mxu0 }
 0x292   : > { %v11773_v27 = vadd.f32 %v3102_v34, %v3045_v10 }
 0x293   : > { %v11775_v29 = vpop.f32.mrf.mxu2 }
 0x297   : > { %v11777_v40 = vpop.f32.mrf.mxu3 }
 0x299   : > { %v3107_v39 = vpop.f32.mrf.mxu0 }
 0x29b   : > { %v3049_v15 = vpop.f32.mrf.mxu2 }
 0x29c   : > { %8629 = vmatmul.msk.bf16.vlgmr.msra.gmra.mxu3 %vm3173_vm1, %v11794_v23 }
 0x29f   : > { %v2991_v45 = vpop.f32.mrf.mxu3 }
 0x2a0   : > { %v3050_v51 = vadd.f32 %v3049_v15, %v2991_v45 }
 0x2a1   : > { %v11779_v43 = vpop.f32.mrf.mxu0 }
 0x2a2   : > { %v11781_v47 = vadd.f32 %v3107_v39, %v3050_v51 }
 0x2a3   : > { %v11783_v19 = vpop.f32.mrf.mxu2 }
 0x2a7   : > { %v11785_v1 = vpop.f32.mrf.mxu3 }
 0x2a9   : > { %v3112_v9 = vpop.f32.mrf.mxu0 }
 0x2ab   : > { %v3054_v37 = vpop.f32.mrf.mxu2 }
 0x2af   : > { %v2996_v60 = vpop.f32.mrf.mxu3 }
 0x2b0   : > { %v3055_v17 = vadd.f32 %v3054_v37, %v2996_v60 }
 0x2b1   : > { %v11787_v31 = vpop.f32.mrf.mxu0 }
 0x2b2   : > { %v11789_v59 = vadd.f32 %v3112_v9, %v3055_v17 }
 0x2b3   : > { %v3056_v38 = vpop.f32.mrf.mxu2 }
 0x2b7   : > { %v2998_v8 = vpop.f32.mrf.mxu3 }
 0x2b8   : > { %v3057_v44 = vadd.f32 %v3056_v38, %v2998_v8 }
 0x2b9   : > { %v3117_v14 = vpop.f32.mrf.mxu0 }
 0x2bb   : > { %v3059_v52 = vpop.f32.mrf.mxu2 }
 0x2bf   : > { %v3001_v56 = vpop.f32.mrf.mxu3 }
 0x2c0   : > { %v3060_v48 = vadd.f32 %v3059_v52, %v3001_v56 }
 0x2c1   : > { %v3119_v2 = vpop.f32.mrf.mxu0 }
 0x2c2   : > { %v3118_v57 = vadd.f32 %v3117_v14, %v3060_v48 }
 0x2c3   : > { %v3061_v30 = vpop.f32.mrf.mxu2 }
 0x2c7   : > { %v3003_v13 = vpop.f32.mrf.mxu3 }
 0x2c8   : > { %v3062_v17 = vadd.f32 %v3061_v30, %v3003_v13  ;;  %v3047_v13 = vadd.f32 %v11775_v29, %v11777_v40 }
 0x2c9   : > { %v3122_v16 = vpop.f32.mrf.mxu0 }
 0x2ca   : > { %v3120_v28 = vadd.f32 %v3119_v2, %v3062_v17  ;;  %v3042_v2 = vadd.f32 %v11763_v11, %v11765_v61  ;;  %v9744_v17 = vld [vmem:[%s13727_s15 + $0x128] sm:$0xf0] }
 0x2cb   : > { %v3064_v50 = vpop.f32.mrf.mxu2 }
 0x2cc   : > { %v3100_v29 = vadd.f32 %v11759_v18, %v3042_v2 }
 0x2cf   : > { %v3006_v4 = vpop.f32.mrf.mxu3 }
 0x2d0   : > { %v3065_v9 = vadd.f32 %v3064_v50, %v3006_v4  ;;  %v3115_v50 = vadd.f32 %v11787_v31, %v3057_v44  ;;  %v3155_v4 = vpack.c.bf16 %v3120_v28, %v3118_v57  ;;  %v9741_v44 = vld [vmem:[%s13727_s15 + $0x110] sm:$0xf0] }
 0x2d1   : > { %v3124_v12 = vpop.f32.mrf.mxu0 }
 0x2d2   : > { %v3123_v48 = vadd.f32 %v3122_v16, %v3065_v9  ;;  %v3153_v38 = vpack.c.bf16 %v3115_v50, %v11789_v59  ;;  %v8681_v9 = vld [vmem:[%s13727_s15 + $0x60] sm:$0xf]  ;;  %v9714_v50 = vld [vmem:[%s13727_s15 + $0x38] sm:$0xf0] }
 0x2d3   : > { %v3066_v42 = vpop.f32.mrf.mxu2 }
 0x2d7   : > { %v3008_v24 = vpop.f32.mrf.mxu3 }
 0x2d8   : > { %v3067_v15 = vadd.f32 %v3066_v42, %v3008_v24  ;;  %v3052_v42 = vadd.f32 %v11783_v19, %v11785_v1  ;;  %v3105_v19 = vadd.f32 %v11771_v46, %v3047_v13  ;;  %v3147_v46 = vpack.c.bf16 %v3100_v29, %v11761_v26  ;;  %v9729_v26 = vld [vmem:[%s13727_s15 + $0xb0] sm:$0xf0]  ;;  %v8741_v29 = vld [vmem:[%s13727_s15 + $0xd8] sm:$0xf] }
 0x2d9   : > { %v3127_v62 = vpop.f32.mrf.mxu0 }
 0x2da   : > { %v3125_v14 = vadd.f32 %v3124_v12, %v3067_v15  ;;  %v3110_v16 = vadd.f32 %v11779_v43, %v3052_v42  ;;  %v3149_v59 = vpack.c.bf16 %v3105_v19, %v11773_v27  ;;  %v9747_v15 = vld [vmem:[%s13727_s15 + $0x140] sm:$0xf0]  ;;  %v8657_v42 = vld [vmem:[%s13727_s15 + $0x30] sm:$0xf] }
 0x2db   : > { %v3069_v36 = vpop.f32.mrf.mxu2 }
 0x2dc   : > { %v3151_v31 = vpack.c.bf16 %v3110_v16, %v11781_v47 }
 0x2df   : > { %v3011_v6 = vpop.f32.mrf.mxu3 }
 0x2e0   : > { %v3070_v20 = vadd.f32 %v3069_v36, %v3011_v6  ;;  %v3157_v36 = vpack.c.bf16 %v3125_v14, %v3123_v48  ;;  %v9717_v48 = vld [vmem:[%s13727_s15 + $0x50] sm:$0xf0] }
 0x2e1   : > { %v3129_v25 = vpop.f32.mrf.mxu0 }
 0x2e2   : > { %v3128_v37 = vadd.f32 %v3127_v62, %v3070_v20 }
 0x2e3   : > { %v3071_v5 = vpop.f32.mrf.mxu2 }
 0x2e7   : > { %v3013_v7 = vpop.f32.mrf.mxu3 }
 0x2e8   : > { %v3072_v58 = vadd.f32 %v3071_v5, %v3013_v7 }
 0x2e9   : > { %v3132_v32 = vpop.f32.mrf.mxu0 }
 0x2ea   : > { %v3130_v45 = vadd.f32 %v3129_v25, %v3072_v58  ;;  %v8801_v58 = vld [vmem:[%s13727_s15 + $0x150] sm:$0xf] }
 0x2eb   : > { %v3074_v41 = vpop.f32.mrf.mxu2 }
 0x2ec   : > { %v3159_v52 = vpack.c.bf16 %v3130_v45, %v3128_v37  ;;  %v9720_v37 = vld [vmem:[%s13727_s15 + $0x68] sm:$0xf0] }
 0x2ed   : > { %v8682_v14 = vor.u32 %v9720_v37, %v8681_v9  ;;  %v9719_v9 = vld [vmem:[%s13727_s15 + $0x64] sm:$0xf]  ;;  %v8683_v37 = vld [vmem:[%s13727_s15 + $0x6c] sm:$0xf0] }
 0x2ef   : > { %v3016_v22 = vpop.f32.mrf.mxu3 }
 0x2f0   : > { %v3075_v55 = vadd.f32 %v3074_v41, %v3016_v22  ;;  %v8717_v22 = vld [vmem:[%s13727_s15 + $0xa8] sm:$0xf] }
 0x2f1   : > { %v3134_v49 = vpop.f32.mrf.mxu0 }
 0x2f2   : > { %v3133_v54 = vadd.f32 %v3132_v32, %v3075_v55  ;;  %v9726_v55 = vld [vmem:[%s13727_s15 + $0x98] sm:$0xf0] }
 0x2f3   : > { %v3076_v0 = vpop.f32.mrf.mxu2 }
 0x2f7   : > { %v3018_v63 = vpop.f32.mrf.mxu3 }
 0x2f8   : > { %v3077_v21 = vadd.f32 %v3076_v0, %v3018_v63  ;;  %v8705_v0 = vld [vmem:[%s13727_s15 + $0x90] sm:$0xf] }
 0x2f9   : > { %v3137_v34 = vpop.f32.mrf.mxu0 }
 0x2fa   : > { %v3135_v10 = vadd.f32 %v3134_v49, %v3077_v21  ;;  %v3196_v18 = vpop.f32.mrf.mxu1  ;;  %v8813_v49 = vld [vmem:[%s13727_s15 + $0x168] sm:$0xf]  ;;  %v9750_v21 = vld [vmem:[%s13727_s15 + $0x158] sm:$0xf0] }
 0x2fb   : > { %v3079_v39 = vpop.f32.mrf.mxu2  ;;  %v8802_v20 = vor.u32 %v9750_v21, %v8801_v58  ;;  %v8803_v58 = vld [vmem:[%s13727_s15 + $0x15c] sm:$0xf0] }
 0x2fc   : > { %v3161_v51 = vpack.c.bf16 %v3135_v10, %v3133_v54  ;;  %v8693_v54 = vld [vmem:[%s13727_s15 + $0x78] sm:$0xf]  ;;  %v9723_v10 = vld [vmem:[%s13727_s15 + $0x80] sm:$0xf0] }
 0x2fd   : > { %v8694_v45 = vor.u32 %v9723_v10, %v8693_v54  ;;  %v8695_v54 = vld [vmem:[%s13727_s15 + $0x84] sm:$0xf0]  ;;  %v9746_v10 = vld [vmem:[%s13727_s15 + $0x13c] sm:$0xf] }
 0x2fe   : > { %3213 = vmatpush.bf16.msra.mxu1 %v3161_v51 }
 0x2ff   : > { %v3021_v60 = vpop.f32.mrf.mxu3 }
 0x300   : > { %v3080_v40 = vadd.f32 %v3079_v39, %v3021_v60  ;;  %v8789_v39 = vld [vmem:[%s13727_s15 + $0x138] sm:$0xf]  ;;  %v8777_v60 = vld [vmem:[%s13727_s15 + $0x120] sm:$0xf] }
 0x301   : > { %v3139_v56 = vpop.f32.mrf.mxu0  ;;  %v8790_v51 = vor.u32 %v9747_v15, %v8789_v39  ;;  %v8791_v15 = vld [vmem:[%s13727_s15 + $0x144] sm:$0xf0] }
 0x302   : > { %3214 = vmatpush.bf16.msra.mxu1 %v3159_v52  ;;  %v3138_v61 = vadd.f32 %v3137_v34, %v3080_v40  ;;  %v3198_v27 = vpop.f32.mrf.mxu1  ;;  %v8706_v34 = vor.u32 %v9726_v55, %v8705_v0  ;;  %v8778_v52 = vor.u32 %v9744_v17, %v8777_v60  ;;  %v8707_v0 = vld [vmem:[%s13727_s15 + $0x9c] sm:$0xf0]  ;;  %v9749_v55 = vld [vmem:[%s13727_s15 + $0x154] sm:$0xf]  ;;  %v9743_v60 = vld [vmem:[%s13727_s15 + $0x124] sm:$0xf]  ;;  %v8686_v17 = vor.u32 %v9719_v9, %v8683_v37 }
 0x303   : > { %v3081_v5 = vpop.f32.mrf.mxu2  ;;  %v8806_v21 = vor.u32 %v9749_v55, %v8803_v58  ;;  %v8725_v58 = vld [vmem:[%s13727_s15 + $0xb0] sm:$0xf]  ;;  %v9727_v37 = vld [vmem:[%s13727_s15 + $0xa0] sm:$0xf0] }
 0x306   : > { %3215 = vmatpush.bf16.msra.mxu1 %v3157_v36 }
 0x307   : > { %v3023_v6 = vpop.f32.mrf.mxu3 }
 0x308   : > { %v3082_v12 = vadd.f32 %v3081_v5, %v3023_v6  ;;  %v8765_v5 = vld [vmem:[%s13727_s15 + $0x108] sm:$0xf] }
 0x309   : > { %v3142_v24 = vpop.f32.mrf.mxu0  ;;  %v8766_v6 = vor.u32 %v9741_v44, %v8765_v5  ;;  %v8671_v5 = vld [vmem:[%s13727_s15 + $0x54] sm:$0xf0]  ;;  %v9740_v44 = vld [vmem:[%s13727_s15 + $0x10c] sm:$0xf] }
 0x30a   : > { %3216 = vmatpush.bf16.msra.mxu1 %v3155_v4  ;;  %v3140_v7 = vadd.f32 %v3139_v56, %v3082_v12  ;;  %v8669_v56 = vld [vmem:[%s13727_s15 + $0x48] sm:$0xf]  ;;  %v8753_v4 = vld [vmem:[%s13727_s15 + $0xf0] sm:$0xf] }
 0x30b   : > { %v3084_v30 = vpop.f32.mrf.mxu2  ;;  %v8670_v28 = vor.u32 %v9717_v48, %v8669_v56  ;;  %v9716_v48 = vld [vmem:[%s13727_s15 + $0x4c] sm:$0xf] }
 0x30c   : > { %v3163_v47 = vpack.c.bf16 %v3140_v7, %v3138_v61  ;;  %v10151_v7 = vmov 256.0   ;;  %v8729_v61 = vld [vmem:[%s13727_s15 + $0xc0] sm:$0xf] }
 0x30d   : > { %10045 = vrcp.f32 %v10151_v7  ;;  %v9707_v7 = vld [vmem:[%s13727_s15 + $0x4] sm:$0xf] }
 0x30e   : > { %3217 = vmatpush.bf16.msra.mxu1 %v3153_v38 }
 0x30f   : > { %v3026_v8 = vpop.f32.mrf.mxu3 }
 0x310   : > { %v3085_v1 = vadd.f32 %v3084_v30, %v3026_v8  ;;  %v8658_v30 = vor.u32 %v9714_v50, %v8657_v42  ;;  %v9713_v50 = vld [vmem:[%s13727_s15 + $0x34] sm:$0xf] }
 0x311   : > { %v3144_v57 = vpop.f32.mrf.mxu0 }
 0x312   : > { %v3143_v62 = vadd.f32 %v3142_v24, %v3085_v1  ;;  %3218 = vmatpush.bf16.msra.mxu1 %v3151_v31  ;;  %v9738_v24 = vld [vmem:[%s13727_s15 + $0xf8] sm:$0xf0] }
 0x313   : > { %v3086_v25 = vpop.f32.mrf.mxu2  ;;  %v8754_v13 = vor.u32 %v9738_v24, %v8753_v4  ;;  %v8659_v4 = vld [vmem:[%s13727_s15 + $0x3c] sm:$0xf0]  ;;  %v9737_v24 = vld [vmem:[%s13727_s15 + $0xf4] sm:$0xf] }
 0x314   : > { %v3165_v43 = vpack.c.bf16 %v3143_v62, %v3143_v62  ;;  %v8645_v62 = vld [vmem:[%s13727_s15 + $0x18] sm:$0xf]  ;;  %v9711_v25 = vld [vmem:[%s13727_s15 + $0x20] sm:$0xf0] }
 0x315   : > { %v8646_v40 = vor.u32 %v9711_v25, %v8645_v62 }
 0x316   : > { %v3185_v32 = vand.u32 %v11752_v3, %v3165_v43  ;;  %3219 = vmatpush.bf16.msra.mxu1 %v3149_v59  ;;  %v9735_v43 = vld [vmem:[%s13727_s15 + $0xe0] sm:$0xf0] }
 0x317   : > { %v3028_v11 = vpop.f32.mrf.mxu3  ;;  %v8742_v59 = vor.u32 %v9735_v43, %v8741_v29 }
 0x318   : > { %3232 = vmatpush.bf16.msrb.mxu3 %v3185_v32  ;;  %v8633_v32 = vld [vmem:[%s13727_s15] sm:$0xf]  ;;  %v9708_v11 = vld [vmem:[%s13727_s15 + $0x8] sm:$0xf0] }
 0x31a   : > { %3220 = vmatpush.bf16.msra.mxu1 %v3147_v46  ;;  %v8634_v46 = vor.u32 %v9708_v11, %v8633_v32  ;;  %v8635_v32 = vld [vmem:[%s13727_s15 + $0xc] sm:$0xf0]  ;;  %v9731_v11 = vld [vmem:[%s13727_s15 + $0xc4] sm:$0xf] }
 0x31c   : > { %3233 = vmatpush.bf16.msrb.mxu3 %v3163_v47  ;;  %v9732_v47 = vld [vmem:[%s13727_s15 + $0xc8] sm:$0xf0] }
 0x31d   : > { %3221 = vmatmul.bf16.vlgmr.msra.gmra.mxu1 %v11798_v53  ;;  %v8718_v53 = vor.u32 %v9729_v26, %v8717_v22  ;;  %v8730_v27 = vor.u32 %v9732_v47, %v8729_v61  ;;  %v9752_v22 = vld [vmem:[%s13727_s15 + $0x16c] sm:$0xf]  ;;  %v8815_v26 = vld [vmem:[%s13727_s15 + $0x174] sm:$0xf0]  ;;  %v8638_v61 = vor.u32 %v9707_v7, %v8635_v32  ;;  %v8749_v7 = vld [vmem:[%s13727_s15 + $0xe0] sm:$0xf] }
 0x31e   : > { %v9736_v32 = vld [vmem:[%s13727_s15 + $0xe8] sm:$0xf0] }
 0x31f   : > { %8630 = vmatmul.msk.bf16.vlgmr.msrb.gmra.mxu3 %vm3173_vm1, %v11794_v23  ;;  %v3209_v41 = vpop.f32.mrf.mxu3  ;;  %v9753_v23 = vld [vmem:[%s13727_s15 + $0x170] sm:$0xf0]  ;;  %vm3796_vm1 = vcmask 875520  }
 0x320   : > { %v8814_v63 = vor.u32 %v9753_v23, %v8813_v49  ;;  %3598 = vmatpush.bf16.msra.mxu3 %v8718_v53  ;;  %v11891_v16 = vadd.f32 %v3209_v41, %v3196_v18  ;;  %v9728_v18 = vld [vmem:[%s13727_s15 + $0xac] sm:$0xf]  ;;  %v8719_v41 = vld [vmem:[%s13727_s15 + $0xb4] sm:$0xf0]  ;;  %v8818_v49 = vor.u32 %v9752_v22, %v8815_v26  ;;  %v10046_v53 = vpop.eup %10045  ;;  %v9725_v23 = vld [vmem:[%s13727_s15 + $0x94] sm:$0xf] }
 0x321   : > { %vm3247_vm14 = vweird.f32 %v10046_v53 }
 0x322   : > { %3611 = vmatpush.bf16.msrb.mxu1 %v8814_v63  ;;  %v3250_v1 = vmul.f32 %v11891_v16, %v11891_v16  ;;  %v8710_v63 = vor.u32 %v9725_v23, %v8707_v0 }
 0x324   : > { %3599 = vmatpush.bf16.msra.mxu3 %v8706_v34  ;;  %v3243_v34 = vmul.f32 256.0, %v10046_v53 }
 0x326   : > { %3612 = vmatpush.bf16.msrb.mxu1 %v8802_v20  ;;  %v9722_v20 = vld [vmem:[%s13727_s15 + $0x7c] sm:$0xf] }
 0x327   : > { %v3211_v35 = vpop.f32.mrf.mxu3  ;;  %v8698_v39 = vor.u32 %v9722_v20, %v8695_v54  ;;  %v9730_v20 = vld [vmem:[%s13727_s15 + $0xb8] sm:$0xf0]  ;;  %v8821_v54 = vld [vmem:[%s13727_s15 + $0x170] sm:$0xf] }
 0x328   : > { %3600 = vmatpush.bf16.msra.mxu3 %v8694_v45  ;;  %v8722_v35 = vor.u32 %v9728_v18, %v8719_v41  ;;  %v8794_v45 = vor.u32 %v9746_v10, %v8791_v15 }
 0x32a   : > { %3613 = vmatpush.bf16.msrb.mxu1 %v8790_v51  ;;  %v3244_v51 = vsub.f32 1.0, %v3243_v34 }
 0x32c   : > { %3601 = vmatpush.bf16.msra.mxu3 %v8682_v14  ;;  %v8779_v14 = vld [vmem:[%s13727_s15 + $0x12c] sm:$0xf0]  ;;  %v3245_v56 = vmul.f32 %v10046_v53, %v3244_v51 }
 0x32e   : > { %3614 = vmatpush.bf16.msrb.mxu1 %v8778_v52  ;;  %v8782_v52 = vor.u32 %v9743_v60, %v8779_v14  ;;  %v3246_v42 = vadd.f32 %v10046_v53, %v3245_v56  ;;  %v8809_v60 = vld [vmem:[%s13727_s15 + $0x158] sm:$0xf]  ;;  %v8701_v56 = vld [vmem:[%s13727_s15 + $0x80] sm:$0xf] }
 0x330   : > { %3602 = vmatpush.bf16.msra.mxu3 %v8670_v28  ;;  %v8674_v28 = vor.u32 %v9716_v48, %v8671_v5  ;;  %v9724_v48 = vld [vmem:[%s13727_s15 + $0x88] sm:$0xf0]  ;;  %v8797_v5 = vld [vmem:[%s13727_s15 + $0x140] sm:$0xf] }
 0x332   : > { %3615 = vmatpush.bf16.msrb.mxu1 %v8766_v6 }
 0x334   : > { %3603 = vmatpush.bf16.msra.mxu3 %v8658_v30  ;;  %v8662_v30 = vor.u32 %v9713_v50, %v8659_v4  ;;  %v8785_v50 = vld [vmem:[%s13727_s15 + $0x128] sm:$0xf]  ;;  %v9745_v4 = vld [vmem:[%s13727_s15 + $0x130] sm:$0xf0] }
 0x336   : > { %3616 = vmatpush.bf16.msrb.mxu1 %v8754_v13  ;;  %v8755_v13 = vld [vmem:[%s13727_s15 + $0xfc] sm:$0xf0] }
 0x338   : > { %3604 = vmatpush.bf16.msra.mxu3 %v8646_v40 }
 0x33a   : > { %3617 = vmatpush.bf16.msrb.mxu1 %v8742_v59 }
 0x33c   : > { %3605 = vmatpush.bf16.msra.mxu3 %v8634_v46  ;;  %v8731_v46 = vld [vmem:[%s13727_s15 + $0xcc] sm:$0xf0] }
 0x33d   : > { %v8734_v18 = vor.u32 %v9731_v11, %v8731_v46  ;;  %v8641_v46 = vld [vmem:[%s13727_s15 + $0x8] sm:$0xf] }
 0x33e   : > { %3618 = vmatpush.bf16.msrb.mxu1 %v8730_v27 }
 0x340   : > { %3624 = vmatpush.bf16.msrb.mxu3 %v8722_v35 }
 0x342   : > { %3637 = vmatpush.bf16.msra.mxu1 %v8818_v49 }
 0x344   : > { %3625 = vmatpush.bf16.msrb.mxu3 %v8710_v63 }
 0x346   : > { %3638 = vmatpush.bf16.msra.mxu1 %v8806_v21 }
 0x348   : > { %3626 = vmatpush.bf16.msrb.mxu3 %v8698_v39  ;;  %v8726_v39 = vor.u32 %v9730_v20, %v8725_v58 }
 0x34a   : > { %3639 = vmatpush.bf16.msra.mxu1 %v8794_v45  ;;  %v8713_v45 = vld [vmem:[%s13727_s15 + $0x98] sm:$0xf] }
 0x34b   : > { %v8714_v14 = vor.u32 %v9727_v37, %v8713_v45 }
 0x34c   : > { %3627 = vmatpush.bf16.msrb.mxu3 %v8686_v17  ;;  %v9751_v17 = vld [vmem:[%s13727_s15 + $0x160] sm:$0xf0] }
 0x34e   : > { %3640 = vmatpush.bf16.msra.mxu1 %v8782_v52  ;;  %v8810_v52 = vor.u32 %v9751_v17, %v8809_v60 }
 0x350   : > { %3628 = vmatpush.bf16.msrb.mxu3 %v8674_v28  ;;  %v8702_v28 = vor.u32 %v9724_v48, %v8701_v56 }
 0x354   : > { %3629 = vmatpush.bf16.msrb.mxu3 %v8662_v30  ;;  %v8786_v30 = vor.u32 %v9745_v4, %v8785_v50  ;;  %v9792_v50 = vld [vmem:[%s13701_s9 + $0x68] sm:$0xff]  ;;  %v9783_v4 = vld [vmem:[%s13701_s9 + $0x20] sm:$0xff] }
 0x39a   : > { %v3222_v36 = vpop.f32.mrf.mxu1 }
 0x3a2   : > { %v3224_v38 = vpop.f32.mrf.mxu1  ;;  %v3235_v8 = vpop.f32.mrf.mxu3 }
 0x3a3   : > { %v11893_v2 = vadd.f32 %v3235_v8, %v3222_v36  ;;  %v8767_v36 = vld [vmem:[%s13727_s15 + $0x114] sm:$0xf0]  ;;  %v9710_v38 = vld [vmem:[%s13727_s15 + $0x1c] sm:$0xf]  ;;  %v8647_v8 = vld [vmem:[%s13727_s15 + $0x24] sm:$0xf0] }
 0x3a4   : > { %v8770_v6 = vor.u32 %v9740_v44, %v8767_v36  ;;  %v9748_v44 = vld [vmem:[%s13727_s15 + $0x148] sm:$0xf0] }
 0x3a5   : > { %v3239_v19 = vadd.f32 %v11893_v2, %v11891_v16  ;;  %v3251_v31 = vmul.f32 %v11893_v2, %v11893_v2  ;;  %v8798_v36 = vor.u32 %v9748_v44, %v8797_v5  ;;  %v9786_v5 = vld [vmem:[%s13701_s9 + $0x38] sm:$0xff] }
 0x3a6   : > { %3641 = vmatpush.bf16.msra.mxu1 %v8770_v6  ;;  %v8689_v6 = vld [vmem:[%s13727_s15 + $0x68] sm:$0xf]  ;;  %v9794_v44 = vld [vmem:[%s13701_s9 + $0x78] sm:$0xff] }
 0x3a7   : > { %3240 = vadd.xlane.f32.xlu0 %v3239_v19  ;;  %v3252_v57 = vadd.f32 %v3251_v31, %v3250_v1  ;;  %v8758_v19 = vor.u32 %v9737_v24, %v8755_v13  ;;  %v9734_v1 = vld [vmem:[%s13727_s15 + $0xdc] sm:$0xf]  ;;  %v8743_v31 = vld [vmem:[%s13727_s15 + $0xe4] sm:$0xf0]  ;;  %v8677_v13 = vld [vmem:[%s13727_s15 + $0x50] sm:$0xf]  ;;  %4305 = vmatpush.bf16.msra.mxu2 %v9794_v44 }
 0x3a8   : > { %v8746_v62 = vor.u32 %v9734_v1, %v8743_v31 }
 0x3a9   : > { %3253 = vadd.xlane.f32.xlu1 %v3252_v57  ;;  %v3248_v57 = vsel %vm3247_vm14, %v10046_v53, %v3246_v42  ;;  %v9721_v42 = vld [vmem:[%s13727_s15 + $0x70] sm:$0xf0]  ;;  %vm3762_vm14 = vcmask 891904  }
 0x3aa   : > { %v3237_v12 = vpop.f32.mrf.mxu3  ;;  %3642 = vmatpush.bf16.msra.mxu1 %v8758_v19  ;;  %v8690_v24 = vor.u32 %v9721_v42, %v8689_v6  ;;  %v9742_v19 = vld [vmem:[%s13727_s15 + $0x118] sm:$0xf0]  ;;  %v9784_v42 = vld [vmem:[%s13701_s9 + $0x28] sm:$0xff] }
 0x3ab   : > { %v8650_v12 = vor.u32 %v9710_v38, %v8647_v8  ;;  %v9718_v38 = vld [vmem:[%s13727_s15 + $0x58] sm:$0xf0]  ;;  %v8773_v8 = vld [vmem:[%s13727_s15 + $0x110] sm:$0xf] }
 0x3ac   : > { %v8678_v1 = vor.u32 %v9718_v38, %v8677_v13  ;;  %v8774_v31 = vor.u32 %v9742_v19, %v8773_v8  ;;  %v9782_v13 = vld [vmem:[%s13701_s9 + $0x18] sm:$0xff]  ;;  %v9781_v8 = vld [vmem:[%s13701_s9 + $0x10] sm:$0xff] }
 0x3ad   : > { %3630 = vmatpush.bf16.msrb.mxu3 %v8650_v12  ;;  %v9715_v12 = vld [vmem:[%s13727_s15 + $0x40] sm:$0xf0]  ;;  %v9790_v38 = vld [vmem:[%s13701_s9 + $0x58] sm:$0xff]  ;;  %v9789_v19 = vld [vmem:[%s13701_s9 + $0x50] sm:$0xff] }
 0x3ae   : > { %3643 = vmatpush.bf16.msra.mxu1 %v8746_v62  ;;  %v8761_v62 = vld [vmem:[%s13727_s15 + $0xf8] sm:$0xf] }
 0x3b1   : > { %3631 = vmatpush.bf16.msrb.mxu3 %v8638_v61  ;;  %v8750_v61 = vor.u32 %v9736_v32, %v8749_v7 }
 0x3b2   : > { %3644 = vmatpush.bf16.msra.mxu1 %v8734_v18  ;;  %v8737_v18 = vld [vmem:[%s13727_s15 + $0xc8] sm:$0xf] }
 0x41a   : > { %v3241_v25 = vpop.xlane.xlu0 %3240 }
 0x41b   : > { %v3249_v29 = vmul.f32 %v3248_v57, %v3241_v25  ;;  %v9739_v25 = vld [vmem:[%s13727_s15 + $0x100] sm:$0xf0] }
 0x41c   : > { %v3254_v40 = vpop.xlane.xlu1 %3253 }
 0x41d   : > { %v3255_v43 = vmul.f32 %v3254_v40, %v3248_v57  ;;  %v3256_v59 = vmul.f32 %v3249_v29, %v3249_v29  ;;  %v3259_v0 = vsub.f32 %v11891_v16, %v3249_v29  ;;  %v3260_v55 = vsub.f32 %v11893_v2, %v3249_v29  ;;  %v9754_v16 = vld [vmem:[%s13727_s15 + $0x178] sm:$0xf0]  ;;  %v8665_v57 = vld [vmem:[%s13727_s15 + $0x38] sm:$0xf] }
 0x41e   : > { %v8822_v15 = vor.u32 %v9754_v16, %v8821_v54  ;;  %v8666_v29 = vor.u32 %v9715_v12, %v8665_v57  ;;  %v8762_v40 = vor.u32 %v9739_v25, %v8761_v62  ;;  %v9788_v57 = vld [vmem:[%s13701_s9 + $0x48] sm:$0xff]  ;;  %v9779_v62 = vld [vmem:[%s13701_s9] sm:$0xff] }
 0x41f   : > { %v3257_v47 = vsub.f32 %v3255_v43, %v3256_v59  ;;  %v8653_v43 = vld [vmem:[%s13727_s15 + $0x20] sm:$0xf]  ;;  %v9712_v59 = vld [vmem:[%s13727_s15 + $0x28] sm:$0xf0] }
 0x420   : > { %v8654_v11 = vor.u32 %v9712_v59, %v8653_v43  ;;  %v9787_v25 = vld [vmem:[%s13701_s9 + $0x40] sm:$0xff] }
 0x421   : > { %v3258_v41 = vmax.f32 %v3257_v47, 0.0  ;;  %v9709_v47 = vld [vmem:[%s13727_s15 + $0x10] sm:$0xf0] }
 0x423   : > { %v3261_v27 = vadd.f32 1e-05, %v3258_v41  ;;  %v9733_v41 = vld [vmem:[%s13727_s15 + $0xd0] sm:$0xf0] }
 0x425   : > { %10047 = vrsqrt.f32 %v3261_v27  ;;  %vm3268_vm2 = vweird.f32 %v3261_v27 }
 0x42b   : > { %v10048_v35 = vpop.eup %10047 }
 0x42c   : > { %v3263_v22 = vmul.f32 %v10048_v35, %v3261_v27  ;;  %vm3269_vm7 = vweird.f32 %v10048_v35  ;;  %v8642_v27 = vor.u32 %v9709_v47, %v8641_v46 }
 0x42d   : > { %vm3270_vm15 = vmor %vm3268_vm2, %vm3269_vm7 }
 0x42e   : > { %v3264_v26 = vmul.f32 %v10048_v35, %v3263_v22  ;;  %vm13744_vm7 = vmmov %vm13741_vm3 }
 0x42f   : > { %vm13745_vm2 = vmmov %vm13741_vm3 }
 0x430   : > { %v3265_v49 = vmul.f32 0.5, %v3264_v26 }
 0x432   : > { %v3266_v53 = vsub.f32 1.5, %v3265_v49 }
 0x434   : > { %v3267_v23 = vmul.f32 %v10048_v35, %v3266_v53 }
 0x436   : > { %v3271_v63 = vsel %vm3270_vm15, %v10048_v35, %v3267_v23  ;;  %v8738_v35 = vor.u32 %v9733_v41, %v8737_v18  ;;  %vm3779_vm15 = vcmask 883712  }
 0x437   : > { %v3272_v21 = vmul.f32 %v3271_v63, %v3259_v0  ;;  %v3273_v34 = vmul.f32 %v3271_v63, %v3260_v55 }
 0x439   : > { %v3274_v2 = vmax.f32 %v3272_v21, 0.0  ;;  %v3275_v10 = vmax.f32 %v3273_v34, 0.0 }
 0x43b   : > { %v12038_v51 = vpack.c.bf16 %v3274_v2, %v3274_v2  ;;  %v12040_v9 = vpack.c.bf16 %v3275_v10, %v3275_v10 }
 0x43d   : > { %3606 = vmatmul.bf16.vlgmr.msra.gmra.mxu3 %v12038_v51  ;;  %3619 = vmatmul.bf16.vlgmr.msrb.gmra.mxu1 %v12040_v9 }
 0x43e   : > { %3650 = vmatpush.bf16.msra.mxu3 %v8726_v39  ;;  %3663 = vmatpush.bf16.msrb.mxu1 %v8822_v15 }
 0x442   : > { %3651 = vmatpush.bf16.msra.mxu3 %v8714_v14  ;;  %3664 = vmatpush.bf16.msrb.mxu1 %v8810_v52 }
 0x446   : > { %3652 = vmatpush.bf16.msra.mxu3 %v8702_v28  ;;  %3665 = vmatpush.bf16.msrb.mxu1 %v8798_v36  ;;  %v9785_v28 = vld [vmem:[%s13701_s9 + $0x30] sm:$0xff] }
 0x447   : > { %v9793_v36 = vld [vmem:[%s13701_s9 + $0x70] sm:$0xff] }
 0x448   : > { %4306 = vmatpush.bf16.msra.mxu2 %v9793_v36 }
 0x44a   : > { %3653 = vmatpush.bf16.msra.mxu3 %v8690_v24  ;;  %3666 = vmatpush.bf16.msrb.mxu1 %v8786_v30  ;;  %v9791_v24 = vld [vmem:[%s13701_s9 + $0x60] sm:$0xff] }
 0x44c   : > { %4307 = vmatpush.bf16.msra.mxu2 %v9792_v50 }
 0x44d   : > { %3632 = vmatmul.bf16.vlgmr.msrb.gmra.mxu3 %v12038_v51  ;;  %3645 = vmatmul.bf16.vlgmr.msra.gmra.mxu1 %v12040_v9 }
 0x44e   : > { %3654 = vmatpush.bf16.msra.mxu3 %v8678_v1  ;;  %3667 = vmatpush.bf16.msrb.mxu1 %v8774_v31  ;;  %v9780_v31 = vld [vmem:[%s13701_s9 + $0x8] sm:$0xff]  ;;  %s13790_s9 = smov 114  }
 0x450   : > { %4308 = vmatpush.bf16.msra.mxu2 %v9791_v24 }
 0x452   : > { %3655 = vmatpush.bf16.msra.mxu3 %v8666_v29  ;;  %3668 = vmatpush.bf16.msrb.mxu1 %v8762_v40 }
 0x454   : > { %4309 = vmatpush.bf16.msra.mxu2 %v9790_v38 }
 0x456   : > { %3656 = vmatpush.bf16.msra.mxu3 %v8654_v11  ;;  %3669 = vmatpush.bf16.msrb.mxu1 %v8750_v61 }
 0x458   : > { %4310 = vmatpush.bf16.msra.mxu2 %v9789_v19 }
 0x45a   : > { %3657 = vmatpush.bf16.msra.mxu3 %v8642_v27  ;;  %3670 = vmatpush.bf16.msrb.mxu1 %v8738_v35 }
 0x45c   : > { %4311 = vmatpush.bf16.msra.mxu2 %v9788_v57 }
 0x45d   : > { %3658 = vmatmul.bf16.vlgmr.msra.gmra.mxu3 %v12038_v51  ;;  %3671 = vmatmul.bf16.vlgmr.msrb.gmra.mxu1 %v12040_v9 }
 0x45e   : > { %9937 = vmatpush.bf16.msra.mxu1 %v11671_v33  ;;  %4256 = vmatpush.bf16.msrb.mxu3 %v9786_v5 }
 0x460   : > { %4312 = vmatpush.bf16.msra.mxu2 %v9787_v25 }
 0x462   : > { %4257 = vmatpush.bf16.msrb.mxu3 %v9785_v28 }
 0x466   : > { %4258 = vmatpush.bf16.msrb.mxu3 %v9784_v42 }
 0x46a   : > { %4259 = vmatpush.bf16.msrb.mxu3 %v9783_v4 }
 0x46e   : > { %4260 = vmatpush.bf16.msrb.mxu3 %v9782_v13 }
 0x472   : > { %4261 = vmatpush.bf16.msrb.mxu3 %v9781_v8 }
 0x476   : > { %4262 = vmatpush.bf16.msrb.mxu3 %v9780_v31 }
 0x47a   : > { %4263 = vmatpush.bf16.msrb.mxu3 %v9779_v62 }
 0x4ba   : > { %v3620_v22 = vpop.f32.mrf.mxu1 }
 0x4c0   : > { %v3607_v26 = vpop.f32.mrf.mxu3 }
 0x4c1   : > { %v3621_v55 = vadd.f32 %v3620_v22, %v3607_v26 }
 0x4c2   : > { %v3622_v49 = vpop.f32.mrf.mxu1 }
 0x4c8   : > { %v3609_v53 = vpop.f32.mrf.mxu3 }
 0x4ca   : > { %v3646_v23 = vpop.f32.mrf.mxu1 }
 0x4d0   : > { %v3633_v0 = vpop.f32.mrf.mxu3 }
 0x4d1   : > { %v3647_v63 = vadd.f32 %v3646_v23, %v3633_v0 }
 0x4d2   : > { %v3648_v58 = vpop.f32.mrf.mxu1 }
 0x4d3   : > { %v12130_v21 = vpack.c.bf16 %v3647_v63, %v3621_v55 }
 0x4d5   : > { %3678 = vst [vmem:[#allocation3] sm:$0xff] %v12130_v21  ;;  %3738 = vrot.lane.b32.xlu0 %v12130_v21, %s10152_s29  ;;  %3690 = vrot.lane.b32.xlu2 %v12130_v21, %s13728_s30 }
 0x4d6   : > { %3683 = vst [vmem:[#allocation2] sm:$0xff] %v12130_v21 }
 0x4d8   : > { %v3635_v33 = vpop.f32.mrf.mxu3 }
 0x4da   : > { %v3672_v34 = vpop.f32.mrf.mxu1 }
 0x4dd   : > { %3772 = vrot.lane.b32.xlu0 %v12130_v21, %s13456_s26  ;;  %3706 = vrot.lane.b32.xlu2 %v12130_v21, %s13729_s27  ;;  %v8825_v49 = vld [vmem:[#allocation2] sm:$0xf]  ;;  %v9755_v0 = vld [vmem:[#allocation2 + $0x4] sm:$0xf] }
 0x4e0   : > { %v3659_v20 = vpop.f32.mrf.mxu3 }
 0x4e1   : > { %v3673_v54 = vadd.f32 %v3672_v34, %v3659_v20 }
 0x4e2   : > { %v3674_v16 = vpop.f32.mrf.mxu1 }
 0x4e3   : > { %v3677_v2 = vpack.c.bf16 %v3673_v54, %v3673_v54 }
 0x4e5   : > { %3680 = vst.msk [vmem:[#allocation3 + $0x8] sm:$0xf] %vm3679_vm13, %v3677_v2  ;;  %3722 = vrot.lane.b32.xlu2 %v12130_v21, %s13730_s23  ;;  %vm13746_vm13 = vmmov %vm13745_vm2 }
 0x4e8   : > { %v3661_v10 = vpop.f32.mrf.mxu3 }
 0x4ec   : > { %v3735_v39 = vld [vmem:[#allocation3 + $0x8] sm:$0xf] }
 0x4ed   : > { %v3786_v15 = vld [vmem:[#allocation3 + $0x8] sm:$0xf]  ;;  %3740 = vrot.lane.b32.xlu1 %v3735_v39, %s10152_s29  ;;  %s13455_s29 = smov 89  }
 0x4ee   : > { %v3687_v45 = vld [vmem:[#allocation3 + $0x8] sm:$0xf]  ;;  %3791 = vrot.lane.b32.xlu0 %v3786_v15, %s13448_s5 }
 0x4ef   : > { %3692 = vrot.lane.b32.xlu2 %v3687_v45, %s13728_s30  ;;  %v3682_v51 = vld [vmem:[#allocation3 + $0x8] sm:$0xf] }
 0x4f0   : > { %3685 = vst.msk [vmem:[#allocation2 + $0x8] sm:$0xf] %vm3684_vm0, %v3682_v51  ;;  %v3703_v9 = vld [vmem:[#allocation3 + $0x8] sm:$0xf] }
 0x4f1   : > { %v3803_v37 = vld [vmem:[#allocation3 + $0x8] sm:$0xf] }
 0x4f2   : > { %v3837_v60 = vld [vmem:[#allocation3 + $0x8] sm:$0xf] }
 0x4f3   : > { %v3719_v17 = vld [vmem:[#allocation3 + $0x8] sm:$0xf] }
 0x4f4   : > { %v3854_v14 = vld [vmem:[#allocation3 + $0x8] sm:$0xf] }
 0x4f5   : > { %3789 = vrot.lane.b32.xlu1 %v12130_v21, %s13448_s5  ;;  %v3888_v52 = vld [vmem:[#allocation3 + $0x8] sm:$0xf]  ;;  %s10161_s5 = smov 73  }
 0x4f6   : > { %3823 = vrot.lane.b32.xlu0 %v12130_v21, %s13453_s28  ;;  %v3752_v56 = vld [vmem:[#allocation3 + $0x8] sm:$0xf]  ;;  %s10170_s28 = smov 98  }
 0x4f7   : > { %3708 = vrot.lane.b32.xlu2 %v3703_v9, %s13729_s27  ;;  %v3769_v48 = vld [vmem:[#allocation3 + $0x8] sm:$0xf]  ;;  %v8833_v18 = vld [vmem:[#allocation2 + $0x8] sm:$0xf] }
 0x4f8   : > { %v3905_v6 = vld [vmem:[#allocation3 + $0x8] sm:$0xf] }
 0x4f9   : > { %v3820_v30 = vld [vmem:[#allocation3 + $0x8] sm:$0xf] }
 0x4fa   : > { %v3871_v12 = vld [vmem:[#allocation3 + $0x8] sm:$0xf] }
 0x4fb   : > { %v3922_v43 = vld [vmem:[#allocation3 + $0x8] sm:$0xf] }
 0x4fd   : > { %3808 = vrot.lane.b32.xlu1 %v3803_v37, %s13454_s0  ;;  %s13758_s0 = smov 118  }
 0x4fe   : > { %3842 = vrot.lane.b32.xlu0 %v3837_v60, %s10157_s1 }
 0x4ff   : > { %3724 = vrot.lane.b32.xlu2 %v3719_v17, %s13730_s23 }
 0x505   : > { %3840 = vrot.lane.b32.xlu1 %v12130_v21, %s10157_s1  ;;  %s13756_s1 = sld [smem:[#allocation13_spill]] }
 0x506   : > { %3874 = vrot.lane.b32.xlu0 %v12130_v21, %s13452_s24  ;;  %s13731_s24 = smov 92  }
 0x507   : > { %3755 = vrot.lane.b32.xlu2 %v12130_v21, %s10159_s3 }
 0x50d   : > { %3859 = vrot.lane.b32.xlu1 %v3854_v14, %s13455_s29  ;;  %s13462_s29 = smov 115  }
 0x50e   : > { %3893 = vrot.lane.b32.xlu0 %v3888_v52, %s10161_s5 }
 0x50f   : > { %3757 = vrot.lane.b32.xlu2 %v3752_v56, %s10159_s3  ;;  %s13464_s3 = smov 116  }
 0x515   : > { %3891 = vrot.lane.b32.xlu1 %v12130_v21, %s10161_s5  ;;  %s13735_s5 = smov 72  }
 0x516   : > { %3925 = vrot.lane.b32.xlu0 %v12130_v21, %s13458_s4  ;;  %s13734_s4 = smov 74  }
 0x517   : > { %3774 = vrot.lane.b32.xlu2 %v3769_v48, %s13456_s26  ;;  %s13459_s26 = smov 72  }
 0x51d   : > { %3910 = vrot.lane.b32.xlu1 %v3905_v6, %s13459_s26  ;;  %s13733_s26 = smov 89  }
 0x51f   : > { %3806 = vrot.lane.b32.xlu2 %v12130_v21, %s13731_s24  ;;  %s13732_s24 = smov 91  }
 0x527   : > { %3825 = vrot.lane.b32.xlu2 %v3820_v30, %s13732_s24  ;;  %s13736_s24 = smov 71  }
 0x52f   : > { %3857 = vrot.lane.b32.xlu2 %v12130_v21, %s13733_s26  ;;  %v3691_v1 = vpop.permute.xlu2 %3690  ;;  %s13761_s26 = smov 105  }
 0x530   : > { %v3694_v7 = vrot.slane %v3691_v1, 4 }
 0x537   : > { %3876 = vrot.lane.b32.xlu2 %v3871_v12, %s13734_s4  ;;  %v3707_v29 = vpop.permute.xlu2 %3706  ;;  %s13762_s4 = smov 107  }
 0x538   : > { %v3710_v27 = vrot.slane %v3707_v29, 4 }
 0x53f   : > { %3908 = vrot.lane.b32.xlu2 %v12130_v21, %s13735_s5  ;;  %v3723_v40 = vpop.permute.xlu2 %3722  ;;  %s10168_s5 = smov 97  }
 0x540   : > { %v3726_v34 = vrot.slane %v3723_v40, 4 }
 0x547   : > { %3927 = vrot.lane.b32.xlu2 %v3922_v43, %s13736_s24  ;;  %v3739_v46 = vpop.permute.xlu0 %3738  ;;  %s10169_s24 = smov 96  }
 0x548   : > { %v3742_v15 = vrot.slane %v3739_v46, 4 }
 0x549   : > { %v3693_v59 = vpop.permute.xlu2 %3692 }
 0x54a   : > { %v3695_v32 = vrot.slane %v3693_v59, 4  ;;  %3701 = vst.msk [vmem:[#allocation2 + $0x14] sm:$0xf] %vm3684_vm0, %v3693_v59 }
 0x54c   : > { %v3696_v11 = vsel %vm13737_vm6, %v3694_v7, %v3695_v32  ;;  %vm3813_vm6 = vcmask 752640  }
 0x54d   : > { %v3697_v61 = vsel %vm13738_vm11, %v3691_v1, %v3696_v11  ;;  %vm13747_vm11 = vmmov %vm13745_vm2 }
 0x54e   : > { %3700 = vst [vmem:[#allocation2 + $0xc] sm:$0xff] %v3697_v61 }
 0x54f   : > { %v12227_v21 = vpop.permute.xlu0 %3772 }
 0x550   : > { %v3776_v62 = vrot.slane %v12227_v21, 4 }
 0x551   : > { %v3709_v47 = vpop.permute.xlu2 %3708  ;;  %v9757_v41 = vld [vmem:[#allocation2 + $0x10] sm:$0xf0] }
 0x552   : > { %v3711_v35 = vrot.slane %v3709_v47, 4  ;;  %3717 = vst.msk [vmem:[#allocation2 + $0x20] sm:$0xf] %vm3684_vm0, %v3709_v47  ;;  %v8834_v22 = vor.u32 %v9757_v41, %v8833_v18 }
 0x554   : > { %v3712_v26 = vsel %vm13739_vm10, %v3710_v27, %v3711_v35  ;;  %8987 = vmatmul.msk.bf16.vlgmr.msra.gmra.mxu0 %vm4225_vm12, %v8834_v22  ;;  %vm13748_vm10 = vcmask 736256  }
 0x555   : > { %v3713_v53 = vsel %vm13740_vm5, %v3707_v29, %v3712_v26  ;;  %v9756_v23 = vld [vmem:[#allocation2 + $0x8] sm:$0xf0]  ;;  %v8827_v55 = vld [vmem:[#allocation2 + $0xc] sm:$0xf0]  ;;  %vm13749_vm5 = vmmov %vm13745_vm2 }
 0x556   : > { %3716 = vst [vmem:[#allocation2 + $0x18] sm:$0xff] %v3713_v53  ;;  %v8826_v63 = vor.u32 %v9756_v23, %v8825_v49  ;;  %v8830_v58 = vor.u32 %v9755_v0, %v8827_v55 }
 0x558   : > { %4264 = vmatmul.bf16.vlgmr.msrb.gmra.mxu3 %v8826_v63  ;;  %4313 = vmatmul.bf16.vlgmr.msra.gmra.mxu2 %v8830_v58 }
 0x559   : > { %v3725_v33 = vpop.permute.xlu2 %3724  ;;  %v8845_v39 = vld [vmem:[#allocation2 + $0x20] sm:$0xf] }
 0x55a   : > { %v3727_v20 = vrot.slane %v3725_v33, 4  ;;  %3733 = vst.msk [vmem:[#allocation2 + $0x2c] sm:$0xf] %vm3684_vm0, %v3725_v33 }
 0x55c   : > { %v3728_v54 = vsel %vm13741_vm3, %v3726_v34, %v3727_v20  ;;  %vm3830_vm3 = vcmask 744448  }
 0x55d   : > { %v3729_v16 = vsel %vm13742_vm4, %v3723_v40, %v3728_v54  ;;  %v8837_v14 = vld [vmem:[#allocation2 + $0x18] sm:$0xf]  ;;  %v9758_v52 = vld [vmem:[#allocation2 + $0x1c] sm:$0xf]  ;;  %vm13750_vm4 = vmmov %vm13745_vm2 }
 0x55e   : > { %3732 = vst [vmem:[#allocation2 + $0x24] sm:$0xff] %v3729_v16 }
 0x55f   : > { %v3741_v2 = vpop.permute.xlu1 %3740 }
 0x560   : > { %v3792_v10 = vpop.permute.xlu0 %3791  ;;  %v3743_v45 = vrot.slane %v3741_v2, 4  ;;  %3750 = vst.msk [vmem:[#allocation2 + $0x38] sm:$0xf] %vm3684_vm0, %v3741_v2 }
 0x561   : > { %v3756_v51 = vpop.permute.xlu2 %3755  ;;  %v9760_v9 = vld [vmem:[#allocation2 + $0x28] sm:$0xf0]  ;;  %3801 = vst.msk [vmem:[#allocation2 + $0x5c] sm:$0xf] %vm3684_vm0, %v3792_v10  ;;  %v3794_v6 = vrot.slane %v3792_v10, 4 }
 0x562   : > { %v8846_v37 = vor.u32 %v9760_v9, %v8845_v39  ;;  %v3744_v60 = vsel %vm13743_vm8, %v3742_v15, %v3743_v45  ;;  %v3759_v4 = vrot.slane %v3756_v51, 4  ;;  %vm3864_vm8 = vcmask 728064  }
 0x563   : > { %v3746_v17 = vsel %vm3745_vm9, %v3739_v46, %v3744_v60  ;;  %vm3898_vm9 = vcmask 596992  }
 0x564   : > { %8988 = vmatmul.msk.bf16.gmra.mxu0 %vm4225_vm12, %v8846_v37  ;;  %3749 = vst [vmem:[#allocation2 + $0x30] sm:$0xff] %v3746_v17 }
 0x565   : > { %v9759_v56 = vld [vmem:[#allocation2 + $0x20] sm:$0xf0]  ;;  %v8839_v48 = vld [vmem:[#allocation2 + $0x24] sm:$0xf0] }
 0x566   : > { %v8838_v5 = vor.u32 %v9759_v56, %v8837_v14  ;;  %v8842_v44 = vor.u32 %v9758_v52, %v8839_v48 }
 0x567   : > { %v3790_v28 = vpop.permute.xlu1 %3789  ;;  %v8857_v57 = vld [vmem:[#allocation2 + $0x38] sm:$0xf] }
 0x568   : > { %v12236_v36 = vpop.permute.xlu0 %3823  ;;  %4269 = vmatmul.bf16.gmra.mxu3 %v8838_v5  ;;  %4318 = vmatmul.bf16.gmra.mxu2 %v8842_v44  ;;  %v3793_v42 = vrot.slane %v3790_v28, 4  ;;  %v9766_v33 = vld [vmem:[#allocation2 + $0x58] sm:$0xf0] }
 0x569   : > { %v3758_v50 = vpop.permute.xlu2 %3757  ;;  %v3827_v34 = vrot.slane %v12236_v36, 4 }
 0x56a   : > { %v3760_v24 = vrot.slane %v3758_v50, 4  ;;  %3767 = vst.msk [vmem:[#allocation2 + $0x44] sm:$0xf] %vm3684_vm0, %v3758_v50  ;;  %v3795_v30 = vsel %vm13744_vm7, %v3793_v42, %v3794_v6  ;;  %vm3881_vm7 = vcmask 605184  }
 0x56b   : > { %v3797_v13 = vsel %vm3796_vm1, %v3790_v28, %v3795_v30  ;;  %v8849_v43 = vld [vmem:[#allocation2 + $0x30] sm:$0xf]  ;;  %v9761_v32 = vld [vmem:[#allocation2 + $0x34] sm:$0xf]  ;;  %vm13751_vm1 = vmmov %vm13745_vm2 }
 0x56c   : > { %v3761_v38 = vsel %vm13745_vm2, %v3759_v4, %v3760_v24  ;;  %3800 = vst [vmem:[#allocation2 + $0x54] sm:$0xff] %v3797_v13  ;;  %vm13753_vm2 = vmmov %vm13751_vm1 }
 0x56d   : > { %v3763_v8 = vsel %vm3762_vm14, %v3756_v51, %v3761_v38  ;;  %vm13752_vm14 = vmmov %vm13751_vm1 }
 0x56e   : > { %3766 = vst [vmem:[#allocation2 + $0x3c] sm:$0xff] %v3763_v8 }
 0x56f   : > { %v3809_v19 = vpop.permute.xlu1 %3808 }
 0x570   : > { %v3843_v1 = vpop.permute.xlu0 %3842  ;;  %3818 = vst.msk [vmem:[#allocation2 + $0x68] sm:$0xf] %vm3684_vm0, %v3809_v19  ;;  %v3811_v22 = vrot.slane %v3809_v19, 4 }
 0x571   : > { %v3775_v31 = vpop.permute.xlu2 %3774  ;;  %v9763_v12 = vld [vmem:[#allocation2 + $0x40] sm:$0xf0]  ;;  %3852 = vst.msk [vmem:[#allocation2 + $0x80] sm:$0xf] %vm3684_vm0, %v3843_v1  ;;  %v3845_v41 = vrot.slane %v3843_v1, 4 }
 0x572   : > { %v3777_v25 = vrot.slane %v3775_v31, 4  ;;  %v8858_v29 = vor.u32 %v9763_v12, %v8857_v57  ;;  %3784 = vst.msk [vmem:[#allocation2 + $0x50] sm:$0xf] %vm3684_vm0, %v3775_v31 }
 0x573   : > { %v9765_v15 = vld [vmem:[#allocation2 + $0x50] sm:$0xf0]  ;;  %v8863_v45 = vld [vmem:[#allocation2 + $0x54] sm:$0xf0] }
 0x574   : > { %v3778_v40 = vsel %vm13746_vm13, %v3776_v62, %v3777_v25  ;;  %8989 = vmatmul.msk.bf16.gmra.mxu0 %vm4225_vm12, %v8858_v29  ;;  %vm13754_vm13 = vmmov %vm13751_vm1 }
 0x575   : > { %v3780_v59 = vsel %vm3779_vm15, %v12227_v21, %v3778_v40  ;;  %v9762_v7 = vld [vmem:[#allocation2 + $0x38] sm:$0xf0]  ;;  %v8851_v11 = vld [vmem:[#allocation2 + $0x3c] sm:$0xf0]  ;;  %vm3915_vm15 = vcmask 588800  }
 0x576   : > { %3783 = vst [vmem:[#allocation2 + $0x48] sm:$0xff] %v3780_v59  ;;  %v8850_v61 = vor.u32 %v9762_v7, %v8849_v43  ;;  %v8854_v46 = vor.u32 %v9761_v32, %v8851_v11 }
 0x577   : > { %v3841_v47 = vpop.permute.xlu1 %3840  ;;  %v8881_v50 = vld [vmem:[#allocation2 + $0x68] sm:$0xf] }
 0x578   : > { %v12248_v18 = vpop.permute.xlu0 %3874  ;;  %4274 = vmatmul.bf16.gmra.mxu3 %v8850_v61  ;;  %4323 = vmatmul.bf16.gmra.mxu2 %v8854_v46  ;;  %v3844_v27 = vrot.slane %v3841_v47, 4 }
 0x579   : > { %v3807_v35 = vpop.permute.xlu2 %3806  ;;  %v8869_v55 = vld [vmem:[#allocation2 + $0x50] sm:$0xf]  ;;  %v3878_v4 = vrot.slane %v12248_v18, 4 }
 0x57a   : > { %v3810_v26 = vrot.slane %v3807_v35, 4  ;;  %v3846_v49 = vsel %vm13747_vm11, %v3844_v27, %v3845_v41  ;;  %v8870_v54 = vor.u32 %v9766_v33, %v8869_v55  ;;  %vm13755_vm11 = vmmov %vm13751_vm1 }
 0x57b   : > { %v3848_v53 = vsel %vm13748_vm10, %v3841_v47, %v3846_v49  ;;  %v8893_v47 = vld [vmem:[#allocation2 + $0x80] sm:$0xf] }
 0x57c   : > { %v3812_v23 = vsel %vm13749_vm5, %v3810_v26, %v3811_v22  ;;  %3851 = vst [vmem:[#allocation2 + $0x78] sm:$0xff] %v3848_v53 }
 0x57d   : > { %v3814_v0 = vsel %vm3813_vm6, %v3807_v35, %v3812_v23  ;;  %v8861_v16 = vld [vmem:[#allocation2 + $0x48] sm:$0xf]  ;;  %v9764_v2 = vld [vmem:[#allocation2 + $0x4c] sm:$0xf]  ;;  %vm3932_vm6 = vcmask 580608  }
 0x57e   : > { %3817 = vst [vmem:[#allocation2 + $0x60] sm:$0xff] %v3814_v0  ;;  %v8862_v51 = vor.u32 %v9765_v15, %v8861_v16  ;;  %v8866_v9 = vor.u32 %v9764_v2, %v8863_v45 }
 0x57f   : > { %v3860_v63 = vpop.permute.xlu1 %3859 }
 0x580   : > { %v3894_v58 = vpop.permute.xlu0 %3893  ;;  %3869 = vst.msk [vmem:[#allocation2 + $0x8c] sm:$0xf] %vm3684_vm0, %v3860_v63  ;;  %v3862_v52 = vrot.slane %v3860_v63, 4 }
 0x581   : > { %v3826_v21 = vpop.permute.xlu2 %3825  ;;  %3903 = vst.msk [vmem:[#allocation2 + $0xa4] sm:$0xf] %vm3684_vm0, %v3894_v58  ;;  %v3896_v60 = vrot.slane %v3894_v58, 4 }
 0x582   : > { %v3828_v20 = vrot.slane %v3826_v21, 4  ;;  %3835 = vst.msk [vmem:[#allocation2 + $0x74] sm:$0xf] %vm3684_vm0, %v3826_v21 }
 0x583   : > { %v8885_v53 = vld [vmem:[#allocation2 + $0x78] sm:$0xf]  ;;  %v9770_v23 = vld [vmem:[#allocation2 + $0x7c] sm:$0xf] }
 0x584   : > { %v3829_v10 = vsel %vm13750_vm4, %v3827_v34, %v3828_v20  ;;  %8990 = vmatmul.msk.bf16.gmra.mxu0 %vm4225_vm12, %v8870_v54 }
 0x585   : > { %v3831_v39 = vsel %vm3830_vm3, %v12236_v36, %v3829_v10  ;;  %v8873_v1 = vld [vmem:[#allocation2 + $0x60] sm:$0xf]  ;;  %v9767_v31 = vld [vmem:[#allocation2 + $0x64] sm:$0xf] }
 0x586   : > { %3834 = vst [vmem:[#allocation2 + $0x6c] sm:$0xff] %v3831_v39 }
 0x587   : > { %v3892_v37 = vpop.permute.xlu1 %3891  ;;  %v9772_v61 = vld [vmem:[#allocation2 + $0x88] sm:$0xf0] }
 0x588   : > { %4279 = vmatmul.bf16.gmra.mxu3 %v8862_v51  ;;  %4328 = vmatmul.bf16.gmra.mxu2 %v8866_v9  ;;  %v3895_v17 = vrot.slane %v3892_v37, 4  ;;  %v9775_v29 = vld [vmem:[#allocation2 + $0xa0] sm:$0xf0]  ;;  %v3926_v11 = vpop.permute.xlu0 %3925  ;;  %v8894_v27 = vor.u32 %v9772_v61, %v8893_v47 }
 0x589   : > { %v3858_v14 = vpop.permute.xlu2 %3857  ;;  %v9769_v36 = vld [vmem:[#allocation2 + $0x70] sm:$0xf0] }
 0x58a   : > { %v3861_v56 = vrot.slane %v3858_v14, 4  ;;  %v3897_v48 = vsel %vm13751_vm1, %v3895_v17, %v3896_v60  ;;  %v8882_v30 = vor.u32 %v9769_v36, %v8881_v50  ;;  %vm4545_vm1 = vcmask 814080  }
 0x58b   : > { %v3899_v5 = vsel %vm3898_vm9, %v3892_v37, %v3897_v48 }
 0x58c   : > { %v3863_v44 = vsel %vm13752_vm14, %v3861_v56, %v3862_v52  ;;  %3902 = vst [vmem:[#allocation2 + $0x9c] sm:$0xff] %v3899_v5  ;;  %vm4550_vm14 = vcmask 543744  }
 0x58d   : > { %v3865_v28 = vsel %vm3864_vm8, %v3858_v14, %v3863_v44  ;;  %v9768_v13 = vld [vmem:[#allocation2 + $0x68] sm:$0xf0]  ;;  %v8875_v38 = vld [vmem:[#allocation2 + $0x6c] sm:$0xf0] }
 0x58e   : > { %3868 = vst [vmem:[#allocation2 + $0x84] sm:$0xff] %v3865_v28  ;;  %v8874_v57 = vor.u32 %v9768_v13, %v8873_v1  ;;  %v8878_v12 = vor.u32 %v9767_v31, %v8875_v38 }
 0x58f   : > { %v3911_v6 = vpop.permute.xlu1 %3910 }
 0x590   : > { %3920 = vst.msk [vmem:[#allocation2 + $0xb0] sm:$0xf] %vm3684_vm0, %v3911_v6  ;;  %v3913_v40 = vrot.slane %v3911_v6, 4 }
 0x591   : > { %v3877_v42 = vpop.permute.xlu2 %3876 }
 0x592   : > { %v3879_v24 = vrot.slane %v3877_v42, 4  ;;  %3886 = vst.msk [vmem:[#allocation2 + $0x98] sm:$0xf] %vm3684_vm0, %v3877_v42 }
 0x593   : > { %v9774_v20 = vld [vmem:[#allocation2 + $0x98] sm:$0xf0]  ;;  %v8899_v54 = vld [vmem:[#allocation2 + $0x9c] sm:$0xf0] }
 0x594   : > { %v3880_v8 = vsel %vm13753_vm2, %v3878_v4, %v3879_v24  ;;  %8991 = vmatmul.msk.bf16.gmra.mxu0 %vm4225_vm12, %v8882_v30  ;;  %vm13764_vm2 = vcmask 130048  }
 0x595   : > { %v3882_v19 = vsel %vm3881_vm7, %v12248_v18, %v3880_v8  ;;  %v3929_v18 = vrot.slane %v3926_v11, 4  ;;  %v9771_v35 = vld [vmem:[#allocation2 + $0x80] sm:$0xf0]  ;;  %v8887_v22 = vld [vmem:[#allocation2 + $0x84] sm:$0xf0]  ;;  %vm4881_vm7 = vcmask 547840  }
 0x596   : > { %3885 = vst [vmem:[#allocation2 + $0x90] sm:$0xff] %v3882_v19  ;;  %v8886_v0 = vor.u32 %v9771_v35, %v8885_v53  ;;  %v8890_v55 = vor.u32 %v9770_v23, %v8887_v22 }
 0x597   : > { %v8917_v63 = vld [vmem:[#allocation2 + $0xb0] sm:$0xf] }
 0x598   : > { %4284 = vmatmul.bf16.gmra.mxu3 %v8874_v57  ;;  %4333 = vmatmul.bf16.gmra.mxu2 %v8878_v12 }
 0x599   : > { %v3909_v62 = vpop.permute.xlu2 %3908  ;;  %v8905_v25 = vld [vmem:[#allocation2 + $0x98] sm:$0xf] }
 0x59a   : > { %v3912_v43 = vrot.slane %v3909_v62, 4  ;;  %v8906_v59 = vor.u32 %v9775_v29, %v8905_v25 }
 0x59c   : > { %v3914_v7 = vsel %vm13754_vm13, %v3912_v43, %v3913_v40  ;;  %8993 = vmatmul.msk.bf16.vlgmr.msra.gmra.mxu1 %vm4225_vm12, %v8906_v59  ;;  %vm13766_vm13 = vmmov %vm13764_vm2 }
 0x59d   : > { %v3916_v32 = vsel %vm3915_vm15, %v3909_v62, %v3914_v7  ;;  %v8897_v33 = vld [vmem:[#allocation2 + $0x90] sm:$0xf]  ;;  %v9773_v34 = vld [vmem:[#allocation2 + $0x94] sm:$0xf]  ;;  %vm13765_vm15 = vmmov %vm13764_vm2 }
 0x59e   : > { %3919 = vst [vmem:[#allocation2 + $0xa8] sm:$0xff] %v3916_v32  ;;  %v8898_v16 = vor.u32 %v9774_v20, %v8897_v33  ;;  %v8902_v2 = vor.u32 %v9773_v34, %v8899_v54 }
 0x5a1   : > { %v3928_v46 = vpop.permute.xlu2 %3927 }
 0x5a2   : > { %v3930_v41 = vrot.slane %v3928_v46, 4  ;;  %3937 = vst.msk [vmem:[#allocation2 + $0xbc] sm:$0xf] %vm3684_vm0, %v3928_v46  ;;  %vm4433_vm0 = vcmask 523264  }
 0x5a4   : > { %v3931_v26 = vsel %vm13755_vm11, %v3929_v18, %v3930_v41  ;;  %8992 = vmatmul.msk.bf16.gmra.mxu0 %vm4225_vm12, %v8894_v27  ;;  %vm13768_vm11 = vmmov %vm13764_vm2 }
 0x5a5   : > { %v3933_v49 = vsel %vm3932_vm6, %v3926_v11, %v3931_v26  ;;  %v8909_v15 = vld [vmem:[#allocation2 + $0xa8] sm:$0xf]  ;;  %v9776_v45 = vld [vmem:[#allocation2 + $0xac] sm:$0xf]  ;;  %vm13767_vm6 = vmmov %vm13764_vm2 }
 0x5a6   : > { %3936 = vst [vmem:[#allocation2 + $0xb4] sm:$0xff] %v3933_v49 }
 0x5a8   : > { %4289 = vmatmul.bf16.gmra.mxu3 %v8886_v0  ;;  %4338 = vmatmul.bf16.gmra.mxu2 %v8890_v55 }
 0x5a9   : > { %v9778_v58 = vld [vmem:[#allocation2 + $0xb8] sm:$0xf0] }
 0x5aa   : > { %v8918_v21 = vor.u32 %v9778_v58, %v8917_v63 }
 0x5ac   : > { %8994 = vmatmul.msk.bf16.gmra.mxu1 %vm4225_vm12, %v8918_v21 }
 0x5ad   : > { %v9777_v10 = vld [vmem:[#allocation2 + $0xb0] sm:$0xf0]  ;;  %v8911_v39 = vld [vmem:[#allocation2 + $0xb4] sm:$0xf0] }
 0x5ae   : > { %v8910_v51 = vor.u32 %v9777_v10, %v8909_v15  ;;  %v8914_v9 = vor.u32 %v9776_v45, %v8911_v39 }
 0x5b8   : > { %4294 = vmatmul.bf16.gmra.mxu3 %v8898_v16  ;;  %4343 = vmatmul.bf16.gmra.mxu2 %v8902_v2 }
 0x5c8   : > { %4299 = vmatmul.bf16.gmra.mxu3 %v8910_v51  ;;  %4348 = vmatmul.bf16.gmra.mxu2 %v8914_v9 }
 0x5d1   : > { %v4363_v37 = vpop.f32.mrf.mxu0 }
 0x5d9   : > { %v12274_v52 = vpop.f32.mrf.mxu0 }
 0x5db   : > { %v4265_v60 = vpop.f32.mrf.mxu3  ;;  %v4314_v17 = vpop.f32.mrf.mxu2 }
 0x5dc   : > { %v4315_v14 = vadd.f32 %v4314_v17, %v4265_v60 }
 0x5de   : > { %v12276_v56 = vadd.f32 %v4363_v37, %v4315_v14 }
 0x5e1   : > { %v4368_v44 = vpop.f32.mrf.mxu0 }
 0x5e3   : > { %v12278_v48 = vpop.f32.mrf.mxu3  ;;  %v12280_v5 = vpop.f32.mrf.mxu2 }
 0x5e9   : > { %v12284_v50 = vpop.f32.mrf.mxu0 }
 0x5eb   : > { %v4270_v28 = vpop.f32.mrf.mxu3  ;;  %v4319_v36 = vpop.f32.mrf.mxu2 }
 0x5ec   : > { %v4320_v6 = vadd.f32 %v4319_v36, %v4270_v28 }
 0x5ee   : > { %v12282_v42 = vadd.f32 %v4368_v44, %v4320_v6 }
 0x5f1   : > { %v4373_v8 = vpop.f32.mrf.mxu0 }
 0x5f3   : > { %v12286_v4 = vpop.f32.mrf.mxu3  ;;  %v12288_v24 = vpop.f32.mrf.mxu2 }
 0x5f9   : > { %v4375_v7 = vpop.f32.mrf.mxu0 }
 0x5fb   : > { %v4275_v30 = vpop.f32.mrf.mxu3  ;;  %v4324_v13 = vpop.f32.mrf.mxu2 }
 0x5fc   : > { %v4325_v38 = vadd.f32 %v4324_v13, %v4275_v30 }
 0x5fe   : > { %v12290_v19 = vadd.f32 %v4373_v8, %v4325_v38 }
 0x601   : > { %v4378_v61 = vpop.f32.mrf.mxu0 }
 0x603   : > { %v4277_v1 = vpop.f32.mrf.mxu3  ;;  %v4326_v31 = vpop.f32.mrf.mxu2 }
 0x609   : > { %v4380_v18 = vpop.f32.mrf.mxu0 }
 0x60b   : > { %v4280_v57 = vpop.f32.mrf.mxu3  ;;  %v4329_v12 = vpop.f32.mrf.mxu2 }
 0x60c   : > { %v4330_v62 = vadd.f32 %v4329_v12, %v4280_v57  ;;  %v4327_v57 = vadd.f32 %v4326_v31, %v4277_v1 }
 0x611   : > { %v4383_v49 = vpop.f32.mrf.mxu0 }
 0x613   : > { %v4282_v25 = vpop.f32.mrf.mxu3  ;;  %v4331_v29 = vpop.f32.mrf.mxu2 }
 0x614   : > { %v4332_v30 = vadd.f32 %v4331_v29, %v4282_v25 }
 0x616   : > { %v4381_v12 = vadd.f32 %v4380_v18, %v4332_v30 }
 0x619   : > { %v4393_v35 = vpop.f32.mrf.mxu1  ;;  %v4385_v55 = vpop.f32.mrf.mxu0 }
 0x61b   : > { %v4285_v40 = vpop.f32.mrf.mxu3  ;;  %v4334_v43 = vpop.f32.mrf.mxu2 }
 0x61c   : > { %v4335_v59 = vadd.f32 %v4334_v43, %v4285_v40  ;;  %v4379_v43 = vadd.f32 %v4378_v61, %v4330_v62 }
 0x61e   : > { %v4384_v8 = vadd.f32 %v4383_v49, %v4335_v59  ;;  %v10164_v59 = vmov 64.0  }
 0x61f   : > { %10049 = vrcp.f32 %v10164_v59 }
 0x621   : > { %v4395_v53 = vpop.f32.mrf.mxu1  ;;  %v4388_v33 = vpop.f32.mrf.mxu0 }
 0x623   : > { %v4287_v32 = vpop.f32.mrf.mxu3  ;;  %v4336_v11 = vpop.f32.mrf.mxu2 }
 0x624   : > { %v4337_v44 = vadd.f32 %v4336_v11, %v4287_v32  ;;  %v4317_v32 = vadd.f32 %v12280_v5, %v12278_v48 }
 0x626   : > { %v4386_v13 = vadd.f32 %v4385_v55, %v4337_v44  ;;  %v4366_v1 = vadd.f32 %v12274_v52, %v4317_v32  ;;  %v4773_v32 = vld [vmem:[%s13757_s10 + $0x20] sm:$0x3] }
 0x628   : > { %v4407_v40 = vpack.c.bf16 %v4386_v13, %v4384_v8  ;;  %v4403_v62 = vpack.c.bf16 %v4366_v1, %v12276_v56 }
 0x629   : > { %v4398_v63 = vpop.f32.mrf.mxu1  ;;  %v4390_v14 = vpop.f32.mrf.mxu0 }
 0x62b   : > { %v4290_v46 = vpop.f32.mrf.mxu3  ;;  %v4339_v47 = vpop.f32.mrf.mxu2 }
 0x62c   : > { %v4340_v60 = vadd.f32 %v4339_v47, %v4290_v46  ;;  %v4322_v46 = vadd.f32 %v12288_v24, %v12286_v4  ;;  %v4376_v47 = vadd.f32 %v4375_v7, %v4327_v57  ;;  %v9796_v4 = vld [vmem:[%s13756_s1] sm:$0xff]  ;;  %v10050_v7 = vpop.eup %10049  ;;  %s10165_s1 = smov 117  }
 0x62d   : > { %v4441_v11 = vmul.f32 64.0, %v10050_v7  ;;  %vm4445_vm12 = vweird.f32 %v10050_v7 }
 0x62e   : > { %v4389_v6 = vadd.f32 %v4388_v33, %v4340_v60  ;;  %v4371_v25 = vadd.f32 %v12284_v50, %v4322_v46  ;;  %v4405_v29 = vpack.c.bf16 %v4376_v47, %v12290_v19 }
 0x62f   : > { %v4442_v61 = vsub.f32 1.0, %v4441_v11 }
 0x630   : > { %v4404_v31 = vpack.c.bf16 %v4371_v25, %v12282_v42  ;;  %v4871_v25 = vunpack.c.l.b16 %v4773_v32 }
 0x631   : > { %v4400_v10 = vpop.f32.mrf.mxu1  ;;  %v4443_v18 = vmul.f32 %v10050_v7, %v4442_v61 }
 0x633   : > { %v4292_v41 = vpop.f32.mrf.mxu3  ;;  %v4341_v27 = vpop.f32.mrf.mxu2 }
 0x634   : > { %v4342_v51 = vadd.f32 %v4341_v27, %v4292_v41  ;;  %v4406_v41 = vpack.c.bf16 %v4381_v12, %v4379_v43  ;;  %v4444_v27 = vadd.f32 %v10050_v7, %v4443_v18 }
 0x636   : > { %v4391_v28 = vadd.f32 %v4390_v14, %v4342_v51 }
 0x638   : > { %v4408_v38 = vpack.c.bf16 %v4391_v28, %v4389_v6 }
 0x63b   : > { %v4295_v22 = vpop.f32.mrf.mxu3  ;;  %v4344_v26 = vpop.f32.mrf.mxu2 }
 0x63c   : > { %v4345_v39 = vadd.f32 %v4344_v26, %v4295_v22  ;;  %v9800_v22 = vld [vmem:[%s13344_s16 + $0x18] sm:$0xff] }
 0x63e   : > { %v4394_v17 = vadd.f32 %v4393_v35, %v4345_v39  ;;  %v4446_v35 = vsel %vm4445_vm12, %v10050_v7, %v4444_v27 }
 0x643   : > { %v4297_v23 = vpop.f32.mrf.mxu3  ;;  %v4346_v0 = vpop.f32.mrf.mxu2 }
 0x644   : > { %v4347_v16 = vadd.f32 %v4346_v0, %v4297_v23  ;;  %v9799_v23 = vld [vmem:[%s13344_s16 + $0x10] sm:$0xff] }
 0x646   : > { %v4396_v9 = vadd.f32 %v4395_v53, %v4347_v16  ;;  %v9797_v16 = vld [vmem:[%s13344_s16] sm:$0xff] }
 0x648   : > { %v4409_v36 = vpack.c.bf16 %v4396_v9, %v4394_v17 }
 0x64b   : > { %v4300_v58 = vpop.f32.mrf.mxu3  ;;  %v4349_v21 = vpop.f32.mrf.mxu2 }
 0x64c   : > { %v4350_v34 = vadd.f32 %v4349_v21, %v4300_v58  ;;  %v9798_v58 = vld [vmem:[%s13344_s16 + $0x8] sm:$0xff] }
 0x64e   : > { %v4399_v15 = vadd.f32 %v4398_v63, %v4350_v34 }
 0x653   : > { %v4302_v20 = vpop.f32.mrf.mxu3  ;;  %v4351_v54 = vpop.f32.mrf.mxu2 }
 0x654   : > { %v4352_v2 = vadd.f32 %v4351_v54, %v4302_v20 }
 0x656   : > { %v4401_v45 = vadd.f32 %v4400_v10, %v4352_v2 }
 0x658   : > { %v4410_v37 = vpack.c.bf16 %v4401_v45, %v4399_v15 }
 0x65a   : > { %4419 = vmatpush.bf16.msrb.mxu0 %v4410_v37 }
 0x65e   : > { %4420 = vmatpush.bf16.msrb.mxu0 %v4409_v36 }
 0x662   : > { %4421 = vmatpush.bf16.msrb.mxu0 %v4408_v38 }
 0x666   : > { %4422 = vmatpush.bf16.msrb.mxu0 %v4407_v40 }
 0x66a   : > { %4423 = vmatpush.bf16.msrb.mxu0 %v4406_v41 }
 0x66e   : > { %4424 = vmatpush.bf16.msrb.mxu0 %v4405_v29  ;;  %v4876_v29 = vpack.c.b16 %v4871_v25, %v4871_v25 }
 0x670   : > { %v4931_v1 = vand.u32 %v4876_v29, %v11752_v3  ;;  %v9817_v3 = vld [vmem:[%s13757_s10] sm:$0xff] }
 0x672   : > { %4425 = vmatpush.bf16.msrb.mxu0 %v4404_v31  ;;  %v9820_v31 = vld [vmem:[%s13757_s10 + $0x18] sm:$0xff] }
 0x676   : > { %4426 = vmatpush.bf16.msrb.mxu0 %v4403_v62  ;;  %v9819_v62 = vld [vmem:[%s13757_s10 + $0x10] sm:$0xff] }
 0x679   : > { %4427 = vmatmul.bf16.vlgmr.msrb.gmra.mxu0 %v9796_v4  ;;  %v9818_v4 = vld [vmem:[%s13757_s10 + $0x8] sm:$0xff] }
 0x67a   : > { %4533 = vmatpush.bf16.msra.mxu0 %v9800_v22 }
 0x67e   : > { %4534 = vmatpush.bf16.msra.mxu0 %v9799_v23 }
 0x682   : > { %4535 = vmatpush.bf16.msra.mxu0 %v9798_v58 }
 0x686   : > { %4536 = vmatpush.bf16.msra.mxu0 %v9797_v16 }
 0x68a   : > { %4936 = vmatpush.bf16.msrb.mxu0 %v4931_v1 }
 0x68e   : > { %4937 = vmatpush.bf16.msrb.mxu0 %v9820_v31 }
 0x692   : > { %4938 = vmatpush.bf16.msrb.mxu0 %v9819_v62 }
 0x696   : > { %4939 = vmatpush.bf16.msrb.mxu0 %v9818_v4 }
 0x69a   : > { %4940 = vmatpush.bf16.msrb.mxu0 %v9817_v3 }
 0x6f6   : > { %v12304_v48 = vpop.f32.mrf.mxu0 }
 0x6f7   : > { %v4449_v5 = vmul.f32 %v12304_v48, %v12304_v48  ;;  %v4434_v52 = vsel %vm4433_vm0, %v12304_v48, 0.0 }
 0x6f8   : > { %4435 = vadd.xlane.f32.xlu1 %v4434_v52 }
 0x6f9   : > { %v4451_v42 = vsel %vm4433_vm0, %v4449_v5, 0.0 }
 0x6fa   : > { %4452 = vadd.xlane.f32.xlu2 %v4451_v42 }
 0x6fe   : > { %v12311_v56 = vpop.f32.mrf.mxu0 }
 0x6ff   : > { %v4437_v50 = vsel %vm4433_vm0, %v12311_v56, 0.0  ;;  %v4450_v24 = vmul.f32 %v12311_v56, %v12311_v56 }
 0x700   : > { %4438 = vadd.xlane.f32.xlu0 %v4437_v50 }
 0x701   : > { %v4454_v19 = vsel %vm4433_vm0, %v4450_v24, 0.0 }
 0x702   : > { %4455 = vadd.xlane.f32.xlu1 %v4454_v19 }
 0x76b   : > { %v4436_v26 = vpop.xlane.xlu1 %4435 }
 0x76c   : > { %v4447_v49 = vmul.f32 %v4446_v35, %v4436_v26 }
 0x76d   : > { %v4453_v53 = vpop.xlane.xlu2 %4452 }
 0x76e   : > { %v4459_v0 = vmul.f32 %v4447_v49, %v4447_v49  ;;  %v4457_v55 = vmul.f32 %v4453_v53, %v4446_v35  ;;  %v4465_v38 = vsub.f32 %v12304_v48, %v4447_v49 }
 0x770   : > { %v4461_v63 = vsub.f32 %v4457_v55, %v4459_v0 }
 0x772   : > { %v4463_v21 = vmax.f32 %v4461_v63, 0.0 }
 0x773   : > { %v4439_v33 = vpop.xlane.xlu0 %4438 }
 0x774   : > { %v4467_v34 = vadd.f32 1e-05, %v4463_v21  ;;  %v4448_v20 = vmul.f32 %v4446_v35, %v4439_v33 }
 0x775   : > { %v4456_v54 = vpop.xlane.xlu1 %4455 }
 0x776   : > { %10051 = vrsqrt.f32 %v4467_v34  ;;  %v4460_v2 = vmul.f32 %v4448_v20, %v4448_v20  ;;  %v4458_v10 = vmul.f32 %v4456_v54, %v4446_v35  ;;  %vm4475_vm5 = vweird.f32 %v4467_v34 }
 0x777   : > { %v4466_v12 = vsub.f32 %v12311_v56, %v4448_v20 }
 0x778   : > { %v4462_v39 = vsub.f32 %v4458_v10, %v4460_v2 }
 0x77a   : > { %v4464_v15 = vmax.f32 %v4462_v39, 0.0 }
 0x77c   : > { %v10052_v45 = vpop.eup %10051  ;;  %v4468_v9 = vadd.f32 1e-05, %v4464_v15 }
 0x77d   : > { %v4470_v51 = vmul.f32 %v10052_v45, %v4467_v34  ;;  %vm4476_vm10 = vweird.f32 %v10052_v45 }
 0x77e   : > { %10053 = vrsqrt.f32 %v4468_v9  ;;  %vm4477_vm3 = vmor %vm4475_vm5, %vm4476_vm10  ;;  %vm4485_vm9 = vweird.f32 %v4468_v9 }
 0x77f   : > { %v4471_v37 = vmul.f32 %v10052_v45, %v4470_v51 }
 0x781   : > { %v4472_v60 = vmul.f32 0.5, %v4471_v37 }
 0x783   : > { %v4473_v17 = vsub.f32 1.5, %v4472_v60 }
 0x784   : > { %v10054_v14 = vpop.eup %10053 }
 0x785   : > { %v4480_v44 = vmul.f32 %v10054_v14, %v4468_v9  ;;  %v4474_v28 = vmul.f32 %v10052_v45, %v4473_v17  ;;  %vm4486_vm4 = vweird.f32 %v10054_v14 }
 0x786   : > { %vm4487_vm8 = vmor %vm4485_vm9, %vm4486_vm4 }
 0x787   : > { %v4481_v36 = vmul.f32 %v10054_v14, %v4480_v44  ;;  %v4478_v30 = vsel %vm4477_vm3, %v10052_v45, %v4474_v28 }
 0x788   : > { %v4489_v57 = vmul.f32 %v4478_v30, %v4465_v38 }
 0x789   : > { %v4482_v6 = vmul.f32 0.5, %v4481_v36 }
 0x78a   : > { %v4491_v46 = vmax.f32 %v4489_v57, 0.0 }
 0x78b   : > { %v4483_v13 = vsub.f32 1.5, %v4482_v6 }
 0x78d   : > { %v4484_v8 = vmul.f32 %v10054_v14, %v4483_v13 }
 0x78f   : > { %v4488_v40 = vsel %vm4487_vm8, %v10054_v14, %v4484_v8 }
 0x790   : > { %v4490_v43 = vmul.f32 %v4488_v40, %v4466_v12 }
 0x792   : > { %v4492_v47 = vmax.f32 %v4490_v43, 0.0 }
 0x794   : > { %v4493_v41 = vpack.c.bf16 %v4492_v47, %v4491_v46 }
 0x796   : > { %9015 = vmatmul.msk.bf16.vlgmr.msra.gmra.mxu0 %vm4433_vm0, %v4493_v41  ;;  %vm13769_vm0 = vmmov %vm13764_vm2 }
 0x797   : > { %vm13770_vm12 = vmmov %vm13769_vm0 }
 0x798   : > { %vm13771_vm10 = vmmov %vm13769_vm0 }
 0x813   : > { %v4538_v48 = vpop.f32.mrf.mxu0 }
 0x814   : > { %v4543_v5 = vpack.c.bf16 %v4538_v48, %v4538_v48 }
 0x816   : > { %4546 = vst.msk [vmem:[#allocation3] sm:$0xf] %vm4545_vm1, %v4543_v5 }
 0x81b   : > { %v4540_v52 = vpop.f32.mrf.mxu0 }
 0x81c   : > { %v4544_v42 = vpack.c.bf16 %v4540_v52, %v4540_v52 }
 0x81d   : > { %v4565_v56 = vld [vmem:[#allocation3] sm:$0xf] }
 0x81e   : > { %v4553_v50 = vld [vmem:[#allocation3] sm:$0xf]  ;;  %4547 = vst.msk [vmem:[#allocation3 + $0x10] sm:$0xf] %vm4545_vm1, %v4544_v42  ;;  %4569 = vrot.lane.b32.xlu1 %v4565_v56, %s13729_s27 }
 0x81f   : > { %4557 = vrot.lane.b32.xlu0 %v4553_v50, %s13728_s30  ;;  %v4548_v24 = vld [vmem:[#allocation3] sm:$0xf] }
 0x820   : > { %4551 = vst.msk [vmem:[#allocation2] sm:$0xf] %vm4550_vm14, %v4548_v24  ;;  %v4589_v19 = vld [vmem:[#allocation3] sm:$0xf] }
 0x821   : > { %v4577_v22 = vld [vmem:[#allocation3] sm:$0xf] }
 0x822   : > { %v4625_v49 = vld [vmem:[#allocation3] sm:$0xf] }
 0x823   : > { %v4601_v53 = vld [vmem:[#allocation3] sm:$0xf] }
 0x824   : > { %v4613_v63 = vld [vmem:[#allocation3] sm:$0xf] }
 0x825   : > { %v4549_v59 = vld [vmem:[#allocation3 + $0x10] sm:$0xf]  ;;  %v4661_v58 = vld [vmem:[#allocation3] sm:$0xf] }
 0x826   : > { %v4566_v7 = vld [vmem:[#allocation3 + $0x10] sm:$0xf]  ;;  %4552 = vst.msk [vmem:[#allocation2 + $0xc] sm:$0xf] %vm4550_vm14, %v4549_v59  ;;  %4593 = vrot.lane.b32.xlu1 %v4589_v19, %s13758_s0  ;;  %v4637_v21 = vld [vmem:[#allocation3] sm:$0xf] }
 0x827   : > { %v4554_v11 = vld [vmem:[#allocation3 + $0x10] sm:$0xf]  ;;  %4571 = vrot.lane.b32.xlu0 %v4566_v7, %s13729_s27  ;;  %v4649_v54 = vld [vmem:[#allocation3] sm:$0xf] }
 0x828   : > { %4559 = vrot.lane.b32.xlu2 %v4554_v11, %s13728_s30  ;;  %v4602_v61 = vld [vmem:[#allocation3 + $0x10] sm:$0xf]  ;;  %v4697_v16 = vld [vmem:[#allocation3] sm:$0xf] }
 0x829   : > { %v4578_v18 = vld [vmem:[#allocation3 + $0x10] sm:$0xf]  ;;  %v4673_v2 = vld [vmem:[#allocation3] sm:$0xf] }
 0x82a   : > { %v9018_v27 = vld [vmem:[#allocation2] sm:$0xf]  ;;  %v4685_v45 = vld [vmem:[#allocation3] sm:$0xf] }
 0x82b   : > { %v4590_v23 = vld [vmem:[#allocation3 + $0x10] sm:$0xf]  ;;  %v4709_v51 = vld [vmem:[#allocation3] sm:$0xf] }
 0x82c   : > { %v4638_v0 = vld [vmem:[#allocation3 + $0x10] sm:$0xf]  ;;  %v4721_v60 = vld [vmem:[#allocation3] sm:$0xf] }
 0x82d   : > { %v9801_v35 = vld [vmem:[#allocation2 + $0x8] sm:$0xf0]  ;;  %v4614_v55 = vld [vmem:[#allocation3 + $0x10] sm:$0xf] }
 0x82e   : > { %4607 = vrot.lane.b32.xlu1 %v4602_v61, %s10165_s1  ;;  %v9019_v26 = vor.u32 %v9801_v35, %v9018_v27  ;;  %v4626_v33 = vld [vmem:[#allocation3 + $0x10] sm:$0xf] }
 0x82f   : > { %4583 = vrot.lane.b32.xlu0 %v4578_v18, %s13730_s23  ;;  %v4674_v34 = vld [vmem:[#allocation3 + $0x10] sm:$0xf] }
 0x830   : > { %4581 = vrot.lane.b32.xlu2 %v4577_v22, %s13730_s23  ;;  %9096 = vmatmul.msk.bf16.vlgmr.msrb.gmra.mxu0 %vm4881_vm7, %v9019_v26  ;;  %s13760_s23 = smov 106   ;;  %v4650_v20 = vld [vmem:[#allocation3 + $0x10] sm:$0xf] }
 0x831   : > { %v4662_v10 = vld [vmem:[#allocation3 + $0x10] sm:$0xf] }
 0x832   : > { %v4710_v39 = vld [vmem:[#allocation3 + $0x10] sm:$0xf] }
 0x833   : > { %v4686_v15 = vld [vmem:[#allocation3 + $0x10] sm:$0xf] }
 0x834   : > { %v4698_v9 = vld [vmem:[#allocation3 + $0x10] sm:$0xf] }
 0x835   : > { %v4722_v37 = vld [vmem:[#allocation3 + $0x10] sm:$0xf] }
 0x836   : > { %4629 = vrot.lane.b32.xlu1 %v4625_v49, %s13462_s29 }
 0x837   : > { %4605 = vrot.lane.b32.xlu0 %v4601_v53, %s10165_s1  ;;  %s13460_s1 = smov 114  }
 0x838   : > { %4595 = vrot.lane.b32.xlu2 %v4590_v23, %s13758_s0  ;;  %s10171_s0 = smov 95  }
 0x83e   : > { %4643 = vrot.lane.b32.xlu1 %v4638_v0, %s13759_s8 }
 0x83f   : > { %4619 = vrot.lane.b32.xlu0 %v4614_v55, %s13464_s3 }
 0x840   : > { %4617 = vrot.lane.b32.xlu2 %v4613_v63, %s13464_s3 }
 0x846   : > { %4665 = vrot.lane.b32.xlu1 %v4661_v58, %s13760_s23 }
 0x847   : > { %4641 = vrot.lane.b32.xlu0 %v4637_v21, %s13759_s8 }
 0x848   : > { %4631 = vrot.lane.b32.xlu2 %v4626_v33, %s13462_s29 }
 0x84e   : > { %4679 = vrot.lane.b32.xlu1 %v4674_v34, %s13761_s26 }
 0x84f   : > { %4655 = vrot.lane.b32.xlu0 %v4650_v20, %s13762_s4 }
 0x850   : > { %4653 = vrot.lane.b32.xlu2 %v4649_v54, %s13762_s4  ;;  %s13777_s4 = sld [smem:[#allocation15_spill]] }
 0x856   : > { %4701 = vrot.lane.b32.xlu1 %v4697_v16, %s10168_s5 }
 0x857   : > { %4677 = vrot.lane.b32.xlu0 %v4673_v2, %s13761_s26 }
 0x858   : > { %4667 = vrot.lane.b32.xlu2 %v4662_v10, %s13760_s23  ;;  %s13763_s23 = sld [smem:[#allocation14_spill]] }
 0x85e   : > { %4715 = vrot.lane.b32.xlu1 %v4710_v39, %s10169_s24 }
 0x85f   : > { %4691 = vrot.lane.b32.xlu0 %v4686_v15, %s10170_s28 }
 0x860   : > { %4689 = vrot.lane.b32.xlu2 %v4685_v45, %s10170_s28  ;;  %s13775_s28 = smov 121  }
 0x867   : > { %4713 = vrot.lane.b32.xlu0 %v4709_v51, %s10169_s24  ;;  %s13789_s24 = smov 115  }
 0x868   : > { %4703 = vrot.lane.b32.xlu2 %v4698_v9, %s10168_s5  ;;  %s13788_s5 = smov 116  }
 0x86f   : > { %4727 = vrot.lane.b32.xlu0 %v4722_v37, %s10171_s0 }
 0x870   : > { %4725 = vrot.lane.b32.xlu2 %v4721_v60, %s10171_s0  ;;  %s13776_s0 = smov 120  }
 0x882   : > { %v4560_v17 = vpop.permute.xlu2 %4559 }
 0x883   : > { %4564 = vst.msk [vmem:[#allocation2 + $0x24] sm:$0xf] %vm4550_vm14, %v4560_v17 }
 0x88a   : > { %v4582_v14 = vpop.permute.xlu2 %4581  ;;  %v9802_v8 = vld [vmem:[#allocation2 + $0x20] sm:$0xf0] }
 0x88b   : > { %4587 = vst.msk [vmem:[#allocation2 + $0x48] sm:$0xf] %vm4550_vm14, %v4582_v14 }
 0x890   : > { %v4570_v44 = vpop.permute.xlu1 %4569 }
 0x891   : > { %v4558_v28 = vpop.permute.xlu0 %4557  ;;  %4575 = vst.msk [vmem:[#allocation2 + $0x30] sm:$0xf] %vm4550_vm14, %v4570_v44 }
 0x892   : > { %v4596_v36 = vpop.permute.xlu2 %4595  ;;  %4563 = vst.msk [vmem:[#allocation2 + $0x18] sm:$0xf] %vm4550_vm14, %v4558_v28  ;;  %v9030_v52 = vld [vmem:[#allocation2 + $0x48] sm:$0xf] }
 0x893   : > { %4600 = vst.msk [vmem:[#allocation2 + $0x6c] sm:$0xf] %vm4550_vm14, %v4596_v36 }
 0x898   : > { %v4594_v6 = vpop.permute.xlu1 %4593  ;;  %v9026_v25 = vld [vmem:[#allocation2 + $0x30] sm:$0xf] }
 0x899   : > { %v4572_v30 = vpop.permute.xlu0 %4571  ;;  %4599 = vst.msk [vmem:[#allocation2 + $0x60] sm:$0xf] %vm4550_vm14, %v4594_v6  ;;  %v9022_v38 = vld [vmem:[#allocation2 + $0x18] sm:$0xf] }
 0x89a   : > { %v4618_v13 = vpop.permute.xlu2 %4617  ;;  %4576 = vst.msk [vmem:[#allocation2 + $0x3c] sm:$0xf] %vm4550_vm14, %v4572_v30  ;;  %v9023_v57 = vor.u32 %v9802_v8, %v9022_v38  ;;  %v9805_v61 = vld [vmem:[#allocation2 + $0x68] sm:$0xf0] }
 0x89b   : > { %4623 = vst.msk [vmem:[#allocation2 + $0x90] sm:$0xf] %vm4550_vm14, %v4618_v13 }
 0x89c   : > { %9097 = vmatmul.msk.bf16.gmra.mxu0 %vm4881_vm7, %v9023_v57 }
 0x8a0   : > { %v4608_v12 = vpop.permute.xlu1 %4607  ;;  %v9034_v19 = vld [vmem:[#allocation2 + $0x60] sm:$0xf] }
 0x8a1   : > { %v4584_v40 = vpop.permute.xlu0 %4583  ;;  %4612 = vst.msk [vmem:[#allocation2 + $0x84] sm:$0xf] %vm4550_vm14, %v4608_v12  ;;  %v9803_v46 = vld [vmem:[#allocation2 + $0x38] sm:$0xf0]  ;;  %v9035_v18 = vor.u32 %v9805_v61, %v9034_v19 }
 0x8a2   : > { %v4632_v43 = vpop.permute.xlu2 %4631  ;;  %4588 = vst.msk [vmem:[#allocation2 + $0x54] sm:$0xf] %vm4550_vm14, %v4584_v40  ;;  %v9027_v29 = vor.u32 %v9803_v46, %v9026_v25  ;;  %v9042_v55 = vld [vmem:[#allocation2 + $0x90] sm:$0xf] }
 0x8a3   : > { %4636 = vst.msk [vmem:[#allocation2 + $0xb4] sm:$0xf] %vm4550_vm14, %v4632_v43 }
 0x8a8   : > { %v4630_v47 = vpop.permute.xlu1 %4629  ;;  %v9806_v49 = vld [vmem:[#allocation2 + $0x80] sm:$0xf0] }
 0x8a9   : > { %v4606_v41 = vpop.permute.xlu0 %4605  ;;  %4635 = vst.msk [vmem:[#allocation2 + $0xa8] sm:$0xf] %vm4550_vm14, %v4630_v47  ;;  %v9804_v4 = vld [vmem:[#allocation2 + $0x50] sm:$0xf0] }
 0x8aa   : > { %v4654_v32 = vpop.permute.xlu2 %4653  ;;  %4611 = vst.msk [vmem:[#allocation2 + $0x78] sm:$0xf] %vm4550_vm14, %v4606_v41  ;;  %v9031_v42 = vor.u32 %v9804_v4, %v9030_v52  ;;  %v9808_v21 = vld [vmem:[#allocation2 + $0xb0] sm:$0xf0] }
 0x8ab   : > { %4659 = vst.msk [vmem:[#allocation2 + $0xd8] sm:$0xf] %vm4550_vm14, %v4654_v32 }
 0x8ac   : > { %9098 = vmatmul.msk.bf16.gmra.mxu0 %vm4881_vm7, %v9027_v29 }
 0x8ad   : > { %v12409_v34 = vpop.f32.mrf.mxu0 }
 0x8b0   : > { %v4644_v1 = vpop.permute.xlu1 %4643  ;;  %v9046_v58 = vld [vmem:[#allocation2 + $0xa8] sm:$0xf] }
 0x8b1   : > { %v4620_v31 = vpop.permute.xlu0 %4619  ;;  %4648 = vst.msk [vmem:[#allocation2 + $0xcc] sm:$0xf] %vm4550_vm14, %v4644_v1  ;;  %v9038_v22 = vld [vmem:[#allocation2 + $0x78] sm:$0xf]  ;;  %v9047_v33 = vor.u32 %v9808_v21, %v9046_v58 }
 0x8b2   : > { %v4668_v62 = vpop.permute.xlu2 %4667  ;;  %4624 = vst.msk [vmem:[#allocation2 + $0x9c] sm:$0xf] %vm4550_vm14, %v4620_v31  ;;  %v9039_v53 = vor.u32 %v9806_v49, %v9038_v22  ;;  %v9054_v15 = vld [vmem:[#allocation2 + $0xd8] sm:$0xf] }
 0x8b3   : > { %4672 = vst.msk [vmem:[#allocation2 + $0xfc] sm:$0xf] %vm4550_vm14, %v4668_v62 }
 0x8b5   : > { %v4944_v2 = vpop.f32.mrf.mxu0 }
 0x8b8   : > { %v4666_v3 = vpop.permute.xlu1 %4665  ;;  %v9809_v54 = vld [vmem:[#allocation2 + $0xc8] sm:$0xf0] }
 0x8b9   : > { %v4642_v48 = vpop.permute.xlu0 %4641  ;;  %4671 = vst.msk [vmem:[#allocation2 + $0xf0] sm:$0xf] %vm4550_vm14, %v4666_v3  ;;  %v9807_v0 = vld [vmem:[#allocation2 + $0x98] sm:$0xf0] }
 0x8ba   : > { %v4690_v5 = vpop.permute.xlu2 %4689  ;;  %4647 = vst.msk [vmem:[#allocation2 + $0xc0] sm:$0xf] %vm4550_vm14, %v4642_v48  ;;  %v9043_v63 = vor.u32 %v9807_v0, %v9042_v55  ;;  %v9811_v17 = vld [vmem:[#allocation2 + $0xf8] sm:$0xf0] }
 0x8bb   : > { %4695 = vst.msk [vmem:[#allocation2 + $0x120] sm:$0xf] %vm4550_vm14, %v4690_v5 }
 0x8bc   : > { %9099 = vmatmul.msk.bf16.gmra.mxu0 %vm4881_vm7, %v9031_v42 }
 0x8c0   : > { %v4680_v56 = vpop.permute.xlu1 %4679  ;;  %v9058_v37 = vld [vmem:[#allocation2 + $0xf0] sm:$0xf] }
 0x8c1   : > { %v4656_v50 = vpop.permute.xlu0 %4655  ;;  %4684 = vst.msk [vmem:[#allocation2 + $0x114] sm:$0xf] %vm4550_vm14, %v4680_v56  ;;  %v9050_v20 = vld [vmem:[#allocation2 + $0xc0] sm:$0xf]  ;;  %v9059_v14 = vor.u32 %v9811_v17, %v9058_v37  ;;  %v9821_v17 = vld [vmem:[%s13763_s23 + $0x4] sm:$0xf] }
 0x8c2   : > { %v4704_v24 = vpop.permute.xlu2 %4703  ;;  %4660 = vst.msk [vmem:[#allocation2 + $0xe4] sm:$0xf] %vm4550_vm14, %v4656_v50  ;;  %v9051_v16 = vor.u32 %v9809_v54, %v9050_v20  ;;  %v9066_v40 = vld [vmem:[#allocation2 + $0x120] sm:$0xf] }
 0x8c3   : > { %4708 = vst.msk [vmem:[#allocation2 + $0x144] sm:$0xf] %vm4550_vm14, %v4704_v24 }
 0x8c8   : > { %v4702_v59 = vpop.permute.xlu1 %4701  ;;  %v9812_v30 = vld [vmem:[#allocation2 + $0x110] sm:$0xf0] }
 0x8c9   : > { %v4678_v7 = vpop.permute.xlu0 %4677  ;;  %4707 = vst.msk [vmem:[#allocation2 + $0x138] sm:$0xf] %vm4550_vm14, %v4702_v59  ;;  %v9810_v10 = vld [vmem:[#allocation2 + $0xe0] sm:$0xf0] }
 0x8ca   : > { %v4726_v11 = vpop.permute.xlu2 %4725  ;;  %4683 = vst.msk [vmem:[#allocation2 + $0x108] sm:$0xf] %vm4550_vm14, %v4678_v7  ;;  %v9055_v45 = vor.u32 %v9810_v10, %v9054_v15  ;;  %v9814_v32 = vld [vmem:[#allocation2 + $0x140] sm:$0xf0]  ;;  %v9824_v15 = vld [vmem:[%s13763_s23 + $0x14] sm:$0xf0] }
 0x8cb   : > { %4731 = vst.msk [vmem:[#allocation2 + $0x168] sm:$0xf] %vm4550_vm14, %v4726_v11 }
 0x8cc   : > { %9100 = vmatmul.msk.bf16.gmra.mxu0 %vm4881_vm7, %v9035_v18  ;;  %v5022_v18 = vpack.c.bf16 %v4944_v2, %v12409_v34  ;;  %v9822_v34 = vld [vmem:[%s13763_s23 + $0x4] sm:$0xf0] }
 0x8d0   : > { %v4716_v27 = vpop.permute.xlu1 %4715  ;;  %v9070_v47 = vld [vmem:[#allocation2 + $0x138] sm:$0xf] }
 0x8d1   : > { %v4692_v35 = vpop.permute.xlu0 %4691  ;;  %4720 = vst.msk [vmem:[#allocation2 + $0x15c] sm:$0xf] %vm4550_vm14, %v4716_v27  ;;  %v9062_v36 = vld [vmem:[#allocation2 + $0x108] sm:$0xf]  ;;  %v9071_v25 = vor.u32 %v9814_v32, %v9070_v47 }
 0x8d2   : > { %4696 = vst.msk [vmem:[#allocation2 + $0x12c] sm:$0xf] %vm4550_vm14, %v4692_v35  ;;  %v9063_v13 = vor.u32 %v9812_v30, %v9062_v36  ;;  %v9078_v52 = vld [vmem:[#allocation2 + $0x168] sm:$0xf]  ;;  %v9823_v36 = vld [vmem:[%s13763_s23 + $0x14] sm:$0xf] }
 0x8d8   : > { %v9815_v62 = vld [vmem:[#allocation2 + $0x158] sm:$0xf0] }
 0x8d9   : > { %v4714_v26 = vpop.permute.xlu0 %4713  ;;  %v9813_v57 = vld [vmem:[#allocation2 + $0x128] sm:$0xf0] }
 0x8da   : > { %4719 = vst.msk [vmem:[#allocation2 + $0x150] sm:$0xf] %vm4550_vm14, %v4714_v26  ;;  %v9067_v43 = vor.u32 %v9813_v57, %v9066_v40 }
 0x8dc   : > { %9101 = vmatmul.msk.bf16.gmra.mxu0 %vm4881_vm7, %v9039_v53 }
 0x8e1   : > { %v4728_v23 = vpop.permute.xlu0 %4727  ;;  %v9074_v1 = vld [vmem:[#allocation2 + $0x150] sm:$0xf] }
 0x8e2   : > { %4732 = vst.msk [vmem:[#allocation2 + $0x174] sm:$0xf] %vm4550_vm14, %v4728_v23  ;;  %v9075_v4 = vor.u32 %v9815_v62, %v9074_v1 }
 0x8e9   : > { %v9816_v48 = vld [vmem:[#allocation2 + $0x170] sm:$0xf0] }
 0x8ea   : > { %v9079_v42 = vor.u32 %v9816_v48, %v9078_v52 }
 0x8ec   : > { %9102 = vmatmul.msk.bf16.gmra.mxu0 %vm4881_vm7, %v9043_v63 }
 0x8fc   : > { %9103 = vmatmul.msk.bf16.gmra.mxu0 %vm4881_vm7, %v9047_v33  ;;  %v9114_v33 = vld [vmem:[%s13763_s23] sm:$0xf] }
 0x8fd   : > { %v9115_v54 = vor.u32 %v9822_v34, %v9114_v33 }
 0x90c   : > { %9104 = vmatmul.msk.bf16.gmra.mxu0 %vm4881_vm7, %v9051_v16 }
 0x919   : > { %v4947_v39 = vpop.f32.mrf.mxu0 }
 0x91c   : > { %9105 = vmatmul.msk.bf16.gmra.mxu0 %vm4881_vm7, %v9055_v45 }
 0x921   : > { %v4949_v51 = vpop.f32.mrf.mxu0 }
 0x922   : > { %v5023_v9 = vpack.c.bf16 %v4949_v51, %v4947_v39  ;;  %v9122_v39 = vld [vmem:[%s13763_s23 + $0x10] sm:$0xf] }
 0x923   : > { %v9123_v51 = vor.u32 %v9824_v15, %v9122_v39 }
 0x929   : > { %v4952_v60 = vpop.f32.mrf.mxu0 }
 0x92c   : > { %9106 = vmatmul.msk.bf16.gmra.mxu0 %vm4881_vm7, %v9059_v14  ;;  %v9116_v14 = vld [vmem:[%s13763_s23 + $0x8] sm:$0xf0] }
 0x931   : > { %v4954_v44 = vpop.f32.mrf.mxu0 }
 0x932   : > { %v5024_v28 = vpack.c.bf16 %v4954_v44, %v4952_v60 }
 0x939   : > { %v4957_v6 = vpop.f32.mrf.mxu0 }
 0x93c   : > { %9107 = vmatmul.msk.bf16.gmra.mxu0 %vm4881_vm7, %v9063_v13 }
 0x941   : > { %v4959_v38 = vpop.f32.mrf.mxu0 }
 0x942   : > { %v5025_v8 = vpack.c.bf16 %v4959_v38, %v4957_v6  ;;  %v9124_v6 = vld [vmem:[%s13763_s23 + $0x18] sm:$0xf0] }
 0x943   : > { %v9127_v30 = vor.u32 %v9823_v36, %v9124_v6 }
 0x949   : > { %v4962_v12 = vpop.f32.mrf.mxu0 }
 0x94c   : > { %9108 = vmatmul.msk.bf16.gmra.mxu0 %vm4881_vm7, %v9067_v43 }
 0x951   : > { %v4964_v46 = vpop.f32.mrf.mxu0 }
 0x952   : > { %v5026_v7 = vpack.c.bf16 %v4964_v46, %v4962_v12 }
 0x959   : > { %v4967_v41 = vpop.f32.mrf.mxu0 }
 0x95c   : > { %9109 = vmatmul.msk.bf16.gmra.mxu0 %vm4881_vm7, %v9071_v25 }
 0x961   : > { %v4969_v29 = vpop.f32.mrf.mxu0 }
 0x962   : > { %v5027_v59 = vpack.c.bf16 %v4969_v29, %v4967_v41 }
 0x969   : > { %v4972_v31 = vpop.f32.mrf.mxu0 }
 0x96c   : > { %9110 = vmatmul.msk.bf16.gmra.mxu0 %vm4881_vm7, %v9075_v4 }
 0x971   : > { %v4974_v3 = vpop.f32.mrf.mxu0 }
 0x972   : > { %v5028_v24 = vpack.c.bf16 %v4974_v3, %v4972_v31 }
 0x979   : > { %v4977_v5 = vpop.f32.mrf.mxu0 }
 0x97c   : > { %9111 = vmatmul.msk.bf16.gmra.mxu0 %vm4881_vm7, %v9079_v42  ;;  %vm13772_vm7 = vmmov %vm13769_vm0 }
 0x981   : > { %v4979_v56 = vpop.f32.mrf.mxu0 }
 0x982   : > { %v5029_v50 = vpack.c.bf16 %v4979_v56, %v4977_v5 }
 0x984   : > { %5062 = vmatpush.bf16.msrb.mxu1 %v5029_v50 }
 0x988   : > { %5063 = vmatpush.bf16.msrb.mxu1 %v5028_v24  ;;  %v10172_v24 = vmov 16.0  }
 0x989   : > { %v4982_v19 = vpop.f32.mrf.mxu0  ;;  %10055 = vrcp.f32 %v10172_v24 }
 0x98c   : > { %5064 = vmatpush.bf16.msrb.mxu1 %v5027_v59 }
 0x990   : > { %5065 = vmatpush.bf16.msrb.mxu1 %v5026_v7 }
 0x991   : > { %v4984_v11 = vpop.f32.mrf.mxu0 }
 0x992   : > { %v5030_v44 = vpack.c.bf16 %v4984_v11, %v4982_v19  ;;  %v10056_v19 = vpop.eup %10055 }
 0x993   : > { %v5114_v59 = vmul.f32 16.0, %v10056_v19  ;;  %vm5118_vm5 = vweird.f32 %v10056_v19 }
 0x994   : > { %5066 = vmatpush.bf16.msrb.mxu1 %v5025_v8 }
 0x995   : > { %v5115_v7 = vsub.f32 1.0, %v5114_v59 }
 0x997   : > { %v5116_v11 = vmul.f32 %v10056_v19, %v5115_v7 }
 0x998   : > { %5067 = vmatpush.bf16.msrb.mxu1 %v5024_v28  ;;  %v9119_v28 = vor.u32 %v9821_v17, %v9116_v14 }
 0x999   : > { %v4987_v61 = vpop.f32.mrf.mxu0 }
 0x99c   : > { %5068 = vmatpush.bf16.msrb.mxu1 %v5023_v9 }
 0x9a0   : > { %5069 = vmatpush.bf16.msrb.mxu1 %v5022_v18 }
 0x9a1   : > { %v4989_v27 = vpop.f32.mrf.mxu0 }
 0x9a2   : > { %v5031_v60 = vpack.c.bf16 %v4989_v27, %v4987_v61  ;;  %v5117_v61 = vadd.f32 %v10056_v19, %v5116_v11 }
 0x9a3   : > { %5070 = vmatmul.bf16.vlgmr.msrb.gmra.mxu1 %v9115_v54 }
 0x9a4   : > { %v12472_v18 = vsel %vm5118_vm5, %v10056_v19, %v5117_v61  ;;  %vm5251_vm5 = vcmask 289792  }
 0x9a9   : > { %v4992_v35 = vpop.f32.mrf.mxu0 }
 0x9b1   : > { %v4994_v22 = vpop.f32.mrf.mxu0 }
 0x9b2   : > { %v5032_v37 = vpack.c.bf16 %v4994_v22, %v4992_v35 }
 0x9b3   : > { %5075 = vmatmul.bf16.gmra.mxu1 %v9123_v51 }
 0x9b9   : > { %v4997_v26 = vpop.f32.mrf.mxu0 }
 0x9c1   : > { %v4999_v49 = vpop.f32.mrf.mxu0 }
 0x9c2   : > { %v5033_v9 = vpack.c.bf16 %v4999_v49, %v4997_v26 }
 0x9c9   : > { %v5002_v53 = vpop.f32.mrf.mxu0 }
 0x9d1   : > { %v5004_v23 = vpop.f32.mrf.mxu0 }
 0x9d2   : > { %v5034_v45 = vpack.c.bf16 %v5004_v23, %v5002_v53 }
 0x9d9   : > { %v5007_v0 = vpop.f32.mrf.mxu0 }
 0x9e1   : > { %v5009_v55 = vpop.f32.mrf.mxu0 }
 0x9e2   : > { %v5035_v10 = vpack.c.bf16 %v5009_v55, %v5007_v0 }
 0x9e9   : > { %v5012_v63 = vpop.f32.mrf.mxu0 }
 0x9f1   : > { %v5014_v58 = vpop.f32.mrf.mxu0 }
 0x9f2   : > { %v5036_v2 = vpack.c.bf16 %v5014_v58, %v5012_v63 }
 0x9f9   : > { %v5017_v21 = vpop.f32.mrf.mxu0 }
 0xa01   : > { %v5019_v20 = vpop.f32.mrf.mxu0 }
 0xa02   : > { %v5037_v16 = vpack.c.bf16 %v5019_v20, %v5017_v21  ;;  %v9825_v21 = vld [vmem:[%s13345_s17] sm:$0xff] }
 0xa03   : > { %5235 = vmatpush.bf16.msrb.mxu2 %v9825_v21 }
 0xa04   : > { %5081 = vmatpush.bf16.msra.mxu3 %v5037_v16 }
 0xa08   : > { %5082 = vmatpush.bf16.msra.mxu3 %v5036_v2 }
 0xa0c   : > { %5083 = vmatpush.bf16.msra.mxu3 %v5035_v10 }
 0xa10   : > { %5084 = vmatpush.bf16.msra.mxu3 %v5034_v45 }
 0xa14   : > { %5085 = vmatpush.bf16.msra.mxu3 %v5033_v9 }
 0xa18   : > { %5086 = vmatpush.bf16.msra.mxu3 %v5032_v37 }
 0xa1c   : > { %5087 = vmatpush.bf16.msra.mxu3 %v5031_v60 }
 0xa20   : > { %5088 = vmatpush.bf16.msra.mxu3 %v5030_v44  ;;  %v5071_v13 = vpop.f32.mrf.mxu1 }
 0xa23   : > { %5089 = vmatmul.bf16.vlgmr.msra.gmra.mxu3 %v9119_v28 }
 0xa28   : > { %v5073_v40 = vpop.f32.mrf.mxu1 }
 0xa30   : > { %v5076_v29 = vpop.f32.mrf.mxu1 }
 0xa33   : > { %5094 = vmatmul.bf16.gmra.mxu3 %v9127_v30 }
 0xa38   : > { %v5078_v48 = vpop.f32.mrf.mxu1 }
 0xaa6   : > { %v5090_v38 = vpop.f32.mrf.mxu3 }
 0xaa7   : > { %v12444_v8 = vadd.f32 %v5090_v38, %v5071_v13 }
 0xaa9   : > { %v5101_v57 = vsel %vm13764_vm2, %v12444_v8, 0.0  ;;  %v5124_v12 = vmul.f32 %v12444_v8, %v12444_v8 }
 0xaaa   : > { %5102 = vadd.xlane.f32.xlu1 %v5101_v57 }
 0xaab   : > { %v5128_v43 = vsel %vm13765_vm15, %v5124_v12, 0.0 }
 0xaac   : > { %5129 = vadd.xlane.f32.xlu0 %v5128_v43 }
 0xaae   : > { %v5092_v46 = vpop.f32.mrf.mxu3 }
 0xaaf   : > { %v12451_v47 = vadd.f32 %v5092_v46, %v5073_v40 }
 0xab1   : > { %v5104_v41 = vsel %vm13766_vm13, %v12451_v47, 0.0  ;;  %v5125_v32 = vmul.f32 %v12451_v47, %v12451_v47 }
 0xab2   : > { %5105 = vadd.xlane.f32.xlu2 %v5104_v41 }
 0xab3   : > { %v5131_v25 = vsel %vm13767_vm6, %v5125_v32, 0.0 }
 0xab4   : > { %5132 = vadd.xlane.f32.xlu1 %v5131_v25 }
 0xab6   : > { %v5095_v1 = vpop.f32.mrf.mxu3 }
 0xab7   : > { %v12458_v31 = vadd.f32 %v5095_v1, %v5076_v29 }
 0xab9   : > { %v5107_v62 = vsel %vm13768_vm11, %v12458_v31, 0.0  ;;  %v5126_v4 = vmul.f32 %v12458_v31, %v12458_v31 }
 0xaba   : > { %5108 = vadd.xlane.f32.xlu2 %v5107_v62 }
 0xabb   : > { %v5134_v3 = vsel %vm13769_vm0, %v5126_v4, 0.0 }
 0xabc   : > { %5135 = vadd.xlane.f32.xlu1 %v5134_v3 }
 0xabe   : > { %v5097_v5 = vpop.f32.mrf.mxu3 }
 0xabf   : > { %v12465_v52 = vadd.f32 %v5097_v5, %v5078_v48 }
 0xac1   : > { %v5110_v42 = vsel %vm13770_vm12, %v12465_v52, 0.0  ;;  %v5127_v56 = vmul.f32 %v12465_v52, %v12465_v52  ;;  %vm13773_vm12 = vmmov %vm13772_vm7 }
 0xac2   : > { %5111 = vadd.xlane.f32.xlu0 %v5110_v42 }
 0xac3   : > { %v5137_v50 = vsel %vm13771_vm10, %v5127_v56, 0.0  ;;  %vm5650_vm10 = vcmask 1042432  }
 0xac4   : > { %5138 = vadd.xlane.f32.xlu2 %v5137_v50 }
 0xb1d   : > { %v5103_v27 = vpop.xlane.xlu1 %5102 }
 0xb1e   : > { %v5120_v35 = vmul.f32 %v12472_v18, %v5103_v27 }
 0xb1f   : > { %v5130_v22 = vpop.xlane.xlu0 %5129 }
 0xb20   : > { %v5144_v26 = vmul.f32 %v5120_v35, %v5120_v35  ;;  %v5140_v49 = vmul.f32 %v5130_v22, %v12472_v18  ;;  %v5156_v62 = vsub.f32 %v12444_v8, %v5120_v35 }
 0xb22   : > { %v5148_v53 = vsub.f32 %v5140_v49, %v5144_v26 }
 0xb24   : > { %v5152_v23 = vmax.f32 %v5148_v53, 0.0 }
 0xb25   : > { %v5106_v0 = vpop.xlane.xlu2 %5105 }
 0xb26   : > { %v5160_v55 = vadd.f32 1e-05, %v5152_v23  ;;  %v5121_v63 = vmul.f32 %v12472_v18, %v5106_v0 }
 0xb27   : > { %v5133_v58 = vpop.xlane.xlu1 %5132 }
 0xb28   : > { %10057 = vrsqrt.f32 %v5160_v55  ;;  %v5145_v33 = vmul.f32 %v5121_v63, %v5121_v63  ;;  %v5141_v34 = vmul.f32 %v5133_v58, %v12472_v18  ;;  %vm5170_vm4 = vweird.f32 %v5160_v55 }
 0xb29   : > { %v5157_v42 = vsub.f32 %v12451_v47, %v5121_v63 }
 0xb2a   : > { %v5149_v20 = vsub.f32 %v5141_v34, %v5145_v33 }
 0xb2c   : > { %v5153_v54 = vmax.f32 %v5149_v20, 0.0 }
 0xb2d   : > { %v5109_v16 = vpop.xlane.xlu2 %5108 }
 0xb2e   : > { %v10058_v2 = vpop.eup %10057  ;;  %v12482_v10 = vmul.f32 %v12472_v18, %v5109_v16  ;;  %v5161_v15 = vadd.f32 1e-05, %v5153_v54  ;;  %v9844_v16 = vld [vmem:[%s13774_s11] sm:$0xff] }
 0xb2f   : > { %v5165_v39 = vmul.f32 %v10058_v2, %v5160_v55  ;;  %v5136_v45 = vpop.xlane.xlu1 %5135  ;;  %vm5171_vm3 = vweird.f32 %v10058_v2 }
 0xb30   : > { %v5146_v51 = vmul.f32 %v12482_v10, %v12482_v10  ;;  %v5142_v9 = vmul.f32 %v5136_v45, %v12472_v18  ;;  %10059 = vrsqrt.f32 %v5161_v15  ;;  %vm5172_vm9 = vmor %vm5170_vm4, %vm5171_vm3  ;;  %vm5180_vm1 = vweird.f32 %v5161_v15 }
 0xb31   : > { %v5166_v37 = vmul.f32 %v10058_v2, %v5165_v39  ;;  %v5158_v53 = vsub.f32 %v12458_v31, %v12482_v10  ;;  %v5495_v31 = vld [vmem:[%s13774_s11 + $0x8] sm:$0x7]  ;;  %vm5260_vm3 = vcmask 175104   ;;  %vm5595_vm4 = vcmask 179200  }
 0xb32   : > { %v5150_v60 = vsub.f32 %v5142_v9, %v5146_v51 }
 0xb33   : > { %v5167_v17 = vmul.f32 0.5, %v5166_v37 }
 0xb34   : > { %v5154_v14 = vmax.f32 %v5150_v60, 0.0 }
 0xb35   : > { %v5112_v44 = vpop.xlane.xlu0 %5111  ;;  %v5168_v28 = vsub.f32 1.5, %v5167_v17 }
 0xb36   : > { %v5162_v36 = vadd.f32 1e-05, %v5154_v14  ;;  %v5123_v6 = vmul.f32 %v12472_v18, %v5112_v44  ;;  %v10060_v30 = vpop.eup %10059 }
 0xb37   : > { %v5139_v13 = vpop.xlane.xlu2 %5138  ;;  %v5175_v38 = vmul.f32 %v10060_v30, %v5161_v15  ;;  %v5169_v40 = vmul.f32 %v10058_v2, %v5168_v28  ;;  %vm5181_vm8 = vweird.f32 %v10060_v30 }
 0xb38   : > { %10061 = vrsqrt.f32 %v5162_v36  ;;  %v5147_v57 = vmul.f32 %v5123_v6, %v5123_v6  ;;  %v5143_v12 = vmul.f32 %v5139_v13, %v12472_v18  ;;  %vm5182_vm14 = vmor %vm5180_vm1, %vm5181_vm8  ;;  %vm5190_vm15 = vweird.f32 %v5162_v36 }
 0xb39   : > { %v5176_v43 = vmul.f32 %v10060_v30, %v5175_v38  ;;  %v5173_v29 = vsel %vm5172_vm9, %v10058_v2, %v5169_v40  ;;  %v5159_v0 = vsub.f32 %v12465_v52, %v5123_v6  ;;  %v5591_v52 = vunpack.c.l.b16 %v5495_v31  ;;  %vm13778_vm8 = vmmov %vm13772_vm7 }
 0xb3a   : > { %v5151_v46 = vsub.f32 %v5143_v12, %v5147_v57  ;;  %v12490_v5 = vmul.f32 %v5173_v29, %v5156_v62  ;;  %vm5809_vm9 = vcmask 261120   ;;  %vm13779_vm1 = vmmov %vm13772_vm7 }
 0xb3b   : > { %v5177_v41 = vmul.f32 0.5, %v5176_v43  ;;  %v5593_v20 = vpack.c.b16 %v5591_v52, %v5591_v52 }
 0xb3c   : > { %v5155_v32 = vmax.f32 %v5151_v46, 0.0  ;;  %v5208_v59 = vmax.f32 %v12490_v5, 0.0 }
 0xb3d   : > { %v5178_v1 = vsub.f32 1.5, %v5177_v41  ;;  %v5652_v54 = vsel %vm5650_vm10, %v5593_v20, 0 }
 0xb3e   : > { %v10062_v25 = vpop.eup %10061  ;;  %v5163_v3 = vadd.f32 1e-05, %v5155_v32  ;;  %5660 = vmatpush.bf16.msra.mxu1 %v5652_v54 }
 0xb3f   : > { %v5185_v4 = vmul.f32 %v10062_v25, %v5162_v36  ;;  %v5179_v48 = vmul.f32 %v10060_v30, %v5178_v1  ;;  %vm5191_vm2 = vweird.f32 %v10062_v25 }
 0xb40   : > { %10063 = vrsqrt.f32 %v5163_v3  ;;  %vm5192_vm13 = vmor %vm5190_vm15, %vm5191_vm2  ;;  %vm5200_vm11 = vweird.f32 %v5163_v3 }
 0xb41   : > { %v5186_v56 = vmul.f32 %v10062_v25, %v5185_v4  ;;  %v5183_v50 = vsel %vm5182_vm14, %v10060_v30, %v5179_v48  ;;  %vm13780_vm14 = vmmov %vm13779_vm1 }
 0xb42   : > { %v12493_v24 = vmul.f32 %v5183_v50, %v5157_v42  ;;  %5661 = vmatpush.bf16.msra.mxu1 %v9844_v16  ;;  %vm13782_vm2 = vmmov %vm13779_vm1 }
 0xb43   : > { %v5187_v19 = vmul.f32 0.5, %v5186_v56  ;;  %vm13783_vm15 = vmmov %vm13779_vm1 }
 0xb44   : > { %v5209_v7 = vmax.f32 %v12493_v24, 0.0 }
 0xb45   : > { %v5188_v8 = vsub.f32 1.5, %v5187_v19 }
 0xb46   : > { %v10064_v11 = vpop.eup %10063  ;;  %v5212_v61 = vpack.c.bf16 %v5209_v7, %v5208_v59 }
 0xb47   : > { %v5195_v27 = vmul.f32 %v10064_v11, %v5163_v3  ;;  %v5189_v47 = vmul.f32 %v10062_v25, %v5188_v8  ;;  %vm5201_vm6 = vweird.f32 %v10064_v11 }
 0xb48   : > { %9132 = vmatmul.msk.bf16.vlgmr.msrb.gmra.mxu2 %vm13772_vm7, %v5212_v61  ;;  %vm5202_vm0 = vmor %vm5200_vm11, %vm5201_vm6 }
 0xb49   : > { %v5196_v35 = vmul.f32 %v10064_v11, %v5195_v27  ;;  %v5193_v49 = vsel %vm5192_vm13, %v10062_v25, %v5189_v47  ;;  %vm13781_vm7 = vmmov %vm13779_vm1 }
 0xb4a   : > { %v12505_v55 = vmul.f32 %v5193_v49, %v5158_v53  ;;  %vm13784_vm13 = vmmov %vm13779_vm1 }
 0xb4b   : > { %v5197_v22 = vmul.f32 0.5, %v5196_v35  ;;  %vm13785_vm6 = vmmov %vm13779_vm1 }
 0xb4c   : > { %v5210_v21 = vmax.f32 %v12505_v55, 0.0  ;;  %v9896_v55 = vld [vmem:[%s13341_s13] sm:$0xff] }
 0xb4d   : > { %v5198_v26 = vsub.f32 1.5, %v5197_v22 }
 0xb4f   : > { %v5199_v23 = vmul.f32 %v10064_v11, %v5198_v26 }
 0xb51   : > { %v5203_v63 = vsel %vm5202_vm0, %v10064_v11, %v5199_v23 }
 0xb52   : > { %v12507_v58 = vmul.f32 %v5203_v63, %v5159_v0 }
 0xb54   : > { %v5211_v33 = vmax.f32 %v12507_v58, 0.0 }
 0xb56   : > { %v5213_v34 = vpack.c.bf16 %v5211_v33, %v5210_v21 }
 0xb58   : > { %9133 = vmatmul.msk.bf16.gmra.mxu2 %vm13773_vm12, %v5213_v34 }
 0xbcb   : > { %v5237_v2 = vpop.f32.mrf.mxu2 }
 0xbcc   : > { %v5247_v10 = vpack.c.bf16 %v5237_v2, %v5237_v2 }
 0xbce   : > { %5252 = vst.msk [vmem:[#allocation3] sm:$0xf] %vm5251_vm5, %v5247_v10 }
 0xbd3   : > { %v5239_v39 = vpop.f32.mrf.mxu2 }
 0xbd4   : > { %v5248_v15 = vpack.c.bf16 %v5239_v39, %v5239_v39 }
 0xbd5   : > { %v5265_v45 = vld [vmem:[#allocation3] sm:$0xf] }
 0xbd6   : > { %v5256_v51 = vld [vmem:[#allocation3] sm:$0xf]  ;;  %5273 = vrot.lane.b32.xlu0 %v5265_v45, %s13728_s30  ;;  %5253 = vst.msk [vmem:[#allocation3 + $0x10] sm:$0xf] %vm5251_vm5, %v5248_v15 }
 0xbd7   : > { %5261 = vst.msk [vmem:[#allocation2] sm:$0xf] %vm5260_vm3, %v5256_v51  ;;  %v5289_v36 = vld [vmem:[#allocation3] sm:$0xf] }
 0xbd8   : > { %v5337_v62 = vld [vmem:[#allocation3] sm:$0xf] }
 0xbd9   : > { %v5313_v3 = vld [vmem:[#allocation3] sm:$0xf] }
 0xbda   : > { %v5361_v42 = vld [vmem:[#allocation3] sm:$0xf] }
 0xbdb   : > { %v5242_v9 = vpop.f32.mrf.mxu2  ;;  %v5409_v47 = vld [vmem:[#allocation3] sm:$0xf] }
 0xbdc   : > { %v5249_v37 = vpack.c.bf16 %v5242_v9, %v5242_v9  ;;  %v5385_v22 = vld [vmem:[#allocation3] sm:$0xf] }
 0xbdd   : > { %v5266_v60 = vld [vmem:[#allocation3 + $0x10] sm:$0xf]  ;;  %v5433_v49 = vld [vmem:[#allocation3] sm:$0xf] }
 0xbde   : > { %v5257_v17 = vld [vmem:[#allocation3 + $0x10] sm:$0xf]  ;;  %5254 = vst.msk [vmem:[#allocation3 + $0x20] sm:$0xf] %vm5251_vm5, %v5249_v37  ;;  %5275 = vrot.lane.b32.xlu1 %v5266_v60, %s13728_s30 }
 0xbdf   : > { %5262 = vst.msk [vmem:[#allocation2 + $0xc] sm:$0xf] %vm5260_vm3, %v5257_v17  ;;  %v9136_v30 = vld [vmem:[#allocation2] sm:$0xf] }
 0xbe0   : > { %v5314_v46 = vld [vmem:[#allocation3 + $0x10] sm:$0xf] }
 0xbe1   : > { %v5290_v29 = vld [vmem:[#allocation3 + $0x10] sm:$0xf] }
 0xbe2   : > { %v5338_v4 = vld [vmem:[#allocation3 + $0x10] sm:$0xf] }
 0xbe3   : > { %v5244_v14 = vpop.f32.mrf.mxu2  ;;  %v5386_v11 = vld [vmem:[#allocation3 + $0x10] sm:$0xf] }
 0xbe4   : > { %v5250_v44 = vpack.c.bf16 %v5244_v14, %v5244_v14  ;;  %v5362_v27 = vld [vmem:[#allocation3 + $0x10] sm:$0xf] }
 0xbe5   : > { %v5258_v28 = vld [vmem:[#allocation3 + $0x20] sm:$0xf]  ;;  %v5410_v35 = vld [vmem:[#allocation3 + $0x10] sm:$0xf] }
 0xbe6   : > { %v5267_v6 = vld [vmem:[#allocation3 + $0x20] sm:$0xf]  ;;  %5255 = vst.msk [vmem:[#allocation3 + $0x30] sm:$0xf] %vm5251_vm5, %v5250_v44  ;;  %5297 = vrot.lane.b32.xlu1 %v5289_v36, %s13729_s27  ;;  %v9826_v13 = vld [vmem:[#allocation2 + $0x8] sm:$0xf0] }
 0xbe7   : > { %5277 = vrot.lane.b32.xlu2 %v5267_v6, %s13728_s30  ;;  %v9137_v38 = vor.u32 %v9826_v13, %v9136_v30  ;;  %5263 = vst.msk [vmem:[#allocation2 + $0x18] sm:$0xf] %vm5260_vm3, %v5258_v28  ;;  %v5291_v57 = vld [vmem:[#allocation3 + $0x20] sm:$0xf]  ;;  %v5434_v34 = vld [vmem:[#allocation3 + $0x10] sm:$0xf] }
 0xbe8   : > { %v5315_v41 = vld [vmem:[#allocation3 + $0x20] sm:$0xf] }
 0xbe9   : > { %9210 = vmatmul.msk.bf16.vlgmr.msra.gmra.mxu1 %vm5595_vm4, %v9137_v38  ;;  %v5363_v50 = vld [vmem:[#allocation3 + $0x20] sm:$0xf] }
 0xbea   : > { %v5339_v8 = vld [vmem:[#allocation3 + $0x20] sm:$0xf] }
 0xbeb   : > { %v5387_v61 = vld [vmem:[#allocation3 + $0x20] sm:$0xf] }
 0xbec   : > { %v5435_v23 = vld [vmem:[#allocation3 + $0x20] sm:$0xf] }
 0xbed   : > { %v5259_v12 = vld [vmem:[#allocation3 + $0x30] sm:$0xf]  ;;  %v5411_v63 = vld [vmem:[#allocation3 + $0x20] sm:$0xf] }
 0xbee   : > { %v5292_v40 = vld [vmem:[#allocation3 + $0x30] sm:$0xf]  ;;  %5264 = vst.msk [vmem:[#allocation2 + $0x24] sm:$0xf] %vm5260_vm3, %v5259_v12  ;;  %v9140_v32 = vld [vmem:[#allocation2 + $0x18] sm:$0xf] }
 0xbef   : > { %v5268_v43 = vld [vmem:[#allocation3 + $0x30] sm:$0xf]  ;;  %5301 = vrot.lane.b32.xlu2 %v5291_v57, %s13729_s27  ;;  %5303 = vrot.lane.b32.xlu1 %v5292_v40, %s13729_s27 }
 0xbf0   : > { %5279 = vrot.lane.b32.xlu0 %v5268_v43, %s13728_s30  ;;  %v5340_v48 = vld [vmem:[#allocation3 + $0x30] sm:$0xf] }
 0xbf1   : > { %v5316_v56 = vld [vmem:[#allocation3 + $0x30] sm:$0xf] }
 0xbf2   : > { %v5364_v19 = vld [vmem:[#allocation3 + $0x30] sm:$0xf] }
 0xbf3   : > { %v5412_v26 = vld [vmem:[#allocation3 + $0x30] sm:$0xf] }
 0xbf4   : > { %v5388_v53 = vld [vmem:[#allocation3 + $0x30] sm:$0xf] }
 0xbf5   : > { %v9827_v25 = vld [vmem:[#allocation2 + $0x20] sm:$0xf0]  ;;  %v5436_v0 = vld [vmem:[#allocation3 + $0x30] sm:$0xf] }
 0xbf6   : > { %v9141_v1 = vor.u32 %v9827_v25, %v9140_v32 }
 0xbf7   : > { %5323 = vrot.lane.b32.xlu2 %v5314_v46, %s13615_s22  ;;  %5325 = vrot.lane.b32.xlu1 %v5315_v41, %s13615_s22 }
 0xbf8   : > { %5299 = vrot.lane.b32.xlu0 %v5290_v29, %s13729_s27 }
 0xbf9   : > { %9211 = vmatmul.msk.bf16.gmra.mxu1 %vm5595_vm4, %v9141_v1 }
 0xbff   : > { %5345 = vrot.lane.b32.xlu2 %v5337_v62, %s13775_s28  ;;  %5347 = vrot.lane.b32.xlu1 %v5338_v4, %s13775_s28 }
 0xc00   : > { %5321 = vrot.lane.b32.xlu0 %v5313_v3, %s13615_s22 }
 0xc07   : > { %5351 = vrot.lane.b32.xlu2 %v5340_v48, %s13775_s28  ;;  %5369 = vrot.lane.b32.xlu1 %v5361_v42, %s13776_s0 }
 0xc08   : > { %5327 = vrot.lane.b32.xlu0 %v5316_v56, %s13615_s22 }
 0xc0f   : > { %5373 = vrot.lane.b32.xlu2 %v5363_v50, %s13776_s0  ;;  %5375 = vrot.lane.b32.xlu1 %v5364_v19, %s13776_s0 }
 0xc10   : > { %5349 = vrot.lane.b32.xlu0 %v5339_v8, %s13775_s28 }
 0xc17   : > { %5395 = vrot.lane.b32.xlu2 %v5386_v11, %s13464_s3  ;;  %5397 = vrot.lane.b32.xlu1 %v5387_v61, %s13464_s3 }
 0xc18   : > { %5371 = vrot.lane.b32.xlu0 %v5362_v27, %s13776_s0 }
 0xc1f   : > { %5417 = vrot.lane.b32.xlu2 %v5409_v47, %s13462_s29  ;;  %5419 = vrot.lane.b32.xlu1 %v5410_v35, %s13462_s29 }
 0xc20   : > { %5393 = vrot.lane.b32.xlu0 %v5385_v22, %s13464_s3 }
 0xc27   : > { %5423 = vrot.lane.b32.xlu2 %v5412_v26, %s13462_s29  ;;  %5441 = vrot.lane.b32.xlu1 %v5433_v49, %s13460_s1 }
 0xc28   : > { %5399 = vrot.lane.b32.xlu0 %v5388_v53, %s13464_s3 }
 0xc2f   : > { %5445 = vrot.lane.b32.xlu2 %v5435_v23, %s13460_s1  ;;  %5447 = vrot.lane.b32.xlu1 %v5436_v0, %s13460_s1 }
 0xc30   : > { %5421 = vrot.lane.b32.xlu0 %v5411_v63, %s13462_s29 }
 0xc38   : > { %5443 = vrot.lane.b32.xlu0 %v5434_v34, %s13460_s1  ;;  %s13791_s1 = sld [smem:[#allocation16_spill]] }
 0xc41   : > { %v5278_v31 = vpop.permute.xlu2 %5277 }
 0xc42   : > { %5287 = vst.msk [vmem:[#allocation2 + $0x48] sm:$0xf] %vm5260_vm3, %v5278_v31 }
 0xc48   : > { %v5274_v52 = vpop.permute.xlu0 %5273 }
 0xc49   : > { %v5302_v20 = vpop.permute.xlu2 %5301  ;;  %5285 = vst.msk [vmem:[#allocation2 + $0x30] sm:$0xf] %vm5260_vm3, %v5274_v52  ;;  %v9148_v44 = vld [vmem:[#allocation2 + $0x48] sm:$0xf] }
 0xc4a   : > { %5311 = vst.msk [vmem:[#allocation2 + $0x78] sm:$0xf] %vm5260_vm3, %v5302_v20 }
 0xc50   : > { %v5276_v16 = vpop.permute.xlu1 %5275  ;;  %v9144_v39 = vld [vmem:[#allocation2 + $0x30] sm:$0xf] }
 0xc51   : > { %v5324_v54 = vpop.permute.xlu2 %5323  ;;  %5286 = vst.msk [vmem:[#allocation2 + $0x3c] sm:$0xf] %vm5260_vm3, %v5276_v16  ;;  %v9156_v3 = vld [vmem:[#allocation2 + $0x78] sm:$0xf] }
 0xc52   : > { %5334 = vst.msk [vmem:[#allocation2 + $0x9c] sm:$0xf] %vm5260_vm3, %v5324_v54 }
 0xc58   : > { %v5298_v10 = vpop.permute.xlu1 %5297  ;;  %v9828_v15 = vld [vmem:[#allocation2 + $0x38] sm:$0xf0] }
 0xc59   : > { %v5346_v2 = vpop.permute.xlu2 %5345  ;;  %5309 = vst.msk [vmem:[#allocation2 + $0x60] sm:$0xf] %vm5260_vm3, %v5298_v10  ;;  %v9145_v45 = vor.u32 %v9828_v15, %v9144_v39  ;;  %v9832_v11 = vld [vmem:[#allocation2 + $0x98] sm:$0xf0] }
 0xc5a   : > { %5357 = vst.msk [vmem:[#allocation2 + $0xc0] sm:$0xf] %vm5260_vm3, %v5346_v2 }
 0xc5b   : > { %9212 = vmatmul.msk.bf16.gmra.mxu1 %vm5595_vm4, %v9145_v45 }
 0xc60   : > { %v9152_v43 = vld [vmem:[#allocation2 + $0x60] sm:$0xf] }
 0xc61   : > { %v5352_v51 = vpop.permute.xlu2 %5351  ;;  %v5304_v9 = vpop.permute.xlu1 %5303  ;;  %v9168_v0 = vld [vmem:[#allocation2 + $0xc0] sm:$0xf] }
 0xc62   : > { %5360 = vst.msk [vmem:[#allocation2 + $0xe4] sm:$0xf] %vm5260_vm3, %v5352_v51  ;;  %v5280_v37 = vpop.permute.xlu0 %5279 }
 0xc63   : > { %5288 = vst.msk [vmem:[#allocation2 + $0x54] sm:$0xf] %vm5260_vm3, %v5280_v37 }
 0xc64   : > { %5312 = vst.msk [vmem:[#allocation2 + $0x84] sm:$0xf] %vm5260_vm3, %v5304_v9 }
 0xc66   : > { %v12603_v53 = vpop.f32.mrf.mxu1 }
 0xc69   : > { %v5374_v60 = vpop.permute.xlu2 %5373  ;;  %v5326_v17 = vpop.permute.xlu1 %5325  ;;  %v9835_v20 = vld [vmem:[#allocation2 + $0xe0] sm:$0xf0] }
 0xc6a   : > { %5383 = vst.msk [vmem:[#allocation2 + $0x108] sm:$0xf] %vm5260_vm3, %v5374_v60  ;;  %v5300_v14 = vpop.permute.xlu0 %5299  ;;  %v9829_v28 = vld [vmem:[#allocation2 + $0x50] sm:$0xf0] }
 0xc6b   : > { %5310 = vst.msk [vmem:[#allocation2 + $0x6c] sm:$0xf] %vm5260_vm3, %v5300_v14  ;;  %v9149_v36 = vor.u32 %v9829_v28, %v9148_v44  ;;  %v9831_v29 = vld [vmem:[#allocation2 + $0x80] sm:$0xf0] }
 0xc6c   : > { %5335 = vst.msk [vmem:[#allocation2 + $0xa8] sm:$0xf] %vm5260_vm3, %v5326_v17  ;;  %v9157_v48 = vor.u32 %v9831_v29, %v9156_v3 }
 0xc6d   : > { %9213 = vmatmul.msk.bf16.gmra.mxu1 %vm5595_vm4, %v9149_v36 }
 0xc6e   : > { %v12606_v34 = vpop.f32.mrf.mxu1 }
 0xc71   : > { %v5396_v6 = vpop.permute.xlu2 %5395  ;;  %v5348_v30 = vpop.permute.xlu1 %5347  ;;  %v9180_v60 = vld [vmem:[#allocation2 + $0x108] sm:$0xf] }
 0xc72   : > { %5406 = vst.msk [vmem:[#allocation2 + $0x12c] sm:$0xf] %vm5260_vm3, %v5396_v6  ;;  %v5322_v13 = vpop.permute.xlu0 %5321  ;;  %v9830_v38 = vld [vmem:[#allocation2 + $0x68] sm:$0xf0] }
 0xc73   : > { %5333 = vst.msk [vmem:[#allocation2 + $0x90] sm:$0xf] %vm5260_vm3, %v5322_v13  ;;  %v9153_v46 = vor.u32 %v9830_v38, %v9152_v43  ;;  %v9164_v26 = vld [vmem:[#allocation2 + $0xa8] sm:$0xf] }
 0xc74   : > { %5358 = vst.msk [vmem:[#allocation2 + $0xcc] sm:$0xf] %vm5260_vm3, %v5348_v30 }
 0xc76   : > { %v12608_v31 = vpop.f32.mrf.mxu1 }
 0xc79   : > { %v5418_v57 = vpop.permute.xlu2 %5417  ;;  %v5370_v12 = vpop.permute.xlu1 %5369  ;;  %v9838_v6 = vld [vmem:[#allocation2 + $0x128] sm:$0xf0] }
 0xc7a   : > { %5429 = vst.msk [vmem:[#allocation2 + $0x150] sm:$0xf] %vm5260_vm3, %v5418_v57  ;;  %v5328_v40 = vpop.permute.xlu0 %5327  ;;  %v9160_v50 = vld [vmem:[#allocation2 + $0x90] sm:$0xf] }
 0xc7b   : > { %5336 = vst.msk [vmem:[#allocation2 + $0xb4] sm:$0xf] %vm5260_vm3, %v5328_v40  ;;  %v9161_v61 = vor.u32 %v9832_v11, %v9160_v50  ;;  %v9834_v23 = vld [vmem:[#allocation2 + $0xc8] sm:$0xf0] }
 0xc7c   : > { %5381 = vst.msk [vmem:[#allocation2 + $0xf0] sm:$0xf] %vm5260_vm3, %v5370_v12  ;;  %v9169_v63 = vor.u32 %v9834_v23, %v9168_v0  ;;  %v5753_v0 = vpack.c.bf16 %v12606_v34, %v12603_v53 }
 0xc7d   : > { %9214 = vmatmul.msk.bf16.gmra.mxu1 %vm5595_vm4, %v9153_v46 }
 0xc7e   : > { %v5670_v16 = vpop.f32.mrf.mxu1 }
 0xc81   : > { %v5424_v41 = vpop.permute.xlu2 %5423  ;;  %v5376_v32 = vpop.permute.xlu1 %5375 }
 0xc82   : > { %5432 = vst.msk [vmem:[#allocation2 + $0x174] sm:$0xf] %vm5260_vm3, %v5424_v41  ;;  %v5350_v25 = vpop.permute.xlu0 %5349  ;;  %v9833_v35 = vld [vmem:[#allocation2 + $0xb0] sm:$0xf0] }
 0xc83   : > { %5359 = vst.msk [vmem:[#allocation2 + $0xd8] sm:$0xf] %vm5260_vm3, %v5350_v25  ;;  %v9165_v49 = vor.u32 %v9833_v35, %v9164_v26  ;;  %v9176_v39 = vld [vmem:[#allocation2 + $0xf0] sm:$0xf] }
 0xc84   : > { %5384 = vst.msk [vmem:[#allocation2 + $0x114] sm:$0xf] %vm5260_vm3, %v5376_v32  ;;  %v9192_v32 = vld [vmem:[#allocation2 + $0x150] sm:$0xf] }
 0xc89   : > { %v5446_v1 = vpop.permute.xlu2 %5445  ;;  %v5398_v62 = vpop.permute.xlu1 %5397 }
 0xc8a   : > { %5455 = vst.msk [vmem:[#allocation2 + $0x198] sm:$0xf] %vm5260_vm3, %v5446_v1  ;;  %v5372_v4 = vpop.permute.xlu0 %5371  ;;  %v9172_v52 = vld [vmem:[#allocation2 + $0xd8] sm:$0xf] }
 0xc8b   : > { %5382 = vst.msk [vmem:[#allocation2 + $0xfc] sm:$0xf] %vm5260_vm3, %v5372_v4  ;;  %v9173_v54 = vor.u32 %v9835_v20, %v9172_v52  ;;  %v9837_v9 = vld [vmem:[#allocation2 + $0x110] sm:$0xf0] }
 0xc8c   : > { %5407 = vst.msk [vmem:[#allocation2 + $0x138] sm:$0xf] %vm5260_vm3, %v5398_v62  ;;  %v9181_v17 = vor.u32 %v9837_v9, %v9180_v60  ;;  %v9841_v4 = vld [vmem:[#allocation2 + $0x170] sm:$0xf0]  ;;  %v9242_v9 = vld [vmem:[%s13777_s4 + $0x18] sm:$0xf] }
 0xc8d   : > { %9215 = vmatmul.msk.bf16.gmra.mxu1 %vm5595_vm4, %v9157_v48 }
 0xc91   : > { %v5420_v42 = vpop.permute.xlu1 %5419  ;;  %v9204_v26 = vld [vmem:[#allocation2 + $0x198] sm:$0xf] }
 0xc92   : > { %v5394_v56 = vpop.permute.xlu0 %5393  ;;  %5430 = vst.msk [vmem:[#allocation2 + $0x15c] sm:$0xf] %vm5260_vm3, %v5420_v42  ;;  %v9836_v2 = vld [vmem:[#allocation2 + $0xf8] sm:$0xf0] }
 0xc93   : > { %5405 = vst.msk [vmem:[#allocation2 + $0x120] sm:$0xf] %vm5260_vm3, %v5394_v56  ;;  %v9177_v15 = vor.u32 %v9836_v2, %v9176_v39  ;;  %v9188_v12 = vld [vmem:[#allocation2 + $0x138] sm:$0xf] }
 0xc99   : > { %v5442_v19 = vpop.permute.xlu1 %5441  ;;  %v9840_v46 = vld [vmem:[#allocation2 + $0x158] sm:$0xf0] }
 0xc9a   : > { %v5400_v8 = vpop.permute.xlu0 %5399  ;;  %5453 = vst.msk [vmem:[#allocation2 + $0x180] sm:$0xf] %vm5260_vm3, %v5442_v19  ;;  %v9184_v28 = vld [vmem:[#allocation2 + $0x120] sm:$0xf]  ;;  %v9193_v25 = vor.u32 %v9840_v46, %v9192_v32  ;;  %v9232_v46 = vld [vmem:[%s13777_s4 + $0xc] sm:$0xf0] }
 0xc9b   : > { %5408 = vst.msk [vmem:[#allocation2 + $0x144] sm:$0xf] %vm5260_vm3, %v5400_v8  ;;  %v9185_v30 = vor.u32 %v9838_v6, %v9184_v28 }
 0xc9d   : > { %9216 = vmatmul.msk.bf16.gmra.mxu1 %vm5595_vm4, %v9161_v61 }
 0xca1   : > { %v5448_v27 = vpop.permute.xlu1 %5447  ;;  %v9200_v8 = vld [vmem:[#allocation2 + $0x180] sm:$0xf] }
 0xca2   : > { %v5422_v47 = vpop.permute.xlu0 %5421  ;;  %5456 = vst.msk [vmem:[#allocation2 + $0x1a4] sm:$0xf] %vm5260_vm3, %v5448_v27  ;;  %v9839_v38 = vld [vmem:[#allocation2 + $0x140] sm:$0xf0] }
 0xca3   : > { %5431 = vst.msk [vmem:[#allocation2 + $0x168] sm:$0xf] %vm5260_vm3, %v5422_v47  ;;  %v9189_v40 = vor.u32 %v9839_v38, %v9188_v12 }
 0xca9   : > { %v9843_v35 = vld [vmem:[#allocation2 + $0x1a0] sm:$0xf0] }
 0xcaa   : > { %v5444_v22 = vpop.permute.xlu0 %5443  ;;  %v9196_v1 = vld [vmem:[#allocation2 + $0x168] sm:$0xf]  ;;  %v9205_v23 = vor.u32 %v9843_v35, %v9204_v26 }
 0xcab   : > { %5454 = vst.msk [vmem:[#allocation2 + $0x18c] sm:$0xf] %vm5260_vm3, %v5444_v22  ;;  %v9197_v3 = vor.u32 %v9841_v4, %v9196_v1  ;;  %v9238_v1 = vld [vmem:[%s13777_s4 + $0x8] sm:$0xf] }
 0xcad   : > { %9217 = vmatmul.msk.bf16.gmra.mxu1 %vm5595_vm4, %v9165_v49  ;;  %v5754_v49 = vpack.c.bf16 %v5670_v16, %v12608_v31  ;;  %v9230_v31 = vld [vmem:[%s13777_s4] sm:$0xf]  ;;  %v9846_v16 = vld [vmem:[%s13777_s4 + $0x8] sm:$0xf0] }
 0xcb2   : > { %v9842_v50 = vld [vmem:[#allocation2 + $0x188] sm:$0xf0] }
 0xcb3   : > { %v9201_v61 = vor.u32 %v9842_v50, %v9200_v8  ;;  %v9250_v50 = vld [vmem:[%s13777_s4 + $0x20] sm:$0xf] }
 0xcbd   : > { %9218 = vmatmul.msk.bf16.gmra.mxu1 %vm5595_vm4, %v9169_v63 }
 0xccd   : > { %9219 = vmatmul.msk.bf16.gmra.mxu1 %vm5595_vm4, %v9173_v54 }
 0xcd8   : > { %v5673_v10 = vpop.f32.mrf.mxu1 }
 0xcdd   : > { %9220 = vmatmul.msk.bf16.gmra.mxu1 %vm5595_vm4, %v9177_v15 }
 0xce0   : > { %v5675_v45 = vpop.f32.mrf.mxu1 }
 0xce1   : > { %v5755_v51 = vpack.c.bf16 %v5675_v45, %v5673_v10 }
 0xcea   : > { %v5678_v37 = vpop.f32.mrf.mxu1 }
 0xced   : > { %9221 = vmatmul.msk.bf16.gmra.mxu1 %vm5595_vm4, %v9181_v17 }
 0xcf2   : > { %v5680_v14 = vpop.f32.mrf.mxu1 }
 0xcf3   : > { %v5756_v44 = vpack.c.bf16 %v5680_v14, %v5678_v37  ;;  %v9849_v37 = vld [vmem:[%s13777_s4 + $0x20] sm:$0xf0] }
 0xcf4   : > { %v9243_v60 = vor.u32 %v9849_v37, %v9242_v9 }
 0xcfa   : > { %v5683_v36 = vpop.f32.mrf.mxu1 }
 0xcfd   : > { %9222 = vmatmul.msk.bf16.gmra.mxu1 %vm5595_vm4, %v9185_v30 }
 0xd02   : > { %v5685_v13 = vpop.f32.mrf.mxu1 }
 0xd03   : > { %v5757_v27 = vpack.c.bf16 %v5685_v13, %v5683_v36 }
 0xd0a   : > { %v5688_v57 = vpop.f32.mrf.mxu1 }
 0xd0d   : > { %9223 = vmatmul.msk.bf16.gmra.mxu1 %vm5595_vm4, %v9189_v40 }
 0xd12   : > { %v5690_v43 = vpop.f32.mrf.mxu1 }
 0xd13   : > { %v5758_v11 = vpack.c.bf16 %v5690_v43, %v5688_v57  ;;  %v9845_v43 = vld [vmem:[%s13777_s4 + $0x4] sm:$0xf] }
 0xd14   : > { %v9235_v32 = vor.u32 %v9845_v43, %v9232_v46 }
 0xd1a   : > { %v5693_v41 = vpop.f32.mrf.mxu1 }
 0xd1d   : > { %9224 = vmatmul.msk.bf16.gmra.mxu1 %vm5595_vm4, %v9193_v25 }
 0xd22   : > { %v5695_v29 = vpop.f32.mrf.mxu1 }
 0xd23   : > { %v5759_v56 = vpack.c.bf16 %v5695_v29, %v5693_v41 }
 0xd2a   : > { %v5698_v62 = vpop.f32.mrf.mxu1 }
 0xd2d   : > { %9225 = vmatmul.msk.bf16.gmra.mxu1 %vm5595_vm4, %v9197_v3 }
 0xd32   : > { %v5700_v48 = vpop.f32.mrf.mxu1 }
 0xd33   : > { %v5760_v42 = vpack.c.bf16 %v5700_v48, %v5698_v62  ;;  %v9847_v62 = vld [vmem:[%s13777_s4 + $0x10] sm:$0xf0]  ;;  %v9848_v48 = vld [vmem:[%s13777_s4 + $0x1c] sm:$0xf] }
 0xd34   : > { %v9239_v3 = vor.u32 %v9847_v62, %v9238_v1 }
 0xd35   : > { %5816 = vmatpush.bf16.msrb.mxu3 %v5760_v42  ;;  %v9244_v42 = vld [vmem:[%s13777_s4 + $0x24] sm:$0xf0] }
 0xd39   : > { %5817 = vmatpush.bf16.msrb.mxu3 %v5759_v56  ;;  %v9247_v56 = vor.u32 %v9848_v48, %v9244_v42 }
 0xd3a   : > { %v5703_v19 = vpop.f32.mrf.mxu1 }
 0xd3d   : > { %9226 = vmatmul.msk.bf16.gmra.mxu1 %vm5595_vm4, %v9201_v61  ;;  %5818 = vmatpush.bf16.msrb.mxu3 %v5758_v11 }
 0xd41   : > { %5819 = vmatpush.bf16.msrb.mxu3 %v5757_v27 }
 0xd42   : > { %v5705_v47 = vpop.f32.mrf.mxu1 }
 0xd43   : > { %v5761_v41 = vpack.c.bf16 %v5705_v47, %v5703_v19  ;;  %v9850_v19 = vld [vmem:[%s13777_s4 + $0x28] sm:$0xf0] }
 0xd44   : > { %v9251_v8 = vor.u32 %v9850_v19, %v9250_v50 }
 0xd45   : > { %5820 = vmatpush.bf16.msrb.mxu3 %v5756_v44 }
 0xd49   : > { %5821 = vmatpush.bf16.msrb.mxu3 %v5755_v51  ;;  %v9231_v51 = vor.u32 %v9846_v16, %v9230_v31 }
 0xd4a   : > { %v5708_v22 = vpop.f32.mrf.mxu1 }
 0xd4d   : > { %9227 = vmatmul.msk.bf16.gmra.mxu1 %vm5595_vm4, %v9205_v23  ;;  %5822 = vmatpush.bf16.msrb.mxu3 %v5754_v49 }
 0xd51   : > { %5823 = vmatpush.bf16.msrb.mxu3 %v5753_v0 }
 0xd52   : > { %v5710_v63 = vpop.f32.mrf.mxu1 }
 0xd53   : > { %v5762_v40 = vpack.c.bf16 %v5710_v63, %v5708_v22 }
 0xd54   : > { %5824 = vmatmul.bf16.vlgmr.msrb.gmra.mxu3 %v9231_v51 }
 0xd5a   : > { %v5713_v52 = vpop.f32.mrf.mxu1 }
 0xd62   : > { %v5715_v20 = vpop.f32.mrf.mxu1 }
 0xd63   : > { %v5763_v57 = vpack.c.bf16 %v5715_v20, %v5713_v52 }
 0xd64   : > { %5829 = vmatmul.bf16.gmra.mxu3 %v9243_v60 }
 0xd6a   : > { %v5718_v54 = vpop.f32.mrf.mxu1 }
 0xd72   : > { %v5720_v2 = vpop.f32.mrf.mxu1 }
 0xd73   : > { %v5764_v38 = vpack.c.bf16 %v5720_v2, %v5718_v54 }
 0xd7a   : > { %v5723_v10 = vpop.f32.mrf.mxu1 }
 0xd82   : > { %v5725_v39 = vpop.f32.mrf.mxu1 }
 0xd83   : > { %v5765_v30 = vpack.c.bf16 %v5725_v39, %v5723_v10 }
 0xd8a   : > { %v5728_v15 = vpop.f32.mrf.mxu1 }
 0xd92   : > { %v5730_v45 = vpop.f32.mrf.mxu1 }
 0xd93   : > { %v5766_v6 = vpack.c.bf16 %v5730_v45, %v5728_v15 }
 0xd9a   : > { %v5733_v53 = vpop.f32.mrf.mxu1 }
 0xda2   : > { %v5735_v34 = vpop.f32.mrf.mxu1 }
 0xda3   : > { %v5767_v28 = vpack.c.bf16 %v5735_v34, %v5733_v53 }
 0xdaa   : > { %v5738_v17 = vpop.f32.mrf.mxu1 }
 0xdb2   : > { %v5740_v14 = vpop.f32.mrf.mxu1 }
 0xdb3   : > { %v5768_v44 = vpack.c.bf16 %v5740_v14, %v5738_v17 }
 0xdb5   : > { %5835 = vmatpush.bf16.msra.mxu2 %v5768_v44 }
 0xdb9   : > { %5836 = vmatpush.bf16.msra.mxu2 %v5767_v28 }
 0xdba   : > { %v5743_v36 = vpop.f32.mrf.mxu1 }
 0xdbd   : > { %5837 = vmatpush.bf16.msra.mxu2 %v5766_v6 }
 0xdc1   : > { %5838 = vmatpush.bf16.msra.mxu2 %v5765_v30 }
 0xdc2   : > { %v5745_v13 = vpop.f32.mrf.mxu1 }
 0xdc3   : > { %v5769_v4 = vpack.c.bf16 %v5745_v13, %v5743_v36 }
 0xdc5   : > { %5839 = vmatpush.bf16.msra.mxu2 %v5764_v38 }
 0xdc9   : > { %5840 = vmatpush.bf16.msra.mxu2 %v5763_v57 }
 0xdca   : > { %v5748_v12 = vpop.f32.mrf.mxu1 }
 0xdcd   : > { %5841 = vmatpush.bf16.msra.mxu2 %v5762_v40 }
 0xdd1   : > { %5842 = vmatpush.bf16.msra.mxu2 %v5761_v41 }
 0xdd2   : > { %v5750_v25 = vpop.f32.mrf.mxu1 }
 0xdd3   : > { %v5770_v29 = vpack.c.bf16 %v5750_v25, %v5748_v12 }
 0xdd4   : > { %5843 = vmatmul.bf16.vlgmr.msra.gmra.mxu2 %v9235_v32  ;;  %v9851_v32 = vld [vmem:[%s13346_s18] sm:$0xff] }
 0xdd5   : > { %5860 = vmatpush.bf16.msra.mxu3 %v5770_v29  ;;  %6000 = vmatpush.bf16.msrb.mxu2 %v9851_v32 }
 0xdd7   : > { %v5825_v11 = vpop.f32.mrf.mxu3 }
 0xdd9   : > { %5861 = vmatpush.bf16.msra.mxu3 %v5769_v4 }
 0xddc   : > { %9252 = vmatmul.msk.bf16.vlgmr.msra.gmra.mxu3 %vm5809_vm9, %v9239_v3 }
 0xddf   : > { %v5827_v61 = vpop.f32.mrf.mxu3 }
 0xde4   : > { %5848 = vmatmul.bf16.gmra.mxu2 %v9247_v56 }
 0xde7   : > { %v5830_v27 = vpop.f32.mrf.mxu3 }
 0xdec   : > { %9253 = vmatmul.msk.bf16.gmra.mxu3 %vm5809_vm9, %v9251_v8 }
 0xdef   : > { %v5832_v47 = vpop.f32.mrf.mxu3 }
 0xe57   : > { %v5844_v35 = vpop.f32.mrf.mxu2 }
 0xe58   : > { %v5845_v22 = vadd.f32 %v5844_v35, %v5825_v11 }
 0xe5f   : > { %v5846_v26 = vpop.f32.mrf.mxu2  ;;  %v5863_v49 = vpop.f32.mrf.mxu3 }
 0xe60   : > { %v12660_v23 = vadd.f32 %v5863_v49, %v5845_v22  ;;  %v5847_v20 = vadd.f32 %v5846_v26, %v5827_v61 }
 0xe62   : > { %v5873_v0 = vsel %vm13778_vm8, %v12660_v23, 0.0  ;;  %v5889_v63 = vmul.f32 %v12660_v23, %v12660_v23 }
 0xe63   : > { %5874 = vadd.xlane.f32.xlu0 %v5873_v0 }
 0xe64   : > { %v5893_v52 = vsel %vm13779_vm1, %v5889_v63, 0.0 }
 0xe65   : > { %5894 = vadd.xlane.f32.xlu1 %v5893_v52 }
 0xe67   : > { %v5865_v54 = vpop.f32.mrf.mxu3  ;;  %v5849_v10 = vpop.f32.mrf.mxu2 }
 0xe68   : > { %v12667_v2 = vadd.f32 %v5865_v54, %v5847_v20  ;;  %v5850_v15 = vadd.f32 %v5849_v10, %v5830_v27 }
 0xe6a   : > { %v5876_v39 = vsel %vm13780_vm14, %v12667_v2, 0.0  ;;  %v5890_v45 = vmul.f32 %v12667_v2, %v12667_v2 }
 0xe6b   : > { %5877 = vadd.xlane.f32.xlu2 %v5876_v39 }
 0xe6c   : > { %v5896_v51 = vsel %vm13781_vm7, %v5890_v45, 0.0 }
 0xe6f   : > { %v5868_v31 = vpop.f32.mrf.mxu3  ;;  %v5851_v34 = vpop.f32.mrf.mxu2 }
 0xe70   : > { %v12673_v16 = vadd.f32 %v5868_v31, %v5850_v15  ;;  %v5852_v9 = vadd.f32 %v5851_v34, %v5832_v47 }
 0xe72   : > { %v5879_v53 = vsel %vm13782_vm2, %v12673_v16, 0.0  ;;  %v5891_v37 = vmul.f32 %v12673_v16, %v12673_v16 }
 0xe73   : > { %5897 = vadd.xlane.f32.xlu2 %v5896_v51  ;;  %5880 = vadd.xlane.f32.xlu0 %v5879_v53 }
 0xe74   : > { %v5899_v14 = vsel %vm13783_vm15, %v5891_v37, 0.0 }
 0xe77   : > { %v5870_v60 = vpop.f32.mrf.mxu3 }
 0xe78   : > { %v12680_v17 = vadd.f32 %v5870_v60, %v5852_v9 }
 0xe7a   : > { %v5882_v44 = vsel %vm13784_vm13, %v12680_v17, 0.0  ;;  %v5892_v28 = vmul.f32 %v12680_v17, %v12680_v17 }
 0xe7b   : > { %5900 = vadd.xlane.f32.xlu2 %v5899_v14  ;;  %5883 = vadd.xlane.f32.xlu1 %v5882_v44 }
 0xe7c   : > { %v5902_v36 = vsel %vm13785_vm6, %v5892_v28, 0.0 }
 0xe7d   : > { %5903 = vadd.xlane.f32.xlu0 %v5902_v36 }
 0xed6   : > { %v5875_v6 = vpop.xlane.xlu0 %5874 }
 0xed7   : > { %v5885_v30 = vmul.f32 %v5875_v6, %v12472_v18 }
 0xed8   : > { %v5895_v13 = vpop.xlane.xlu1 %5894 }
 0xed9   : > { %v5909_v38 = vmul.f32 %v5885_v30, %v5885_v30  ;;  %v5905_v57 = vmul.f32 %v5895_v13, %v12472_v18  ;;  %v5921_v60 = vsub.f32 %v12660_v23, %v5885_v30 }
 0xedb   : > { %v5913_v12 = vsub.f32 %v5905_v57, %v5909_v38 }
 0xedd   : > { %v5917_v40 = vmax.f32 %v5913_v12, 0.0 }
 0xede   : > { %v5878_v43 = vpop.xlane.xlu2 %5877 }
 0xedf   : > { %v5925_v46 = vadd.f32 1e-05, %v5917_v40  ;;  %v5886_v41 = vmul.f32 %v5878_v43, %v12472_v18 }
 0xee1   : > { %10065 = vrsqrt.f32 %v5925_v46  ;;  %v5910_v1 = vmul.f32 %v5886_v41, %v5886_v41  ;;  %vm5935_vm0 = vweird.f32 %v5925_v46  ;;  %v5922_v6 = vsub.f32 %v12667_v2, %v5886_v41 }
 0xee6   : > { %v5898_v25 = vpop.xlane.xlu2 %5897  ;;  %v5881_v3 = vpop.xlane.xlu0 %5880 }
 0xee7   : > { %v10066_v29 = vpop.eup %10065  ;;  %v5906_v62 = vmul.f32 %v5898_v25, %v12472_v18  ;;  %v12696_v56 = vmul.f32 %v5881_v3, %v12472_v18 }
 0xee8   : > { %v5930_v4 = vmul.f32 %v10066_v29, %v5925_v46  ;;  %vm5936_vm11 = vweird.f32 %v10066_v29 }
 0xee9   : > { %v5914_v48 = vsub.f32 %v5906_v62, %v5910_v1  ;;  %v5911_v61 = vmul.f32 %v12696_v56, %v12696_v56  ;;  %vm5937_vm12 = vmor %vm5935_vm0, %vm5936_vm11  ;;  %v5923_v3 = vsub.f32 %v12673_v16, %v12696_v56  ;;  %v9870_v16 = vld [vmem:[%s13787_s12] sm:$0xff] }
 0xeea   : > { %v5931_v50 = vmul.f32 %v10066_v29, %v5930_v4 }
 0xeeb   : > { %v5918_v42 = vmax.f32 %v5914_v48, 0.0 }
 0xeec   : > { %v5932_v35 = vmul.f32 0.5, %v5931_v50 }
 0xeed   : > { %v5926_v19 = vadd.f32 1e-05, %v5918_v42 }
 0xeee   : > { %v5901_v8 = vpop.xlane.xlu2 %5900  ;;  %v5884_v11 = vpop.xlane.xlu1 %5883  ;;  %v5933_v20 = vsub.f32 1.5, %v5932_v35 }
 0xeef   : > { %10067 = vrsqrt.f32 %v5926_v19  ;;  %v5907_v27 = vmul.f32 %v5901_v8, %v12472_v18  ;;  %v5888_v47 = vmul.f32 %v5884_v11, %v12472_v18  ;;  %vm5945_vm1 = vweird.f32 %v5926_v19  ;;  %v6258_v11 = vld [vmem:[%s13787_s12 + $0x8] sm:$0x7] }
 0xef0   : > { %v5904_v22 = vpop.xlane.xlu0 %5903  ;;  %v5934_v31 = vmul.f32 %v10066_v29, %v5933_v20 }
 0xef1   : > { %v5915_v26 = vsub.f32 %v5907_v27, %v5911_v61  ;;  %v5912_v49 = vmul.f32 %v5888_v47, %v5888_v47  ;;  %v5908_v0 = vmul.f32 %v5904_v22, %v12472_v18  ;;  %v5924_v41 = vsub.f32 %v12680_v17, %v5888_v47 }
 0xef2   : > { %v5938_v34 = vsel %vm5937_vm12, %v10066_v29, %v5934_v31  ;;  %vm13786_vm12 = vmmov %vm13782_vm2  ;;  %v6354_v61 = vunpack.c.l.b16 %v6258_v11 }
 0xef3   : > { %v5919_v63 = vmax.f32 %v5915_v26, 0.0  ;;  %v5916_v52 = vsub.f32 %v5908_v0, %v5912_v49  ;;  %v5969_v36 = vmul.f32 %v5938_v34, %v5921_v60 }
 0xef4   : > { %v6356_v27 = vpack.c.b16 %v6354_v61, %v6354_v61 }
 0xef5   : > { %v10068_v54 = vpop.eup %10067  ;;  %v5927_v10 = vadd.f32 1e-05, %v5919_v63  ;;  %v5920_v39 = vmax.f32 %v5916_v52, 0.0  ;;  %v5973_v46 = vmax.f32 %v5969_v36, 0.0 }
 0xef6   : > { %v5940_v15 = vmul.f32 %v10068_v54, %v5926_v19  ;;  %vm5946_vm8 = vweird.f32 %v10068_v54  ;;  %v6413_v35 = vsel %vm5650_vm10, %v6356_v27, 0 }
 0xef7   : > { %10069 = vrsqrt.f32 %v5927_v10  ;;  %v5928_v45 = vadd.f32 1e-05, %v5920_v39  ;;  %vm5947_vm14 = vmor %vm5945_vm1, %vm5946_vm8  ;;  %vm5955_vm11 = vweird.f32 %v5927_v10  ;;  %6421 = vmatpush.bf16.msrb.mxu3 %v6413_v35 }
 0xef8   : > { %v5941_v51 = vmul.f32 %v10068_v54, %v5940_v15  ;;  %vm13792_vm8 = vmmov %vm13782_vm2 }
 0xef9   : > { %10071 = vrsqrt.f32 %v5928_v45  ;;  %vm5965_vm13 = vweird.f32 %v5928_v45  ;;  %vm13793_vm1 = vmmov %vm13782_vm2 }
 0xefa   : > { %v5942_v53 = vmul.f32 0.5, %v5941_v51 }
 0xefb   : > { %6422 = vmatpush.bf16.msrb.mxu3 %v9870_v16 }
 0xefc   : > { %v5943_v9 = vsub.f32 1.5, %v5942_v53 }
 0xefd   : > { %v10070_v37 = vpop.eup %10069 }
 0xefe   : > { %v5944_v14 = vmul.f32 %v10068_v54, %v5943_v9  ;;  %v5950_v44 = vmul.f32 %v10070_v37, %v5927_v10  ;;  %vm5956_vm15 = vweird.f32 %v10070_v37 }
 0xeff   : > { %v10072_v28 = vpop.eup %10071  ;;  %vm5957_vm0 = vmor %vm5955_vm11, %vm5956_vm15 }
 0xf00   : > { %v5948_v13 = vsel %vm5947_vm14, %v10068_v54, %v5944_v14  ;;  %v5951_v38 = vmul.f32 %v10070_v37, %v5950_v44  ;;  %v5960_v57 = vmul.f32 %v10072_v28, %v5928_v45  ;;  %vm5966_vm7 = vweird.f32 %v10072_v28  ;;  %vm13794_vm14 = vmmov %vm13793_vm1 }
 0xf01   : > { %v5970_v12 = vmul.f32 %v5948_v13, %v5922_v6  ;;  %vm5967_vm6 = vmor %vm5965_vm13, %vm5966_vm7 }
 0xf02   : > { %v5952_v40 = vmul.f32 0.5, %v5951_v38  ;;  %v5961_v43 = vmul.f32 %v10072_v28, %v5960_v57  ;;  %vm13795_vm7 = vmmov %vm13793_vm1 }
 0xf03   : > { %v5974_v32 = vmax.f32 %v5970_v12, 0.0  ;;  %vm13797_vm15 = vmmov %vm13793_vm1 }
 0xf04   : > { %v5953_v25 = vsub.f32 1.5, %v5952_v40  ;;  %v5962_v29 = vmul.f32 0.5, %v5961_v43  ;;  %vm13798_vm13 = vmmov %vm13793_vm1 }
 0xf05   : > { %v5977_v1 = vpack.c.bf16 %v5974_v32, %v5973_v46 }
 0xf06   : > { %v5963_v23 = vsub.f32 1.5, %v5962_v29  ;;  %v5954_v30 = vmul.f32 %v10070_v37, %v5953_v25 }
 0xf07   : > { %9258 = vmatmul.msk.bf16.vlgmr.msrb.gmra.mxu2 %vm13782_vm2, %v5977_v1  ;;  %vm13796_vm2 = vmmov %vm13793_vm1 }
 0xf08   : > { %v5964_v62 = vmul.f32 %v10072_v28, %v5963_v23  ;;  %v5958_v4 = vsel %vm5957_vm0, %v10070_v37, %v5954_v30 }
 0xf09   : > { %v5971_v42 = vmul.f32 %v5958_v4, %v5923_v3 }
 0xf0a   : > { %v5968_v2 = vsel %vm5967_vm6, %v10072_v28, %v5964_v62  ;;  %vm13799_vm6 = vmmov %vm13793_vm1 }
 0xf0b   : > { %v5972_v48 = vmul.f32 %v5968_v2, %v5924_v41  ;;  %v5975_v19 = vmax.f32 %v5971_v42, 0.0 }
 0xf0d   : > { %v5976_v50 = vmax.f32 %v5972_v48, 0.0 }
 0xf0f   : > { %v5978_v8 = vpack.c.bf16 %v5976_v50, %v5975_v19 }
 0xf17   : > { %9259 = vmatmul.msk.bf16.gmra.mxu2 %vm13786_vm12, %v5978_v8 }
 0xf8a   : > { %v6002_v17 = vpop.f32.mrf.mxu2 }
 0xf8b   : > { %v6012_v56 = vpack.c.bf16 %v6002_v17, %v6002_v17 }
 0xf8d   : > { %6016 = vst.msk [vmem:[#allocation3] sm:$0xf] %vm5251_vm5, %v6012_v56 }
 0xf92   : > { %v6004_v47 = vpop.f32.mrf.mxu2 }
 0xf93   : > { %v6013_v22 = vpack.c.bf16 %v6004_v47, %v6004_v47 }
 0xf94   : > { %v6028_v26 = vld [vmem:[#allocation3] sm:$0xf] }
 0xf95   : > { %6017 = vst.msk [vmem:[#allocation3 + $0x10] sm:$0xf] %vm5251_vm5, %v6013_v22  ;;  %6036 = vrot.lane.b32.xlu1 %v6028_v26, %s13728_s30  ;;  %v6020_v49 = vld [vmem:[#allocation3] sm:$0xf] }
 0xf96   : > { %6024 = vst.msk [vmem:[#allocation2] sm:$0xf] %vm5260_vm3, %v6020_v49  ;;  %v6076_v15 = vld [vmem:[#allocation3] sm:$0xf] }
 0xf97   : > { %v6052_v45 = vld [vmem:[#allocation3] sm:$0xf] }
 0xf98   : > { %v6148_v46 = vld [vmem:[#allocation3] sm:$0xf] }
 0xf99   : > { %v6124_v32 = vld [vmem:[#allocation3] sm:$0xf] }
 0xf9a   : > { %v6007_v0 = vpop.f32.mrf.mxu2  ;;  %v6100_v25 = vld [vmem:[#allocation3] sm:$0xf] }
 0xf9b   : > { %v6014_v63 = vpack.c.bf16 %v6007_v0, %v6007_v0  ;;  %v6196_v48 = vld [vmem:[#allocation3] sm:$0xf] }
 0xf9c   : > { %v6053_v52 = vld [vmem:[#allocation3 + $0x10] sm:$0xf]  ;;  %v6172_v42 = vld [vmem:[#allocation3] sm:$0xf] }
 0xf9d   : > { %v6029_v20 = vld [vmem:[#allocation3 + $0x10] sm:$0xf]  ;;  %6018 = vst.msk [vmem:[#allocation3 + $0x20] sm:$0xf] %vm5251_vm5, %v6014_v63  ;;  %6062 = vrot.lane.b32.xlu1 %v6053_v52, %s13729_s27 }
 0xf9e   : > { %v6021_v54 = vld [vmem:[#allocation3 + $0x10] sm:$0xf]  ;;  %6038 = vrot.lane.b32.xlu2 %v6029_v20, %s13728_s30 }
 0xf9f   : > { %6025 = vst.msk [vmem:[#allocation2 + $0xc] sm:$0xf] %vm5260_vm3, %v6021_v54  ;;  %v9262_v51 = vld [vmem:[#allocation2] sm:$0xf] }
 0xfa0   : > { %v6125_v12 = vld [vmem:[#allocation3 + $0x10] sm:$0xf] }
 0xfa1   : > { %v6101_v40 = vld [vmem:[#allocation3 + $0x10] sm:$0xf] }
 0xfa2   : > { %v6009_v10 = vpop.f32.mrf.mxu2  ;;  %v6077_v43 = vld [vmem:[#allocation3 + $0x10] sm:$0xf] }
 0xfa3   : > { %v6015_v39 = vpack.c.bf16 %v6009_v10, %v6009_v10  ;;  %v6197_v41 = vld [vmem:[#allocation3 + $0x10] sm:$0xf] }
 0xfa4   : > { %v6030_v31 = vld [vmem:[#allocation3 + $0x20] sm:$0xf]  ;;  %v6173_v4 = vld [vmem:[#allocation3 + $0x10] sm:$0xf] }
 0xfa5   : > { %6019 = vst.msk [vmem:[#allocation3 + $0x30] sm:$0xf] %vm5251_vm5, %v6015_v39  ;;  %6084 = vrot.lane.b32.xlu1 %v6076_v15, %s13615_s22  ;;  %6040 = vrot.lane.b32.xlu0 %v6030_v31, %s13728_s30  ;;  %v6022_v9 = vld [vmem:[#allocation3 + $0x20] sm:$0xf]  ;;  %v6149_v3 = vld [vmem:[#allocation3 + $0x10] sm:$0xf] }
 0xfa6   : > { %6060 = vrot.lane.b32.xlu2 %v6052_v45, %s13729_s27  ;;  %v9852_v53 = vld [vmem:[#allocation2 + $0x8] sm:$0xf0]  ;;  %6026 = vst.msk [vmem:[#allocation2 + $0x18] sm:$0xf] %vm5260_vm3, %v6022_v9  ;;  %v6102_v28 = vld [vmem:[#allocation3 + $0x20] sm:$0xf] }
 0xfa7   : > { %v9263_v34 = vor.u32 %v9852_v53, %v9262_v51  ;;  %v6078_v36 = vld [vmem:[#allocation3 + $0x20] sm:$0xf] }
 0xfa8   : > { %v6054_v6 = vld [vmem:[#allocation3 + $0x20] sm:$0xf] }
 0xfa9   : > { %9336 = vmatmul.msk.bf16.vlgmr.msrb.gmra.mxu3 %vm5595_vm4, %v9263_v34  ;;  %v6174_v30 = vld [vmem:[#allocation3 + $0x20] sm:$0xf] }
 0xfaa   : > { %v6150_v62 = vld [vmem:[#allocation3 + $0x20] sm:$0xf] }
 0xfab   : > { %v6126_v2 = vld [vmem:[#allocation3 + $0x20] sm:$0xf] }
 0xfac   : > { %v6079_v37 = vld [vmem:[#allocation3 + $0x30] sm:$0xf]  ;;  %v6198_v8 = vld [vmem:[#allocation3 + $0x20] sm:$0xf] }
 0xfad   : > { %v6055_v60 = vld [vmem:[#allocation3 + $0x30] sm:$0xf]  ;;  %6090 = vrot.lane.b32.xlu1 %v6079_v37, %s13615_s22  ;;  %v9266_v13 = vld [vmem:[#allocation2 + $0x18] sm:$0xf] }
 0xfae   : > { %v6031_v14 = vld [vmem:[#allocation3 + $0x30] sm:$0xf]  ;;  %6066 = vrot.lane.b32.xlu2 %v6055_v60, %s13729_s27 }
 0xfaf   : > { %v6023_v44 = vld [vmem:[#allocation3 + $0x30] sm:$0xf]  ;;  %6042 = vrot.lane.b32.xlu0 %v6031_v14, %s13728_s30 }
 0xfb0   : > { %6027 = vst.msk [vmem:[#allocation2 + $0x24] sm:$0xf] %vm5260_vm3, %v6023_v44  ;;  %v6151_v29 = vld [vmem:[#allocation3 + $0x30] sm:$0xf] }
 0xfb1   : > { %v6127_v1 = vld [vmem:[#allocation3 + $0x30] sm:$0xf] }
 0xfb2   : > { %v6103_v23 = vld [vmem:[#allocation3 + $0x30] sm:$0xf] }
 0xfb3   : > { %v6199_v50 = vld [vmem:[#allocation3 + $0x30] sm:$0xf] }
 0xfb4   : > { %v6175_v19 = vld [vmem:[#allocation3 + $0x30] sm:$0xf] }
 0xfb5   : > { %6112 = vrot.lane.b32.xlu1 %v6102_v28, %s13775_s28 }
 0xfb6   : > { %6088 = vrot.lane.b32.xlu2 %v6078_v36, %s13615_s22 }
 0xfb7   : > { %v9853_v38 = vld [vmem:[#allocation2 + $0x20] sm:$0xf0]  ;;  %6064 = vrot.lane.b32.xlu0 %v6054_v6, %s13729_s27 }
 0xfb8   : > { %v9267_v57 = vor.u32 %v9853_v38, %v9266_v13 }
 0xfba   : > { %9337 = vmatmul.msk.bf16.gmra.mxu3 %vm5595_vm4, %v9267_v57 }
 0xfbd   : > { %6134 = vrot.lane.b32.xlu1 %v6125_v12, %s13776_s0 }
 0xfbe   : > { %6110 = vrot.lane.b32.xlu2 %v6101_v40, %s13775_s28 }
 0xfbf   : > { %6086 = vrot.lane.b32.xlu0 %v6077_v43, %s13615_s22 }
 0xfc5   : > { %6156 = vrot.lane.b32.xlu1 %v6148_v46, %s13788_s5 }
 0xfc6   : > { %6132 = vrot.lane.b32.xlu2 %v6124_v32, %s13776_s0 }
 0xfc7   : > { %6108 = vrot.lane.b32.xlu0 %v6100_v25, %s13775_s28 }
 0xfcd   : > { %6162 = vrot.lane.b32.xlu1 %v6151_v29, %s13788_s5 }
 0xfce   : > { %6138 = vrot.lane.b32.xlu2 %v6127_v1, %s13776_s0 }
 0xfcf   : > { %6114 = vrot.lane.b32.xlu0 %v6103_v23, %s13775_s28 }
 0xfd5   : > { %6184 = vrot.lane.b32.xlu1 %v6174_v30, %s13789_s24 }
 0xfd6   : > { %6160 = vrot.lane.b32.xlu2 %v6150_v62, %s13788_s5 }
 0xfd7   : > { %6136 = vrot.lane.b32.xlu0 %v6126_v2, %s13776_s0 }
 0xfdd   : > { %6206 = vrot.lane.b32.xlu1 %v6197_v41, %s13790_s9 }
 0xfde   : > { %6182 = vrot.lane.b32.xlu2 %v6173_v4, %s13789_s24 }
 0xfdf   : > { %6158 = vrot.lane.b32.xlu0 %v6149_v3, %s13788_s5 }
 0xfe6   : > { %6204 = vrot.lane.b32.xlu2 %v6196_v48, %s13790_s9 }
 0xfe7   : > { %6180 = vrot.lane.b32.xlu0 %v6172_v42, %s13789_s24 }
 0xfee   : > { %6210 = vrot.lane.b32.xlu2 %v6199_v50, %s13790_s9 }
 0xfef   : > { %6186 = vrot.lane.b32.xlu0 %v6175_v19, %s13789_s24 }
 0xff7   : > { %6208 = vrot.lane.b32.xlu0 %v6198_v8, %s13790_s9 }
 0xff8   : > { %v6039_v11 = vpop.permute.xlu2 %6038 }
 0xff9   : > { %6049 = vst.msk [vmem:[#allocation2 + $0x3c] sm:$0xf] %vm5260_vm3, %v6039_v11 }
0x1000   : > { %v6061_v61 = vpop.permute.xlu2 %6060  ;;  %v9854_v47 = vld [vmem:[#allocation2 + $0x38] sm:$0xf0] }
0x1001   : > { %6072 = vst.msk [vmem:[#allocation2 + $0x60] sm:$0xf] %vm5260_vm3, %v6061_v61 }
0x1007   : > { %v6037_v27 = vpop.permute.xlu1 %6036 }
0x1008   : > { %v6067_v35 = vpop.permute.xlu2 %6066  ;;  %6048 = vst.msk [vmem:[#allocation2 + $0x30] sm:$0xf] %vm5260_vm3, %v6037_v27  ;;  %v9278_v44 = vld [vmem:[#allocation2 + $0x60] sm:$0xf] }
0x1009   : > { %6075 = vst.msk [vmem:[#allocation2 + $0x84] sm:$0xf] %vm5260_vm3, %v6067_v35 }
0x100f   : > { %v6063_v16 = vpop.permute.xlu1 %6062  ;;  %v9270_v56 = vld [vmem:[#allocation2 + $0x30] sm:$0xf] }
0x1010   : > { %v6089_v17 = vpop.permute.xlu2 %6088  ;;  %6073 = vst.msk [vmem:[#allocation2 + $0x6c] sm:$0xf] %vm5260_vm3, %v6063_v16  ;;  %v9271_v22 = vor.u32 %v9854_v47, %v9270_v56  ;;  %v9857_v43 = vld [vmem:[#allocation2 + $0x80] sm:$0xf0] }
0x1011   : > { %6098 = vst.msk [vmem:[#allocation2 + $0xa8] sm:$0xf] %vm5260_vm3, %v6089_v17 }
0x1012   : > { %9338 = vmatmul.msk.bf16.gmra.mxu3 %vm5595_vm4, %v9271_v22 }
0x1017   : > { %v6085_v26 = vpop.permute.xlu1 %6084  ;;  %v6041_v0 = vpop.permute.xlu0 %6040  ;;  %v9856_v60 = vld [vmem:[#allocation2 + $0x68] sm:$0xf0] }
0x1018   : > { %v6111_v49 = vpop.permute.xlu2 %6110  ;;  %6096 = vst.msk [vmem:[#allocation2 + $0x90] sm:$0xf] %vm5260_vm3, %v6085_v26  ;;  %v9279_v28 = vor.u32 %v9856_v60, %v9278_v44  ;;  %v9290_v4 = vld [vmem:[#allocation2 + $0xa8] sm:$0xf] }
0x1019   : > { %6050 = vst.msk [vmem:[#allocation2 + $0x48] sm:$0xf] %vm5260_vm3, %v6041_v0 }
0x101a   : > { %6121 = vst.msk [vmem:[#allocation2 + $0xcc] sm:$0xf] %vm5260_vm3, %v6111_v49 }
0x101f   : > { %v6091_v63 = vpop.permute.xlu1 %6090  ;;  %v9286_v23 = vld [vmem:[#allocation2 + $0x90] sm:$0xf] }
0x1020   : > { %v6133_v52 = vpop.permute.xlu2 %6132  ;;  %6099 = vst.msk [vmem:[#allocation2 + $0xb4] sm:$0xf] %vm5260_vm3, %v6091_v63  ;;  %v9274_v15 = vld [vmem:[#allocation2 + $0x48] sm:$0xf] }
0x1021   : > { %v6043_v20 = vpop.permute.xlu0 %6042  ;;  %6144 = vst.msk [vmem:[#allocation2 + $0xf0] sm:$0xf] %vm5260_vm3, %v6133_v52  ;;  %v9860_v19 = vld [vmem:[#allocation2 + $0xc8] sm:$0xf0] }
0x1022   : > { %6051 = vst.msk [vmem:[#allocation2 + $0x54] sm:$0xf] %vm5260_vm3, %v6043_v20 }
0x1027   : > { %v6113_v54 = vpop.permute.xlu1 %6112  ;;  %v9859_v2 = vld [vmem:[#allocation2 + $0xb0] sm:$0xf0] }
0x1028   : > { %v6139_v10 = vpop.permute.xlu2 %6138  ;;  %6122 = vst.msk [vmem:[#allocation2 + $0xd8] sm:$0xf] %vm5260_vm3, %v6113_v54  ;;  %v9291_v3 = vor.u32 %v9859_v2, %v9290_v4  ;;  %v9302_v47 = vld [vmem:[#allocation2 + $0xf0] sm:$0xf] }
0x1029   : > { %v6065_v39 = vpop.permute.xlu0 %6064  ;;  %6147 = vst.msk [vmem:[#allocation2 + $0x114] sm:$0xf] %vm5260_vm3, %v6139_v10  ;;  %v9855_v45 = vld [vmem:[#allocation2 + $0x50] sm:$0xf0] }
0x102a   : > { %6074 = vst.msk [vmem:[#allocation2 + $0x78] sm:$0xf] %vm5260_vm3, %v6065_v39  ;;  %v9275_v31 = vor.u32 %v9855_v45, %v9274_v15 }
0x102c   : > { %9339 = vmatmul.msk.bf16.gmra.mxu3 %vm5595_vm4, %v9275_v31  ;;  %v12797_v48 = vpop.f32.mrf.mxu3 }
0x102f   : > { %v6135_v51 = vpop.permute.xlu1 %6134  ;;  %v9298_v27 = vld [vmem:[#allocation2 + $0xd8] sm:$0xf] }
0x1030   : > { %v6161_v53 = vpop.permute.xlu2 %6160  ;;  %6145 = vst.msk [vmem:[#allocation2 + $0xfc] sm:$0xf] %vm5260_vm3, %v6135_v51  ;;  %v9863_v63 = vld [vmem:[#allocation2 + $0x110] sm:$0xf0] }
0x1031   : > { %v6087_v34 = vpop.permute.xlu0 %6086  ;;  %6170 = vst.msk [vmem:[#allocation2 + $0x138] sm:$0xf] %vm5260_vm3, %v6161_v53  ;;  %v9282_v12 = vld [vmem:[#allocation2 + $0x78] sm:$0xf] }
0x1032   : > { %6097 = vst.msk [vmem:[#allocation2 + $0x9c] sm:$0xf] %vm5260_vm3, %v6087_v34  ;;  %v9283_v46 = vor.u32 %v9857_v43, %v9282_v12 }
0x1034   : > { %v12799_v50 = vpop.f32.mrf.mxu3 }
0x1037   : > { %v6157_v9 = vpop.permute.xlu1 %6156  ;;  %v9862_v56 = vld [vmem:[#allocation2 + $0xf8] sm:$0xf0] }
0x1038   : > { %v6183_v37 = vpop.permute.xlu2 %6182  ;;  %6168 = vst.msk [vmem:[#allocation2 + $0x120] sm:$0xf] %vm5260_vm3, %v6157_v9  ;;  %v9303_v22 = vor.u32 %v9862_v56, %v9302_v47  ;;  %v9314_v34 = vld [vmem:[#allocation2 + $0x138] sm:$0xf] }
0x1039   : > { %v6109_v14 = vpop.permute.xlu0 %6108  ;;  %6193 = vst.msk [vmem:[#allocation2 + $0x15c] sm:$0xf] %vm5260_vm3, %v6183_v37  ;;  %v9858_v29 = vld [vmem:[#allocation2 + $0x98] sm:$0xf0] }
0x103a   : > { %6120 = vst.msk [vmem:[#allocation2 + $0xc0] sm:$0xf] %vm5260_vm3, %v6109_v14  ;;  %v9287_v30 = vor.u32 %v9858_v29, %v9286_v23 }
0x103c   : > { %9340 = vmatmul.msk.bf16.gmra.mxu3 %vm5595_vm4, %v9279_v28 }
0x103d   : > { %v12802_v11 = vpop.f32.mrf.mxu3 }
0x103f   : > { %v6163_v36 = vpop.permute.xlu1 %6162  ;;  %v9310_v15 = vld [vmem:[#allocation2 + $0x120] sm:$0xf] }
0x1040   : > { %v6205_v6 = vpop.permute.xlu2 %6204  ;;  %6171 = vst.msk [vmem:[#allocation2 + $0x144] sm:$0xf] %vm5260_vm3, %v6163_v36  ;;  %v9866_v44 = vld [vmem:[#allocation2 + $0x158] sm:$0xf0] }
0x1041   : > { %v6115_v13 = vpop.permute.xlu0 %6114  ;;  %6216 = vst.msk [vmem:[#allocation2 + $0x180] sm:$0xf] %vm5260_vm3, %v6205_v6  ;;  %v9294_v42 = vld [vmem:[#allocation2 + $0xc0] sm:$0xf] }
0x1042   : > { %6123 = vst.msk [vmem:[#allocation2 + $0xe4] sm:$0xf] %vm5260_vm3, %v6115_v13  ;;  %v9295_v8 = vor.u32 %v9860_v19, %v9294_v42  ;;  %v6514_v19 = vpack.c.bf16 %v12799_v50, %v12797_v48 }
0x1045   : > { %v6431_v16 = vpop.f32.mrf.mxu3 }
0x1046   : > { %v6515_v42 = vpack.c.bf16 %v6431_v16, %v12802_v11  ;;  %v9872_v11 = vld [vmem:[%s13791_s1 + $0x8] sm:$0xf0] }
0x1047   : > { %v6185_v38 = vpop.permute.xlu1 %6184  ;;  %v9865_v53 = vld [vmem:[#allocation2 + $0x140] sm:$0xf0] }
0x1048   : > { %v6211_v57 = vpop.permute.xlu2 %6210  ;;  %6194 = vst.msk [vmem:[#allocation2 + $0x168] sm:$0xf] %vm5260_vm3, %v6185_v38  ;;  %v9315_v9 = vor.u32 %v9865_v53, %v9314_v34 }
0x1049   : > { %v6137_v40 = vpop.permute.xlu0 %6136  ;;  %6219 = vst.msk [vmem:[#allocation2 + $0x1a4] sm:$0xf] %vm5260_vm3, %v6211_v57  ;;  %v9861_v61 = vld [vmem:[#allocation2 + $0xe0] sm:$0xf0] }
0x104a   : > { %6146 = vst.msk [vmem:[#allocation2 + $0x108] sm:$0xf] %vm5260_vm3, %v6137_v40  ;;  %v9299_v35 = vor.u32 %v9861_v61, %v9298_v27 }
0x104c   : > { %9341 = vmatmul.msk.bf16.gmra.mxu3 %vm5595_vm4, %v9283_v46 }
0x104f   : > { %v6207_v32 = vpop.permute.xlu1 %6206  ;;  %v9322_v38 = vld [vmem:[#allocation2 + $0x168] sm:$0xf] }
0x1050   : > { %6217 = vst.msk [vmem:[#allocation2 + $0x18c] sm:$0xf] %vm5260_vm3, %v6207_v32  ;;  %v9326_v32 = vld [vmem:[#allocation2 + $0x180] sm:$0xf] }
0x1051   : > { %v6159_v25 = vpop.permute.xlu0 %6158  ;;  %v9306_v0 = vld [vmem:[#allocation2 + $0x108] sm:$0xf] }
0x1052   : > { %6169 = vst.msk [vmem:[#allocation2 + $0x12c] sm:$0xf] %vm5260_vm3, %v6159_v25  ;;  %v9307_v52 = vor.u32 %v9863_v63, %v9306_v0  ;;  %v9368_v63 = vld [vmem:[%s13791_s1 + $0x18] sm:$0xf] }
0x1057   : > { %v9868_v43 = vld [vmem:[#allocation2 + $0x188] sm:$0xf0] }
0x1058   : > { %v9327_v25 = vor.u32 %v9868_v43, %v9326_v32  ;;  %v9873_v43 = vld [vmem:[%s13791_s1 + $0x10] sm:$0xf0]  ;;  %v9376_v32 = vld [vmem:[%s13791_s1 + $0x20] sm:$0xf] }
0x1059   : > { %v6181_v1 = vpop.permute.xlu0 %6180  ;;  %v9864_v10 = vld [vmem:[#allocation2 + $0x128] sm:$0xf0] }
0x105a   : > { %6192 = vst.msk [vmem:[#allocation2 + $0x150] sm:$0xf] %vm5260_vm3, %v6181_v1  ;;  %v9311_v45 = vor.u32 %v9864_v10, %v9310_v15 }
0x105c   : > { %9342 = vmatmul.msk.bf16.gmra.mxu3 %vm5595_vm4, %v9287_v30 }
0x1061   : > { %v6187_v62 = vpop.permute.xlu0 %6186  ;;  %v9318_v14 = vld [vmem:[#allocation2 + $0x150] sm:$0xf] }
0x1062   : > { %6195 = vst.msk [vmem:[#allocation2 + $0x174] sm:$0xf] %vm5260_vm3, %v6187_v62  ;;  %v9319_v28 = vor.u32 %v9866_v44, %v9318_v14  ;;  %v9358_v14 = vld [vmem:[%s13791_s1 + $0xc] sm:$0xf0] }
0x1069   : > { %v6209_v41 = vpop.permute.xlu0 %6208  ;;  %v9867_v13 = vld [vmem:[#allocation2 + $0x170] sm:$0xf0] }
0x106a   : > { %6218 = vst.msk [vmem:[#allocation2 + $0x198] sm:$0xf] %vm5260_vm3, %v6209_v41  ;;  %v9323_v57 = vor.u32 %v9867_v13, %v9322_v38  ;;  %v9869_v41 = vld [vmem:[#allocation2 + $0x1a0] sm:$0xf0]  ;;  %v9874_v38 = vld [vmem:[%s13791_s1 + $0x1c] sm:$0xf] }
0x106c   : > { %9343 = vmatmul.msk.bf16.gmra.mxu3 %vm5595_vm4, %v9291_v3 }
0x1071   : > { %v9330_v2 = vld [vmem:[#allocation2 + $0x198] sm:$0xf] }
0x1072   : > { %v9331_v4 = vor.u32 %v9869_v41, %v9330_v2  ;;  %v9877_v41 = vld [vmem:[%s13347_s19] sm:$0xff] }
0x1073   : > { %6760 = vmatpush.bf16.msra.mxu3 %v9877_v41 }
0x107c   : > { %9344 = vmatmul.msk.bf16.gmra.mxu3 %vm5595_vm4, %v9295_v8 }
0x108c   : > { %9345 = vmatmul.msk.bf16.gmra.mxu3 %vm5595_vm4, %v9299_v35 }
0x1095   : > { %v6434_v17 = vpop.f32.mrf.mxu3 }
0x109c   : > { %9346 = vmatmul.msk.bf16.gmra.mxu3 %vm5595_vm4, %v9303_v22 }
0x109d   : > { %v6436_v26 = vpop.f32.mrf.mxu3 }
0x109e   : > { %v6516_v49 = vpack.c.bf16 %v6436_v26, %v6434_v17 }
0x10ac   : > { %9347 = vmatmul.msk.bf16.gmra.mxu3 %vm5595_vm4, %v9307_v52  ;;  %v9875_v52 = vld [vmem:[%s13791_s1 + $0x20] sm:$0xf0] }
0x10af   : > { %v6439_v20 = vpop.f32.mrf.mxu3 }
0x10b7   : > { %v6441_v54 = vpop.f32.mrf.mxu3 }
0x10b8   : > { %v6517_v39 = vpack.c.bf16 %v6441_v54, %v6439_v20  ;;  %v9369_v20 = vor.u32 %v9875_v52, %v9368_v63 }
0x10bc   : > { %9348 = vmatmul.msk.bf16.gmra.mxu3 %vm5595_vm4, %v9311_v45 }
0x10bf   : > { %v6444_v31 = vpop.f32.mrf.mxu3 }
0x10c7   : > { %v6446_v51 = vpop.f32.mrf.mxu3 }
0x10c8   : > { %v6518_v30 = vpack.c.bf16 %v6446_v51, %v6444_v31 }
0x10cc   : > { %9349 = vmatmul.msk.bf16.gmra.mxu3 %vm5595_vm4, %v9315_v9 }
0x10cf   : > { %v6449_v37 = vpop.f32.mrf.mxu3 }
0x10d7   : > { %v6451_v60 = vpop.f32.mrf.mxu3 }
0x10d8   : > { %v6519_v23 = vpack.c.bf16 %v6451_v60, %v6449_v37  ;;  %v9871_v60 = vld [vmem:[%s13791_s1 + $0x4] sm:$0xf] }
0x10dc   : > { %9350 = vmatmul.msk.bf16.gmra.mxu3 %vm5595_vm4, %v9319_v28  ;;  %v9361_v28 = vor.u32 %v9871_v60, %v9358_v14 }
0x10df   : > { %v6454_v36 = vpop.f32.mrf.mxu3 }
0x10e7   : > { %v6456_v6 = vpop.f32.mrf.mxu3 }
0x10e8   : > { %v6520_v29 = vpack.c.bf16 %v6456_v6, %v6454_v36 }
0x10ec   : > { %9351 = vmatmul.msk.bf16.gmra.mxu3 %vm5595_vm4, %v9323_v57  ;;  %v9370_v57 = vld [vmem:[%s13791_s1 + $0x24] sm:$0xf0] }
0x10ef   : > { %v6459_v12 = vpop.f32.mrf.mxu3 }
0x10f7   : > { %v6461_v40 = vpop.f32.mrf.mxu3 }
0x10f8   : > { %v6521_v46 = vpack.c.bf16 %v6461_v40, %v6459_v12  ;;  %v9373_v12 = vor.u32 %v9874_v38, %v9370_v57  ;;  %v9364_v40 = vld [vmem:[%s13791_s1 + $0x8] sm:$0xf] }
0x10fa   : > { %6576 = vmatpush.bf16.msra.mxu2 %v6521_v46  ;;  %v9365_v46 = vor.u32 %v9873_v43, %v9364_v40 }
0x10fc   : > { %9352 = vmatmul.msk.bf16.gmra.mxu3 %vm5595_vm4, %v9327_v25  ;;  %v9876_v25 = vld [vmem:[%s13791_s1 + $0x28] sm:$0xf0] }
0x10fe   : > { %6577 = vmatpush.bf16.msra.mxu2 %v6520_v29  ;;  %v9377_v29 = vor.u32 %v9876_v25, %v9376_v32 }
0x10ff   : > { %v6464_v1 = vpop.f32.mrf.mxu3 }
0x1102   : > { %6578 = vmatpush.bf16.msra.mxu2 %v6519_v23 }
0x1106   : > { %6579 = vmatpush.bf16.msra.mxu2 %v6518_v30 }
0x1107   : > { %v6466_v62 = vpop.f32.mrf.mxu3 }
0x1108   : > { %v6522_v44 = vpack.c.bf16 %v6466_v62, %v6464_v1 }
0x110a   : > { %6580 = vmatpush.bf16.msra.mxu2 %v6517_v39 }
0x110c   : > { %9353 = vmatmul.msk.bf16.gmra.mxu3 %vm5595_vm4, %v9331_v4 }
0x110e   : > { %6581 = vmatpush.bf16.msra.mxu2 %v6516_v49  ;;  %v9356_v49 = vld [vmem:[%s13791_s1] sm:$0xf] }
0x110f   : > { %v6469_v3 = vpop.f32.mrf.mxu3  ;;  %v9357_v48 = vor.u32 %v9872_v11, %v9356_v49 }
0x1112   : > { %6582 = vmatpush.bf16.msra.mxu2 %v6515_v42 }
0x1116   : > { %6583 = vmatpush.bf16.msra.mxu2 %v6514_v19 }
0x1117   : > { %v6471_v8 = vpop.f32.mrf.mxu3 }
0x1118   : > { %v6523_v37 = vpack.c.bf16 %v6471_v8, %v6469_v3 }
0x1119   : > { %6584 = vmatmul.bf16.vlgmr.msra.gmra.mxu2 %v9357_v48 }
0x111f   : > { %v6474_v61 = vpop.f32.mrf.mxu3 }
0x1127   : > { %v6476_v27 = vpop.f32.mrf.mxu3 }
0x1128   : > { %v6524_v35 = vpack.c.bf16 %v6476_v27, %v6474_v61 }
0x1129   : > { %6589 = vmatmul.bf16.gmra.mxu2 %v9369_v20 }
0x112f   : > { %v6479_v17 = vpop.f32.mrf.mxu3 }
0x1137   : > { %v6481_v56 = vpop.f32.mrf.mxu3 }
0x1138   : > { %v6525_v47 = vpack.c.bf16 %v6481_v56, %v6479_v17 }
0x113f   : > { %v6484_v22 = vpop.f32.mrf.mxu3 }
0x1147   : > { %v6486_v26 = vpop.f32.mrf.mxu3 }
0x1148   : > { %v6526_v53 = vpack.c.bf16 %v6486_v26, %v6484_v22 }
0x114f   : > { %v6489_v0 = vpop.f32.mrf.mxu3 }
0x1157   : > { %v6491_v50 = vpop.f32.mrf.mxu3 }
0x1158   : > { %v6527_v51 = vpack.c.bf16 %v6491_v50, %v6489_v0 }
0x115f   : > { %v6494_v16 = vpop.f32.mrf.mxu3 }
0x1167   : > { %v6496_v54 = vpop.f32.mrf.mxu3 }
0x1168   : > { %v6528_v45 = vpack.c.bf16 %v6496_v54, %v6494_v16 }
0x116f   : > { %v6499_v10 = vpop.f32.mrf.mxu3 }
0x1177   : > { %v6501_v39 = vpop.f32.mrf.mxu3 }
0x1178   : > { %v6529_v15 = vpack.c.bf16 %v6501_v39, %v6499_v10 }
0x117a   : > { %6595 = vmatpush.bf16.msrb.mxu2 %v6529_v15 }
0x117e   : > { %6596 = vmatpush.bf16.msrb.mxu2 %v6528_v45 }
0x117f   : > { %v6504_v31 = vpop.f32.mrf.mxu3 }
0x1182   : > { %6597 = vmatpush.bf16.msrb.mxu2 %v6527_v51 }
0x1186   : > { %6598 = vmatpush.bf16.msrb.mxu2 %v6526_v53 }
0x1187   : > { %v6506_v34 = vpop.f32.mrf.mxu3 }
0x1188   : > { %v6530_v13 = vpack.c.bf16 %v6506_v34, %v6504_v31 }
0x118a   : > { %6599 = vmatpush.bf16.msrb.mxu2 %v6525_v47 }
0x118e   : > { %6600 = vmatpush.bf16.msrb.mxu2 %v6524_v35 }
0x118f   : > { %v6509_v9 = vpop.f32.mrf.mxu3 }
0x1192   : > { %6601 = vmatpush.bf16.msrb.mxu2 %v6523_v37 }
0x1196   : > { %6602 = vmatpush.bf16.msrb.mxu2 %v6522_v44 }
0x1197   : > { %v6511_v36 = vpop.f32.mrf.mxu3 }
0x1198   : > { %v6531_v6 = vpack.c.bf16 %v6511_v36, %v6509_v9 }
0x1199   : > { %6603 = vmatmul.bf16.vlgmr.msrb.gmra.mxu2 %v9361_v28 }
0x119a   : > { %6620 = vmatpush.bf16.msra.mxu2 %v6531_v6 }
0x119c   : > { %v6585_v1 = vpop.f32.mrf.mxu2 }
0x119e   : > { %6621 = vmatpush.bf16.msra.mxu2 %v6530_v13 }
0x11a4   : > { %v6587_v23 = vpop.f32.mrf.mxu2 }
0x11a9   : > { %6608 = vmatmul.bf16.gmra.mxu2 %v9373_v12 }
0x11ac   : > { %v6590_v30 = vpop.f32.mrf.mxu2 }
0x11b4   : > { %v6592_v62 = vpop.f32.mrf.mxu2 }
0x11b9   : > { %9378 = vmatmul.msk.bf16.vlgmr.msra.gmra.mxu2 %vm5809_vm9, %v9365_v46 }
0x11c9   : > { %9379 = vmatmul.msk.bf16.gmra.mxu2 %vm5809_vm9, %v9377_v29 }
0x121c   : > { %v6604_v2 = vpop.f32.mrf.mxu2 }
0x121d   : > { %v6605_v19 = vadd.f32 %v6604_v2, %v6585_v1 }
0x1224   : > { %v6606_v4 = vpop.f32.mrf.mxu2 }
0x1225   : > { %v6607_v56 = vadd.f32 %v6606_v4, %v6587_v23 }
0x122c   : > { %v6609_v3 = vpop.f32.mrf.mxu2 }
0x122d   : > { %v6610_v11 = vadd.f32 %v6609_v3, %v6590_v30 }
0x1234   : > { %v6611_v42 = vpop.f32.mrf.mxu2 }
0x1235   : > { %v6612_v20 = vadd.f32 %v6611_v42, %v6592_v62 }
0x123c   : > { %v6623_v8 = vpop.f32.mrf.mxu2 }
0x123d   : > { %v12857_v61 = vadd.f32 %v6623_v8, %v6605_v19 }
0x123f   : > { %v6633_v27 = vsel %vm13792_vm8, %v12857_v61, 0.0  ;;  %v6649_v35 = vmul.f32 %v12857_v61, %v12857_v61 }
0x1240   : > { %6634 = vadd.xlane.f32.xlu1 %v6633_v27 }
0x1241   : > { %v6653_v17 = vsel %vm13793_vm1, %v6649_v35, 0.0 }
0x1242   : > { %6654 = vadd.xlane.f32.xlu2 %v6653_v17 }
0x1244   : > { %v6625_v47 = vpop.f32.mrf.mxu2 }
0x1245   : > { %v12864_v22 = vadd.f32 %v6625_v47, %v6607_v56 }
0x1247   : > { %v6636_v26 = vsel %vm13794_vm14, %v12864_v22, 0.0  ;;  %v6650_v0 = vmul.f32 %v12864_v22, %v12864_v22 }
0x1248   : > { %6637 = vadd.xlane.f32.xlu0 %v6636_v26 }
0x1249   : > { %v6656_v49 = vsel %vm13795_vm7, %v6650_v0, 0.0  ;;  %vm13800_vm7 = vmmov %vm13796_vm2 }
0x124a   : > { %6657 = vadd.xlane.f32.xlu1 %v6656_v49 }
0x124c   : > { %v6628_v48 = vpop.f32.mrf.mxu2 }
0x124d   : > { %v12871_v50 = vadd.f32 %v6628_v48, %v6610_v11 }
0x124f   : > { %v6639_v16 = vsel %vm13796_vm2, %v12871_v50, 0.0  ;;  %v6651_v63 = vmul.f32 %v12871_v50, %v12871_v50 }
0x1250   : > { %6640 = vadd.xlane.f32.xlu0 %v6639_v16 }
0x1251   : > { %v6659_v52 = vsel %vm13797_vm15, %v6651_v63, 0.0 }
0x1252   : > { %6660 = vadd.xlane.f32.xlu1 %v6659_v52 }
0x1254   : > { %v6630_v54 = vpop.f32.mrf.mxu2 }
0x1255   : > { %v12878_v10 = vadd.f32 %v6630_v54, %v6612_v20 }
0x1257   : > { %v6642_v39 = vsel %vm13798_vm13, %v12878_v10, 0.0  ;;  %v6652_v15 = vmul.f32 %v12878_v10, %v12878_v10 }
0x1258   : > { %6643 = vadd.xlane.f32.xlu2 %v6642_v39 }
0x1259   : > { %v6662_v45 = vsel %vm13799_vm6, %v6652_v15, 0.0 }
0x125a   : > { %6663 = vadd.xlane.f32.xlu0 %v6662_v45 }
0x12b3   : > { %v6635_v31 = vpop.xlane.xlu1 %6634 }
0x12b4   : > { %v6645_v51 = vmul.f32 %v6635_v31, %v12472_v18 }
0x12b5   : > { %v6655_v53 = vpop.xlane.xlu2 %6654 }
0x12b6   : > { %v6669_v34 = vmul.f32 %v6645_v51, %v6645_v51  ;;  %v6665_v9 = vmul.f32 %v6655_v53, %v12472_v18  ;;  %v6681_v63 = vsub.f32 %v12857_v61, %v6645_v51 }
0x12b8   : > { %v6673_v37 = vsub.f32 %v6665_v9, %v6669_v34 }
0x12ba   : > { %v6677_v60 = vmax.f32 %v6673_v37, 0.0 }
0x12bb   : > { %v6638_v14 = vpop.xlane.xlu0 %6637 }
0x12bc   : > { %v6685_v44 = vadd.f32 1e-05, %v6677_v60  ;;  %v6646_v28 = vmul.f32 %v6638_v14, %v12472_v18 }
0x12bd   : > { %v6658_v36 = vpop.xlane.xlu1 %6657 }
0x12be   : > { %10073 = vrsqrt.f32 %v6685_v44  ;;  %v6670_v6 = vmul.f32 %v6646_v28, %v6646_v28  ;;  %v6666_v13 = vmul.f32 %v6658_v36, %v12472_v18  ;;  %vm6695_vm0 = vweird.f32 %v6685_v44 }
0x12bf   : > { %v6682_v15 = vsub.f32 %v12864_v22, %v6646_v28 }
0x12c0   : > { %v6674_v38 = vsub.f32 %v6666_v13, %v6670_v6 }
0x12c2   : > { %v6678_v57 = vmax.f32 %v6674_v38, 0.0 }
0x12c3   : > { %v6641_v12 = vpop.xlane.xlu0 %6640 }
0x12c4   : > { %v10074_v40 = vpop.eup %10073  ;;  %v12890_v43 = vmul.f32 %v6641_v12, %v12472_v18  ;;  %v6686_v32 = vadd.f32 1e-05, %v6678_v57 }
0x12c5   : > { %v6690_v46 = vmul.f32 %v10074_v40, %v6685_v44  ;;  %v6661_v25 = vpop.xlane.xlu1 %6660  ;;  %vm6696_vm11 = vweird.f32 %v10074_v40 }
0x12c6   : > { %v6671_v29 = vmul.f32 %v12890_v43, %v12890_v43  ;;  %v6667_v1 = vmul.f32 %v6661_v25, %v12472_v18  ;;  %10075 = vrsqrt.f32 %v6686_v32  ;;  %vm6697_vm12 = vmor %vm6695_vm0, %vm6696_vm11  ;;  %vm6705_vm1 = vweird.f32 %v6686_v32 }
0x12c7   : > { %v6691_v23 = vmul.f32 %v10074_v40, %v6690_v46  ;;  %v6683_v24 = vsub.f32 %v12871_v50, %v12890_v43  ;;  %v7018_v50 = vld [vmem:[%s13341_s13 + $0x8] sm:$0x7] }
0x12c8   : > { %v6675_v30 = vsub.f32 %v6667_v1, %v6671_v29 }
0x12c9   : > { %v6692_v62 = vmul.f32 0.5, %v6691_v23 }
0x12ca   : > { %v6679_v2 = vmax.f32 %v6675_v30, 0.0 }
0x12cb   : > { %v6644_v41 = vpop.xlane.xlu2 %6643  ;;  %v6693_v4 = vsub.f32 1.5, %v6692_v62 }
0x12cc   : > { %v6687_v3 = vadd.f32 1e-05, %v6679_v2  ;;  %v6648_v42 = vmul.f32 %v6644_v41, %v12472_v18  ;;  %v10076_v19 = vpop.eup %10075 }
0x12cd   : > { %v6664_v8 = vpop.xlane.xlu0 %6663  ;;  %v6700_v27 = vmul.f32 %v10076_v19, %v6686_v32  ;;  %v6694_v56 = vmul.f32 %v10074_v40, %v6693_v4  ;;  %vm6706_vm8 = vweird.f32 %v10076_v19 }
0x12ce   : > { %10077 = vrsqrt.f32 %v6687_v3  ;;  %v6672_v35 = vmul.f32 %v6648_v42, %v6648_v42  ;;  %v6668_v17 = vmul.f32 %v6664_v8, %v12472_v18  ;;  %vm6707_vm14 = vmor %vm6705_vm1, %vm6706_vm8  ;;  %vm6715_vm15 = vweird.f32 %v6687_v3 }
0x12cf   : > { %v6701_v47 = vmul.f32 %v10076_v19, %v6700_v27  ;;  %v6698_v48 = vsel %vm6697_vm12, %v10074_v40, %v6694_v56  ;;  %v6684_v36 = vsub.f32 %v12878_v10, %v6648_v42  ;;  %vm13801_vm12 = vmmov %vm13800_vm7  ;;  %v7114_v10 = vunpack.c.l.b16 %v7018_v50 }
0x12d0   : > { %v6676_v26 = vsub.f32 %v6668_v17, %v6672_v35  ;;  %v6729_v39 = vmul.f32 %v6698_v48, %v6681_v63  ;;  %vm13802_vm8 = vmmov %vm13800_vm7 }
0x12d1   : > { %v6702_v0 = vmul.f32 0.5, %v6701_v47  ;;  %v7116_v43 = vpack.c.b16 %v7114_v10, %v7114_v10  ;;  %vm13803_vm1 = vmmov %vm13800_vm7 }
0x12d2   : > { %v6680_v49 = vmax.f32 %v6676_v26, 0.0  ;;  %v12901_v9 = vadd.f32 %v6729_v39, %v5208_v59 }
0x12d3   : > { %v6703_v16 = vsub.f32 1.5, %v6702_v0  ;;  %v7173_v46 = vsel %vm5650_vm10, %v7116_v43, 0 }
0x12d4   : > { %v10078_v11 = vpop.eup %10077  ;;  %v6688_v20 = vadd.f32 1e-05, %v6680_v49  ;;  %7181 = vmatpush.bf16.msrb.mxu2 %v7173_v46 }
0x12d5   : > { %v6710_v52 = vmul.f32 %v10078_v11, %v6687_v3  ;;  %v6704_v54 = vmul.f32 %v10076_v19, %v6703_v16  ;;  %vm6716_vm2 = vweird.f32 %v10078_v11 }
0x12d6   : > { %10079 = vrsqrt.f32 %v6688_v20  ;;  %vm6717_vm13 = vmor %vm6715_vm15, %vm6716_vm2  ;;  %vm6725_vm11 = vweird.f32 %v6688_v20 }
0x12d7   : > { %v6711_v45 = vmul.f32 %v10078_v11, %v6710_v52  ;;  %v6708_v31 = vsel %vm6707_vm14, %v10076_v19, %v6704_v54  ;;  %vm13804_vm14 = vmmov %vm13803_vm1 }
0x12d8   : > { %v6730_v53 = vmul.f32 %v6708_v31, %v6682_v15  ;;  %7182 = vmatpush.bf16.msrb.mxu2 %v9896_v55  ;;  %vm13806_vm2 = vmmov %vm13803_vm1 }
0x12d9   : > { %v6712_v34 = vmul.f32 0.5, %v6711_v45  ;;  %vm13807_vm15 = vmmov %vm13803_vm1 }
0x12da   : > { %v12905_v61 = vadd.f32 %v6730_v53, %v5209_v7 }
0x12db   : > { %v6713_v51 = vsub.f32 1.5, %v6712_v34 }
0x12dc   : > { %v10080_v37 = vpop.eup %10079  ;;  %v6737_v60 = vpack.c.bf16 %v12905_v61, %v12901_v9 }
0x12dd   : > { %v6720_v22 = vmul.f32 %v10080_v37, %v6688_v20  ;;  %v6714_v14 = vmul.f32 %v10078_v11, %v6713_v51  ;;  %vm6726_vm6 = vweird.f32 %v10080_v37 }
0x12de   : > { %9384 = vmatmul.msk.bf16.vlgmr.msra.gmra.mxu3 %vm13800_vm7, %v6737_v60  ;;  %vm6727_vm0 = vmor %vm6725_vm11, %vm6726_vm6 }
0x12df   : > { %v6721_v44 = vmul.f32 %v10080_v37, %v6720_v22  ;;  %v6718_v5 = vsel %vm6717_vm13, %v10078_v11, %v6714_v14  ;;  %vm13805_vm7 = vmmov %vm13803_vm1 }
0x12e0   : > { %v6731_v6 = vmul.f32 %v6718_v5, %v6683_v24  ;;  %vm13808_vm13 = vmmov %vm13803_vm1 }
0x12e1   : > { %v6722_v28 = vmul.f32 0.5, %v6721_v44  ;;  %vm13809_vm6 = vmmov %vm13803_vm1 }
0x12e2   : > { %v12915_v57 = vadd.f32 %v6731_v6, %v5210_v21 }
0x12e3   : > { %v6723_v59 = vsub.f32 1.5, %v6722_v28 }
0x12e5   : > { %v6724_v7 = vmul.f32 %v10080_v37, %v6723_v59 }
0x12e7   : > { %v6728_v13 = vsel %vm6727_vm0, %v10080_v37, %v6724_v7 }
0x12e8   : > { %v6732_v38 = vmul.f32 %v6728_v13, %v6684_v36 }
0x12ea   : > { %v12919_v12 = vadd.f32 %v6732_v38, %v5211_v33 }
0x12ec   : > { %v6738_v40 = vpack.c.bf16 %v12919_v12, %v12915_v57 }
0x12ee   : > { %9385 = vmatmul.msk.bf16.gmra.mxu3 %vm13801_vm12, %v6738_v40 }
0x1361   : > { %v6762_v58 = vpop.f32.mrf.mxu3 }
0x1362   : > { %v6772_v21 = vpack.c.bf16 %v6762_v58, %v6762_v58 }
0x1364   : > { %6776 = vst.msk [vmem:[#allocation3] sm:$0xf] %vm5251_vm5, %v6772_v21 }
0x1369   : > { %v6764_v33 = vpop.f32.mrf.mxu3 }
0x136a   : > { %v6773_v32 = vpack.c.bf16 %v6764_v33, %v6764_v33 }
0x136b   : > { %v6788_v25 = vld [vmem:[#allocation3] sm:$0xf] }
0x136c   : > { %v6780_v29 = vld [vmem:[#allocation3] sm:$0xf]  ;;  %6777 = vst.msk [vmem:[#allocation3 + $0x10] sm:$0xf] %vm5251_vm5, %v6773_v32  ;;  %6796 = vrot.lane.b32.xlu2 %v6788_v25, %s13728_s30 }
0x136d   : > { %6784 = vst.msk [vmem:[#allocation2] sm:$0xf] %vm5260_vm3, %v6780_v29  ;;  %v6836_v35 = vld [vmem:[#allocation3] sm:$0xf] }
0x136e   : > { %v6812_v17 = vld [vmem:[#allocation3] sm:$0xf] }
0x136f   : > { %v6860_v15 = vld [vmem:[#allocation3] sm:$0xf] }
0x1370   : > { %v6908_v45 = vld [vmem:[#allocation3] sm:$0xf] }
0x1371   : > { %v6767_v1 = vpop.f32.mrf.mxu3  ;;  %v6884_v31 = vld [vmem:[#allocation3] sm:$0xf] }
0x1372   : > { %v6774_v23 = vpack.c.bf16 %v6767_v1, %v6767_v1  ;;  %v6932_v5 = vld [vmem:[#allocation3] sm:$0xf] }
0x1373   : > { %v6789_v30 = vld [vmem:[#allocation3 + $0x10] sm:$0xf]  ;;  %v6956_v59 = vld [vmem:[#allocation3] sm:$0xf] }
0x1374   : > { %v6781_v62 = vld [vmem:[#allocation3 + $0x10] sm:$0xf]  ;;  %6778 = vst.msk [vmem:[#allocation3 + $0x20] sm:$0xf] %vm5251_vm5, %v6774_v23  ;;  %6798 = vrot.lane.b32.xlu1 %v6789_v30, %s13728_s30 }
0x1375   : > { %6785 = vst.msk [vmem:[#allocation2 + $0xc] sm:$0xf] %vm5260_vm3, %v6781_v62  ;;  %v6813_v4 = vld [vmem:[#allocation3 + $0x10] sm:$0xf] }
0x1376   : > { %v9388_v19 = vld [vmem:[#allocation2] sm:$0xf] }
0x1377   : > { %v6837_v20 = vld [vmem:[#allocation3 + $0x10] sm:$0xf] }
0x1378   : > { %v6885_v54 = vld [vmem:[#allocation3 + $0x10] sm:$0xf] }
0x1379   : > { %v6769_v2 = vpop.f32.mrf.mxu3  ;;  %v6861_v39 = vld [vmem:[#allocation3 + $0x10] sm:$0xf] }
0x137a   : > { %v6775_v41 = vpack.c.bf16 %v6769_v2, %v6769_v2  ;;  %v6909_v14 = vld [vmem:[#allocation3 + $0x10] sm:$0xf] }
0x137b   : > { %v6790_v3 = vld [vmem:[#allocation3 + $0x20] sm:$0xf]  ;;  %v6957_v44 = vld [vmem:[#allocation3 + $0x10] sm:$0xf] }
0x137c   : > { %v6782_v42 = vld [vmem:[#allocation3 + $0x20] sm:$0xf]  ;;  %6779 = vst.msk [vmem:[#allocation3 + $0x30] sm:$0xf] %vm5251_vm5, %v6775_v41  ;;  %6822 = vrot.lane.b32.xlu1 %v6813_v4, %s13729_s27  ;;  %6800 = vrot.lane.b32.xlu0 %v6790_v3, %s13728_s30  ;;  %v9878_v8 = vld [vmem:[#allocation2 + $0x8] sm:$0xf0] }
0x137d   : > { %v9389_v27 = vor.u32 %v9878_v8, %v9388_v19  ;;  %6786 = vst.msk [vmem:[#allocation2 + $0x18] sm:$0xf] %vm5260_vm3, %v6782_v42  ;;  %v6814_v49 = vld [vmem:[#allocation3 + $0x20] sm:$0xf]  ;;  %v6933_v28 = vld [vmem:[#allocation3 + $0x10] sm:$0xf] }
0x137e   : > { %v6862_v63 = vld [vmem:[#allocation3 + $0x20] sm:$0xf] }
0x137f   : > { %9462 = vmatmul.msk.bf16.vlgmr.msrb.gmra.mxu2 %vm5595_vm4, %v9389_v27  ;;  %v6838_v52 = vld [vmem:[#allocation3 + $0x20] sm:$0xf] }
0x1380   : > { %v6886_v37 = vld [vmem:[#allocation3 + $0x20] sm:$0xf] }
0x1381   : > { %v6934_v60 = vld [vmem:[#allocation3 + $0x20] sm:$0xf] }
0x1382   : > { %v6910_v22 = vld [vmem:[#allocation3 + $0x20] sm:$0xf] }
0x1383   : > { %v6791_v56 = vld [vmem:[#allocation3 + $0x30] sm:$0xf]  ;;  %v6958_v6 = vld [vmem:[#allocation3 + $0x20] sm:$0xf] }
0x1384   : > { %6844 = vrot.lane.b32.xlu1 %v6836_v35, %s13615_s22  ;;  %6820 = vrot.lane.b32.xlu0 %v6812_v17, %s13729_s27  ;;  %v6783_v47 = vld [vmem:[#allocation3 + $0x30] sm:$0xf]  ;;  %v9392_v11 = vld [vmem:[#allocation2 + $0x18] sm:$0xf] }
0x1385   : > { %6802 = vrot.lane.b32.xlu2 %v6791_v56, %s13728_s30  ;;  %6787 = vst.msk [vmem:[#allocation2 + $0x24] sm:$0xf] %vm5260_vm3, %v6783_v47  ;;  %v6839_v26 = vld [vmem:[#allocation3 + $0x30] sm:$0xf] }
0x1386   : > { %v6815_v0 = vld [vmem:[#allocation3 + $0x30] sm:$0xf] }
0x1387   : > { %v6863_v53 = vld [vmem:[#allocation3 + $0x30] sm:$0xf] }
0x1388   : > { %v6911_v34 = vld [vmem:[#allocation3 + $0x30] sm:$0xf] }
0x1389   : > { %v6887_v51 = vld [vmem:[#allocation3 + $0x30] sm:$0xf] }
0x138a   : > { %v6935_v24 = vld [vmem:[#allocation3 + $0x30] sm:$0xf] }
0x138b   : > { %v6959_v36 = vld [vmem:[#allocation3 + $0x30] sm:$0xf] }
0x138c   : > { %6850 = vrot.lane.b32.xlu1 %v6839_v26, %s13615_s22  ;;  %6826 = vrot.lane.b32.xlu0 %v6815_v0, %s13729_s27  ;;  %v9879_v48 = vld [vmem:[#allocation2 + $0x20] sm:$0xf0] }
0x138d   : > { %6824 = vrot.lane.b32.xlu2 %v6814_v49, %s13729_s27  ;;  %v9393_v16 = vor.u32 %v9879_v48, %v9392_v11 }
0x138f   : > { %9463 = vmatmul.msk.bf16.gmra.mxu2 %vm5595_vm4, %v9393_v16 }
0x1394   : > { %6872 = vrot.lane.b32.xlu1 %v6862_v63, %s13775_s28  ;;  %6848 = vrot.lane.b32.xlu0 %v6838_v52, %s13615_s22 }
0x1395   : > { %6846 = vrot.lane.b32.xlu2 %v6837_v20, %s13615_s22 }
0x139c   : > { %6894 = vrot.lane.b32.xlu1 %v6885_v54, %s13776_s0  ;;  %6870 = vrot.lane.b32.xlu0 %v6861_v39, %s13775_s28 }
0x139d   : > { %6868 = vrot.lane.b32.xlu2 %v6860_v15, %s13775_s28 }
0x13a4   : > { %6916 = vrot.lane.b32.xlu1 %v6908_v45, %s13788_s5  ;;  %6892 = vrot.lane.b32.xlu0 %v6884_v31, %s13776_s0 }
0x13a5   : > { %6874 = vrot.lane.b32.xlu2 %v6863_v53, %s13775_s28 }
0x13ac   : > { %6922 = vrot.lane.b32.xlu1 %v6911_v34, %s13788_s5  ;;  %6898 = vrot.lane.b32.xlu0 %v6887_v51, %s13776_s0 }
0x13ad   : > { %6896 = vrot.lane.b32.xlu2 %v6886_v37, %s13776_s0 }
0x13b4   : > { %6944 = vrot.lane.b32.xlu1 %v6934_v60, %s13789_s24  ;;  %6920 = vrot.lane.b32.xlu0 %v6910_v22, %s13788_s5 }
0x13b5   : > { %6918 = vrot.lane.b32.xlu2 %v6909_v14, %s13788_s5 }
0x13bc   : > { %6966 = vrot.lane.b32.xlu1 %v6957_v44, %s13790_s9  ;;  %6942 = vrot.lane.b32.xlu0 %v6933_v28, %s13789_s24 }
0x13bd   : > { %6940 = vrot.lane.b32.xlu2 %v6932_v5, %s13789_s24 }
0x13c4   : > { %6964 = vrot.lane.b32.xlu0 %v6956_v59, %s13790_s9 }
0x13c5   : > { %6946 = vrot.lane.b32.xlu2 %v6935_v24, %s13789_s24 }
0x13c6   : > { %v6797_v7 = vpop.permute.xlu2 %6796 }
0x13c7   : > { %6808 = vst.msk [vmem:[#allocation2 + $0x30] sm:$0xf] %vm5260_vm3, %v6797_v7 }
0x13cc   : > { %6970 = vrot.lane.b32.xlu0 %v6959_v36, %s13790_s9 }
0x13cd   : > { %6968 = vrot.lane.b32.xlu2 %v6958_v6, %s13790_s9 }
0x13ce   : > { %v9396_v43 = vld [vmem:[#allocation2 + $0x30] sm:$0xf] }
0x13df   : > { %v6803_v13 = vpop.permute.xlu2 %6802 }
0x13e0   : > { %6811 = vst.msk [vmem:[#allocation2 + $0x54] sm:$0xf] %vm5260_vm3, %v6803_v13 }
0x13e6   : > { %v6799_v38 = vpop.permute.xlu1 %6798 }
0x13e7   : > { %v6825_v40 = vpop.permute.xlu2 %6824  ;;  %6809 = vst.msk [vmem:[#allocation2 + $0x3c] sm:$0xf] %vm5260_vm3, %v6799_v38  ;;  %v9881_v23 = vld [vmem:[#allocation2 + $0x50] sm:$0xf0] }
0x13e8   : > { %6834 = vst.msk [vmem:[#allocation2 + $0x78] sm:$0xf] %vm5260_vm3, %v6825_v40 }
0x13ee   : > { %v6801_v50 = vpop.permute.xlu0 %6800  ;;  %v6823_v10 = vpop.permute.xlu1 %6822  ;;  %v9880_v46 = vld [vmem:[#allocation2 + $0x38] sm:$0xf0] }
0x13ef   : > { %6810 = vst.msk [vmem:[#allocation2 + $0x48] sm:$0xf] %vm5260_vm3, %v6801_v50  ;;  %v6847_v55 = vpop.permute.xlu2 %6846  ;;  %v9397_v58 = vor.u32 %v9880_v46, %v9396_v43  ;;  %v9408_v11 = vld [vmem:[#allocation2 + $0x78] sm:$0xf] }
0x13f0   : > { %6857 = vst.msk [vmem:[#allocation2 + $0x9c] sm:$0xf] %vm5260_vm3, %v6847_v55 }
0x13f1   : > { %6833 = vst.msk [vmem:[#allocation2 + $0x6c] sm:$0xf] %vm5260_vm3, %v6823_v10  ;;  %9464 = vmatmul.msk.bf16.gmra.mxu2 %vm5595_vm4, %v9397_v58 }
0x13f6   : > { %v6821_v21 = vpop.permute.xlu0 %6820  ;;  %v6845_v33 = vpop.permute.xlu1 %6844  ;;  %v9400_v25 = vld [vmem:[#allocation2 + $0x48] sm:$0xf] }
0x13f7   : > { %6832 = vst.msk [vmem:[#allocation2 + $0x60] sm:$0xf] %vm5260_vm3, %v6821_v21  ;;  %v6869_v32 = vpop.permute.xlu2 %6868  ;;  %v9401_v62 = vor.u32 %v9881_v23, %v9400_v25  ;;  %v9884_v45 = vld [vmem:[#allocation2 + $0x98] sm:$0xf0] }
0x13f8   : > { %6880 = vst.msk [vmem:[#allocation2 + $0xc0] sm:$0xf] %vm5260_vm3, %v6869_v32  ;;  %v9882_v8 = vld [vmem:[#allocation2 + $0x68] sm:$0xf0] }
0x13f9   : > { %6856 = vst.msk [vmem:[#allocation2 + $0x90] sm:$0xf] %vm5260_vm3, %v6845_v33 }
0x13fe   : > { %v6827_v29 = vpop.permute.xlu0 %6826  ;;  %v6851_v1 = vpop.permute.xlu1 %6850  ;;  %v9404_v3 = vld [vmem:[#allocation2 + $0x60] sm:$0xf] }
0x13ff   : > { %6835 = vst.msk [vmem:[#allocation2 + $0x84] sm:$0xf] %vm5260_vm3, %v6827_v29  ;;  %v6875_v30 = vpop.permute.xlu2 %6874  ;;  %v9405_v35 = vor.u32 %v9882_v8, %v9404_v3  ;;  %v9420_v44 = vld [vmem:[#allocation2 + $0xc0] sm:$0xf] }
0x1400   : > { %6883 = vst.msk [vmem:[#allocation2 + $0xe4] sm:$0xf] %vm5260_vm3, %v6875_v30  ;;  %v9412_v54 = vld [vmem:[#allocation2 + $0x90] sm:$0xf] }
0x1401   : > { %6859 = vst.msk [vmem:[#allocation2 + $0xb4] sm:$0xf] %vm5260_vm3, %v6851_v1  ;;  %9465 = vmatmul.msk.bf16.gmra.mxu2 %vm5595_vm4, %v9401_v62  ;;  %v9413_v31 = vor.u32 %v9884_v45, %v9412_v54 }
0x1402   : > { %v13011_v14 = vpop.f32.mrf.mxu2 }
0x1406   : > { %v6849_v2 = vpop.permute.xlu0 %6848  ;;  %v6873_v41 = vpop.permute.xlu1 %6872  ;;  %v9883_v26 = vld [vmem:[#allocation2 + $0x80] sm:$0xf0] }
0x1407   : > { %6858 = vst.msk [vmem:[#allocation2 + $0xa8] sm:$0xf] %vm5260_vm3, %v6849_v2  ;;  %v6897_v4 = vpop.permute.xlu2 %6896  ;;  %v9409_v16 = vor.u32 %v9883_v26, %v9408_v11  ;;  %v9887_v24 = vld [vmem:[#allocation2 + $0xe0] sm:$0xf0] }
0x1408   : > { %6906 = vst.msk [vmem:[#allocation2 + $0x108] sm:$0xf] %vm5260_vm3, %v6897_v4  ;;  %v9885_v37 = vld [vmem:[#allocation2 + $0xb0] sm:$0xf0] }
0x1409   : > { %6882 = vst.msk [vmem:[#allocation2 + $0xd8] sm:$0xf] %vm5260_vm3, %v6873_v41 }
0x140a   : > { %v13014_v5 = vpop.f32.mrf.mxu2 }
0x140e   : > { %v6871_v42 = vpop.permute.xlu0 %6870  ;;  %v6895_v19 = vpop.permute.xlu1 %6894  ;;  %v9416_v34 = vld [vmem:[#allocation2 + $0xa8] sm:$0xf] }
0x140f   : > { %6881 = vst.msk [vmem:[#allocation2 + $0xcc] sm:$0xf] %vm5260_vm3, %v6871_v42  ;;  %v6919_v27 = vpop.permute.xlu2 %6918  ;;  %v9417_v60 = vor.u32 %v9885_v37, %v9416_v34  ;;  %v9432_v55 = vld [vmem:[#allocation2 + $0x108] sm:$0xf]  ;;  %v7274_v37 = vpack.c.bf16 %v13014_v5, %v13011_v14  ;;  %v9898_v14 = vld [vmem:[%s13334_s6 + $0x8] sm:$0xf0] }
0x1410   : > { %6929 = vst.msk [vmem:[#allocation2 + $0x12c] sm:$0xf] %vm5260_vm3, %v6919_v27  ;;  %v9424_v59 = vld [vmem:[#allocation2 + $0xd8] sm:$0xf] }
0x1411   : > { %6905 = vst.msk [vmem:[#allocation2 + $0xfc] sm:$0xf] %vm5260_vm3, %v6895_v19  ;;  %9466 = vmatmul.msk.bf16.gmra.mxu2 %vm5595_vm4, %v9405_v35  ;;  %v9425_v7 = vor.u32 %v9887_v24, %v9424_v59 }
0x1412   : > { %v13017_v36 = vpop.f32.mrf.mxu2 }
0x1416   : > { %v6893_v17 = vpop.permute.xlu0 %6892  ;;  %v6917_v56 = vpop.permute.xlu1 %6916  ;;  %v9886_v22 = vld [vmem:[#allocation2 + $0xc8] sm:$0xf0] }
0x1417   : > { %6904 = vst.msk [vmem:[#allocation2 + $0xf0] sm:$0xf] %vm5260_vm3, %v6893_v17  ;;  %v6941_v47 = vpop.permute.xlu2 %6940  ;;  %v9421_v28 = vor.u32 %v9886_v22, %v9420_v44  ;;  %v9890_v29 = vld [vmem:[#allocation2 + $0x128] sm:$0xf0] }
0x1418   : > { %6952 = vst.msk [vmem:[#allocation2 + $0x150] sm:$0xf] %vm5260_vm3, %v6941_v47  ;;  %v9888_v38 = vld [vmem:[#allocation2 + $0xf8] sm:$0xf0] }
0x1419   : > { %6928 = vst.msk [vmem:[#allocation2 + $0x120] sm:$0xf] %vm5260_vm3, %v6917_v56 }
0x141a   : > { %v7191_v6 = vpop.f32.mrf.mxu2 }
0x141e   : > { %v6899_v0 = vpop.permute.xlu0 %6898  ;;  %v6923_v49 = vpop.permute.xlu1 %6922  ;;  %v9428_v13 = vld [vmem:[#allocation2 + $0xf0] sm:$0xf] }
0x141f   : > { %6907 = vst.msk [vmem:[#allocation2 + $0x114] sm:$0xf] %vm5260_vm3, %v6899_v0  ;;  %v6947_v48 = vpop.permute.xlu2 %6946  ;;  %v9429_v40 = vor.u32 %v9888_v38, %v9428_v13  ;;  %v9444_v19 = vld [vmem:[#allocation2 + $0x150] sm:$0xf] }
0x1420   : > { %6955 = vst.msk [vmem:[#allocation2 + $0x174] sm:$0xf] %vm5260_vm3, %v6947_v48  ;;  %v9436_v32 = vld [vmem:[#allocation2 + $0x120] sm:$0xf] }
0x1421   : > { %6931 = vst.msk [vmem:[#allocation2 + $0x144] sm:$0xf] %vm5260_vm3, %v6923_v49  ;;  %9467 = vmatmul.msk.bf16.gmra.mxu2 %vm5595_vm4, %v9409_v16  ;;  %v9437_v1 = vor.u32 %v9890_v29, %v9436_v32 }
0x1426   : > { %v6921_v63 = vpop.permute.xlu0 %6920  ;;  %v6945_v52 = vpop.permute.xlu1 %6944  ;;  %v9889_v43 = vld [vmem:[#allocation2 + $0x110] sm:$0xf0] }
0x1427   : > { %6930 = vst.msk [vmem:[#allocation2 + $0x138] sm:$0xf] %vm5260_vm3, %v6921_v63  ;;  %v6969_v20 = vpop.permute.xlu2 %6968  ;;  %v9433_v58 = vor.u32 %v9889_v43, %v9432_v55  ;;  %v9893_v56 = vld [vmem:[#allocation2 + $0x170] sm:$0xf0]  ;;  %v9494_v43 = vld [vmem:[%s13334_s6 + $0x18] sm:$0xf] }
0x1428   : > { %6978 = vst.msk [vmem:[#allocation2 + $0x198] sm:$0xf] %vm5260_vm3, %v6969_v20  ;;  %v9891_v2 = vld [vmem:[#allocation2 + $0x140] sm:$0xf0] }
0x1429   : > { %6954 = vst.msk [vmem:[#allocation2 + $0x168] sm:$0xf] %vm5260_vm3, %v6945_v52 }
0x142e   : > { %v6943_v39 = vpop.permute.xlu0 %6942  ;;  %v6967_v15 = vpop.permute.xlu1 %6966  ;;  %v9440_v62 = vld [vmem:[#allocation2 + $0x138] sm:$0xf] }
0x142f   : > { %6953 = vst.msk [vmem:[#allocation2 + $0x15c] sm:$0xf] %vm5260_vm3, %v6943_v39  ;;  %v9441_v41 = vor.u32 %v9891_v2, %v9440_v62  ;;  %v9897_v2 = vld [vmem:[%s13334_s6 + $0x4] sm:$0xf] }
0x1430   : > { %6977 = vst.msk [vmem:[#allocation2 + $0x18c] sm:$0xf] %vm5260_vm3, %v6967_v15  ;;  %v9448_v17 = vld [vmem:[#allocation2 + $0x168] sm:$0xf] }
0x1431   : > { %9468 = vmatmul.msk.bf16.gmra.mxu2 %vm5595_vm4, %v9413_v31  ;;  %v9449_v47 = vor.u32 %v9893_v56, %v9448_v17  ;;  %v9456_v31 = vld [vmem:[#allocation2 + $0x198] sm:$0xf]  ;;  %v9490_v17 = vld [vmem:[%s13334_s6 + $0x8] sm:$0xf]  ;;  %v9899_v56 = vld [vmem:[%s13334_s6 + $0x10] sm:$0xf0] }
0x1436   : > { %v6965_v53 = vpop.permute.xlu0 %6964  ;;  %v9892_v42 = vld [vmem:[#allocation2 + $0x158] sm:$0xf0] }
0x1437   : > { %6976 = vst.msk [vmem:[#allocation2 + $0x180] sm:$0xf] %vm5260_vm3, %v6965_v53  ;;  %v9445_v8 = vor.u32 %v9892_v42, %v9444_v19  ;;  %v9894_v48 = vld [vmem:[#allocation2 + $0x188] sm:$0xf0] }
0x143e   : > { %v6971_v51 = vpop.permute.xlu0 %6970  ;;  %v9452_v49 = vld [vmem:[#allocation2 + $0x180] sm:$0xf] }
0x143f   : > { %6979 = vst.msk [vmem:[#allocation2 + $0x1a4] sm:$0xf] %vm5260_vm3, %v6971_v51  ;;  %v9453_v16 = vor.u32 %v9894_v48, %v9452_v49  ;;  %v7275_v51 = vpack.c.bf16 %v7191_v6, %v13017_v36  ;;  %v9482_v36 = vld [vmem:[%s13334_s6] sm:$0xf] }
0x1440   : > { %v9483_v5 = vor.u32 %v9898_v14, %v9482_v36 }
0x1441   : > { %9469 = vmatmul.msk.bf16.gmra.mxu2 %vm5595_vm4, %v9417_v60 }
0x1446   : > { %v9895_v15 = vld [vmem:[#allocation2 + $0x1a0] sm:$0xf0] }
0x1447   : > { %v9457_v53 = vor.u32 %v9895_v15, %v9456_v31 }
0x1451   : > { %9470 = vmatmul.msk.bf16.gmra.mxu2 %vm5595_vm4, %v9421_v28 }
0x1461   : > { %9471 = vmatmul.msk.bf16.gmra.mxu2 %vm5595_vm4, %v9425_v7 }
0x1471   : > { %9472 = vmatmul.msk.bf16.gmra.mxu2 %vm5595_vm4, %v9429_v40 }
0x1474   : > { %v7194_v50 = vpop.f32.mrf.mxu2 }
0x147c   : > { %v7196_v10 = vpop.f32.mrf.mxu2 }
0x147d   : > { %v7276_v46 = vpack.c.bf16 %v7196_v10, %v7194_v50 }
0x1481   : > { %9473 = vmatmul.msk.bf16.gmra.mxu2 %vm5595_vm4, %v9433_v58 }
0x1484   : > { %v7199_v21 = vpop.f32.mrf.mxu2 }
0x148c   : > { %v7201_v33 = vpop.f32.mrf.mxu2 }
0x148d   : > { %v7277_v25 = vpack.c.bf16 %v7201_v33, %v7199_v21 }
0x1491   : > { %9474 = vmatmul.msk.bf16.gmra.mxu2 %vm5595_vm4, %v9437_v1 }
0x1494   : > { %v7204_v23 = vpop.f32.mrf.mxu2 }
0x149c   : > { %v7206_v30 = vpop.f32.mrf.mxu2 }
0x149d   : > { %v7278_v54 = vpack.c.bf16 %v7206_v30, %v7204_v23 }
0x14a1   : > { %9475 = vmatmul.msk.bf16.gmra.mxu2 %vm5595_vm4, %v9441_v41  ;;  %v9484_v41 = vld [vmem:[%s13334_s6 + $0xc] sm:$0xf0] }
0x14a4   : > { %v7209_v4 = vpop.f32.mrf.mxu2 }
0x14ac   : > { %v7211_v3 = vpop.f32.mrf.mxu2 }
0x14ad   : > { %v7279_v20 = vpack.c.bf16 %v7211_v3, %v7209_v4  ;;  %v9487_v4 = vor.u32 %v9897_v2, %v9484_v41 }
0x14b1   : > { %9476 = vmatmul.msk.bf16.gmra.mxu2 %vm5595_vm4, %v9445_v8  ;;  %v9900_v8 = vld [vmem:[%s13334_s6 + $0x1c] sm:$0xf] }
0x14b4   : > { %v7214_v27 = vpop.f32.mrf.mxu2 }
0x14bc   : > { %v7216_v35 = vpop.f32.mrf.mxu2 }
0x14bd   : > { %v7280_v63 = vpack.c.bf16 %v7216_v35, %v7214_v27  ;;  %v9496_v27 = vld [vmem:[%s13334_s6 + $0x24] sm:$0xf0] }
0x14be   : > { %v9499_v35 = vor.u32 %v9900_v8, %v9496_v27 }
0x14c1   : > { %9477 = vmatmul.msk.bf16.gmra.mxu2 %vm5595_vm4, %v9449_v47  ;;  %v9491_v47 = vor.u32 %v9899_v56, %v9490_v17 }
0x14c4   : > { %v7219_v26 = vpop.f32.mrf.mxu2 }
0x14cc   : > { %v7221_v0 = vpop.f32.mrf.mxu2 }
0x14cd   : > { %v7281_v11 = vpack.c.bf16 %v7221_v0, %v7219_v26  ;;  %v9502_v26 = vld [vmem:[%s13334_s6 + $0x20] sm:$0xf]  ;;  %v9902_v0 = vld [vmem:[%s13334_s6 + $0x28] sm:$0xf0] }
0x14ce   : > { %v9503_v49 = vor.u32 %v9902_v0, %v9502_v26 }
0x14cf   : > { %7336 = vmatpush.bf16.msra.mxu0 %v7281_v11 }
0x14d1   : > { %9478 = vmatmul.msk.bf16.gmra.mxu2 %vm5595_vm4, %v9453_v16 }
0x14d3   : > { %7337 = vmatpush.bf16.msra.mxu0 %v7280_v63 }
0x14d4   : > { %v7224_v52 = vpop.f32.mrf.mxu2 }
0x14d7   : > { %7338 = vmatpush.bf16.msra.mxu0 %v7279_v20 }
0x14db   : > { %7339 = vmatpush.bf16.msra.mxu0 %v7278_v54 }
0x14dc   : > { %v7226_v39 = vpop.f32.mrf.mxu2 }
0x14dd   : > { %v7282_v45 = vpack.c.bf16 %v7226_v39, %v7224_v52 }
0x14df   : > { %7340 = vmatpush.bf16.msra.mxu0 %v7277_v25 }
0x14e1   : > { %9479 = vmatmul.msk.bf16.gmra.mxu2 %vm5595_vm4, %v9457_v53 }
0x14e3   : > { %7341 = vmatpush.bf16.msra.mxu0 %v7276_v46  ;;  %v9901_v46 = vld [vmem:[%s13334_s6 + $0x20] sm:$0xf0] }
0x14e4   : > { %v7229_v34 = vpop.f32.mrf.mxu2  ;;  %v9495_v55 = vor.u32 %v9901_v46, %v9494_v43 }
0x14e7   : > { %7342 = vmatpush.bf16.msra.mxu0 %v7275_v51 }
0x14eb   : > { %7343 = vmatpush.bf16.msra.mxu0 %v7274_v37 }
0x14ec   : > { %v7231_v60 = vpop.f32.mrf.mxu2 }
0x14ed   : > { %v7283_v22 = vpack.c.bf16 %v7231_v60, %v7229_v34 }
0x14ee   : > { %7344 = vmatmul.bf16.vlgmr.msra.gmra.mxu0 %v9483_v5 }
0x14f4   : > { %v7234_v44 = vpop.f32.mrf.mxu2 }
0x14fc   : > { %v7236_v28 = vpop.f32.mrf.mxu2 }
0x14fd   : > { %v7284_v59 = vpack.c.bf16 %v7236_v28, %v7234_v44 }
0x14fe   : > { %7349 = vmatmul.bf16.gmra.mxu0 %v9495_v55 }
0x1504   : > { %v7239_v24 = vpop.f32.mrf.mxu2 }
0x150c   : > { %v7241_v7 = vpop.f32.mrf.mxu2 }
0x150d   : > { %v7285_v13 = vpack.c.bf16 %v7241_v7, %v7239_v24 }
0x1514   : > { %v7244_v38 = vpop.f32.mrf.mxu2 }
0x151c   : > { %v7246_v40 = vpop.f32.mrf.mxu2 }
0x151d   : > { %v7286_v23 = vpack.c.bf16 %v7246_v40, %v7244_v38 }
0x1524   : > { %v7249_v50 = vpop.f32.mrf.mxu2 }
0x152c   : > { %v7251_v6 = vpop.f32.mrf.mxu2 }
0x152d   : > { %v7287_v1 = vpack.c.bf16 %v7251_v6, %v7249_v50 }
0x1534   : > { %v7254_v10 = vpop.f32.mrf.mxu2 }
0x153c   : > { %v7256_v58 = vpop.f32.mrf.mxu2 }
0x153d   : > { %v7288_v25 = vpack.c.bf16 %v7256_v58, %v7254_v10 }
0x1544   : > { %v7259_v21 = vpop.f32.mrf.mxu2 }
0x154c   : > { %v7261_v33 = vpop.f32.mrf.mxu2 }
0x154d   : > { %v7289_v32 = vpack.c.bf16 %v7261_v33, %v7259_v21 }
0x154f   : > { %7355 = vmatpush.bf16.msrb.mxu0 %v7289_v32 }
0x1553   : > { %7356 = vmatpush.bf16.msrb.mxu0 %v7288_v25 }
0x1554   : > { %v7264_v29 = vpop.f32.mrf.mxu2 }
0x1557   : > { %7357 = vmatpush.bf16.msrb.mxu0 %v7287_v1 }
0x155b   : > { %7358 = vmatpush.bf16.msrb.mxu0 %v7286_v23 }
0x155c   : > { %v7266_v30 = vpop.f32.mrf.mxu2 }
0x155d   : > { %v7290_v19 = vpack.c.bf16 %v7266_v30, %v7264_v29  ;;  %v9903_v30 = vld [vmem:[%s13348_s20] sm:$0xff] }
0x155f   : > { %7359 = vmatpush.bf16.msrb.mxu0 %v7285_v13 }
0x1563   : > { %7360 = vmatpush.bf16.msrb.mxu0 %v7284_v59 }
0x1564   : > { %v7269_v62 = vpop.f32.mrf.mxu2 }
0x1567   : > { %7361 = vmatpush.bf16.msrb.mxu0 %v7283_v22 }
0x156b   : > { %7362 = vmatpush.bf16.msrb.mxu0 %v7282_v45  ;;  %v7345_v11 = vpop.f32.mrf.mxu0 }
0x156c   : > { %v7271_v3 = vpop.f32.mrf.mxu2 }
0x156d   : > { %v7291_v42 = vpack.c.bf16 %v7271_v3, %v7269_v62 }
0x156e   : > { %7363 = vmatmul.bf16.vlgmr.msrb.gmra.mxu0 %v9487_v4 }
0x156f   : > { %7380 = vmatpush.bf16.msra.mxu0 %v7291_v42 }
0x1573   : > { %7381 = vmatpush.bf16.msra.mxu0 %v7290_v19  ;;  %v7347_v48 = vpop.f32.mrf.mxu0 }
0x1577   : > { %7520 = vmatpush.bf16.msrb.mxu0 %v9903_v30 }
0x157b   : > { %v7350_v16 = vpop.f32.mrf.mxu0 }
0x157e   : > { %7368 = vmatmul.bf16.gmra.mxu0 %v9499_v35 }
0x1583   : > { %v7352_v63 = vpop.f32.mrf.mxu0 }
0x158e   : > { %9504 = vmatmul.msk.bf16.vlgmr.msra.gmra.mxu0 %vm5809_vm9, %v9491_v47 }
0x159e   : > { %9505 = vmatmul.msk.bf16.gmra.mxu0 %vm5809_vm9, %v9503_v49 }
0x15eb   : > { %v7364_v52 = vpop.f32.mrf.mxu0 }
0x15ec   : > { %v7365_v15 = vadd.f32 %v7364_v52, %v7345_v11 }
0x15f3   : > { %v7366_v20 = vpop.f32.mrf.mxu0 }
0x15f4   : > { %v7367_v37 = vadd.f32 %v7366_v20, %v7347_v48 }
0x15fb   : > { %v7369_v54 = vpop.f32.mrf.mxu0 }
0x15fc   : > { %v7370_v24 = vadd.f32 %v7369_v54, %v7350_v16 }
0x1603   : > { %v7371_v39 = vpop.f32.mrf.mxu0 }
0x1604   : > { %v7372_v36 = vadd.f32 %v7371_v39, %v7352_v63 }
0x160b   : > { %v7383_v45 = vpop.f32.mrf.mxu0 }
0x160c   : > { %v13068_v31 = vadd.f32 %v7383_v45, %v7365_v15 }
0x160e   : > { %v7393_v53 = vsel %vm13802_vm8, %v13068_v31, 0.0  ;;  %v7409_v34 = vmul.f32 %v13068_v31, %v13068_v31 }
0x160f   : > { %7394 = vadd.xlane.f32.xlu1 %v7393_v53  ;;  %v7778_v53 = vld [vmem:[%s13342_s14 + $0x8] sm:$0x7] }
0x1610   : > { %v7413_v51 = vsel %vm13803_vm1, %v7409_v34, 0.0 }
0x1611   : > { %7414 = vadd.xlane.f32.xlu0 %v7413_v51 }
0x1613   : > { %v7385_v60 = vpop.f32.mrf.mxu0 }
0x1614   : > { %v13075_v22 = vadd.f32 %v7385_v60, %v7367_v37  ;;  %v7874_v37 = vunpack.c.l.b16 %v7778_v53 }
0x1616   : > { %v7396_v44 = vsel %vm13804_vm14, %v13075_v22, 0.0  ;;  %v7410_v28 = vmul.f32 %v13075_v22, %v13075_v22 }
0x1617   : > { %7397 = vadd.xlane.f32.xlu2 %v7396_v44 }
0x1618   : > { %v7416_v59 = vsel %vm13805_vm7, %v7410_v28, 0.0  ;;  %v7876_v28 = vpack.c.b16 %v7874_v37, %v7874_v37 }
0x1619   : > { %7417 = vadd.xlane.f32.xlu1 %v7416_v59 }
0x161b   : > { %v7388_v7 = vpop.f32.mrf.mxu0 }
0x161c   : > { %v13082_v13 = vadd.f32 %v7388_v7, %v7370_v24 }
0x161e   : > { %v7399_v38 = vsel %vm13806_vm2, %v13082_v13, 0.0  ;;  %v7411_v40 = vmul.f32 %v13082_v13, %v13082_v13 }
0x161f   : > { %7400 = vadd.xlane.f32.xlu2 %v7399_v38 }
0x1620   : > { %v7419_v50 = vsel %vm13807_vm15, %v7411_v40, 0.0  ;;  %v7933_v40 = vsel %vm5650_vm10, %v7876_v28, 0  ;;  %vm13810_vm10 = vmmov %vm13806_vm2 }
0x1621   : > { %7420 = vadd.xlane.f32.xlu1 %v7419_v50  ;;  %7941 = vmatpush.bf16.msrb.mxu1 %v7933_v40 }
0x1623   : > { %v7390_v14 = vpop.f32.mrf.mxu0 }
0x1624   : > { %v13089_v5 = vadd.f32 %v7390_v14, %v7372_v36 }
0x1626   : > { %v7402_v6 = vsel %vm13808_vm13, %v13089_v5, 0.0  ;;  %v7412_v10 = vmul.f32 %v13089_v5, %v13089_v5 }
0x1627   : > { %7403 = vadd.xlane.f32.xlu0 %v7402_v6 }
0x1628   : > { %v7422_v43 = vsel %vm13809_vm6, %v7412_v10, 0.0 }
0x1629   : > { %7423 = vadd.xlane.f32.xlu2 %v7422_v43 }
0x1682   : > { %v7395_v46 = vpop.xlane.xlu1 %7394 }
0x1683   : > { %v13097_v55 = vmul.f32 %v7395_v46, %v12472_v18 }
0x1684   : > { %v7415_v58 = vpop.xlane.xlu0 %7414 }
0x1685   : > { %v7429_v21 = vmul.f32 %v13097_v55, %v13097_v55  ;;  %v7425_v33 = vmul.f32 %v7415_v58, %v12472_v18  ;;  %v7441_v50 = vsub.f32 %v13068_v31, %v13097_v55 }
0x1687   : > { %v7433_v32 = vsub.f32 %v7425_v33, %v7429_v21 }
0x1689   : > { %v7437_v25 = vmax.f32 %v7433_v32, 0.0 }
0x168a   : > { %v7398_v29 = vpop.xlane.xlu2 %7397 }
0x168b   : > { %v7445_v1 = vadd.f32 1e-05, %v7437_v25  ;;  %v7406_v23 = vmul.f32 %v7398_v29, %v12472_v18 }
0x168c   : > { %v7418_v62 = vpop.xlane.xlu1 %7417 }
0x168d   : > { %10081 = vrsqrt.f32 %v7445_v1  ;;  %v7430_v2 = vmul.f32 %v7406_v23, %v7406_v23  ;;  %v7426_v41 = vmul.f32 %v7418_v62, %v12472_v18  ;;  %vm7455_vm0 = vweird.f32 %v7445_v1 }
0x168e   : > { %v7442_v43 = vsub.f32 %v13075_v22, %v7406_v23 }
0x168f   : > { %v7434_v4 = vsub.f32 %v7426_v41, %v7430_v2 }
0x1691   : > { %v7438_v3 = vmax.f32 %v7434_v4, 0.0 }
0x1692   : > { %v7401_v42 = vpop.xlane.xlu2 %7400 }
0x1693   : > { %v10082_v19 = vpop.eup %10081  ;;  %v13108_v8 = vmul.f32 %v7401_v42, %v12472_v18  ;;  %v7446_v35 = vadd.f32 1e-05, %v7438_v3 }
0x1694   : > { %v7450_v27 = vmul.f32 %v10082_v19, %v7445_v1  ;;  %v7421_v17 = vpop.xlane.xlu1 %7420  ;;  %vm7456_vm11 = vweird.f32 %v10082_v19 }
0x1695   : > { %v7431_v56 = vmul.f32 %v13108_v8, %v13108_v8  ;;  %v7427_v47 = vmul.f32 %v7421_v17, %v12472_v18  ;;  %10083 = vrsqrt.f32 %v7446_v35  ;;  %vm7457_vm12 = vmor %vm7455_vm0, %vm7456_vm11  ;;  %vm7465_vm1 = vweird.f32 %v7446_v35 }
0x1696   : > { %v7451_v26 = vmul.f32 %v10082_v19, %v7450_v27  ;;  %v7443_v41 = vsub.f32 %v13082_v13, %v13108_v8  ;;  %vm13811_vm0 = vmmov %vm13810_vm10 }
0x1697   : > { %v7435_v0 = vsub.f32 %v7427_v47, %v7431_v56  ;;  %v9922_v47 = vld [vmem:[%s13342_s14] sm:$0xff] }
0x1698   : > { %v7452_v49 = vmul.f32 0.5, %v7451_v26  ;;  %7942 = vmatpush.bf16.msrb.mxu1 %v9922_v47 }
0x1699   : > { %v7439_v11 = vmax.f32 %v7435_v0, 0.0 }
0x169a   : > { %v7404_v48 = vpop.xlane.xlu0 %7403  ;;  %v7453_v16 = vsub.f32 1.5, %v7452_v49 }
0x169b   : > { %v7447_v63 = vadd.f32 1e-05, %v7439_v11  ;;  %v7408_v52 = vmul.f32 %v7404_v48, %v12472_v18  ;;  %v10084_v20 = vpop.eup %10083 }
0x169c   : > { %v7424_v54 = vpop.xlane.xlu2 %7423  ;;  %v7460_v39 = vmul.f32 %v10084_v20, %v7446_v35  ;;  %v7454_v34 = vmul.f32 %v10082_v19, %v7453_v16  ;;  %vm7466_vm8 = vweird.f32 %v10084_v20 }
0x169d   : > { %10085 = vrsqrt.f32 %v7447_v63  ;;  %v7432_v15 = vmul.f32 %v7408_v52, %v7408_v52  ;;  %v7428_v45 = vmul.f32 %v7424_v54, %v12472_v18  ;;  %vm7467_vm14 = vmor %vm7465_vm1, %vm7466_vm8  ;;  %vm7475_vm2 = vweird.f32 %v7447_v63 }
0x169e   : > { %v7461_v51 = vmul.f32 %v10084_v20, %v7460_v39  ;;  %v7458_v7 = vsel %vm7457_vm12, %v10082_v19, %v7454_v34  ;;  %v7444_v3 = vsub.f32 %v13089_v5, %v7408_v52  ;;  %vm13816_vm12 = vmmov %vm13811_vm0 }
0x169f   : > { %v7436_v60 = vsub.f32 %v7428_v45, %v7432_v15  ;;  %v7489_v10 = vmul.f32 %v7458_v7, %v7441_v50  ;;  %vm13817_vm8 = vmmov %vm13811_vm0 }
0x16a0   : > { %v7462_v44 = vmul.f32 0.5, %v7461_v51  ;;  %vm13818_vm1 = vmmov %vm13811_vm0 }
0x16a1   : > { %v7440_v59 = vmax.f32 %v7436_v60, 0.0  ;;  %v7493_v32 = vmax.f32 %v7489_v10, 0.0 }
0x16a2   : > { %v7463_v38 = vsub.f32 1.5, %v7462_v44 }
0x16a3   : > { %v10086_v24 = vpop.eup %10085  ;;  %v7448_v14 = vadd.f32 1e-05, %v7440_v59 }
0x16a4   : > { %v7470_v36 = vmul.f32 %v10086_v24, %v7447_v63  ;;  %v7464_v6 = vmul.f32 %v10084_v20, %v7463_v38  ;;  %vm7476_vm7 = vweird.f32 %v10086_v24 }
0x16a5   : > { %10087 = vrsqrt.f32 %v7448_v14  ;;  %vm7477_vm15 = vmor %vm7475_vm2, %vm7476_vm7  ;;  %vm7485_vm6 = vweird.f32 %v7448_v14 }
0x16a6   : > { %v7471_v46 = vmul.f32 %v10086_v24, %v7470_v36  ;;  %v7468_v58 = vsel %vm7467_vm14, %v10084_v20, %v7464_v6  ;;  %vm13819_vm14 = vmmov %vm13811_vm0 }
0x16a7   : > { %v7490_v21 = vmul.f32 %v7468_v58, %v7442_v43 }
0x16a8   : > { %v7472_v33 = vmul.f32 0.5, %v7471_v46 }
0x16a9   : > { %v7494_v25 = vmax.f32 %v7490_v21, 0.0 }
0x16aa   : > { %v7473_v29 = vsub.f32 1.5, %v7472_v33 }
0x16ab   : > { %v10088_v1 = vpop.eup %10087  ;;  %v7497_v30 = vpack.c.bf16 %v7494_v25, %v7493_v32 }
0x16ac   : > { %v7480_v31 = vmul.f32 %v10088_v1, %v7448_v14  ;;  %v7474_v55 = vmul.f32 %v10086_v24, %v7473_v29  ;;  %vm7486_vm13 = vweird.f32 %v10088_v1 }
0x16ad   : > { %9510 = vmatmul.msk.bf16.vlgmr.msrb.gmra.mxu0 %vm13810_vm10, %v7497_v30  ;;  %vm7487_vm11 = vmor %vm7485_vm6, %vm7486_vm13 }
0x16ae   : > { %v7481_v62 = vmul.f32 %v10088_v1, %v7480_v31  ;;  %v7478_v23 = vsel %vm7477_vm15, %v10086_v24, %v7474_v55  ;;  %vm13820_vm15 = vmmov %vm13811_vm0 }
0x16af   : > { %v7491_v42 = vmul.f32 %v7478_v23, %v7443_v41 }
0x16b0   : > { %v7482_v2 = vmul.f32 0.5, %v7481_v62 }
0x16b1   : > { %v7495_v35 = vmax.f32 %v7491_v42, 0.0 }
0x16b2   : > { %v7483_v22 = vsub.f32 1.5, %v7482_v2 }
0x16b4   : > { %v7484_v4 = vmul.f32 %v10088_v1, %v7483_v22 }
0x16b6   : > { %v7488_v19 = vsel %vm7487_vm11, %v10088_v1, %v7484_v4 }
0x16b7   : > { %v7492_v27 = vmul.f32 %v7488_v19, %v7444_v3 }
0x16b9   : > { %v7496_v17 = vmax.f32 %v7492_v27, 0.0 }
0x16bb   : > { %v7498_v56 = vpack.c.bf16 %v7496_v17, %v7495_v35 }
0x16bd   : > { %9511 = vmatmul.msk.bf16.gmra.mxu0 %vm13811_vm0, %v7498_v56 }
0x172a   : > { %v7522_v26 = vpop.f32.mrf.mxu0 }
0x172b   : > { %v7532_v13 = vpack.c.bf16 %v7522_v26, %v7522_v26 }
0x172d   : > { %7536 = vst.msk [vmem:[#allocation3] sm:$0xf] %vm5251_vm5, %v7532_v13 }
0x1732   : > { %v7524_v8 = vpop.f32.mrf.mxu0 }
0x1733   : > { %v7533_v5 = vpack.c.bf16 %v7524_v8, %v7524_v8 }
0x1734   : > { %v7548_v0 = vld [vmem:[#allocation3] sm:$0xf] }
0x1735   : > { %v7540_v49 = vld [vmem:[#allocation3] sm:$0xf]  ;;  %7537 = vst.msk [vmem:[#allocation3 + $0x10] sm:$0xf] %vm5251_vm5, %v7533_v5  ;;  %7556 = vrot.lane.b32.xlu0 %v7548_v0, %s13728_s30 }
0x1736   : > { %7544 = vst.msk [vmem:[#allocation2] sm:$0xf] %vm5260_vm3, %v7540_v49  ;;  %v7572_v54 = vld [vmem:[#allocation3] sm:$0xf] }
0x1737   : > { %v7620_v50 = vld [vmem:[#allocation3] sm:$0xf] }
0x1738   : > { %v7596_v14 = vld [vmem:[#allocation3] sm:$0xf] }
0x1739   : > { %v7644_v10 = vld [vmem:[#allocation3] sm:$0xf] }
0x173a   : > { %v7527_v11 = vpop.f32.mrf.mxu0  ;;  %v7692_v29 = vld [vmem:[#allocation3] sm:$0xf] }
0x173b   : > { %v7534_v48 = vpack.c.bf16 %v7527_v11, %v7527_v11  ;;  %v7668_v30 = vld [vmem:[#allocation3] sm:$0xf] }
0x173c   : > { %v7549_v16 = vld [vmem:[#allocation3 + $0x10] sm:$0xf]  ;;  %v7716_v55 = vld [vmem:[#allocation3] sm:$0xf] }
0x173d   : > { %v7541_v63 = vld [vmem:[#allocation3 + $0x10] sm:$0xf]  ;;  %7538 = vst.msk [vmem:[#allocation3 + $0x20] sm:$0xf] %vm5251_vm5, %v7534_v48  ;;  %7558 = vrot.lane.b32.xlu1 %v7549_v16, %s13728_s30 }
0x173e   : > { %7545 = vst.msk [vmem:[#allocation2 + $0xc] sm:$0xf] %vm5260_vm3, %v7541_v63  ;;  %v9514_v15 = vld [vmem:[#allocation2] sm:$0xf] }
0x173f   : > { %v7597_v28 = vld [vmem:[#allocation3 + $0x10] sm:$0xf] }
0x1740   : > { %v7573_v38 = vld [vmem:[#allocation3 + $0x10] sm:$0xf] }
0x1741   : > { %v7621_v36 = vld [vmem:[#allocation3 + $0x10] sm:$0xf] }
0x1742   : > { %v7529_v52 = vpop.f32.mrf.mxu0  ;;  %v7669_v33 = vld [vmem:[#allocation3 + $0x10] sm:$0xf] }
0x1743   : > { %v7535_v20 = vpack.c.bf16 %v7529_v52, %v7529_v52  ;;  %v7645_v25 = vld [vmem:[#allocation3 + $0x10] sm:$0xf] }
0x1744   : > { %v7550_v39 = vld [vmem:[#allocation3 + $0x20] sm:$0xf]  ;;  %v7693_v1 = vld [vmem:[#allocation3 + $0x10] sm:$0xf] }
0x1745   : > { %7539 = vst.msk [vmem:[#allocation3 + $0x30] sm:$0xf] %vm5251_vm5, %v7535_v20  ;;  %7580 = vrot.lane.b32.xlu1 %v7572_v54, %s13729_s27  ;;  %7560 = vrot.lane.b32.xlu2 %v7550_v39, %s13728_s30  ;;  %v9904_v45 = vld [vmem:[#allocation2 + $0x8] sm:$0xf0]  ;;  %v7542_v53 = vld [vmem:[#allocation3 + $0x20] sm:$0xf]  ;;  %vm13812_vm5 = vmmov %vm13811_vm0 }
0x1746   : > { %v9515_v34 = vor.u32 %v9904_v45, %v9514_v15  ;;  %7546 = vst.msk [vmem:[#allocation2 + $0x18] sm:$0xf] %vm5260_vm3, %v7542_v53  ;;  %v7574_v51 = vld [vmem:[#allocation3 + $0x20] sm:$0xf]  ;;  %v7717_v41 = vld [vmem:[#allocation3 + $0x10] sm:$0xf] }
0x1747   : > { %v7598_v59 = vld [vmem:[#allocation3 + $0x20] sm:$0xf] }
0x1748   : > { %9588 = vmatmul.msk.bf16.vlgmr.msrb.gmra.mxu1 %vm5595_vm4, %v9515_v34  ;;  %v7646_v46 = vld [vmem:[#allocation3 + $0x20] sm:$0xf] }
0x1749   : > { %v7622_v21 = vld [vmem:[#allocation3 + $0x20] sm:$0xf] }
0x174a   : > { %v7670_v32 = vld [vmem:[#allocation3 + $0x20] sm:$0xf] }
0x174b   : > { %v7718_v2 = vld [vmem:[#allocation3 + $0x20] sm:$0xf] }
0x174c   : > { %v7575_v37 = vld [vmem:[#allocation3 + $0x30] sm:$0xf]  ;;  %v7694_v23 = vld [vmem:[#allocation3 + $0x20] sm:$0xf] }
0x174d   : > { %v7551_v60 = vld [vmem:[#allocation3 + $0x30] sm:$0xf]  ;;  %7584 = vrot.lane.b32.xlu2 %v7574_v51, %s13729_s27  ;;  %7586 = vrot.lane.b32.xlu1 %v7575_v37, %s13729_s27  ;;  %v9518_v24 = vld [vmem:[#allocation2 + $0x18] sm:$0xf] }
0x174e   : > { %v7543_v44 = vld [vmem:[#allocation3 + $0x30] sm:$0xf]  ;;  %7562 = vrot.lane.b32.xlu0 %v7551_v60, %s13728_s30 }
0x174f   : > { %7547 = vst.msk [vmem:[#allocation2 + $0x24] sm:$0xf] %vm5260_vm3, %v7543_v44  ;;  %v7623_v6 = vld [vmem:[#allocation3 + $0x30] sm:$0xf] }
0x1750   : > { %v7599_v43 = vld [vmem:[#allocation3 + $0x30] sm:$0xf] }
0x1751   : > { %v7647_v58 = vld [vmem:[#allocation3 + $0x30] sm:$0xf] }
0x1752   : > { %v7695_v31 = vld [vmem:[#allocation3 + $0x30] sm:$0xf] }
0x1753   : > { %v7671_v62 = vld [vmem:[#allocation3 + $0x30] sm:$0xf] }
0x1754   : > { %v7719_v22 = vld [vmem:[#allocation3 + $0x30] sm:$0xf] }
0x1755   : > { %7606 = vrot.lane.b32.xlu2 %v7597_v28, %s13615_s22  ;;  %7608 = vrot.lane.b32.xlu1 %v7598_v59, %s13615_s22 }
0x1756   : > { %v9905_v7 = vld [vmem:[#allocation2 + $0x20] sm:$0xf0]  ;;  %7582 = vrot.lane.b32.xlu0 %v7573_v38, %s13729_s27 }
0x1757   : > { %v9519_v40 = vor.u32 %v9905_v7, %v9518_v24 }
0x1759   : > { %9589 = vmatmul.msk.bf16.gmra.mxu1 %vm5595_vm4, %v9519_v40 }
0x175d   : > { %7628 = vrot.lane.b32.xlu2 %v7620_v50, %s13775_s28  ;;  %7630 = vrot.lane.b32.xlu1 %v7621_v36, %s13775_s28 }
0x175e   : > { %7604 = vrot.lane.b32.xlu0 %v7596_v14, %s13615_s22 }
0x1765   : > { %7634 = vrot.lane.b32.xlu2 %v7623_v6, %s13775_s28  ;;  %7652 = vrot.lane.b32.xlu1 %v7644_v10, %s13776_s0 }
0x1766   : > { %7610 = vrot.lane.b32.xlu0 %v7599_v43, %s13615_s22 }
0x176d   : > { %7656 = vrot.lane.b32.xlu2 %v7646_v46, %s13776_s0  ;;  %7658 = vrot.lane.b32.xlu1 %v7647_v58, %s13776_s0 }
0x176e   : > { %7632 = vrot.lane.b32.xlu0 %v7622_v21, %s13775_s28 }
0x1775   : > { %7678 = vrot.lane.b32.xlu2 %v7669_v33, %s13788_s5  ;;  %7680 = vrot.lane.b32.xlu1 %v7670_v32, %s13788_s5 }
0x1776   : > { %7654 = vrot.lane.b32.xlu0 %v7645_v25, %s13776_s0 }
0x177d   : > { %7700 = vrot.lane.b32.xlu2 %v7692_v29, %s13789_s24  ;;  %7702 = vrot.lane.b32.xlu1 %v7693_v1, %s13789_s24 }
0x177e   : > { %7676 = vrot.lane.b32.xlu0 %v7668_v30, %s13788_s5 }
0x1785   : > { %7706 = vrot.lane.b32.xlu2 %v7695_v31, %s13789_s24  ;;  %7724 = vrot.lane.b32.xlu1 %v7716_v55, %s13790_s9 }
0x1786   : > { %7682 = vrot.lane.b32.xlu0 %v7671_v62, %s13788_s5 }
0x178d   : > { %7728 = vrot.lane.b32.xlu2 %v7718_v2, %s13790_s9  ;;  %7730 = vrot.lane.b32.xlu1 %v7719_v22, %s13790_s9 }
0x178e   : > { %7704 = vrot.lane.b32.xlu0 %v7694_v23, %s13789_s24 }
0x1796   : > { %7726 = vrot.lane.b32.xlu0 %v7717_v41, %s13790_s9  ;;  %s9635_s9 = sshll.u32 %s13825_s25, 5 }
0x1797   : > { %s13307_s15 = scalar_lea.vmem %s13349_s21, %s9635_s9 }
0x179f   : > { %v7561_v4 = vpop.permute.xlu2 %7560 }
0x17a0   : > { %7570 = vst.msk [vmem:[#allocation2 + $0x48] sm:$0xf] %vm5260_vm3, %v7561_v4 }
0x17a7   : > { %v7557_v3 = vpop.permute.xlu0 %7556  ;;  %v7585_v42 = vpop.permute.xlu2 %7584  ;;  %v9526_v48 = vld [vmem:[#allocation2 + $0x48] sm:$0xf] }
0x17a8   : > { %7568 = vst.msk [vmem:[#allocation2 + $0x30] sm:$0xf] %vm5260_vm3, %v7557_v3 }
0x17a9   : > { %7594 = vst.msk [vmem:[#allocation2 + $0x78] sm:$0xf] %vm5260_vm3, %v7585_v42 }
0x17af   : > { %v7607_v19 = vpop.permute.xlu2 %7606  ;;  %v7559_v27 = vpop.permute.xlu1 %7558  ;;  %v9522_v56 = vld [vmem:[#allocation2 + $0x30] sm:$0xf] }
0x17b0   : > { %7617 = vst.msk [vmem:[#allocation2 + $0x9c] sm:$0xf] %vm5260_vm3, %v7607_v19  ;;  %v9534_v38 = vld [vmem:[#allocation2 + $0x78] sm:$0xf] }
0x17b1   : > { %7569 = vst.msk [vmem:[#allocation2 + $0x3c] sm:$0xf] %vm5260_vm3, %v7559_v27 }
0x17b7   : > { %v7629_v35 = vpop.permute.xlu2 %7628  ;;  %v7581_v17 = vpop.permute.xlu1 %7580  ;;  %v9910_v43 = vld [vmem:[#allocation2 + $0x98] sm:$0xf0] }
0x17b8   : > { %7640 = vst.msk [vmem:[#allocation2 + $0xc0] sm:$0xf] %vm5260_vm3, %v7629_v35  ;;  %v9906_v47 = vld [vmem:[#allocation2 + $0x38] sm:$0xf0] }
0x17b9   : > { %7592 = vst.msk [vmem:[#allocation2 + $0x60] sm:$0xf] %vm5260_vm3, %v7581_v17  ;;  %v9523_v26 = vor.u32 %v9906_v47, %v9522_v56 }
0x17bb   : > { %9590 = vmatmul.msk.bf16.gmra.mxu1 %vm5595_vm4, %v9523_v26 }
0x17bf   : > { %v7635_v13 = vpop.permute.xlu2 %7634  ;;  %v7587_v8 = vpop.permute.xlu1 %7586  ;;  %v9546_v31 = vld [vmem:[#allocation2 + $0xc0] sm:$0xf] }
0x17c0   : > { %7643 = vst.msk [vmem:[#allocation2 + $0xe4] sm:$0xf] %vm5260_vm3, %v7635_v13  ;;  %v7563_v5 = vpop.permute.xlu0 %7562  ;;  %v9530_v34 = vld [vmem:[#allocation2 + $0x60] sm:$0xf] }
0x17c1   : > { %7571 = vst.msk [vmem:[#allocation2 + $0x54] sm:$0xf] %vm5260_vm3, %v7563_v5 }
0x17c2   : > { %7595 = vst.msk [vmem:[#allocation2 + $0x84] sm:$0xf] %vm5260_vm3, %v7587_v8 }
0x17c5   : > { %v13210_v1 = vpop.f32.mrf.mxu1 }
0x17c7   : > { %v7657_v0 = vpop.permute.xlu2 %7656  ;;  %v7609_v49 = vpop.permute.xlu1 %7608  ;;  %v9913_v23 = vld [vmem:[#allocation2 + $0xe0] sm:$0xf0] }
0x17c8   : > { %7666 = vst.msk [vmem:[#allocation2 + $0x108] sm:$0xf] %vm5260_vm3, %v7657_v0  ;;  %v7583_v11 = vpop.permute.xlu0 %7582  ;;  %v9907_v16 = vld [vmem:[#allocation2 + $0x50] sm:$0xf0] }
0x17c9   : > { %7593 = vst.msk [vmem:[#allocation2 + $0x6c] sm:$0xf] %vm5260_vm3, %v7583_v11  ;;  %v9527_v63 = vor.u32 %v9907_v16, %v9526_v48  ;;  %v9909_v28 = vld [vmem:[#allocation2 + $0x80] sm:$0xf0] }
0x17ca   : > { %7618 = vst.msk [vmem:[#allocation2 + $0xa8] sm:$0xf] %vm5260_vm3, %v7609_v49  ;;  %v9535_v40 = vor.u32 %v9909_v28, %v9534_v38 }
0x17cb   : > { %9591 = vmatmul.msk.bf16.gmra.mxu1 %vm5595_vm4, %v9527_v63 }
0x17cd   : > { %v13213_v62 = vpop.f32.mrf.mxu1 }
0x17cf   : > { %v7679_v52 = vpop.permute.xlu2 %7678  ;;  %v7631_v20 = vpop.permute.xlu1 %7630  ;;  %v9558_v26 = vld [vmem:[#allocation2 + $0x108] sm:$0xf] }
0x17d0   : > { %7689 = vst.msk [vmem:[#allocation2 + $0x12c] sm:$0xf] %vm5260_vm3, %v7679_v52  ;;  %v7605_v54 = vpop.permute.xlu0 %7604  ;;  %v9908_v39 = vld [vmem:[#allocation2 + $0x68] sm:$0xf0] }
0x17d1   : > { %7616 = vst.msk [vmem:[#allocation2 + $0x90] sm:$0xf] %vm5260_vm3, %v7605_v54  ;;  %v9531_v51 = vor.u32 %v9908_v39, %v9530_v34  ;;  %v9542_v25 = vld [vmem:[#allocation2 + $0xa8] sm:$0xf] }
0x17d2   : > { %7641 = vst.msk [vmem:[#allocation2 + $0xcc] sm:$0xf] %vm5260_vm3, %v7631_v20 }
0x17d6   : > { %v13215_v2 = vpop.f32.mrf.mxu1 }
0x17d7   : > { %v7701_v15 = vpop.permute.xlu2 %7700  ;;  %v7653_v45 = vpop.permute.xlu1 %7652  ;;  %v9916_v11 = vld [vmem:[#allocation2 + $0x128] sm:$0xf0] }
0x17d8   : > { %7712 = vst.msk [vmem:[#allocation2 + $0x150] sm:$0xf] %vm5260_vm3, %v7701_v15  ;;  %v7611_v53 = vpop.permute.xlu0 %7610  ;;  %v9538_v14 = vld [vmem:[#allocation2 + $0x90] sm:$0xf] }
0x17d9   : > { %7619 = vst.msk [vmem:[#allocation2 + $0xb4] sm:$0xf] %vm5260_vm3, %v7611_v53  ;;  %v9539_v46 = vor.u32 %v9910_v43, %v9538_v14  ;;  %v9912_v30 = vld [vmem:[#allocation2 + $0xc8] sm:$0xf0] }
0x17da   : > { %7664 = vst.msk [vmem:[#allocation2 + $0xf0] sm:$0xf] %vm5260_vm3, %v7653_v45  ;;  %v9547_v55 = vor.u32 %v9912_v30, %v9546_v31 }
0x17db   : > { %9592 = vmatmul.msk.bf16.gmra.mxu1 %vm5595_vm4, %v9531_v51 }
0x17de   : > { %v7951_v4 = vpop.f32.mrf.mxu1 }
0x17df   : > { %v7707_v37 = vpop.permute.xlu2 %7706  ;;  %v7659_v60 = vpop.permute.xlu1 %7658  ;;  %v9570_v53 = vld [vmem:[#allocation2 + $0x150] sm:$0xf] }
0x17e0   : > { %7715 = vst.msk [vmem:[#allocation2 + $0x174] sm:$0xf] %vm5260_vm3, %v7707_v37  ;;  %v7633_v44 = vpop.permute.xlu0 %7632  ;;  %v9911_v33 = vld [vmem:[#allocation2 + $0xb0] sm:$0xf0] }
0x17e1   : > { %7642 = vst.msk [vmem:[#allocation2 + $0xd8] sm:$0xf] %vm5260_vm3, %v7633_v44  ;;  %v9543_v29 = vor.u32 %v9911_v33, %v9542_v25  ;;  %v9554_v19 = vld [vmem:[#allocation2 + $0xf0] sm:$0xf]  ;;  %v8035_v33 = vpack.c.bf16 %v7951_v4, %v13215_v2  ;;  %v8034_v25 = vpack.c.bf16 %v13213_v62, %v13210_v1  ;;  %v9608_v4 = vld [vmem:[%s13335_s7] sm:$0xf] }
0x17e2   : > { %7667 = vst.msk [vmem:[#allocation2 + $0x114] sm:$0xf] %vm5260_vm3, %v7659_v60  ;;  %v9924_v1 = vld [vmem:[%s13335_s7 + $0x8] sm:$0xf0] }
0x17e3   : > { %v9609_v62 = vor.u32 %v9924_v1, %v9608_v4 }
0x17e7   : > { %v7729_v59 = vpop.permute.xlu2 %7728  ;;  %v7681_v24 = vpop.permute.xlu1 %7680  ;;  %v9919_v44 = vld [vmem:[#allocation2 + $0x170] sm:$0xf0] }
0x17e8   : > { %7738 = vst.msk [vmem:[#allocation2 + $0x198] sm:$0xf] %vm5260_vm3, %v7729_v59  ;;  %v7655_v7 = vpop.permute.xlu0 %7654  ;;  %v9550_v22 = vld [vmem:[#allocation2 + $0xd8] sm:$0xf] }
0x17e9   : > { %7665 = vst.msk [vmem:[#allocation2 + $0xfc] sm:$0xf] %vm5260_vm3, %v7655_v7  ;;  %v9551_v41 = vor.u32 %v9913_v23, %v9550_v22  ;;  %v9915_v56 = vld [vmem:[#allocation2 + $0x110] sm:$0xf0] }
0x17ea   : > { %7690 = vst.msk [vmem:[#allocation2 + $0x138] sm:$0xf] %vm5260_vm3, %v7681_v24  ;;  %v9559_v13 = vor.u32 %v9915_v56, %v9558_v26  ;;  %v9620_v56 = vld [vmem:[%s13335_s7 + $0x18] sm:$0xf] }
0x17eb   : > { %9593 = vmatmul.msk.bf16.gmra.mxu1 %vm5595_vm4, %v9535_v40 }
0x17ef   : > { %v7703_v50 = vpop.permute.xlu1 %7702 }
0x17f0   : > { %v7677_v36 = vpop.permute.xlu0 %7676  ;;  %7713 = vst.msk [vmem:[#allocation2 + $0x15c] sm:$0xf] %vm5260_vm3, %v7703_v50  ;;  %v9914_v3 = vld [vmem:[#allocation2 + $0xf8] sm:$0xf0] }
0x17f1   : > { %7688 = vst.msk [vmem:[#allocation2 + $0x120] sm:$0xf] %vm5260_vm3, %v7677_v36  ;;  %v9555_v27 = vor.u32 %v9914_v3, %v9554_v19  ;;  %v9566_v20 = vld [vmem:[#allocation2 + $0x138] sm:$0xf] }
0x17f7   : > { %v7725_v6 = vpop.permute.xlu1 %7724  ;;  %v9918_v15 = vld [vmem:[#allocation2 + $0x158] sm:$0xf0] }
0x17f8   : > { %v7683_v10 = vpop.permute.xlu0 %7682  ;;  %7736 = vst.msk [vmem:[#allocation2 + $0x180] sm:$0xf] %vm5260_vm3, %v7725_v6  ;;  %v9562_v0 = vld [vmem:[#allocation2 + $0x120] sm:$0xf]  ;;  %v9571_v34 = vor.u32 %v9918_v15, %v9570_v53  ;;  %v9925_v53 = vld [vmem:[%s13335_s7 + $0x10] sm:$0xf0] }
0x17f9   : > { %7691 = vst.msk [vmem:[#allocation2 + $0x144] sm:$0xf] %vm5260_vm3, %v7683_v10  ;;  %v9563_v48 = vor.u32 %v9916_v11, %v9562_v0 }
0x17fb   : > { %9594 = vmatmul.msk.bf16.gmra.mxu1 %vm5595_vm4, %v9539_v46 }
0x17ff   : > { %v7731_v58 = vpop.permute.xlu1 %7730  ;;  %v9578_v50 = vld [vmem:[#allocation2 + $0x180] sm:$0xf] }
0x1800   : > { %v7705_v21 = vpop.permute.xlu0 %7704  ;;  %7739 = vst.msk [vmem:[#allocation2 + $0x1a4] sm:$0xf] %vm5260_vm3, %v7731_v58  ;;  %v9917_v63 = vld [vmem:[#allocation2 + $0x140] sm:$0xf0] }
0x1801   : > { %7714 = vst.msk [vmem:[#allocation2 + $0x168] sm:$0xf] %vm5260_vm3, %v7705_v21  ;;  %v9567_v54 = vor.u32 %v9917_v63, %v9566_v20  ;;  %v9582_v21 = vld [vmem:[#allocation2 + $0x198] sm:$0xf]  ;;  %v9610_v20 = vld [vmem:[%s13335_s7 + $0xc] sm:$0xf0] }
0x1807   : > { %v9921_v46 = vld [vmem:[#allocation2 + $0x1a0] sm:$0xf0] }
0x1808   : > { %v7727_v32 = vpop.permute.xlu0 %7726  ;;  %v9574_v37 = vld [vmem:[#allocation2 + $0x168] sm:$0xf] }
0x1809   : > { %7737 = vst.msk [vmem:[#allocation2 + $0x18c] sm:$0xf] %vm5260_vm3, %v7727_v32  ;;  %v9575_v28 = vor.u32 %v9919_v44, %v9574_v37  ;;  %v9583_v32 = vor.u32 %v9921_v46, %v9582_v21  ;;  %v9926_v37 = vld [vmem:[%s13335_s7 + $0x1c] sm:$0xf]  ;;  %vm13813_vm3 = vmmov %vm13811_vm0 }
0x180b   : > { %9595 = vmatmul.msk.bf16.gmra.mxu1 %vm5595_vm4, %v9543_v29 }
0x1810   : > { %v9920_v38 = vld [vmem:[#allocation2 + $0x188] sm:$0xf0] }
0x1811   : > { %v9579_v14 = vor.u32 %v9920_v38, %v9578_v50 }
0x181b   : > { %9596 = vmatmul.msk.bf16.gmra.mxu1 %vm5595_vm4, %v9547_v55 }
0x182b   : > { %9597 = vmatmul.msk.bf16.gmra.mxu1 %vm5595_vm4, %v9551_v41 }
0x1838   : > { %v7954_v42 = vpop.f32.mrf.mxu1 }
0x183b   : > { %9598 = vmatmul.msk.bf16.gmra.mxu1 %vm5595_vm4, %v9555_v27 }
0x1840   : > { %v7956_v35 = vpop.f32.mrf.mxu1 }
0x1841   : > { %v8036_v17 = vpack.c.bf16 %v7956_v35, %v7954_v42 }
0x1848   : > { %v7959_v47 = vpop.f32.mrf.mxu1 }
0x184b   : > { %9599 = vmatmul.msk.bf16.gmra.mxu1 %vm5595_vm4, %v9559_v13 }
0x1850   : > { %v7961_v8 = vpop.f32.mrf.mxu1 }
0x1851   : > { %v8037_v5 = vpack.c.bf16 %v7961_v8, %v7959_v47  ;;  %v9927_v47 = vld [vmem:[%s13335_s7 + $0x20] sm:$0xf0] }
0x1852   : > { %v9621_v26 = vor.u32 %v9927_v47, %v9620_v56 }
0x1858   : > { %v7964_v49 = vpop.f32.mrf.mxu1 }
0x185b   : > { %9600 = vmatmul.msk.bf16.gmra.mxu1 %vm5595_vm4, %v9563_v48 }
0x1860   : > { %v7966_v16 = vpop.f32.mrf.mxu1 }
0x1861   : > { %v8038_v6 = vpack.c.bf16 %v7966_v16, %v7964_v49 }
0x1868   : > { %v7969_v52 = vpop.f32.mrf.mxu1 }
0x186b   : > { %9601 = vmatmul.msk.bf16.gmra.mxu1 %vm5595_vm4, %v9567_v54 }
0x1870   : > { %v7971_v39 = vpop.f32.mrf.mxu1 }
0x1871   : > { %v8039_v36 = vpack.c.bf16 %v7971_v39, %v7969_v52  ;;  %v9923_v52 = vld [vmem:[%s13335_s7 + $0x4] sm:$0xf] }
0x1872   : > { %v9613_v54 = vor.u32 %v9923_v52, %v9610_v20 }
0x1878   : > { %v7974_v45 = vpop.f32.mrf.mxu1 }
0x187b   : > { %9602 = vmatmul.msk.bf16.gmra.mxu1 %vm5595_vm4, %v9571_v34 }
0x1880   : > { %v7976_v51 = vpop.f32.mrf.mxu1 }
0x1881   : > { %v8040_v7 = vpack.c.bf16 %v7976_v51, %v7974_v45  ;;  %v9616_v45 = vld [vmem:[%s13335_s7 + $0x8] sm:$0xf] }
0x1882   : > { %v9617_v51 = vor.u32 %v9925_v53, %v9616_v45 }
0x1888   : > { %v7979_v60 = vpop.f32.mrf.mxu1 }
0x188b   : > { %9603 = vmatmul.msk.bf16.gmra.mxu1 %vm5595_vm4, %v9575_v28  ;;  %v9628_v28 = vld [vmem:[%s13335_s7 + $0x20] sm:$0xf] }
0x1890   : > { %v7981_v59 = vpop.f32.mrf.mxu1 }
0x1891   : > { %v8041_v24 = vpack.c.bf16 %v7981_v59, %v7979_v60  ;;  %v9622_v60 = vld [vmem:[%s13335_s7 + $0x24] sm:$0xf0]  ;;  %v9928_v59 = vld [vmem:[%s13335_s7 + $0x28] sm:$0xf0] }
0x1892   : > { %v9625_v44 = vor.u32 %v9926_v37, %v9622_v60 }
0x1893   : > { %8096 = vmatpush.bf16.msra.mxu0 %v8041_v24  ;;  %v9629_v24 = vor.u32 %v9928_v59, %v9628_v28 }
0x1897   : > { %8097 = vmatpush.bf16.msra.mxu0 %v8040_v7 }
0x1898   : > { %v7984_v40 = vpop.f32.mrf.mxu1 }
0x189b   : > { %9604 = vmatmul.msk.bf16.gmra.mxu1 %vm5595_vm4, %v9579_v14  ;;  %8098 = vmatpush.bf16.msra.mxu0 %v8039_v36 }
0x189f   : > { %8099 = vmatpush.bf16.msra.mxu0 %v8038_v6 }
0x18a0   : > { %v7986_v10 = vpop.f32.mrf.mxu1 }
0x18a1   : > { %v8042_v43 = vpack.c.bf16 %v7986_v10, %v7984_v40 }
0x18a3   : > { %8100 = vmatpush.bf16.msra.mxu0 %v8037_v5 }
0x18a7   : > { %8101 = vmatpush.bf16.msra.mxu0 %v8036_v17 }
0x18a8   : > { %v7989_v58 = vpop.f32.mrf.mxu1 }
0x18ab   : > { %9605 = vmatmul.msk.bf16.gmra.mxu1 %vm5595_vm4, %v9583_v32  ;;  %8102 = vmatpush.bf16.msra.mxu0 %v8035_v33  ;;  %vm13814_vm4 = vmmov %vm13811_vm0 }
0x18af   : > { %8103 = vmatpush.bf16.msra.mxu0 %v8034_v25 }
0x18b0   : > { %v7991_v29 = vpop.f32.mrf.mxu1 }
0x18b1   : > { %v8043_v30 = vpack.c.bf16 %v7991_v29, %v7989_v58 }
0x18b2   : > { %8104 = vmatmul.bf16.vlgmr.msra.gmra.mxu0 %v9609_v62 }
0x18b8   : > { %v7994_v31 = vpop.f32.mrf.mxu1 }
0x18c0   : > { %v7996_v55 = vpop.f32.mrf.mxu1 }
0x18c1   : > { %v8044_v22 = vpack.c.bf16 %v7996_v55, %v7994_v31 }
0x18c2   : > { %8109 = vmatmul.bf16.gmra.mxu0 %v9621_v26 }
0x18c8   : > { %v7999_v23 = vpop.f32.mrf.mxu1 }
0x18d0   : > { %v8001_v41 = vpop.f32.mrf.mxu1 }
0x18d1   : > { %v8045_v3 = vpack.c.bf16 %v8001_v41, %v7999_v23 }
0x18d8   : > { %v8004_v42 = vpop.f32.mrf.mxu1 }
0x18e0   : > { %v8006_v19 = vpop.f32.mrf.mxu1 }
0x18e1   : > { %v8046_v48 = vpack.c.bf16 %v8006_v19, %v8004_v42 }
0x18e8   : > { %v8009_v27 = vpop.f32.mrf.mxu1 }
0x18f0   : > { %v8011_v2 = vpop.f32.mrf.mxu1 }
0x18f1   : > { %v8047_v11 = vpack.c.bf16 %v8011_v2, %v8009_v27 }
0x18f8   : > { %v8014_v35 = vpop.f32.mrf.mxu1 }
0x1900   : > { %v8016_v17 = vpop.f32.mrf.mxu1 }
0x1901   : > { %v8048_v0 = vpack.c.bf16 %v8016_v17, %v8014_v35 }
0x1908   : > { %v8019_v13 = vpop.f32.mrf.mxu1 }
0x1910   : > { %v8021_v8 = vpop.f32.mrf.mxu1 }
0x1911   : > { %v8049_v5 = vpack.c.bf16 %v8021_v8, %v8019_v13 }
0x1913   : > { %8115 = vmatpush.bf16.msrb.mxu0 %v8049_v5 }
0x1917   : > { %8116 = vmatpush.bf16.msrb.mxu0 %v8048_v0 }
0x1918   : > { %v8024_v49 = vpop.f32.mrf.mxu1 }
0x191b   : > { %8117 = vmatpush.bf16.msrb.mxu0 %v8047_v11 }
0x191f   : > { %8118 = vmatpush.bf16.msrb.mxu0 %v8046_v48 }
0x1920   : > { %v8026_v16 = vpop.f32.mrf.mxu1 }
0x1921   : > { %v8050_v34 = vpack.c.bf16 %v8026_v16, %v8024_v49 }
0x1923   : > { %8119 = vmatpush.bf16.msrb.mxu0 %v8045_v3 }
0x1927   : > { %8120 = vmatpush.bf16.msrb.mxu0 %v8044_v22 }
0x1928   : > { %v8029_v63 = vpop.f32.mrf.mxu1 }
0x192b   : > { %8121 = vmatpush.bf16.msrb.mxu0 %v8043_v30 }
0x192f   : > { %8122 = vmatpush.bf16.msrb.mxu0 %v8042_v43  ;;  %v8105_v7 = vpop.f32.mrf.mxu0 }
0x1930   : > { %v8031_v39 = vpop.f32.mrf.mxu1 }
0x1931   : > { %v8051_v15 = vpack.c.bf16 %v8031_v39, %v8029_v63 }
0x1932   : > { %8123 = vmatmul.bf16.vlgmr.msrb.gmra.mxu0 %v9613_v54 }
0x1933   : > { %8140 = vmatpush.bf16.msrb.mxu3 %v8051_v15 }
0x1937   : > { %8141 = vmatpush.bf16.msrb.mxu3 %v8050_v34  ;;  %v8107_v38 = vpop.f32.mrf.mxu0 }
0x193a   : > { %9630 = vmatmul.msk.bf16.vlgmr.msrb.gmra.mxu3 %vm5809_vm9, %v9617_v51 }
0x193f   : > { %v8110_v40 = vpop.f32.mrf.mxu0 }
0x1942   : > { %8128 = vmatmul.bf16.gmra.mxu0 %v9625_v44 }
0x1947   : > { %v8112_v50 = vpop.f32.mrf.mxu0 }
0x194a   : > { %9631 = vmatmul.msk.bf16.gmra.mxu3 %vm5809_vm9, %v9629_v24  ;;  %vm13815_vm9 = vmmov %vm13811_vm0 }
0x19af   : > { %v8124_v36 = vpop.f32.mrf.mxu0 }
0x19b0   : > { %v8125_v14 = vadd.f32 %v8124_v36, %v8105_v7 }
0x19b7   : > { %v8126_v10 = vpop.f32.mrf.mxu0 }
0x19b8   : > { %v8127_v33 = vadd.f32 %v8126_v10, %v8107_v38 }
0x19bd   : > { %v8143_v6 = vpop.f32.mrf.mxu3 }
0x19be   : > { %v13267_v43 = vadd.f32 %v8143_v6, %v8125_v14 }
0x19bf   : > { %v8129_v29 = vpop.f32.mrf.mxu0 }
0x19c0   : > { %v8153_v46 = vsel %vm13812_vm5, %v13267_v43, 0.0  ;;  %v8169_v58 = vmul.f32 %v13267_v43, %v13267_v43  ;;  %v8130_v31 = vadd.f32 %v8129_v29, %v8110_v40 }
0x19c1   : > { %8154 = vadd.xlane.f32.xlu0 %v8153_v46 }
0x19c2   : > { %v8173_v21 = vsel %vm13813_vm3, %v8169_v58, 0.0 }
0x19c3   : > { %8174 = vadd.xlane.f32.xlu2 %v8173_v21 }
0x19c5   : > { %v8145_v32 = vpop.f32.mrf.mxu3 }
0x19c6   : > { %v13274_v25 = vadd.f32 %v8145_v32, %v8127_v33 }
0x19c7   : > { %v8131_v41 = vpop.f32.mrf.mxu0 }
0x19c8   : > { %v8156_v30 = vsel %vm13814_vm4, %v13274_v25, 0.0  ;;  %v8132_v3 = vadd.f32 %v8131_v41, %v8112_v50  ;;  %v8170_v42 = vmul.f32 %v13274_v25, %v13274_v25 }
0x19ca   : > { %v8176_v2 = vsel %vm13816_vm12, %v8170_v42, 0.0 }
0x19cb   : > { %8157 = vadd.xlane.f32.xlu2 %v8156_v30 }
0x19cd   : > { %v8148_v55 = vpop.f32.mrf.mxu3 }
0x19ce   : > { %v13278_v22 = vadd.f32 %v8148_v55, %v8130_v31 }
0x19d0   : > { %v8159_v23 = vsel %vm13815_vm9, %v13278_v22, 0.0  ;;  %v8171_v35 = vmul.f32 %v13278_v22, %v13278_v22  ;;  %vm13821_vm9 = vmmov %vm13818_vm1 }
0x19d1   : > { %8160 = vadd.xlane.f32.xlu1 %v8159_v23 }
0x19d2   : > { %v8179_v17 = vsel %vm13819_vm14, %v8171_v35, 0.0 }
0x19d5   : > { %v8150_v19 = vpop.f32.mrf.mxu3 }
0x19d6   : > { %v13284_v27 = vadd.f32 %v8150_v19, %v8132_v3 }
0x19d8   : > { %v8162_v4 = vsel %vm13817_vm8, %v13284_v27, 0.0  ;;  %v8172_v1 = vmul.f32 %v13284_v27, %v13284_v27  ;;  %vm13822_vm8 = vmmov %vm13818_vm1 }
0x19d9   : > { %8177 = vadd.xlane.f32.xlu1 %v8176_v2  ;;  %8163 = vadd.xlane.f32.xlu0 %v8162_v4  ;;  %vm13823_vm14 = vmmov %vm13822_vm8 }
0x19da   : > { %v8182_v62 = vsel %vm13818_vm1, %v8172_v1, 0.0 }
0x19db   : > { %8183 = vadd.xlane.f32.xlu2 %v8182_v62 }
0x19e1   : > { %8180 = vadd.xlane.f32.xlu0 %v8179_v17 }
0x1a34   : > { %v8155_v56 = vpop.xlane.xlu0 %8154 }
0x1a35   : > { %v8165_v47 = vmul.f32 %v8155_v56, %v12472_v18 }
0x1a36   : > { %v8175_v26 = vpop.xlane.xlu2 %8174 }
0x1a37   : > { %v8189_v13 = vmul.f32 %v8165_v47, %v8165_v47  ;;  %v8185_v8 = vmul.f32 %v8175_v26, %v12472_v18  ;;  %v8201_v44 = vsub.f32 %v13267_v43, %v8165_v47 }
0x1a39   : > { %v8193_v5 = vsub.f32 %v8185_v8, %v8189_v13 }
0x1a3b   : > { %v8197_v0 = vmax.f32 %v8193_v5, 0.0 }
0x1a3d   : > { %v8205_v49 = vadd.f32 1e-05, %v8197_v0 }
0x1a3e   : > { %v8158_v63 = vpop.xlane.xlu2 %8157 }
0x1a3f   : > { %10089 = vrsqrt.f32 %v8205_v49  ;;  %v8166_v20 = vmul.f32 %v8158_v63, %v12472_v18  ;;  %vm8215_vm7 = vweird.f32 %v8205_v49 }
0x1a41   : > { %v8190_v53 = vmul.f32 %v8166_v20, %v8166_v20  ;;  %v8202_v62 = vsub.f32 %v13274_v25, %v8166_v20 }
0x1a44   : > { %v8161_v11 = vpop.xlane.xlu1 %8160 }
0x1a45   : > { %v10090_v48 = vpop.eup %10089  ;;  %v8167_v40 = vmul.f32 %v8161_v11, %v12472_v18 }
0x1a46   : > { %v8210_v16 = vmul.f32 %v10090_v48, %v8205_v49  ;;  %vm8216_vm10 = vweird.f32 %v10090_v48 }
0x1a47   : > { %vm8217_vm2 = vmor %vm8215_vm7, %vm8216_vm10  ;;  %v8191_v46 = vmul.f32 %v8167_v40, %v8167_v40 }
0x1a48   : > { %v8211_v52 = vmul.f32 %v10090_v48, %v8210_v16 }
0x1a4a   : > { %v8212_v54 = vmul.f32 0.5, %v8211_v52 }
0x1a4c   : > { %v8213_v39 = vsub.f32 1.5, %v8212_v54  ;;  %v8178_v15 = vpop.xlane.xlu1 %8177  ;;  %v8164_v45 = vpop.xlane.xlu0 %8163 }
0x1a4d   : > { %v8186_v34 = vmul.f32 %v8178_v15, %v12472_v18  ;;  %v8168_v51 = vmul.f32 %v8164_v45, %v12472_v18 }
0x1a4e   : > { %v8214_v37 = vmul.f32 %v10090_v48, %v8213_v39  ;;  %v8184_v60 = vpop.xlane.xlu2 %8183 }
0x1a4f   : > { %v8194_v28 = vsub.f32 %v8186_v34, %v8190_v53  ;;  %v8192_v59 = vmul.f32 %v8168_v51, %v8168_v51  ;;  %v8188_v24 = vmul.f32 %v8184_v60, %v12472_v18  ;;  %v8204_v26 = vsub.f32 %v13284_v27, %v8168_v51 }
0x1a50   : > { %v8218_v7 = vsel %vm8217_vm2, %v10090_v48, %v8214_v37  ;;  %v8203_v48 = vsub.f32 %v13278_v22, %v8167_v40 }
0x1a51   : > { %v8249_v38 = vmul.f32 %v8218_v7, %v8201_v44  ;;  %v8198_v50 = vmax.f32 %v8194_v28, 0.0  ;;  %v8196_v36 = vsub.f32 %v8188_v24, %v8192_v59 }
0x1a53   : > { %v8253_v14 = vadd.f32 %v8249_v38, %v12901_v9  ;;  %v8206_v6 = vadd.f32 1e-05, %v8198_v50  ;;  %v8200_v10 = vmax.f32 %v8196_v36, 0.0 }
0x1a54   : > { %v8181_v43 = vpop.xlane.xlu0 %8180 }
0x1a55   : > { %8257 = vst.msk [vmem:[%s13307_s15] sm:$0xff] %vm13820_vm15, %v8253_v14  ;;  %10091 = vrsqrt.f32 %v8206_v6  ;;  %v8208_v58 = vadd.f32 1e-05, %v8200_v10  ;;  %v8187_v21 = vmul.f32 %v8181_v43, %v12472_v18  ;;  %vm8225_vm6 = vweird.f32 %v8206_v6 }
0x1a57   : > { %10093 = vrsqrt.f32 %v8208_v58  ;;  %v8195_v33 = vsub.f32 %v8187_v21, %v8191_v46  ;;  %vm8245_vm5 = vweird.f32 %v8208_v58 }
0x1a59   : > { %v8199_v32 = vmax.f32 %v8195_v33, 0.0 }
0x1a5b   : > { %v10092_v29 = vpop.eup %10091  ;;  %v8207_v30 = vadd.f32 1e-05, %v8199_v32 }
0x1a5c   : > { %v8220_v31 = vmul.f32 %v10092_v29, %v8206_v6  ;;  %vm8226_vm13 = vweird.f32 %v10092_v29 }
0x1a5d   : > { %v10094_v55 = vpop.eup %10093  ;;  %10095 = vrsqrt.f32 %v8207_v30  ;;  %vm8227_vm0 = vmor %vm8225_vm6, %vm8226_vm13  ;;  %vm8235_vm12 = vweird.f32 %v8207_v30 }
0x1a5e   : > { %v8221_v23 = vmul.f32 %v10092_v29, %v8220_v31  ;;  %v8240_v9 = vmul.f32 %v10094_v55, %v8208_v58  ;;  %vm8246_vm11 = vweird.f32 %v10094_v55 }
0x1a5f   : > { %vm8247_vm3 = vmor %vm8245_vm5, %vm8246_vm11 }
0x1a60   : > { %v8222_v41 = vmul.f32 0.5, %v8221_v23  ;;  %v8241_v3 = vmul.f32 %v10094_v55, %v8240_v9 }
0x1a62   : > { %v8223_v42 = vsub.f32 1.5, %v8222_v41  ;;  %v8242_v19 = vmul.f32 0.5, %v8241_v3 }
0x1a63   : > { %v10096_v2 = vpop.eup %10095 }
0x1a64   : > { %v8224_v4 = vmul.f32 %v10092_v29, %v8223_v42  ;;  %v8243_v1 = vsub.f32 1.5, %v8242_v19  ;;  %v8230_v18 = vmul.f32 %v10096_v2, %v8207_v30  ;;  %vm8236_vm4 = vweird.f32 %v10096_v2 }
0x1a65   : > { %vm8237_vm1 = vmor %vm8235_vm12, %vm8236_vm4 }
0x1a66   : > { %v8228_v35 = vsel %vm8227_vm0, %v10092_v29, %v8224_v4  ;;  %v8244_v17 = vmul.f32 %v10094_v55, %v8243_v1  ;;  %v8231_v56 = vmul.f32 %v10096_v2, %v8230_v18 }
0x1a67   : > { %v8250_v47 = vmul.f32 %v8228_v35, %v8202_v62 }
0x1a68   : > { %v8248_v13 = vsel %vm8247_vm3, %v10094_v55, %v8244_v17  ;;  %v8232_v8 = vmul.f32 0.5, %v8231_v56 }
0x1a69   : > { %v8254_v5 = vadd.f32 %v8250_v47, %v12905_v61  ;;  %v8252_v0 = vmul.f32 %v8248_v13, %v8204_v26 }
0x1a6a   : > { %v8233_v49 = vsub.f32 1.5, %v8232_v8 }
0x1a6b   : > { %8258 = vst.msk [vmem:[%s13307_s15 + $0x8] sm:$0xff] %vm13821_vm9, %v8254_v5  ;;  %v8256_v25 = vadd.f32 %v8252_v0, %v12919_v12 }
0x1a6c   : > { %v8234_v11 = vmul.f32 %v10096_v2, %v8233_v49 }
0x1a6d   : > { %8260 = vst.msk [vmem:[%s13307_s15 + $0x18] sm:$0xff] %vm13822_vm8, %v8256_v25 }
0x1a6e   : > { %v8238_v27 = vsel %vm8237_vm1, %v10096_v2, %v8234_v11 }
0x1a6f   : > { %v8251_v16 = vmul.f32 %v8238_v27, %v8203_v48 }
0x1a71   : > { %v8255_v63 = vadd.f32 %v8251_v16, %v12915_v57 }
0x1a73   : > { %8259 = vst.msk [vmem:[%s13307_s15 + $0x10] sm:$0xff] %vm13823_vm14, %v8255_v63 }
0x1a74 PF: > { %s31_s2 = sadd.s32 1, %s10103_s2  }
0x1a75   : > { %p28_p4 = scmp.ge.s32.totalorder %s31_s2, 4  }
0x1a77   :  { %30 = sbr.rel (!%p28_p4) target bundleno = 13 (0xd), region = 134 }

</bundles_post_ra>
